<compile_context>
chip_gen: v5e
topology: v5e:2x2
jax: 0.10.0
libtpu: 0.0.40
codegen_flags: <defaults>
</compile_context>

<pallas_src>
import functools

import jax
import jax.numpy as jnp
from jax import lax
from jax.experimental import pallas as pl
from jax.experimental.pallas import tpu as pltpu

POOL_SIZES = (1, 5, 9, 13)
_K = 5          # cascaded pool kernel size (SPPF rewrite of the 5/9/13 pools)
_P = _K // 2    # halo of one cascaded 5x5 pool (rows / minimum columns)
_LEFT = 8       # left -inf border width -> interior column offset is sublane-aligned


def _round_up(v, m):
    return (v + m - 1) // m * m


def _tree_max(vals):
    """Balanced (log-depth) elementwise max of a list of arrays."""
    vals = list(vals)
    while len(vals) > 1:
        nxt = [jnp.maximum(vals[i], vals[i + 1]) for i in range(0, len(vals) - 1, 2)]
        if len(vals) % 2:
            nxt.append(vals[-1])
        vals = nxt
    return vals[0]


def _pool5_same(pad_ref, src, H, W, W_pad):
    """5x5, stride-1, same-padding max pool of src (H, W, C).

    pad_ref is a (H + 2*_P, W_pad, C) VMEM scratch whose -inf border is already in
    place; only the (sublane-aligned) interior is rewritten, so one scratch serves
    every cascade stage.
    """
    # Aligned interior store (column offset _LEFT = 8, a multiple of 8).
    pad_ref[_P:_P + H, _LEFT:_LEFT + W, :] = src
    padded = pad_ref[...]                                        # (H+4, W_pad, C)

    # H (row) pass: slices along the leading, untiled axis are free.
    rows = _tree_max([padded[d:d + H] for d in range(_K)])       # (H, W_pad, C)

    # W (column) pass: sublane shifts on the XLU. The shift set {0, +-1, +-2} is
    # symmetric, so the max is identical under either roll-direction convention,
    # and any column outside the interior only ever contributes -inf.
    shifted = [rows]
    for k in (1, 2):
        shifted.append(pltpu.roll(rows, shift=k, axis=1))
        shifted.append(pltpu.roll(rows, shift=W_pad - k, axis=1))
    cols = _tree_max(shifted)                                    # (H, W_pad, C)
    return cols[:, _LEFT:_LEFT + W, :]                           # aligned final slice


def _spp_kernel(x_ref, w_ref, b_ref, o_ref, pad_ref, *, H, W, C, W_pad):
    # x_ref:   (1, H, W, C) NHWC tile for one image
    # w_ref:   (4, C, C) per-branch 1x1-conv weights, (c_in, c_out) layout
    # b_ref:   (1, C) f32 bias
    # pad_ref: VMEM scratch (H + 4, W_pad, C)
    dt = pad_ref.dtype

    # Border-only -inf re-init. Done every grid step (cheap, and stays correct if
    # the batch axis is split across TensorCores); the interior is overwritten by
    # every cascade stage so it never needs clearing.
    # NOTE: -inf padding assumes a floating-point activation dtype.
    pad_ref[:_P, :, :] = jnp.full((_P, W_pad, C), -jnp.inf, dt)
    pad_ref[_P + H:, :, :] = jnp.full((_P, W_pad, C), -jnp.inf, dt)
    pad_ref[:, :_LEFT, :] = jnp.full((H + 2 * _P, _LEFT, C), -jnp.inf, dt)
    pad_ref[:, _LEFT + W:, :] = jnp.full((H + 2 * _P, W_pad - _LEFT - W, C), -jnp.inf, dt)

    x = x_ref[0]                                    # (H, W, C): pool-size-1 branch
    hw = H * W

    def branch_dot(p, k):
        # For W % 8 == 0 (this test, and any aligned deployment) the flatten is a
        # free re-view; for W % 8 != 0 maps a rank-3 contraction would avoid the
        # relayout, but rank-3 dot_general lowering is kept out for portability.
        return jnp.dot(p.reshape(hw, C), w_ref[k], preferred_element_type=jnp.float32)

    # Interleave each branch matmul with the pooling cascade so only the current
    # pooled map and the f32 accumulator are live at any point.
    acc = branch_dot(x, 0) + b_ref[...]             # (hw, C) f32
    p = _pool5_same(pad_ref, x, H, W, W_pad)        # 5x5
    acc = acc + branch_dot(p, 1)
    p = _pool5_same(pad_ref, p, H, W, W_pad)        # == 9x9 (SPPF identity)
    acc = acc + branch_dot(p, 2)
    p = _pool5_same(pad_ref, p, H, W, W_pad)        # == 13x13
    acc = acc + branch_dot(p, 3)

    o_ref[0] = acc.reshape(H, W, C).astype(o_ref.dtype)


def spatial_pyramid_pooling(x_nchw, conv_weight, conv_bias):
    """SPP forward. x_nchw: (N, C, H, W); conv_weight: (C, 4C, 1, 1); conv_bias: (C,)."""
    N, C, H, W = x_nchw.shape
    n_pools = len(POOL_SIZES)
    assert conv_weight.shape == (C, n_pools * C, 1, 1)
    assert conv_bias.shape == (C,)

    # Padded scratch width: 8 -inf columns on the left (alignment) + interior W +
    # >=2 -inf columns on the right, rounded so W_pad is a multiple of 8.
    W_pad = _LEFT + _round_up(W + _P, 8)

    # TODO(synk): if the surrounding model is kept NHWC these two transposes
    # (each a full HBM pass) disappear; kept here to honor the PyTorch NCHW contract.
    x_nhwc = jnp.transpose(x_nchw, (0, 2, 3, 1))                            # (N,H,W,C)
    # (C_out, 4C, 1, 1) -> (4C, C_out) -> (4 branches, C_in, C_out); branch order
    # matches torch.cat(dim=1) over POOL_SIZES. Weights kept in the activation
    # dtype (exact for the f32 test; already the bf16-native MXU path otherwise).
    w4 = jnp.transpose(conv_weight[:, :, 0, 0], (1, 0)).reshape(n_pools, C, C)
    w4 = w4.astype(x_nhwc.dtype)
    b = conv_bias.reshape(1, C).astype(jnp.float32)

    kernel = functools.partial(_spp_kernel, H=H, W=W, C=C, W_pad=W_pad)

    # VMEM budget: double-buffered in/out blocks + weights + pad scratch + f32 acc
    # + pooling temporaries. Clamped to [32, 64] MiB (v7x physical VMEM is 64 MiB).
    itemsize = jnp.dtype(x_nhwc.dtype).itemsize
    block = H * W * C * itemsize
    est = (4 * block
           + 2 * n_pools * C * C * itemsize
           + 5 * (H + 2 * _P) * W_pad * C * itemsize
           + H * W * C * 4)
    vmem_limit = int(min(64 * 1024 * 1024, max(32 * 1024 * 1024, 2 * est)))

    out_nhwc = pl.pallas_call(
        kernel,
        out_shape=jax.ShapeDtypeStruct((N, H, W, C), x_nhwc.dtype),
        grid_spec=pltpu.PrefetchScalarGridSpec(
            num_scalar_prefetch=0,
            grid=(N,),
            in_specs=[
                pl.BlockSpec((1, H, W, C), lambda n: (n, 0, 0, 0)),
                # Grid-invariant weight/bias blocks (pipeline_mode=pl.Buffered(1)
                # would drop their second buffer; left default for portability).
                pl.BlockSpec((n_pools, C, C), lambda n: (0, 0, 0)),
                pl.BlockSpec((1, C), lambda n: (0, 0)),
            ],
            out_specs=pl.BlockSpec((1, H, W, C), lambda n: (n, 0, 0, 0)),
            scratch_shapes=[
                pltpu.VMEM((H + 2 * _P, W_pad, C), x_nhwc.dtype),
            ],
        ),
        compiler_params=pltpu.CompilerParams(
            # On v7x (2 TensorCores) a batch of 1 leaves one core idle; splitting H
            # into row bands with a 6-row recompute halo would fix that if needed.
            dimension_semantics=("parallel",),
            vmem_limit_bytes=vmem_limit,
        ),
    )(x_nhwc, w4, b)

    return jnp.transpose(out_nhwc, (0, 3, 1, 2))  # back to NCHW


def _reference_spp(x_nchw, conv_weight, conv_bias):
    """Pure-JAX reference (lax.reduce_window + einsum) for validation."""
    x = jnp.transpose(x_nchw, (0, 2, 3, 1)).astype(jnp.float32)  # NHWC
    pooled = []
    for k in POOL_SIZES:
        p = k // 2
        pooled.append(
            lax.reduce_window(
                x, -jnp.inf, lax.max,
                window_dimensions=(1, k, k, 1),
                window_strides=(1, 1, 1, 1),
                padding=[(0, 0), (p, p), (p, p), (0, 0)]))
    concat = jnp.concatenate(pooled, axis=-1)                     # (N,H,W,4C)
    w = conv_weight[:, :, 0, 0].astype(jnp.float32)               # (C_out, 4C)
    y = jnp.einsum("nhwi,oi->nhwo", concat, w) + conv_bias.astype(jnp.float32)
    return jnp.transpose(y, (0, 3, 1, 2))                         # NCHW


if __name__ == "__main__":
    N, C, H, W = 2, 4, 16, 16
    n_pools = len(POOL_SIZES)

    key = jax.random.PRNGKey(0)
    kx, kw, kb = jax.random.split(key, 3)

    x = jax.random.normal(kx, (N, C, H, W), dtype=jnp.float32)

    # Deterministic parameter init mirroring nn.Conv2d defaults
    # (uniform in +/- 1/sqrt(fan_in), fan_in = 4C * 1 * 1).
    fan_in = n_pools * C
    bound = 1.0 / (fan_in ** 0.5)
    conv_weight = jax.random.uniform(
        kw, (C, n_pools * C, 1, 1), minval=-bound, maxval=bound, dtype=jnp.float32)
    conv_bias = jax.random.uniform(
        kb, (C,), minval=-bound, maxval=bound, dtype=jnp.float32)

    out = spatial_pyramid_pooling(x, conv_weight, conv_bias)
    out = jax.block_until_ready(out)

    ref = jax.block_until_ready(_reference_spp(x, conv_weight, conv_bias))
    assert out.shape == (N, C, H, W), out.shape
    assert jnp.allclose(out, ref, atol=1e-4, rtol=1e-4), float(jnp.max(jnp.abs(out - ref)))

    print("KERNEL_OK")
</pallas_src>

<mosaic_0001>
module attributes {stable_mosaic.version = 11 : i64} {
  func.func @_spp_kernel(%arg0: i32, %arg1: memref<1x16x16x4xf32, #tpu.memory_space<vmem>>, %arg2: memref<4x4x4xf32, #tpu.memory_space<vmem>>, %arg3: memref<1x4xf32, #tpu.memory_space<vmem>>, %arg4: memref<1x16x16x4xf32, #tpu.memory_space<vmem>>, %arg5: memref<20x32x4xf32, #tpu.memory_space<vmem>>) attributes {dimension_semantics = [#tpu.dimension_semantics<parallel>], iteration_bounds = array<i64: 2>, scalar_prefetch = 0 : i64, scratch_operands = 1 : i64, tpu.core_type = #tpu.core_type<tc>, window_params = [{transform_indices = @transform_0, window_bounds = array<i64: 1, 16, 16, 4>}, {pipeline_mode = #tpu.pipeline_mode<synchronous>, transform_indices = @transform_1, window_bounds = array<i64: 4, 4, 4>}, {pipeline_mode = #tpu.pipeline_mode<synchronous>, transform_indices = @transform_2, window_bounds = array<i64: 1, 4>}, {transform_indices = @transform_3, window_bounds = array<i64: 1, 16, 16, 4>}]} {
    %cst = arith.constant 0xFF800000 : f32
    %0 = vector.broadcast %cst : f32 to vector<2x32x4xf32>
    %c0 = arith.constant 0 : index
    %c0_0 = arith.constant 0 : index
    %c0_1 = arith.constant 0 : index
    %1 = vector.load %arg5[%c0, %c0_0, %c0_1] : memref<20x32x4xf32, #tpu.memory_space<vmem>>, vector<2x32x4xf32>
    tpu.vector_store %arg5[%c0, %c0_0, %c0_1], %0 {strides = array<i32>} : memref<20x32x4xf32, #tpu.memory_space<vmem>>, vector<2x32x4xf32>,
    %cst_2 = arith.constant 0xFF800000 : f32
    %2 = vector.broadcast %cst_2 : f32 to vector<2x32x4xf32>
    %c18 = arith.constant 18 : index
    %c0_3 = arith.constant 0 : index
    %c0_4 = arith.constant 0 : index
    %3 = vector.load %arg5[%c18, %c0_3, %c0_4] : memref<20x32x4xf32, #tpu.memory_space<vmem>>, vector<2x32x4xf32>
    tpu.vector_store %arg5[%c18, %c0_3, %c0_4], %2 {strides = array<i32>} : memref<20x32x4xf32, #tpu.memory_space<vmem>>, vector<2x32x4xf32>,
    %cst_5 = arith.constant 0xFF800000 : f32
    %4 = vector.broadcast %cst_5 : f32 to vector<20x8x4xf32>
    %c0_6 = arith.constant 0 : index
    %c0_7 = arith.constant 0 : index
    %c0_8 = arith.constant 0 : index
    %5 = vector.load %arg5[%c0_6, %c0_7, %c0_8] : memref<20x32x4xf32, #tpu.memory_space<vmem>>, vector<20x8x4xf32>
    tpu.vector_store %arg5[%c0_6, %c0_7, %c0_8], %4 {strides = array<i32>} : memref<20x32x4xf32, #tpu.memory_space<vmem>>, vector<20x8x4xf32>,
    %cst_9 = arith.constant 0xFF800000 : f32
    %6 = vector.broadcast %cst_9 : f32 to vector<20x8x4xf32>
    %c0_10 = arith.constant 0 : index
    %c24 = arith.constant 24 : index
    %c0_11 = arith.constant 0 : index
    %7 = vector.load %arg5[%c0_10, %c24, %c0_11] : memref<20x32x4xf32, #tpu.memory_space<vmem>>, vector<20x8x4xf32>
    tpu.vector_store %arg5[%c0_10, %c24, %c0_11], %6 {strides = array<i32>} : memref<20x32x4xf32, #tpu.memory_space<vmem>>, vector<20x8x4xf32>,
    %c0_12 = arith.constant 0 : index
    %c0_13 = arith.constant 0 : index
    %c0_14 = arith.constant 0 : index
    %c0_15 = arith.constant 0 : index
    %8 = vector.load %arg1[%c0_12, %c0_13, %c0_14, %c0_15] : memref<1x16x16x4xf32, #tpu.memory_space<vmem>>, vector<1x16x16x4xf32>
    %9 = vector.shape_cast %8 : vector<1x16x16x4xf32> to vector<16x16x4xf32>
    %10 = vector.shape_cast %9 : vector<16x16x4xf32> to vector<256x4xf32>
    %c0_16 = arith.constant 0 : index
    %c0_17 = arith.constant 0 : index
    %c0_18 = arith.constant 0 : index
    %11 = vector.load %arg2[%c0_16, %c0_17, %c0_18] : memref<4x4x4xf32, #tpu.memory_space<vmem>>, vector<1x4x4xf32>
    %12 = vector.shape_cast %11 : vector<1x4x4xf32> to vector<4x4xf32>
    %cst_19 = arith.constant dense<0.000000e+00> : vector<256x4xf32>
    %13 = tpu.matmul %10, %12, %cst_19 {dimension_numbers = #tpu.dot_dimension_numbers<[1], [0], [0], [1], [0, 0, 1, 1], [], []>} : vector<256x4xf32>, vector<4x4xf32>, vector<256x4xf32> -> vector<256x4xf32>
    %c0_20 = arith.constant 0 : index
    %c0_21 = arith.constant 0 : index
    %14 = vector.load %arg3[%c0_20, %c0_21] : memref<1x4xf32, #tpu.memory_space<vmem>>, vector<1x4xf32>
    %15 = vector.broadcast %14 : vector<1x4xf32> to vector<256x4xf32>
    %16 = arith.addf %13, %15 : vector<256x4xf32>
    %c2 = arith.constant 2 : index
    %c8 = arith.constant 8 : index
    %c0_22 = arith.constant 0 : index
    %17 = vector.load %arg5[%c2, %c8, %c0_22] : memref<20x32x4xf32, #tpu.memory_space<vmem>>, vector<16x16x4xf32>
    tpu.vector_store %arg5[%c2, %c8, %c0_22], %9 {strides = array<i32>} : memref<20x32x4xf32, #tpu.memory_space<vmem>>, vector<16x16x4xf32>,
    %c0_23 = arith.constant 0 : index
    %c0_24 = arith.constant 0 : index
    %c0_25 = arith.constant 0 : index
    %18 = vector.load %arg5[%c0_23, %c0_24, %c0_25] : memref<20x32x4xf32, #tpu.memory_space<vmem>>, vector<20x32x4xf32>
    %19 = vector.extract_strided_slice %18 {offsets = [0, 0, 0], sizes = [16, 32, 4], strides = [1, 1, 1]} : vector<20x32x4xf32> to vector<16x32x4xf32>
    %20 = vector.extract_strided_slice %18 {offsets = [1, 0, 0], sizes = [16, 32, 4], strides = [1, 1, 1]} : vector<20x32x4xf32> to vector<16x32x4xf32>
    %21 = vector.extract_strided_slice %18 {offsets = [2, 0, 0], sizes = [16, 32, 4], strides = [1, 1, 1]} : vector<20x32x4xf32> to vector<16x32x4xf32>
    %22 = vector.extract_strided_slice %18 {offsets = [3, 0, 0], sizes = [16, 32, 4], strides = [1, 1, 1]} : vector<20x32x4xf32> to vector<16x32x4xf32>
    %23 = vector.extract_strided_slice %18 {offsets = [4, 0, 0], sizes = [16, 32, 4], strides = [1, 1, 1]} : vector<20x32x4xf32> to vector<16x32x4xf32>
    %24 = arith.maximumf %19, %20 : vector<16x32x4xf32>
    %25 = arith.maximumf %21, %22 : vector<16x32x4xf32>
    %26 = arith.maximumf %24, %25 : vector<16x32x4xf32>
    %27 = arith.maximumf %26, %23 : vector<16x32x4xf32>
    %c1_i32 = arith.constant 1 : i32
    %28 = tpu.dynamic_rotate %27 by %c1_i32 dim 1 : vector<16x32x4xf32>, i32 -> vector<16x32x4xf32>
    %c31_i32 = arith.constant 31 : i32
    %29 = tpu.dynamic_rotate %27 by %c31_i32 dim 1 : vector<16x32x4xf32>, i32 -> vector<16x32x4xf32>
    %c2_i32 = arith.constant 2 : i32
    %30 = tpu.dynamic_rotate %27 by %c2_i32 dim 1 : vector<16x32x4xf32>, i32 -> vector<16x32x4xf32>
    %c30_i32 = arith.constant 30 : i32
    %31 = tpu.dynamic_rotate %27 by %c30_i32 dim 1 : vector<16x32x4xf32>, i32 -> vector<16x32x4xf32>
    %32 = arith.maximumf %27, %28 : vector<16x32x4xf32>
    %33 = arith.maximumf %29, %30 : vector<16x32x4xf32>
    %34 = arith.maximumf %32, %33 : vector<16x32x4xf32>
    %35 = arith.maximumf %34, %31 : vector<16x32x4xf32>
    %36 = vector.extract_strided_slice %35 {offsets = [0, 8, 0], sizes = [16, 16, 4], strides = [1, 1, 1]} : vector<16x32x4xf32> to vector<16x16x4xf32>
    %37 = vector.shape_cast %36 : vector<16x16x4xf32> to vector<256x4xf32>
    %c1 = arith.constant 1 : index
    %c0_26 = arith.constant 0 : index
    %c0_27 = arith.constant 0 : index
    %38 = vector.load %arg2[%c1, %c0_26, %c0_27] : memref<4x4x4xf32, #tpu.memory_space<vmem>>, vector<1x4x4xf32>
    %39 = vector.shape_cast %38 : vector<1x4x4xf32> to vector<4x4xf32>
    %cst_28 = arith.constant dense<0.000000e+00> : vector<256x4xf32>
    %40 = tpu.matmul %37, %39, %cst_28 {dimension_numbers = #tpu.dot_dimension_numbers<[1], [0], [0], [1], [0, 0, 1, 1], [], []>} : vector<256x4xf32>, vector<4x4xf32>, vector<256x4xf32> -> vector<256x4xf32>
    %41 = arith.addf %16, %40 : vector<256x4xf32>
    %c2_29 = arith.constant 2 : index
    %c8_30 = arith.constant 8 : index
    %c0_31 = arith.constant 0 : index
    %42 = vector.load %arg5[%c2_29, %c8_30, %c0_31] : memref<20x32x4xf32, #tpu.memory_space<vmem>>, vector<16x16x4xf32>
    tpu.vector_store %arg5[%c2_29, %c8_30, %c0_31], %36 {strides = array<i32>} : memref<20x32x4xf32, #tpu.memory_space<vmem>>, vector<16x16x4xf32>,
    %c0_32 = arith.constant 0 : index
    %c0_33 = arith.constant 0 : index
    %c0_34 = arith.constant 0 : index
    %43 = vector.load %arg5[%c0_32, %c0_33, %c0_34] : memref<20x32x4xf32, #tpu.memory_space<vmem>>, vector<20x32x4xf32>
    %44 = vector.extract_strided_slice %43 {offsets = [0, 0, 0], sizes = [16, 32, 4], strides = [1, 1, 1]} : vector<20x32x4xf32> to vector<16x32x4xf32>
    %45 = vector.extract_strided_slice %43 {offsets = [1, 0, 0], sizes = [16, 32, 4], strides = [1, 1, 1]} : vector<20x32x4xf32> to vector<16x32x4xf32>
    %46 = vector.extract_strided_slice %43 {offsets = [2, 0, 0], sizes = [16, 32, 4], strides = [1, 1, 1]} : vector<20x32x4xf32> to vector<16x32x4xf32>
    %47 = vector.extract_strided_slice %43 {offsets = [3, 0, 0], sizes = [16, 32, 4], strides = [1, 1, 1]} : vector<20x32x4xf32> to vector<16x32x4xf32>
    %48 = vector.extract_strided_slice %43 {offsets = [4, 0, 0], sizes = [16, 32, 4], strides = [1, 1, 1]} : vector<20x32x4xf32> to vector<16x32x4xf32>
    %49 = arith.maximumf %44, %45 : vector<16x32x4xf32>
    %50 = arith.maximumf %46, %47 : vector<16x32x4xf32>
    %51 = arith.maximumf %49, %50 : vector<16x32x4xf32>
    %52 = arith.maximumf %51, %48 : vector<16x32x4xf32>
    %c1_i32_35 = arith.constant 1 : i32
    %53 = tpu.dynamic_rotate %52 by %c1_i32_35 dim 1 : vector<16x32x4xf32>, i32 -> vector<16x32x4xf32>
    %c31_i32_36 = arith.constant 31 : i32
    %54 = tpu.dynamic_rotate %52 by %c31_i32_36 dim 1 : vector<16x32x4xf32>, i32 -> vector<16x32x4xf32>
    %c2_i32_37 = arith.constant 2 : i32
    %55 = tpu.dynamic_rotate %52 by %c2_i32_37 dim 1 : vector<16x32x4xf32>, i32 -> vector<16x32x4xf32>
    %c30_i32_38 = arith.constant 30 : i32
    %56 = tpu.dynamic_rotate %52 by %c30_i32_38 dim 1 : vector<16x32x4xf32>, i32 -> vector<16x32x4xf32>
    %57 = arith.maximumf %52, %53 : vector<16x32x4xf32>
    %58 = arith.maximumf %54, %55 : vector<16x32x4xf32>
    %59 = arith.maximumf %57, %58 : vector<16x32x4xf32>
    %60 = arith.maximumf %59, %56 : vector<16x32x4xf32>
    %61 = vector.extract_strided_slice %60 {offsets = [0, 8, 0], sizes = [16, 16, 4], strides = [1, 1, 1]} : vector<16x32x4xf32> to vector<16x16x4xf32>
    %62 = vector.shape_cast %61 : vector<16x16x4xf32> to vector<256x4xf32>
    %c2_39 = arith.constant 2 : index
    %c0_40 = arith.constant 0 : index
    %c0_41 = arith.constant 0 : index
    %63 = vector.load %arg2[%c2_39, %c0_40, %c0_41] : memref<4x4x4xf32, #tpu.memory_space<vmem>>, vector<1x4x4xf32>
    %64 = vector.shape_cast %63 : vector<1x4x4xf32> to vector<4x4xf32>
    %cst_42 = arith.constant dense<0.000000e+00> : vector<256x4xf32>
    %65 = tpu.matmul %62, %64, %cst_42 {dimension_numbers = #tpu.dot_dimension_numbers<[1], [0], [0], [1], [0, 0, 1, 1], [], []>} : vector<256x4xf32>, vector<4x4xf32>, vector<256x4xf32> -> vector<256x4xf32>
    %66 = arith.addf %41, %65 : vector<256x4xf32>
    %c2_43 = arith.constant 2 : index
    %c8_44 = arith.constant 8 : index
    %c0_45 = arith.constant 0 : index
    %67 = vector.load %arg5[%c2_43, %c8_44, %c0_45] : memref<20x32x4xf32, #tpu.memory_space<vmem>>, vector<16x16x4xf32>
    tpu.vector_store %arg5[%c2_43, %c8_44, %c0_45], %61 {strides = array<i32>} : memref<20x32x4xf32, #tpu.memory_space<vmem>>, vector<16x16x4xf32>,
    %c0_46 = arith.constant 0 : index
    %c0_47 = arith.constant 0 : index
    %c0_48 = arith.constant 0 : index
    %68 = vector.load %arg5[%c0_46, %c0_47, %c0_48] : memref<20x32x4xf32, #tpu.memory_space<vmem>>, vector<20x32x4xf32>
    %69 = vector.extract_strided_slice %68 {offsets = [0, 0, 0], sizes = [16, 32, 4], strides = [1, 1, 1]} : vector<20x32x4xf32> to vector<16x32x4xf32>
    %70 = vector.extract_strided_slice %68 {offsets = [1, 0, 0], sizes = [16, 32, 4], strides = [1, 1, 1]} : vector<20x32x4xf32> to vector<16x32x4xf32>
    %71 = vector.extract_strided_slice %68 {offsets = [2, 0, 0], sizes = [16, 32, 4], strides = [1, 1, 1]} : vector<20x32x4xf32> to vector<16x32x4xf32>
    %72 = vector.extract_strided_slice %68 {offsets = [3, 0, 0], sizes = [16, 32, 4], strides = [1, 1, 1]} : vector<20x32x4xf32> to vector<16x32x4xf32>
    %73 = vector.extract_strided_slice %68 {offsets = [4, 0, 0], sizes = [16, 32, 4], strides = [1, 1, 1]} : vector<20x32x4xf32> to vector<16x32x4xf32>
    %74 = arith.maximumf %69, %70 : vector<16x32x4xf32>
    %75 = arith.maximumf %71, %72 : vector<16x32x4xf32>
    %76 = arith.maximumf %74, %75 : vector<16x32x4xf32>
    %77 = arith.maximumf %76, %73 : vector<16x32x4xf32>
    %c1_i32_49 = arith.constant 1 : i32
    %78 = tpu.dynamic_rotate %77 by %c1_i32_49 dim 1 : vector<16x32x4xf32>, i32 -> vector<16x32x4xf32>
    %c31_i32_50 = arith.constant 31 : i32
    %79 = tpu.dynamic_rotate %77 by %c31_i32_50 dim 1 : vector<16x32x4xf32>, i32 -> vector<16x32x4xf32>
    %c2_i32_51 = arith.constant 2 : i32
    %80 = tpu.dynamic_rotate %77 by %c2_i32_51 dim 1 : vector<16x32x4xf32>, i32 -> vector<16x32x4xf32>
    %c30_i32_52 = arith.constant 30 : i32
    %81 = tpu.dynamic_rotate %77 by %c30_i32_52 dim 1 : vector<16x32x4xf32>, i32 -> vector<16x32x4xf32>
    %82 = arith.maximumf %77, %78 : vector<16x32x4xf32>
    %83 = arith.maximumf %79, %80 : vector<16x32x4xf32>
    %84 = arith.maximumf %82, %83 : vector<16x32x4xf32>
    %85 = arith.maximumf %84, %81 : vector<16x32x4xf32>
    %86 = vector.extract_strided_slice %85 {offsets = [0, 8, 0], sizes = [16, 16, 4], strides = [1, 1, 1]} : vector<16x32x4xf32> to vector<16x16x4xf32>
    %87 = vector.shape_cast %86 : vector<16x16x4xf32> to vector<256x4xf32>
    %c3 = arith.constant 3 : index
    %c0_53 = arith.constant 0 : index
    %c0_54 = arith.constant 0 : index
    %88 = vector.load %arg2[%c3, %c0_53, %c0_54] : memref<4x4x4xf32, #tpu.memory_space<vmem>>, vector<1x4x4xf32>
    %89 = vector.shape_cast %88 : vector<1x4x4xf32> to vector<4x4xf32>
    %cst_55 = arith.constant dense<0.000000e+00> : vector<256x4xf32>
    %90 = tpu.matmul %87, %89, %cst_55 {dimension_numbers = #tpu.dot_dimension_numbers<[1], [0], [0], [1], [0, 0, 1, 1], [], []>} : vector<256x4xf32>, vector<4x4xf32>, vector<256x4xf32> -> vector<256x4xf32>
    %91 = arith.addf %66, %90 : vector<256x4xf32>
    %92 = vector.shape_cast %91 : vector<256x4xf32> to vector<16x16x4xf32>
    %c0_56 = arith.constant 0 : index
    %c0_57 = arith.constant 0 : index
    %c0_58 = arith.constant 0 : index
    %c0_59 = arith.constant 0 : index
    %93 = vector.load %arg4[%c0_56, %c0_57, %c0_58, %c0_59] : memref<1x16x16x4xf32, #tpu.memory_space<vmem>>, vector<1x16x16x4xf32>
    %94 = vector.shape_cast %93 : vector<1x16x16x4xf32> to vector<16x16x4xf32>
    %95 = vector.shape_cast %92 : vector<16x16x4xf32> to vector<1x16x16x4xf32>
    tpu.vector_store %arg4[%c0_56, %c0_57, %c0_58, %c0_59], %95 {strides = array<i32>} : memref<1x16x16x4xf32, #tpu.memory_space<vmem>>, vector<1x16x16x4xf32>,
    return
  }
  func.func @transform_0(%arg0: i32) -> (i32, i32, i32, i32) {
    %c0_i32 = arith.constant 0 : i32
    %c0_i32_0 = arith.constant 0 : i32
    %c0_i32_1 = arith.constant 0 : i32
    %c0_i32_2 = arith.constant 0 : i32
    return %arg0, %c0_i32, %c0_i32_0, %c0_i32_1 : i32, i32, i32, i32
  }
  func.func @transform_1(%arg0: i32) -> (i32, i32, i32) {
    %c0_i32 = arith.constant 0 : i32
    %c0_i32_0 = arith.constant 0 : i32
    %c0_i32_1 = arith.constant 0 : i32
    %c0_i32_2 = arith.constant 0 : i32
    return %c0_i32, %c0_i32_0, %c0_i32_1 : i32, i32, i32
  }
  func.func @transform_2(%arg0: i32) -> (i32, i32) {
    %c0_i32 = arith.constant 0 : i32
    %c0_i32_0 = arith.constant 0 : i32
    %c0_i32_1 = arith.constant 0 : i32
    return %c0_i32, %c0_i32_0 : i32, i32
  }
  func.func @transform_3(%arg0: i32) -> (i32, i32, i32, i32) {
    %c0_i32 = arith.constant 0 : i32
    %c0_i32_0 = arith.constant 0 : i32
    %c0_i32_1 = arith.constant 0 : i32
    %c0_i32_2 = arith.constant 0 : i32
    return %arg0, %c0_i32, %c0_i32_0, %c0_i32_1 : i32, i32, i32, i32
  }
}

</mosaic_0001>

<bundles_post_ra>
// kernel: tpu_custom_call.1
= control target key start
LH: loop header
LB: loop body
LE: loop exit
PB: predicated region body
PF: predicated region fallthrough
CT: control target
= control target key end

     0   :  { %s3779_s12 = smov 0   ;;  %s9637_s0 = inlined_call_operand.vmem [shape: f32[2,16,16,4], index: 0, kind: input, shape index: {}]   ;;  %s9638_s1 = inlined_call_operand.vmem [shape: f32[4,4,4], index: 1, kind: input, shape index: {}]   ;;  %s9639_s2 = inlined_call_operand.vmem [shape: f32[1,4], index: 2, kind: input, shape index: {}]   ;;  %s9640_s3 = inlined_call_operand.vmem [shape: f32[2,16,16,4], index: 3, kind: output, shape index: {}]  }
   0x1 LB: > { %s3591_s13 = sadd.s32 4294967295, %s3756_s12   ;;  %p3595_p0 = scmp.ge.s32.totalorder %s3756_s12, 1  ;;  %s3756_s12 = sphi %s3779_s12, %s13_s12  }
   0x2   : > { %p137_p1 = scmp.lt.s32.totalorder %s3756_s12, 3 }
   0x4   : > { %p138_p2 = pnand %p3595_p0, %p137_p1 }
   0x6   : > { %141 = sbr.rel (%p138_p2) target bundleno = 1128 (0x468), region = 32 }
   0xb   : > { %vm362_vm0 = vcmask 1043456   ;;  %v3667_v0 = vld [vmem:[%s9638_s1 + $0x8] sm:$0xf]  ;;  %vm171_vm1 = vcmask 31744   ;;  %v3758_v1 = vmov -inf   ;;  %p161_p3 = scmp.lt.s32.totalorder %s3591_s13, 1 }
   0xc   : > { %3668 = vmatpush.msk.msra.mxu2 %vm362_vm0, %v3667_v0  ;;  %172 = vst.msk [vmem:[#allocation2] sm:$0xff] %vm171_vm1, %v3758_v1 }
   0xd   : > { %173 = vst.msk [vmem:[#allocation2 + $0x8] sm:$0xff] %vm171_vm1, %v3758_v1  ;;  %s11822_s13 = smov (!%p161_p3, %s3591_s13), 1 }
   0xe   : > { %174 = vst.msk [vmem:[#allocation2 + $0x10] sm:$0xff] %vm171_vm1, %v3758_v1  ;;  %s3737_s16 = sshll.u32 %s11822_s13, 8 }
   0xf   : > { %175 = vst.msk [vmem:[#allocation2 + $0x18] sm:$0xff] %vm171_vm1, %v3758_v1  ;;  %s3903_s19 = scalar_lea.vmem %s9637_s0, %s3737_s16  ;;  %s8956_s30 = scalar_lea.vmem %s9640_s3, %s3737_s16 }
  0x10   : > { %176 = vst.msk [vmem:[#allocation2 + $0x20] sm:$0xff] %vm171_vm1, %v3758_v1  ;;  %v3916_v19 = vld [vmem:[%s3903_s19] sm:$0xff]  ;;  %v3928_v24 = vld [vmem:[%s3903_s19 + $0x8] sm:$0xff]  ;;  %v3937_v27 = vld [vmem:[%s3903_s19 + $0x10] sm:$0xff] }
  0x11   : > { %177 = vst.msk [vmem:[#allocation2 + $0x28] sm:$0xff] %vm171_vm1, %v3758_v1  ;;  %v3940_v32 = vld [vmem:[%s3903_s19 + $0x18] sm:$0xff]  ;;  %v3946_v37 = vld [vmem:[%s3903_s19 + $0x20] sm:$0xff]  ;;  %v3961_v42 = vld [vmem:[%s3903_s19 + $0x28] sm:$0xff] }
  0x12   : > { %178 = vst.msk [vmem:[#allocation2 + $0x30] sm:$0xff] %vm171_vm1, %v3758_v1  ;;  %v3966_v44 = vld [vmem:[%s3903_s19 + $0x30] sm:$0xff]  ;;  %v3969_v45 = vld [vmem:[%s3903_s19 + $0x38] sm:$0xff]  ;;  %v3990_v56 = vld [vmem:[%s3903_s19 + $0x40] sm:$0xff] }
  0x13   : > { %179 = vst.msk [vmem:[#allocation2 + $0x38] sm:$0xff] %vm171_vm1, %v3758_v1  ;;  %v3993_v57 = vld [vmem:[%s3903_s19 + $0x48] sm:$0xff]  ;;  %v4005_v62 = vld [vmem:[%s3903_s19 + $0x50] sm:$0xff]  ;;  %v4008_v63 = vld [vmem:[%s3903_s19 + $0x58] sm:$0xff] }
  0x14   : > { %181 = vst.msk [vmem:[#allocation2 + $0x240] sm:$0xff] %vm171_vm1, %v3758_v1  ;;  %v3973_v46 = vld [vmem:[#allocation2 + $0x8] sm:$0xff] }
  0x15   : > { %182 = vst.msk [vmem:[#allocation2 + $0x248] sm:$0xff] %vm171_vm1, %v3758_v1  ;;  %v3979_v49 = vld [vmem:[#allocation2 + $0x10] sm:$0xff] }
  0x16   : > { %183 = vst.msk [vmem:[#allocation2 + $0x250] sm:$0xff] %vm171_vm1, %v3758_v1 }
  0x17   : > { %184 = vst.msk [vmem:[#allocation2 + $0x258] sm:$0xff] %vm171_vm1, %v3758_v1 }
  0x18   : > { %185 = vst.msk [vmem:[#allocation2 + $0x260] sm:$0xff] %vm171_vm1, %v3758_v1  ;;  %v3981_v50 = vld [vmem:[#allocation2 + $0x28] sm:$0xff] }
  0x19   : > { %186 = vst.msk [vmem:[#allocation2 + $0x268] sm:$0xff] %vm171_vm1, %v3758_v1  ;;  %v3983_v51 = vld [vmem:[#allocation2 + $0x30] sm:$0xff] }
  0x1a   : > { %187 = vst.msk [vmem:[#allocation2 + $0x270] sm:$0xff] %vm171_vm1, %v3758_v1 }
  0x1b   : > { %188 = vst.msk [vmem:[#allocation2 + $0x278] sm:$0xff] %vm171_vm1, %v3758_v1 }
  0x1c   : > { %189 = vst.msk [vmem:[#allocation2] sm:$0xff] %vm171_vm1, %v3758_v1 }
  0x1d   : > { %190 = vst.msk [vmem:[#allocation2 + $0x20] sm:$0xff] %vm171_vm1, %v3758_v1 }
  0x1e   : > { %191 = vst.msk [vmem:[#allocation2 + $0x40] sm:$0xff] %vm171_vm1, %v3758_v1 }
  0x1f   : > { %192 = vst.msk [vmem:[#allocation2 + $0x60] sm:$0xff] %vm171_vm1, %v3758_v1 }
  0x20   : > { %193 = vst.msk [vmem:[#allocation2 + $0x80] sm:$0xff] %vm171_vm1, %v3758_v1 }
  0x21   : > { %194 = vst.msk [vmem:[#allocation2 + $0xa0] sm:$0xff] %vm171_vm1, %v3758_v1 }
  0x22   : > { %195 = vst.msk [vmem:[#allocation2 + $0xc0] sm:$0xff] %vm171_vm1, %v3758_v1 }
  0x23   : > { %196 = vst.msk [vmem:[#allocation2 + $0xe0] sm:$0xff] %vm171_vm1, %v3758_v1  ;;  %v512_v2 = vld [vmem:[#allocation2] sm:$0xff] }
  0x24   : > { %197 = vst.msk [vmem:[#allocation2 + $0x100] sm:$0xff] %vm171_vm1, %v3758_v1  ;;  %v516_v3 = vld [vmem:[#allocation2 + $0x20] sm:$0xff] }
  0x25   : > { %198 = vst.msk [vmem:[#allocation2 + $0x120] sm:$0xff] %vm171_vm1, %v3758_v1  ;;  %v520_v4 = vld [vmem:[#allocation2 + $0x40] sm:$0xff]  ;;  %v592_v11 = vmax.f32 %v512_v2, %v516_v3 }
  0x26   : > { %199 = vst.msk [vmem:[#allocation2 + $0x140] sm:$0xff] %vm171_vm1, %v3758_v1  ;;  %v524_v5 = vld [vmem:[#allocation2 + $0x60] sm:$0xff]  ;;  %v596_v12 = vmax.f32 %v516_v3, %v520_v4 }
  0x27   : > { %200 = vst.msk [vmem:[#allocation2 + $0x160] sm:$0xff] %vm171_vm1, %v3758_v1  ;;  %v528_v6 = vld [vmem:[#allocation2 + $0x80] sm:$0xff]  ;;  %v600_v13 = vmax.f32 %v520_v4, %v524_v5 }
  0x28   : > { %201 = vst.msk [vmem:[#allocation2 + $0x180] sm:$0xff] %vm171_vm1, %v3758_v1  ;;  %v532_v7 = vld [vmem:[#allocation2 + $0xa0] sm:$0xff]  ;;  %v604_v14 = vmax.f32 %v524_v5, %v528_v6 }
  0x29   : > { %202 = vst.msk [vmem:[#allocation2 + $0x1a0] sm:$0xff] %vm171_vm1, %v3758_v1  ;;  %v536_v8 = vld [vmem:[#allocation2 + $0xc0] sm:$0xff]  ;;  %v608_v18 = vmax.f32 %v528_v6, %v532_v7  ;;  %v664_v30 = vmax.f32 %v592_v11, %v600_v13 }
  0x2a   : > { %203 = vst.msk [vmem:[#allocation2 + $0x1c0] sm:$0xff] %vm171_vm1, %v3758_v1  ;;  %v3907_v9 = vld [vmem:[#allocation2 + $0xe0] sm:$0xff]  ;;  %v3920_v22 = vmax.f32 %v532_v7, %v536_v8  ;;  %v668_v31 = vmax.f32 %v596_v12, %v604_v14 }
  0x2b   : > { %204 = vst.msk [vmem:[#allocation2 + $0x1e0] sm:$0xff] %vm171_vm1, %v3758_v1  ;;  %v3923_v23 = vmax.f32 %v536_v8, %v3907_v9  ;;  %v672_v36 = vmax.f32 %v600_v13, %v608_v18  ;;  %v544_v43 = vld [vmem:[#allocation2 + $0x100] sm:$0xff]  ;;  %v3975_v48 = vmax.f32 %v664_v30, %v528_v6 }
  0x2c   : > { %205 = vst.msk [vmem:[#allocation2 + $0x200] sm:$0xff] %vm171_vm1, %v3758_v1  ;;  %v676_v40 = vmax.f32 %v604_v14, %v3920_v22  ;;  %v3985_v54 = vmax.f32 %v668_v31, %v532_v7  ;;  %v4017_v2 = vld [vmem:[#allocation2 + $0x120] sm:$0xff] }
  0x2d   : > { %206 = vst.msk [vmem:[#allocation2 + $0x220] sm:$0xff] %vm171_vm1, %v3758_v1  ;;  %v680_v41 = vmax.f32 %v608_v18, %v3923_v23  ;;  %v3987_v55 = vmax.f32 %v672_v36, %v536_v8  ;;  %v4029_v8 = vld [vmem:[%s3903_s19 + $0x68] sm:$0xff]  ;;  %v4050_v18 = vld [vmem:[%s3903_s19 + $0x70] sm:$0xff] }
  0x2e   : > { %207 = vst.msk [vmem:[#allocation2 + $0x240] sm:$0xff] %vm171_vm1, %v3758_v1  ;;  %v4000_v60 = vmax.f32 %v676_v40, %v3907_v9  ;;  %v4037_v12 = vld [vmem:[#allocation2 + $0x160] sm:$0xff] }
  0x2f   : > { %208 = vst.msk [vmem:[#allocation2 + $0x260] sm:$0xff] %vm171_vm1, %v3758_v1  ;;  %v4002_v61 = vmax.f32 %v680_v41, %v544_v43  ;;  %v4077_v41 = vmax.f32 %v3907_v9, %v544_v43 }
  0x30   : > { %209 = vst.msk [vmem:[#allocation2 + $0x18] sm:$0xff] %vm171_vm1, %v3758_v1 }
  0x31   : > { %210 = vst.msk [vmem:[#allocation2 + $0x38] sm:$0xff] %vm171_vm1, %v3758_v1  ;;  %v4097_v9 = vld [vmem:[#allocation2 + $0x1c0] sm:$0xff] }
  0x32   : > { %211 = vst.msk [vmem:[#allocation2 + $0x58] sm:$0xff] %vm171_vm1, %v3758_v1  ;;  %v4124_v5 = vld [vmem:[#allocation2 + $0x1e0] sm:$0xff] }
  0x33   : > { %212 = vst.msk [vmem:[#allocation2 + $0x78] sm:$0xff] %vm171_vm1, %v3758_v1 }
  0x34   : > { %213 = vst.msk [vmem:[#allocation2 + $0x98] sm:$0xff] %vm171_vm1, %v3758_v1 }
  0x35   : > { %214 = vst.msk [vmem:[#allocation2 + $0xb8] sm:$0xff] %vm171_vm1, %v3758_v1 }
  0x36   : > { %215 = vst.msk [vmem:[#allocation2 + $0xd8] sm:$0xff] %vm171_vm1, %v3758_v1 }
  0x37   : > { %216 = vst.msk [vmem:[#allocation2 + $0xf8] sm:$0xff] %vm171_vm1, %v3758_v1  ;;  %v515_v10 = vld [vmem:[#allocation2 + $0x18] sm:$0xff] }
  0x38   : > { %217 = vst.msk [vmem:[#allocation2 + $0x118] sm:$0xff] %vm171_vm1, %v3758_v1  ;;  %v519_v15 = vld [vmem:[#allocation2 + $0x38] sm:$0xff] }
  0x39   : > { %218 = vst.msk [vmem:[#allocation2 + $0x138] sm:$0xff] %vm171_vm1, %v3758_v1  ;;  %v523_v16 = vld [vmem:[#allocation2 + $0x58] sm:$0xff]  ;;  %v595_v28 = vmax.f32 %v515_v10, %v519_v15  ;;  %v4033_v10 = vld [vmem:[#allocation2 + $0x140] sm:$0xff] }
  0x3a   : > { %219 = vst.msk [vmem:[#allocation2 + $0x158] sm:$0xff] %vm171_vm1, %v3758_v1  ;;  %v527_v17 = vld [vmem:[#allocation2 + $0x78] sm:$0xff]  ;;  %v599_v33 = vmax.f32 %v519_v15, %v523_v16 }
  0x3b   : > { %220 = vst.msk [vmem:[#allocation2 + $0x178] sm:$0xff] %vm171_vm1, %v3758_v1  ;;  %v531_v20 = vld [vmem:[#allocation2 + $0x98] sm:$0xff]  ;;  %v603_v29 = vmax.f32 %v523_v16, %v527_v17 }
  0x3c   : > { %221 = vst.msk [vmem:[#allocation2 + $0x198] sm:$0xff] %vm171_vm1, %v3758_v1  ;;  %v3918_v21 = vld [vmem:[#allocation2 + $0xb8] sm:$0xff]  ;;  %v607_v34 = vmax.f32 %v527_v17, %v531_v20  ;;  %v4116_v17 = vld [vmem:[%s3903_s19 + $0x88] sm:$0xff] }
  0x3d   : > { %222 = vst.msk [vmem:[#allocation2 + $0x1b8] sm:$0xff] %vm171_vm1, %v3758_v1  ;;  %v3930_v25 = vld [vmem:[#allocation2 + $0xd8] sm:$0xff]  ;;  %v611_v35 = vmax.f32 %v531_v20, %v3918_v21  ;;  %v667_v47 = vmax.f32 %v595_v28, %v603_v29  ;;  %v4056_v28 = vld [vmem:[#allocation2 + $0x180] sm:$0xff] }
  0x3e   : > { %223 = vst.msk [vmem:[#allocation2 + $0x1d8] sm:$0xff] %vm171_vm1, %v3758_v1  ;;  %v3932_v26 = vld [vmem:[#allocation2 + $0xf8] sm:$0xff]  ;;  %v3952_v38 = vmax.f32 %v3918_v21, %v3930_v25  ;;  %v671_v52 = vmax.f32 %v599_v33, %v607_v34 }
  0x3f   : > { %224 = vst.msk [vmem:[#allocation2 + $0x1f8] sm:$0xff] %vm171_vm1, %v3758_v1  ;;  %v3956_v39 = vmax.f32 %v3930_v25, %v3932_v26  ;;  %v675_v53 = vmax.f32 %v603_v29, %v611_v35  ;;  %v547_v0 = vld [vmem:[#allocation2 + $0x118] sm:$0xff]  ;;  %v4025_v6 = vmax.f32 %v667_v47, %v531_v20 }
  0x40   : > { %225 = vst.msk [vmem:[#allocation2 + $0x218] sm:$0xff] %vm171_vm1, %v3758_v1  ;;  %v679_v58 = vmax.f32 %v607_v34, %v3952_v38  ;;  %v4019_v3 = vld [vmem:[#allocation2 + $0x138] sm:$0xff]  ;;  %v4042_v14 = vmax.f32 %v671_v52, %v3918_v21  ;;  %v4060_v21 = vld [vmem:[#allocation2 + $0x1a0] sm:$0xff]  ;;  %v4080_v47 = vmax.f32 %v3932_v26, %v547_v0  ;;  %v4083_v52 = vmax.f32 %v544_v43, %v4017_v2 }
  0x41   : > { %226 = vst.msk [vmem:[#allocation2 + $0x238] sm:$0xff] %vm171_vm1, %v3758_v1  ;;  %v683_v59 = vmax.f32 %v611_v35, %v3956_v39  ;;  %v4035_v11 = vld [vmem:[#allocation2 + $0x158] sm:$0xff]  ;;  %v4045_v15 = vmax.f32 %v675_v53, %v3930_v25  ;;  %v4086_v53 = vmax.f32 %v547_v0, %v4019_v3 }
  0x42   : > { %10162 = vst [vmem:[#allocation3_spill] sm:$0xff] %v3916_v19  ;;  %v4039_v13 = vld [vmem:[#allocation2 + $0x178] sm:$0xff]  ;;  %v4063_v25 = vmax.f32 %v679_v58, %v3932_v26  ;;  %v4089_v58 = vld [vmem:[%s3903_s19 + $0x80] sm:$0xff]  ;;  %v4101_v26 = vmax.f32 %v4017_v2, %v4033_v10  ;;  %v4105_v43 = vmax.f32 %v4019_v3, %v4035_v11 }
  0x43   : > { %10163 = vst [vmem:[#allocation4_spill] sm:$0xff] %v3923_v23  ;;  %v4058_v29 = vld [vmem:[#allocation2 + $0x198] sm:$0xff]  ;;  %v4065_v30 = vmax.f32 %v683_v59, %v547_v0  ;;  %v4109_v0 = vmax.f32 %v4033_v10, %v4037_v12  ;;  %v4113_v31 = vmax.f32 %v4035_v11, %v4039_v13 }
  0x44   : > { %227 = vst.msk [vmem:[#allocation2 + $0x258] sm:$0xff] %vm171_vm1, %v3758_v1  ;;  %v4070_v34 = vld [vmem:[%s3903_s19 + $0x78] sm:$0xff] }
  0x45   : > { %10164 = vst [vmem:[#allocation5_spill] sm:$0xff] %v3928_v24  ;;  %v4095_v33 = vld [vmem:[#allocation2 + $0x1b8] sm:$0xff] }
  0x46   : > { %228 = vst.msk [vmem:[#allocation2 + $0x278] sm:$0xff] %vm171_vm1, %v3758_v1  ;;  %v4013_v1 = vld [vmem:[%s3903_s19 + $0x60] sm:$0xff]  ;;  %v4122_v7 = vld [vmem:[#allocation2 + $0x1d8] sm:$0xff] }
  0x47   : > { %10165 = vst [vmem:[#allocation6_spill] sm:$0xff] %v3937_v27 }
  0x48   : > { %10166 = vst [vmem:[#allocation7_spill] sm:$0xff] %v3940_v32 }
  0x49   : > { %480 = vst.msk [vmem:[#allocation2 + $0x48] sm:$0xff] %vm171_vm1, %v3916_v19  ;;  %v4169_v19 = vld [vmem:[#allocation2 + $0x220] sm:$0xff] }
  0x4a   : > { %10167 = vst [vmem:[#allocation8_spill] sm:$0xff] %v3946_v37 }
  0x4b   : > { %481 = vst.msk [vmem:[#allocation2 + $0x50] sm:$0xff] %vm171_vm1, %v3928_v24  ;;  %v4167_v24 = vld [vmem:[#allocation2 + $0x218] sm:$0xff] }
  0x4c   : > { %10168 = vst [vmem:[#allocation9_spill] sm:$0xff] %v3956_v39 }
  0x4d   : > { %10169 = vst [vmem:[#allocation10_spill] sm:$0xff] %v3961_v42 }
  0x4e   : > { %482 = vst.msk [vmem:[#allocation2 + $0x68] sm:$0xff] %vm171_vm1, %v3937_v27  ;;  %v4161_v27 = vmax.f32 %v4058_v29, %v4095_v33 }
  0x4f   : > { %10170 = vst [vmem:[#allocation11_spill] sm:$0xff] %v3966_v44 }
  0x50   : > { %10171 = vst [vmem:[#allocation12_spill] sm:$0xff] %v3969_v45  ;;  %v4054_v20 = vld [vmem:[#allocation2 + $0x48] sm:$0xff] }
  0x51   : > { %483 = vst.msk [vmem:[#allocation2 + $0x70] sm:$0xff] %vm171_vm1, %v3940_v32  ;;  %v597_v4 = vmax.f32 %v3981_v50, %v4054_v20 }
  0x52   : > { %10172 = vst [vmem:[#allocation13_spill] sm:$0xff] %v3975_v48  ;;  %v4074_v35 = vld [vmem:[#allocation2 + $0x50] sm:$0xff] }
  0x53   : > { %484 = vst.msk [vmem:[#allocation2 + $0x88] sm:$0xff] %vm171_vm1, %v3946_v37 }
  0x54   : > { %10173 = vst [vmem:[#allocation14_spill] sm:$0xff] %v3985_v54 }
  0x55   : > { %10174 = vst [vmem:[#allocation15_spill] sm:$0xff] %v3987_v55  ;;  %v525_v36 = vld [vmem:[#allocation2 + $0x68] sm:$0xff]  ;;  %v4216_v55 = vld [vmem:[#allocation2 + $0x258] sm:$0xff] }
  0x56   : > { %10175 = vst [vmem:[#allocation16_spill] sm:$0xff] %v3990_v56  ;;  %v4154_v37 = vmax.f32 %v4054_v20, %v525_v36 }
  0x57   : > { %10176 = vst [vmem:[#allocation17_spill] sm:$0xff] %v3993_v57 }
  0x58   : > { %485 = vst.msk [vmem:[#allocation2 + $0x90] sm:$0xff] %vm171_vm1, %v3961_v42  ;;  %v526_v40 = vld [vmem:[#allocation2 + $0x70] sm:$0xff]  ;;  %v598_v42 = vmax.f32 %v3983_v51, %v4074_v35 }
  0x59   : > { %10177 = vst [vmem:[#allocation18_spill] sm:$0xff] %v4000_v60  ;;  %v4157_v32 = vmax.f32 %v4074_v35, %v526_v40  ;;  %v4176_v35 = vmax.f32 %v4060_v21, %v4097_v9  ;;  %v4210_v60 = vld [vmem:[%s3903_s19 + $0x98] sm:$0xff] }
  0x5a   : > { %10178 = vst [vmem:[#allocation19_spill] sm:$0xff] %v4002_v61  ;;  %v4093_v59 = vld [vmem:[#allocation2 + $0x88] sm:$0xff] }
  0x5b   : > { %10179 = vst [vmem:[#allocation20_spill] sm:$0xff] %v4005_v62  ;;  %v4172_v20 = vmax.f32 %v525_v36, %v4093_v59  ;;  %v4190_v36 = vld [vmem:[#allocation2 + $0x238] sm:$0xff] }
  0x5c   : > { %10180 = vst [vmem:[#allocation21_spill] sm:$0xff] %v4008_v63 }
  0x5d   : > { %486 = vst.msk [vmem:[#allocation2 + $0xa8] sm:$0xff] %vm171_vm1, %v3966_v44  ;;  %v4149_v44 = vld [vmem:[#allocation2 + $0x200] sm:$0xff] }
  0x5e   : > { %10181 = vst [vmem:[#allocation22_spill] sm:$0xff] %v4013_v1  ;;  %v4203_v61 = vmax.f32 %v4124_v5, %v4149_v44 }
  0x5f   : > { %487 = vst.msk [vmem:[#allocation2 + $0xb0] sm:$0xff] %vm171_vm1, %v3969_v45  ;;  %v4120_v16 = vld [vmem:[#allocation2 + $0x90] sm:$0xff]  ;;  %v4147_v45 = vld [vmem:[#allocation2 + $0x1f8] sm:$0xff] }
  0x60   : > { %10182 = vst [vmem:[#allocation23_spill] sm:$0xff] %v4025_v6  ;;  %v4199_v6 = vmax.f32 %v4122_v7, %v4147_v45 }
  0x61   : > { %10183 = vst [vmem:[#allocation24_spill] sm:$0xff] %v4029_v8 }
  0x62   : > { %488 = vst.msk [vmem:[#allocation2 + $0xc8] sm:$0xff] %vm171_vm1, %v3990_v56 }
  0x63   : > { %10184 = vst [vmem:[#allocation25_spill] sm:$0xff] %v4033_v10  ;;  %v10234_v10 = vmax.f32 %v4149_v44, %v4169_v19 }
  0x64   : > { %10185 = vst [vmem:[#allocation26_spill] sm:$0xff] %v4035_v11  ;;  %v4145_v56 = vld [vmem:[#allocation2 + $0xa8] sm:$0xff] }
  0x65   : > { %10186 = vst [vmem:[#allocation27_spill] sm:$0xff] %v4037_v12  ;;  %v4220_v54 = vmax.f32 %v4093_v59, %v4145_v56 }
  0x66   : > { %10187 = vst [vmem:[#allocation28_spill] sm:$0xff] %v4039_v13 }
  0x67   : > { %10188 = vst [vmem:[#allocation29_spill] sm:$0xff] %v4042_v14  ;;  %v4195_v14 = vmax.f32 %v526_v40, %v4120_v16 }
  0x68   : > { %10189 = vst [vmem:[#allocation30_spill] sm:$0xff] %v4045_v15  ;;  %v4192_v15 = vld [vmem:[#allocation2 + $0x240] sm:$0xff] }
  0x69   : > { %10190 = vst [vmem:[#allocation31_spill] sm:$0xff] %v4050_v18 }
  0x6a   : > { %489 = vst.msk [vmem:[#allocation2 + $0xd0] sm:$0xff] %vm171_vm1, %v3993_v57  ;;  %v4141_v57 = vld [vmem:[%s3903_s19 + $0x90] sm:$0xff] }
  0x6b   : > { %10191 = vst [vmem:[#allocation32_spill] sm:$0xff] %v4056_v28 }
  0x6c   : > { %10192 = vst [vmem:[#allocation33_spill] sm:$0xff] %v4058_v29 }
  0x6d   : > { %10193 = vst [vmem:[#allocation34_spill] sm:$0xff] %v4060_v21 }
  0x6e   : > { %10194 = vst [vmem:[#allocation35_spill] sm:$0xff] %v4063_v25  ;;  %v4188_v25 = vld [vmem:[#allocation2 + $0xc8] sm:$0xff] }
  0x6f   : > { %10195 = vst [vmem:[#allocation36_spill] sm:$0xff] %v4065_v30  ;;  %v4180_v30 = vmax.f32 %v4095_v33, %v4122_v7  ;;  %v4262_v48 = vmax.f32 %v4145_v56, %v4188_v25 }
  0x70   : > { %10196 = vst [vmem:[#allocation37_spill] sm:$0xff] %v4070_v34 }
  0x71   : > { %490 = vst.msk [vmem:[#allocation2 + $0xe8] sm:$0xff] %vm171_vm1, %v4005_v62  ;;  %v4134_v62 = vmax.f32 %v4039_v13, %v4058_v29  ;;  %v4214_v40 = vld [vmem:[#allocation2 + $0xd0] sm:$0xff]  ;;  %v4320_v13 = vld [vmem:[%s3903_s19 + $0xc8] sm:$0xff] }
  0x72   : > { %10197 = vst [vmem:[#allocation38_spill] sm:$0xff] %v4083_v52 }
  0x73   : > { %10198 = vst [vmem:[#allocation39_spill] sm:$0xff] %v4086_v53  ;;  %v4337_v53 = vld [vmem:[%s3903_s19 + $0xd0] sm:$0xff] }
  0x74   : > { %10199 = vst [vmem:[#allocation40_spill] sm:$0xff] %v4089_v58 }
  0x75   : > { %491 = vst.msk [vmem:[#allocation2 + $0xf0] sm:$0xff] %vm171_vm1, %v4008_v63  ;;  %v4130_v63 = vmax.f32 %v4037_v12, %v4056_v28 }
  0x76   : > { %10200 = vst [vmem:[#allocation41_spill] sm:$0xff] %v4095_v33 }
  0x77   : > { %10201 = vst [vmem:[#allocation42_spill] sm:$0xff] %v4097_v9 }
  0x78   : > { %10202 = vst [vmem:[#allocation43_spill] sm:$0xff] %v4101_v26 }
  0x79   : > { %10203 = vst [vmem:[#allocation44_spill] sm:$0xff] %v4105_v43  ;;  %v4354_v43 = vld [vmem:[%s3903_s19 + $0xd8] sm:$0xff] }
  0x7a   : > { %10204 = vst [vmem:[#allocation45_spill] sm:$0xff] %v4109_v0 }
  0x7b   : > { %10205 = vst [vmem:[#allocation46_spill] sm:$0xff] %v4113_v31  ;;  %v4371_v31 = vld [vmem:[%s3903_s19 + $0xe0] sm:$0xff] }
  0x7c   : > { %10206 = vst [vmem:[#allocation47_spill] sm:$0xff] %v4116_v17  ;;  %v4258_v29 = vld [vmem:[#allocation2 + $0xf0] sm:$0xff] }
  0x7d   : > { %492 = vst.msk [vmem:[#allocation2 + $0x108] sm:$0xff] %vm171_vm1, %v4013_v1  ;;  %v4138_v1 = vmax.f32 %v4056_v28, %v4060_v21  ;;  %v4254_v21 = vld [vmem:[%s3903_s19 + $0xa8] sm:$0xff]  ;;  %v4311_v28 = vmax.f32 %v4214_v40, %v4258_v29 }
  0x7e   : > { %10207 = vst [vmem:[#allocation48_spill] sm:$0xff] %v4122_v7  ;;  %v4229_v7 = vld [vmem:[%s3903_s19 + $0xa0] sm:$0xff] }
  0x7f   : > { %10208 = vst [vmem:[#allocation49_spill] sm:$0xff] %v4124_v5 }
  0x80   : > { %10209 = vst [vmem:[#allocation50_spill] sm:$0xff] %v4130_v63 }
  0x81   : > { %10210 = vst [vmem:[#allocation51_spill] sm:$0xff] %v4134_v62  ;;  %v4388_v62 = vld [vmem:[%s3903_s19 + $0xe8] sm:$0xff] }
  0x82   : > { %10211 = vst [vmem:[#allocation52_spill] sm:$0xff] %v4138_v1  ;;  %v10236_v1 = vmax.f32 %v4167_v24, %v4190_v36 }
  0x83   : > { %10212 = vst [vmem:[#allocation53_spill] sm:$0xff] %v4141_v57 }
  0x84   : > { %493 = vst.msk [vmem:[#allocation2 + $0x110] sm:$0xff] %vm171_vm1, %v4029_v8  ;;  %v4165_v8 = vld [vmem:[#allocation2 + $0xb0] sm:$0xff] }
  0x85   : > { %10213 = vst [vmem:[#allocation54_spill] sm:$0xff] %v4147_v45 }
  0x86   : > { %10214 = vst [vmem:[#allocation55_spill] sm:$0xff] %v4161_v27 }
  0x87   : > { %494 = vst.msk [vmem:[#allocation2 + $0x128] sm:$0xff] %vm171_vm1, %v4050_v18  ;;  %v4184_v18 = vmax.f32 %v4097_v9, %v4124_v5  ;;  %v4237_v9 = vmax.f32 %v4120_v16, %v4165_v8 }
  0x88   : > { %10215 = vst [vmem:[#allocation56_spill] sm:$0xff] %v4167_v24 }
  0x89   : > { %10216 = vst [vmem:[#allocation57_spill] sm:$0xff] %v4176_v35  ;;  %v682_v11 = vmax.f32 %v4237_v9, %v4311_v28 }
  0x8a   : > { %10217 = vst [vmem:[#allocation58_spill] sm:$0xff] %v4180_v30  ;;  %v4424_v30 = vmax.f32 %v4199_v6, %v10236_v1  ;;  %v10240_v1 = vmax.f32 %v4190_v36, %v4216_v55 }
  0x8b   : > { %495 = vst.msk [vmem:[#allocation2 + $0x130] sm:$0xff] %vm171_vm1, %v4070_v34  ;;  %v4207_v34 = vmax.f32 %v4147_v45, %v4167_v24  ;;  %v10222_v45 = vmax.f32 %v3973_v46, %v3981_v50  ;;  %v4272_v50 = vld [vmem:[%s3903_s19 + $0xb0] sm:$0xff]  ;;  %v4303_v46 = vld [vmem:[%s3903_s19 + $0xc0] sm:$0xff] }
  0x8c   : > { %10218 = vst [vmem:[#allocation59_spill] sm:$0xff] %v4199_v6 }
  0x8d   : > { %10219 = vst [vmem:[#allocation60_spill] sm:$0xff] %v4210_v60  ;;  %v4245_v5 = vmax.f32 %v10222_v45, %v4154_v37  ;;  %v4265_v45 = vmax.f32 %v597_v4, %v4172_v20  ;;  %v4403_v4 = vld [vmem:[%s3903_s19 + $0xf0] sm:$0xff] }
  0x8e   : > { %496 = vst.msk [vmem:[#allocation2 + $0x148] sm:$0xff] %vm171_vm1, %v4089_v58  ;;  %v4233_v58 = vld [vmem:[#allocation2 + $0xe8] sm:$0xff] }
  0x8f   : > { %10220 = vst [vmem:[#allocation61_spill] sm:$0xff] %v4216_v55 }
  0x90   : > { %10221 = vst [vmem:[#allocation62_spill] sm:$0xff] %v4229_v7 }
  0x91   : > { %497 = vst.msk [vmem:[#allocation2 + $0x150] sm:$0xff] %vm171_vm1, %v4116_v17  ;;  %v10223_v17 = vmax.f32 %v3979_v49, %v3983_v51  ;;  %v4278_v51 = vmax.f32 %v4165_v8, %v4214_v40  ;;  %v4288_v49 = vld [vmem:[%s3903_s19 + $0xb8] sm:$0xff] }
  0x92   : > { %10224 = vst [vmem:[#allocation63_spill] sm:$0xff] %v4254_v21 }
  0x93   : > { %v4251_v33 = vmax.f32 %v10223_v17, %v4157_v32  ;;  %498 = vst.msk [vmem:[#allocation2 + $0x168] sm:$0xff] %vm171_vm1, %v4141_v57  ;;  %v4281_v17 = vmax.f32 %v598_v42, %v4195_v14  ;;  %v678_v42 = vmax.f32 %v4195_v14, %v4278_v51  ;;  %v4418_v57 = vmax.f32 %v4184_v18, %v10234_v10 }
  0x94   : > { %10225 = vst [vmem:[#allocation64_spill] sm:$0xff] %v4272_v50 }
  0x95   : > { %499 = vst.msk [vmem:[#allocation2 + $0x170] sm:$0xff] %vm171_vm1, %v4210_v60  ;;  %v4294_v60 = vmax.f32 %v4188_v25, %v4233_v58  ;;  %v4463_v55 = vmax.f32 %v4251_v33, %v4120_v16 }
  0x96   : > { %10226 = vst [vmem:[#allocation65_spill] sm:$0xff] %v4288_v49 }
  0x97   : > { %500 = vst.msk [vmem:[#allocation2 + $0x188] sm:$0xff] %vm171_vm1, %v4229_v7  ;;  %v4307_v7 = vld [vmem:[#allocation2 + $0x108] sm:$0xff]  ;;  %v681_v14 = vmax.f32 %v4220_v54, %v4294_v60 }
  0x98   : > { %10227 = vst [vmem:[#allocation66_spill] sm:$0xff] %v4303_v46  ;;  %v4328_v12 = vmax.f32 %v4233_v58, %v4307_v7 }
  0x99   : > { %501 = vst.msk [vmem:[#allocation2 + $0x190] sm:$0xff] %vm171_vm1, %v4254_v21  ;;  %v4324_v21 = vld [vmem:[#allocation2 + $0x110] sm:$0xff] }
  0x9a   : > { %10228 = vst [vmem:[#allocation67_spill] sm:$0xff] %v4320_v13  ;;  %v4345_v39 = vmax.f32 %v4258_v29, %v4324_v21  ;;  %v685_v52 = vmax.f32 %v4262_v48, %v4328_v12 }
  0x9b   : > { %502 = vst.msk [vmem:[#allocation2 + $0x1a8] sm:$0xff] %vm171_vm1, %v4272_v50  ;;  %v4341_v50 = vld [vmem:[#allocation2 + $0x128] sm:$0xff] }
  0x9c   : > { %10229 = vst [vmem:[#allocation68_spill] sm:$0xff] %v4337_v53  ;;  %v4362_v26 = vmax.f32 %v4307_v7, %v4341_v50  ;;  %v686_v23 = vmax.f32 %v4278_v51, %v4345_v39  ;;  %v558_v35 = vld [vmem:[#allocation2 + $0x170] sm:$0xff] }
  0x9d   : > { %503 = vst.msk [vmem:[#allocation2 + $0x1b0] sm:$0xff] %vm171_vm1, %v4288_v49  ;;  %v4358_v49 = vld [vmem:[#allocation2 + $0x130] sm:$0xff] }
  0x9e   : > { %10230 = vst [vmem:[#allocation69_spill] sm:$0xff] %v4354_v43  ;;  %v4379_v0 = vmax.f32 %v4324_v21, %v4358_v49  ;;  %v689_v10 = vmax.f32 %v4294_v60, %v4362_v26 }
  0x9f   : > { %504 = vst.msk [vmem:[#allocation2 + $0x1c8] sm:$0xff] %vm171_vm1, %v4303_v46  ;;  %v4375_v46 = vld [vmem:[#allocation2 + $0x148] sm:$0xff] }
  0xa0   : > { %10231 = vst [vmem:[#allocation70_spill] sm:$0xff] %v4371_v31  ;;  %v4394_v63 = vmax.f32 %v4341_v50, %v4375_v46  ;;  %v690_v60 = vmax.f32 %v4311_v28, %v4379_v0  ;;  %v4475_v28 = vmax.f32 %v4265_v45, %v4145_v56  ;;  %v10245_v56 = vmax.f32 %v4157_v32, %v4237_v9 }
  0xa1   : > { %505 = vst.msk [vmem:[#allocation2 + $0x1d0] sm:$0xff] %vm171_vm1, %v4320_v13  ;;  %v554_v13 = vld [vmem:[#allocation2 + $0x150] sm:$0xff] }
  0xa2   : > { %10232 = vst [vmem:[#allocation71_spill] sm:$0xff] %v4388_v62  ;;  %v4410_v27 = vmax.f32 %v4358_v49, %v554_v13  ;;  %v4453_v6 = vmax.f32 %v554_v13, %v558_v35  ;;  %v565_v16 = vld [vmem:[#allocation2 + $0x1a8] sm:$0xff] }
  0xa3   : > { %506 = vst.msk [vmem:[#allocation2 + $0x1e8] sm:$0xff] %vm171_vm1, %v4337_v53  ;;  %v4407_v53 = vld [vmem:[#allocation2 + $0x168] sm:$0xff] }
  0xa4   : > { %10233 = vst [vmem:[#allocation72_spill] sm:$0xff] %v4403_v4  ;;  %v4433_v51 = vmax.f32 %v4375_v46, %v4407_v53  ;;  %v566_v45 = vld [vmem:[#allocation2 + $0x1b0] sm:$0xff]  ;;  %v698_v9 = vmax.f32 %v4379_v0, %v4453_v6  ;;  %v4534_v0 = vmax.f32 %v685_v52, %v4341_v50  ;;  %v10258_v50 = vld [vmem:[#allocation4_spill] sm:$0xff] }
  0xa5   : > { %507 = vst.msk [vmem:[#allocation2 + $0x1f0] sm:$0xff] %vm171_vm1, %v4354_v43  ;;  %v4427_v43 = vld [vmem:[%s3903_s19 + $0xf8] sm:$0xff]  ;;  %v10257_v52 = vld [vmem:[#allocation25_spill] sm:$0xff] }
  0xa6   : > { %10235 = vst [vmem:[#allocation73_spill] sm:$0xff] %v4418_v57  ;;  %v10239_v57 = vmax.f32 %v4169_v19, %v4192_v15 }
  0xa7   : > { %10237 = vst [vmem:[#allocation74_spill] sm:$0xff] %v4424_v30  ;;  %v4447_v30 = vmax.f32 %v4207_v34, %v10240_v1  ;;  %v562_v1 = vld [vmem:[#allocation2 + $0x190] sm:$0xff] }
  0xa8   : > { %10238 = vst [vmem:[#allocation75_spill] sm:$0xff] %v4427_v43  ;;  %v4441_v24 = vmax.f32 %v4203_v61, %v10239_v57  ;;  %v4459_v57 = vmax.f32 %v4245_v5, %v4093_v59  ;;  %v4479_v5 = vmax.f32 %v4281_v17, %v4165_v8  ;;  %v4483_v33 = vmax.f32 %v558_v35, %v562_v1 }
  0xa9   : > { %508 = vst.msk [vmem:[#allocation2 + $0x208] sm:$0xff] %vm171_vm1, %v4371_v31  ;;  %v4451_v31 = vld [vmem:[#allocation2 + $0x188] sm:$0xff]  ;;  %v694_v59 = vmax.f32 %v4345_v39, %v4410_v27  ;;  %v4497_v8 = vmax.f32 %v10245_v56, %v4214_v40  ;;  %v10247_v39 = vmax.f32 %v4172_v20, %v4262_v48  ;;  %v4513_v32 = vmax.f32 %v562_v1, %v566_v45 }
  0xaa   : > { %10241 = vst [vmem:[#allocation76_spill] sm:$0xff] %v4447_v30  ;;  %v693_v30 = vmax.f32 %v4328_v12, %v4394_v63  ;;  %v10244_v12 = vmax.f32 %v4154_v37, %v4220_v54  ;;  %v4500_v17 = vmax.f32 %v4451_v31, %v565_v16  ;;  %v4511_v54 = vmax.f32 %v678_v42, %v4258_v29  ;;  %v10259_v42 = vld [vmem:[#allocation38_spill] sm:$0xff] }
  0xab   : > { %509 = vst.msk [vmem:[#allocation2 + $0x210] sm:$0xff] %vm171_vm1, %v4388_v62  ;;  %v4469_v62 = vmax.f32 %v4407_v53, %v4451_v31  ;;  %v4508_v37 = vmax.f32 %v10247_v39, %v4233_v58  ;;  %v4518_v40 = vmax.f32 %v681_v14, %v4307_v7  ;;  %v10252_v29 = vmax.f32 %v3920_v22, %v4077_v41  ;;  %v573_v22 = vld [vmem:[#allocation2 + $0x1e8] sm:$0xff] }
  0xac   : > { %10242 = vst [vmem:[#allocation77_spill] sm:$0xff] %v4463_v55  ;;  %v10260_v14 = vmax.f32 %v10258_v50, %v10259_v42 }
  0xad   : > { %510 = vst.msk [vmem:[#allocation2 + $0x228] sm:$0xff] %vm171_vm1, %v4403_v4  ;;  %v4491_v4 = vmax.f32 %v10244_v12, %v4188_v25  ;;  %v569_v25 = vld [vmem:[#allocation2 + $0x1c8] sm:$0xff]  ;;  %v570_v12 = vld [vmem:[#allocation2 + $0x1d0] sm:$0xff]  ;;  %v701_v48 = vmax.f32 %v4394_v63, %v4469_v62  ;;  %v4531_v58 = vmax.f32 %v10252_v29, %v4017_v2  ;;  %v10255_v63 = vmax.f32 %v3952_v38, %v4080_v47 }
  0xae   : > { %10243 = vst [vmem:[#allocation78_spill] sm:$0xff] %v4479_v5  ;;  %v4523_v56 = vmax.f32 %v565_v16, %v569_v25  ;;  %v4536_v7 = vmax.f32 %v566_v45, %v570_v12  ;;  %v705_v2 = vmax.f32 %v4433_v51, %v4500_v17  ;;  %v4555_v39 = vmax.f32 %v10260_v14, %v10257_v52  ;;  %v10270_v52 = vld [vmem:[#allocation43_spill] sm:$0xff] }
  0xaf   : > { %511 = vst.msk [vmem:[#allocation2 + $0x230] sm:$0xff] %vm171_vm1, %v4427_v43  ;;  %v697_v43 = vmax.f32 %v4362_v26, %v4433_v51  ;;  %v4521_v26 = vmax.f32 %v682_v11, %v4324_v21  ;;  %v702_v11 = vmax.f32 %v4410_v27, %v4483_v33  ;;  %v4541_v21 = vmax.f32 %v686_v23, %v4358_v49  ;;  %v574_v49 = vld [vmem:[#allocation2 + $0x1f0] sm:$0xff] }
  0xb0   : > { %10246 = vst [vmem:[#allocation79_spill] sm:$0xff] %v4497_v8  ;;  %v4547_v20 = vmax.f32 %v10255_v63, %v4019_v3  ;;  %v4558_v27 = vmax.f32 %v689_v10, %v4375_v46  ;;  %v4560_v23 = vmax.f32 %v690_v60, %v554_v13  ;;  %v649_v29 = vmax.f32 %v569_v25, %v573_v22  ;;  %v10264_v3 = vld [vmem:[#allocation26_spill] sm:$0xff]  ;;  %v10265_v63 = vld [vmem:[#allocation9_spill] sm:$0xff]  ;;  %v577_v46 = vld [vmem:[#allocation2 + $0x208] sm:$0xff] }
  0xb1   : > { %10248 = vst [vmem:[#allocation80_spill] sm:$0xff] %v4508_v37  ;;  %v706_v38 = vmax.f32 %v4453_v6, %v4513_v32  ;;  %v10271_v50 = vmax.f32 %v4077_v41, %v10270_v52  ;;  %v650_v10 = vmax.f32 %v570_v12, %v574_v49  ;;  %v709_v60 = vmax.f32 %v4469_v62, %v4523_v56  ;;  %v586_v62 = vld [vmem:[#allocation2 + $0x250] sm:$0xff] }
  0xb2   : > { %10249 = vst [vmem:[#allocation81_spill] sm:$0xff] %v4511_v54  ;;  %v578_v13 = vld [vmem:[#allocation2 + $0x210] sm:$0xff]  ;;  %v4579_v6 = vmax.f32 %v693_v30, %v4407_v53  ;;  %v710_v41 = vmax.f32 %v4483_v33, %v4536_v7  ;;  %v10279_v53 = vld [vmem:[#allocation32_spill] sm:$0xff] }
  0xb3   : > { %10250 = vst [vmem:[#allocation82_spill] sm:$0xff] %v4518_v40 }
  0xb4   : > { %10251 = vst [vmem:[#allocation83_spill] sm:$0xff] %v4521_v26  ;;  %v10269_v26 = vld [vmem:[#allocation27_spill] sm:$0xff] }
  0xb5   : > { %10253 = vst [vmem:[#allocation84_spill] sm:$0xff] %v4534_v0  ;;  %v4574_v14 = vmax.f32 %v10271_v50, %v10269_v26  ;;  %v10275_v26 = vld [vmem:[#allocation28_spill] sm:$0xff]  ;;  %v713_v0 = vmax.f32 %v4500_v17, %v649_v29 }
  0xb6   : > { %10254 = vst [vmem:[#allocation85_spill] sm:$0xff] %v4541_v21  ;;  %v10276_v50 = vld [vmem:[#allocation44_spill] sm:$0xff]  ;;  %v582_v5 = vld [vmem:[#allocation2 + $0x230] sm:$0xff] }
  0xb7   : > { %10256 = vst [vmem:[#allocation86_spill] sm:$0xff] %v4547_v20  ;;  %v10266_v20 = vld [vmem:[#allocation39_spill] sm:$0xff]  ;;  %v10277_v54 = vmax.f32 %v4080_v47, %v10276_v50  ;;  %v658_v33 = vmax.f32 %v578_v13, %v582_v5  ;;  %v4601_v47 = vmax.f32 %v698_v9, %v562_v1  ;;  %v4620_v9 = vmax.f32 %v702_v11, %v566_v45  ;;  %v10305_v11 = vld [vmem:[#allocation48_spill] sm:$0xff] }
  0xb8   : > { %10261 = vst [vmem:[#allocation25_spill] sm:$0xff] %v4555_v39  ;;  %v10267_v51 = vmax.f32 %v10265_v63, %v10266_v20  ;;  %v581_v63 = vld [vmem:[#allocation2 + $0x228] sm:$0xff]  ;;  %v4636_v45 = vmax.f32 %v706_v38, %v570_v12  ;;  %v10316_v12 = vld [vmem:[#allocation58_spill] sm:$0xff]  ;;  %v590_v38 = vld [vmem:[#allocation2 + $0x270] sm:$0xff] }
  0xb9   : > { %10262 = vst [vmem:[#allocation4_spill] sm:$0xff] %v4558_v27  ;;  %v4589_v8 = vmax.f32 %v10277_v54, %v10275_v26  ;;  %v657_v55 = vmax.f32 %v577_v46, %v581_v63  ;;  %v662_v27 = vmax.f32 %v582_v5, %v586_v62  ;;  %v714_v54 = vmax.f32 %v4513_v32, %v650_v10  ;;  %v10285_v26 = vld [vmem:[#allocation33_spill] sm:$0xff] }
  0xba   : > { %10263 = vst [vmem:[#allocation38_spill] sm:$0xff] %v4560_v23  ;;  %v4568_v21 = vmax.f32 %v10267_v51, %v10264_v3  ;;  %v4581_v23 = vmax.f32 %v694_v59, %v558_v35  ;;  %v585_v3 = vld [vmem:[#allocation2 + $0x248] sm:$0xff]  ;;  %v653_v51 = vmax.f32 %v573_v22, %v577_v46  ;;  %v10280_v35 = vld [vmem:[#allocation45_spill] sm:$0xff] }
  0xbb   : > { %10272 = vst [vmem:[#allocation9_spill] sm:$0xff] %v4574_v14  ;;  %v661_v30 = vmax.f32 %v581_v63, %v585_v3  ;;  %v10281_v59 = vmax.f32 %v10259_v42, %v10280_v35  ;;  %v10289_v42 = vld [vmem:[#allocation34_spill] sm:$0xff]  ;;  %v10295_v32 = vld [vmem:[#allocation41_spill] sm:$0xff] }
  0xbc   : > { %10268 = vst [vmem:[#allocation26_spill] sm:$0xff] %v4568_v21  ;;  %v654_v21 = vmax.f32 %v574_v49, %v578_v13  ;;  %v717_v17 = vmax.f32 %v4523_v56, %v653_v51  ;;  %v722_v56 = vmax.f32 %v650_v10, %v658_v33  ;;  %v591_v10 = vld [vmem:[#allocation2 + $0x278] sm:$0xff] }
  0xbd   : > { %10273 = vst [vmem:[#allocation39_spill] sm:$0xff] %v4579_v6  ;;  %v4598_v6 = vmax.f32 %v697_v43, %v4451_v31  ;;  %v4616_v43 = vmax.f32 %v701_v48, %v565_v16  ;;  %v4634_v48 = vmax.f32 %v705_v2, %v569_v25  ;;  %v4652_v25 = vmax.f32 %v710_v41, %v574_v49  ;;  %v10323_v49 = vld [vmem:[#allocation56_spill] sm:$0xff] }
  0xbe   : > { %10274 = vst [vmem:[#allocation27_spill] sm:$0xff] %v4581_v23  ;;  %v4595_v23 = vmax.f32 %v10281_v59, %v10279_v53  ;;  %v10290_v53 = vld [vmem:[#allocation50_spill] sm:$0xff]  ;;  %v718_v1 = vmax.f32 %v4536_v7, %v654_v21  ;;  %v726_v7 = vmax.f32 %v654_v21, %v662_v27 }
  0xbf   : > { %10278 = vst [vmem:[#allocation43_spill] sm:$0xff] %v4589_v8  ;;  %v10286_v8 = vld [vmem:[#allocation46_spill] sm:$0xff]  ;;  %v10291_v59 = vmax.f32 %v10270_v52, %v10290_v53  ;;  %v10300_v52 = vld [vmem:[#allocation52_spill] sm:$0xff] }
  0xc0   : > { %10282 = vst [vmem:[#allocation28_spill] sm:$0xff] %v4595_v23  ;;  %v10287_v40 = vmax.f32 %v10266_v20, %v10286_v8  ;;  %v10315_v21 = vld [vmem:[#allocation54_spill] sm:$0xff]  ;;  %v10319_v33 = vmax.f32 %v10300_v52, %v4184_v18  ;;  %v10331_v18 = vmax.f32 %v10316_v12, %v4207_v34  ;;  %v4709_v34 = vmax.f32 %v726_v7, %v590_v38 }
  0xc1   : > { %10283 = vst [vmem:[#allocation44_spill] sm:$0xff] %v4598_v6  ;;  %v4614_v31 = vmax.f32 %v10291_v59, %v10289_v42  ;;  %v10299_v6 = vld [vmem:[#allocation42_spill] sm:$0xff]  ;;  %v10301_v42 = vmax.f32 %v10280_v35, %v10300_v52  ;;  %v10306_v59 = vld [vmem:[#allocation55_spill] sm:$0xff]  ;;  %v4698_v52 = vmax.f32 %v722_v56, %v586_v62  ;;  %v10351_v56 = vld [vmem:[#allocation77_spill] sm:$0xff] }
  0xc2   : > { %10284 = vst [vmem:[#allocation32_spill] sm:$0xff] %v4601_v47  ;;  %v4608_v37 = vmax.f32 %v10287_v40, %v10285_v26  ;;  %v10296_v47 = vld [vmem:[#allocation51_spill] sm:$0xff]  ;;  %v721_v26 = vmax.f32 %v649_v29, %v657_v55  ;;  %v10309_v29 = vld [vmem:[#allocation49_spill] sm:$0xff] }
  0xc3   : > { %10292 = vst [vmem:[#allocation33_spill] sm:$0xff] %v4614_v31  ;;  %v10297_v20 = vmax.f32 %v10276_v50, %v10296_v47  ;;  %v4632_v16 = vmax.f32 %v10301_v42, %v10299_v6  ;;  %v10307_v50 = vmax.f32 %v10286_v8, %v10306_v59  ;;  %v588_v55 = vld [vmem:[#allocation2 + $0x260] sm:$0xff]  ;;  %v4650_v6 = vmax.f32 %v709_v60, %v573_v22  ;;  %v589_v8 = vld [vmem:[#allocation2 + $0x268] sm:$0xff] }
  0xc4   : > { %10288 = vst [vmem:[#allocation45_spill] sm:$0xff] %v4608_v37  ;;  %v725_v37 = vmax.f32 %v653_v51, %v661_v30  ;;  %v10310_v51 = vld [vmem:[#allocation57_spill] sm:$0xff]  ;;  %v10317_v2 = vmax.f32 %v10296_v47, %v10316_v12  ;;  %v4668_v22 = vmax.f32 %v714_v54, %v578_v13  ;;  %v10324_v60 = vld [vmem:[#allocation59_spill] sm:$0xff]  ;;  %v4696_v54 = vmax.f32 %v721_v26, %v585_v3  ;;  %v10345_v12 = vld [vmem:[#allocation80_spill] sm:$0xff] }
  0xc5   : > { %10293 = vst [vmem:[#allocation46_spill] sm:$0xff] %v4616_v43  ;;  %v4626_v40 = vmax.f32 %v10297_v20, %v10295_v32  ;;  %v4642_v32 = vmax.f32 %v10307_v50, %v10305_v11  ;;  %v10311_v30 = vmax.f32 %v10290_v53, %v10310_v51  ;;  %v4664_v53 = vmax.f32 %v10319_v33, %v4149_v44  ;;  %v10353_v3 = vld [vmem:[#allocation79_spill] sm:$0xff] }
  0xc6   : > { %10294 = vst [vmem:[#allocation34_spill] sm:$0xff] %v4620_v9  ;;  %v4658_v27 = vmax.f32 %v10317_v2, %v10315_v21  ;;  %v4666_v20 = vmax.f32 %v713_v0, %v577_v46  ;;  %v10325_v41 = vmax.f32 %v10306_v59, %v10324_v60  ;;  %v10327_v42 = vmax.f32 %v10310_v51, %v4203_v61  ;;  %v10333_v46 = vld [vmem:[#allocation73_spill] sm:$0xff]  ;;  %v10359_v59 = vld [vmem:[#allocation27_spill] sm:$0xff] }
  0xc7   : > { %10298 = vst [vmem:[#allocation50_spill] sm:$0xff] %v4626_v40  ;;  %v4648_v35 = vmax.f32 %v10311_v30, %v10309_v29  ;;  %v4682_v50 = vmax.f32 %v717_v17, %v581_v63  ;;  %v4684_v44 = vmax.f32 %v718_v1, %v582_v5  ;;  %v4690_v0 = vmax.f32 %v10331_v18, %v4190_v36  ;;  %v10338_v61 = vld [vmem:[#allocation61_spill] sm:$0xff]  ;;  %v10339_v5 = vld [vmem:[#allocation74_spill] sm:$0xff]  ;;  %v10343_v36 = vld [vmem:[#allocation76_spill] sm:$0xff] }
  0xc8   : > { %10302 = vst [vmem:[#allocation41_spill] sm:$0xff] %v4632_v16  ;;  %v4674_v47 = vmax.f32 %v10325_v41, %v10323_v49  ;;  %v4680_v11 = vmax.f32 %v10327_v42, %v4169_v19  ;;  %v4694_v13 = vmax.f32 %v10333_v46, %v4192_v15  ;;  %v4701_v19 = vmax.f32 %v4441_v24, %v588_v55  ;;  %v10348_v49 = vld [vmem:[#allocation4_spill] sm:$0xff]  ;;  %v10349_v41 = vld [vmem:[#allocation39_spill] sm:$0xff]  ;;  %v10352_v24 = vld [vmem:[#allocation78_spill] sm:$0xff] }
  0xc9   : > { %10303 = vst [vmem:[#allocation51_spill] sm:$0xff] %v4634_v48  ;;  %v4705_v63 = vmax.f32 %v10339_v5, %v10338_v61  ;;  %v4707_v17 = vmax.f32 %v725_v37, %v589_v8  ;;  %v4712_v1 = vmax.f32 %v10343_v36, %v591_v10  ;;  %v10346_v8 = vld [vmem:[#allocation82_spill] sm:$0xff]  ;;  %v10347_v10 = vld [vmem:[#allocation84_spill] sm:$0xff]  ;;  %v840_v37 = vlaneseq  ;;  %v10354_v61 = vld [vmem:[#allocation81_spill] sm:$0xff] }
  0xca   : > { %10304 = vst [vmem:[#allocation42_spill] sm:$0xff] %v4636_v45  ;;  %v10350_v18 = vld [vmem:[#allocation44_spill] sm:$0xff]  ;;  %v824_v26 = vrot.slane %v10351_v56, 7  ;;  %v825_v62 = vrot.slane %v10352_v24, 7  ;;  %v826_v15 = vrot.slane %v10353_v3, 7  ;;  %v827_v46 = vrot.slane %v10354_v61, 7 }
  0xcb   : > { %10308 = vst [vmem:[#allocation52_spill] sm:$0xff] %v4642_v32  ;;  %v10355_v5 = vld [vmem:[#allocation83_spill] sm:$0xff]  ;;  %v10356_v36 = vld [vmem:[#allocation85_spill] sm:$0xff]  ;;  %v10357_v29 = vld [vmem:[#allocation38_spill] sm:$0xff]  ;;  %v4748_v55 = vshrl.u32 %v840_v37, 7  ;;  %v831_v38 = vrot.slane %v10359_v59, 7 }
  0xcc   : > { %10312 = vst [vmem:[#allocation48_spill] sm:$0xff] %v4648_v35  ;;  %v828_v42 = vrot.slane %v10355_v5, 7  ;;  %v829_v60 = vrot.slane %v10356_v36, 7  ;;  %v830_v33 = vrot.slane %v10357_v29, 7  ;;  %v10360_v7 = vld [vmem:[#allocation32_spill] sm:$0xff]  ;;  %v833_v21 = vrot.slane %v4620_v9, 7 }
  0xcd   : > { %10313 = vst [vmem:[#allocation55_spill] sm:$0xff] %v4650_v6  ;;  %v832_v2 = vrot.slane %v10360_v7, 7  ;;  %v834_v30 = vrot.slane %v4636_v45, 7  ;;  %v835_v51 = vrot.slane %v4652_v25, 7  ;;  %vm842_vm2 = vcmp.lt.s32.totalorder %v4748_v55, 1 }
  0xce   : > { %10314 = vst [vmem:[#allocation49_spill] sm:$0xff] %v4652_v25  ;;  %v10361_v25 = vrot.slane %v4459_v57, 7  ;;  %v10367_v40 = vrot.slane %v10345_v12, 7  ;;  %vm923_vm3 = vcmp.lt.s32.totalorder %v4748_v55, 7  ;;  %vm1004_vm4 = vcmp.lt.s32.totalorder %v4748_v55, 2 }
  0xcf   : > { %10318 = vst [vmem:[#allocation57_spill] sm:$0xff] %v4658_v27  ;;  %v10365_v27 = vrot.slane %v4491_v4, 7  ;;  %vm1085_vm5 = vcmp.lt.s32.totalorder %v4748_v55, 6 }
  0xd0   : > { %10320 = vst [vmem:[#allocation54_spill] sm:$0xff] %v4664_v53  ;;  %v4796_v45 = vsel %vm842_vm2, %v10367_v40, %v827_v46  ;;  %v10375_v40 = vrot.slane %v10349_v41, 7 }
  0xd1   : > { %10321 = vst [vmem:[#allocation58_spill] sm:$0xff] %v4666_v20  ;;  %v4790_v32 = vsel %vm842_vm2, %v10365_v27, %v826_v15  ;;  %v10373_v27 = vrot.slane %v10348_v49, 7 }
  0xd2   : > { %10322 = vst [vmem:[#allocation87_spill] sm:$0xff] %v4668_v22  ;;  %v4820_v46 = vsel %vm842_vm2, %v10375_v40, %v831_v38  ;;  %v10383_v38 = vrot.slane %v4650_v6, 7 }
  0xd3   : > { %10326 = vst [vmem:[#allocation56_spill] sm:$0xff] %v4674_v47  ;;  %v839_v47 = vrot.slane %v4709_v34, 7  ;;  %v4814_v15 = vsel %vm842_vm2, %v10373_v27, %v830_v33  ;;  %v10381_v33 = vrot.slane %v4634_v48, 7 }
  0xd4   : > { %10328 = vst [vmem:[#allocation59_spill] sm:$0xff] %v4680_v11  ;;  %v4844_v40 = vsel %vm842_vm2, %v10383_v38, %v835_v51  ;;  %v10391_v51 = vrot.slane %v4707_v17, 7 }
  0xd5   : > { %10329 = vst [vmem:[#allocation88_spill] sm:$0xff] %v4682_v50  ;;  %v4838_v27 = vsel %vm842_vm2, %v10381_v33, %v834_v30  ;;  %v10389_v30 = vrot.slane %v4696_v54, 7 }
  0xd6   : > { %10330 = vst [vmem:[#allocation89_spill] sm:$0xff] %v4684_v44  ;;  %v4868_v38 = vsel %vm842_vm2, %v10391_v51, %v839_v47  ;;  %v10402_v47 = vld [vmem:[#allocation15_spill] sm:$0xff] }
  0xd7   : > { %10332 = vst [vmem:[#allocation90_spill] sm:$0xff] %v4690_v0  ;;  %v838_v0 = vrot.slane %v4698_v52, 7  ;;  %v10403_v51 = vrot.slane %v10402_v47, 7 }
  0xd8   : > { %10334 = vst [vmem:[#allocation73_spill] sm:$0xff] %v4694_v13 }
  0xd9   : > { %10335 = vst [vmem:[#allocation91_spill] sm:$0xff] %v4696_v54  ;;  %v4862_v33 = vsel %vm842_vm2, %v10389_v30, %v838_v0  ;;  %v10401_v30 = vrot.slane %v4491_v4, 7 }
  0xda   : > { %10336 = vst [vmem:[#allocation92_spill] sm:$0xff] %v4698_v52  ;;  %v10363_v52 = vrot.slane %v4475_v28, 7 }
  0xdb   : > { %10337 = vst [vmem:[#allocation93_spill] sm:$0xff] %v4701_v19 }
  0xdc   : > { %10340 = vst [vmem:[#allocation61_spill] sm:$0xff] %v4705_v63  ;;  %v837_v63 = vrot.slane %v4684_v44, 7  ;;  %v10398_v44 = vld [vmem:[#allocation14_spill] sm:$0xff] }
  0xdd   : > { %10341 = vst [vmem:[#allocation74_spill] sm:$0xff] %v4707_v17 }
  0xde   : > { %10342 = vst [vmem:[#allocation94_spill] sm:$0xff] %v4709_v34  ;;  %v4784_v34 = vsel %vm842_vm2, %v10363_v52, %v825_v62  ;;  %v10371_v52 = vrot.slane %v10347_v10, 7 }
  0xdf   : > { %10344 = vst [vmem:[#allocation76_spill] sm:$0xff] %v4712_v1  ;;  %v836_v1 = vrot.slane %v4668_v22, 7  ;;  %v4778_v22 = vsel %vm842_vm2, %v10361_v25, %v824_v26  ;;  %v10369_v25 = vrot.slane %v10346_v8, 7 }
  0xe0   : > { %10358 = vst [vmem:[#allocation80_spill] sm:$0xff] %v4748_v55  ;;  %v4808_v62 = vsel %vm842_vm2, %v10371_v52, %v829_v60  ;;  %v10379_v60 = vrot.slane %v4616_v43, 7 }
  0xe1   : > { %10362 = vst [vmem:[#allocation82_spill] sm:$0xff] %v4778_v22  ;;  %v4802_v26 = vsel %vm842_vm2, %v10369_v25, %v828_v42  ;;  %v10377_v42 = vrot.slane %v10350_v18, 7 }
  0xe2   : > { %10364 = vst [vmem:[#allocation95_spill] sm:$0xff] %v4784_v34  ;;  %v4832_v52 = vsel %vm842_vm2, %v10379_v60, %v833_v21  ;;  %v10387_v21 = vrot.slane %v4682_v50, 7 }
  0xe3   : > { %10366 = vst [vmem:[#allocation96_spill] sm:$0xff] %v4790_v32  ;;  %v4826_v25 = vsel %vm842_vm2, %v10377_v42, %v832_v2  ;;  %v10385_v2 = vrot.slane %v4666_v20, 7 }
  0xe4   : > { %10368 = vst [vmem:[#allocation97_spill] sm:$0xff] %v4796_v45  ;;  %v4856_v60 = vsel %vm842_vm2, %v10387_v21, %v837_v63  ;;  %v10397_v21 = vrot.slane %v4475_v28, 7 }
  0xe5   : > { %10370 = vst [vmem:[#allocation98_spill] sm:$0xff] %v4802_v26  ;;  %v4850_v42 = vsel %vm842_vm2, %v10385_v2, %v836_v1  ;;  %v10393_v1 = vrot.slane %v4459_v57, 7  ;;  %v10394_v2 = vld [vmem:[#allocation13_spill] sm:$0xff]  ;;  %v897_v26 = vrot.slane %v10357_v29, 1 }
  0xe6   : > { %10372 = vst [vmem:[#allocation99_spill] sm:$0xff] %v4808_v62  ;;  %v10395_v37 = vrot.slane %v10394_v2, 7  ;;  %v10425_v62 = vrot.slane %v4616_v43, 7 }
  0xe7   : > { %10374 = vst [vmem:[#allocation100_spill] sm:$0xff] %v4814_v15  ;;  %v10422_v15 = vrot.slane %v10350_v18, 7 }
  0xe8   : > { %10376 = vst [vmem:[#allocation101_spill] sm:$0xff] %v4820_v46  ;;  %v4876_v63 = vsel %vm842_vm2, %v10395_v37, %v10393_v1  ;;  %v10406_v37 = vld [vmem:[#allocation18_spill] sm:$0xff]  ;;  %v10419_v46 = vrot.slane %v10349_v41, 7 }
  0xe9   : > { %10378 = vst [vmem:[#allocation102_spill] sm:$0xff] %v4826_v25  ;;  %v10407_v1 = vrot.slane %v10406_v37, 7  ;;  %v10416_v25 = vrot.slane %v10348_v49, 7 }
  0xea   : > { %10380 = vst [vmem:[#allocation103_spill] sm:$0xff] %v4832_v52  ;;  %v10413_v52 = vrot.slane %v10347_v10, 7 }
  0xeb   : > { %10382 = vst [vmem:[#allocation104_spill] sm:$0xff] %v4838_v27 }
  0xec   : > { %10384 = vst [vmem:[#allocation105_spill] sm:$0xff] %v4844_v40  ;;  %v10409_v40 = vrot.slane %v10346_v8, 7 }
  0xed   : > { %10386 = vst [vmem:[#allocation106_spill] sm:$0xff] %v4850_v42 }
  0xee   : > { %10388 = vst [vmem:[#allocation107_spill] sm:$0xff] %v4856_v60  ;;  %v10399_v60 = vrot.slane %v10398_v44, 7 }
  0xef   : > { %10390 = vst [vmem:[#allocation108_spill] sm:$0xff] %v4862_v33  ;;  %v10405_v33 = vrot.slane %v10345_v12, 7 }
  0xf0   : > { %10392 = vst [vmem:[#allocation109_spill] sm:$0xff] %v4868_v38  ;;  %v4884_v0 = vsel %vm842_vm2, %v10399_v60, %v10397_v21  ;;  %v4892_v38 = vsel %vm842_vm2, %v10403_v51, %v10401_v30  ;;  %v10410_v60 = vld [vmem:[#allocation19_spill] sm:$0xff]  ;;  %v10414_v30 = vrot.slane %v4531_v58, 7 }
  0xf1   : > { %10396 = vst [vmem:[#allocation13_spill] sm:$0xff] %v4876_v63  ;;  %v4900_v42 = vsel %vm842_vm2, %v10407_v1, %v10405_v33  ;;  %v10411_v21 = vrot.slane %v10410_v60, 7  ;;  %v10417_v33 = vrot.slane %v4555_v39, 7  ;;  %v10451_v63 = vld [vmem:[#allocation94_spill] sm:$0xff]  ;;  %v10467_v39 = vld [vmem:[#allocation76_spill] sm:$0xff] }
  0xf2   : > { %10400 = vst [vmem:[#allocation14_spill] sm:$0xff] %v4884_v0  ;;  %v4916_v51 = vsel %vm842_vm2, %v10414_v30, %v10413_v52  ;;  %v10423_v52 = vrot.slane %v4595_v23, 7  ;;  %v10450_v0 = vld [vmem:[#allocation92_spill] sm:$0xff]  ;;  %v10465_v23 = vld [vmem:[#allocation90_spill] sm:$0xff] }
  0xf3   : > { %10404 = vst [vmem:[#allocation15_spill] sm:$0xff] %v4892_v38  ;;  %v4908_v27 = vsel %vm842_vm2, %v10411_v21, %v10409_v40  ;;  %v4924_v1 = vsel %vm842_vm2, %v10417_v33, %v10416_v25  ;;  %v10420_v40 = vrot.slane %v4574_v14, 7  ;;  %v10426_v25 = vrot.slane %v4614_v31, 7  ;;  %v10449_v38 = vld [vmem:[#allocation89_spill] sm:$0xff]  ;;  %v10464_v31 = vld [vmem:[#allocation56_spill] sm:$0xff] }
  0xf4   : > { %10408 = vst [vmem:[#allocation18_spill] sm:$0xff] %v4900_v42  ;;  %v4940_v30 = vsel %vm842_vm2, %v10423_v52, %v10422_v15  ;;  %v10432_v15 = vrot.slane %v4648_v35, 7  ;;  %v10448_v42 = vld [vmem:[#allocation87_spill] sm:$0xff]  ;;  %v904_v34 = vrot.slane %v10449_v38, 1  ;;  %v905_v22 = vrot.slane %v10450_v0, 1  ;;  %v10462_v35 = vld [vmem:[#allocation52_spill] sm:$0xff] }
  0xf5   : > { %10412 = vst [vmem:[#allocation19_spill] sm:$0xff] %v4908_v27  ;;  %v4932_v21 = vsel %vm842_vm2, %v10420_v40, %v10419_v46  ;;  %v4948_v33 = vsel %vm842_vm2, %v10426_v25, %v10425_v62  ;;  %v10429_v46 = vrot.slane %v4632_v16, 7  ;;  %v10435_v62 = vrot.slane %v4664_v53, 7  ;;  %v10447_v27 = vld [vmem:[#allocation49_spill] sm:$0xff] }
  0xf6   : > { %10415 = vst [vmem:[#allocation110_spill] sm:$0xff] %v4916_v51  ;;  %v893_v51 = vrot.slane %v10353_v3, 1  ;;  %v902_v45 = vrot.slane %v10447_v27, 1  ;;  %v903_v32 = vrot.slane %v10448_v42, 1  ;;  %v10454_v3 = vld [vmem:[#allocation30_spill] sm:$0xff]  ;;  %v10460_v53 = vld [vmem:[#allocation45_spill] sm:$0xff] }
  0xf7   : > { %10418 = vst [vmem:[#allocation111_spill] sm:$0xff] %v4924_v1  ;;  %v10428_v1 = vrot.slane %v4634_v48, 7  ;;  %v915_v0 = vrot.slane %v10460_v53, 1  ;;  %v10463_v16 = vld [vmem:[#allocation57_spill] sm:$0xff] }
  0xf8   : > { %10421 = vst [vmem:[#allocation112_spill] sm:$0xff] %v4932_v21  ;;  %v10431_v21 = vrot.slane %v4650_v6, 7  ;;  %v10466_v14 = vld [vmem:[#allocation61_spill] sm:$0xff] }
  0xf9   : > { %10424 = vst [vmem:[#allocation113_spill] sm:$0xff] %v4940_v30  ;;  %v4956_v40 = vsel %vm842_vm2, %v10429_v46, %v10428_v1  ;;  %v10434_v30 = vrot.slane %v4666_v20, 7  ;;  %v10438_v1 = vrot.slane %v4680_v11, 7  ;;  %v10459_v11 = vld [vmem:[#allocation43_spill] sm:$0xff] }
  0xfa   : > { %10427 = vst [vmem:[#allocation114_spill] sm:$0xff] %v4948_v33  ;;  %v4964_v52 = vsel %vm842_vm2, %v10432_v15, %v10431_v21  ;;  %v10437_v33 = vrot.slane %v4682_v50, 7  ;;  %v10441_v21 = vrot.slane %v4694_v13, 7  ;;  %v10458_v13 = vld [vmem:[#allocation26_spill] sm:$0xff]  ;;  %v914_v38 = vrot.slane %v10459_v11, 1 }
  0xfb   : > { %10430 = vst [vmem:[#allocation115_spill] sm:$0xff] %v4956_v40  ;;  %v4972_v25 = vsel %vm842_vm2, %v10435_v62, %v10434_v30  ;;  %v10440_v40 = vrot.slane %v4696_v54, 7  ;;  %v10444_v30 = vrot.slane %v4701_v19, 7  ;;  %v10457_v19 = vld [vmem:[#allocation86_spill] sm:$0xff]  ;;  %v913_v42 = vrot.slane %v10458_v13, 1 }
  0xfc   : > { %10433 = vst [vmem:[#allocation116_spill] sm:$0xff] %v4964_v52  ;;  %v4980_v46 = vsel %vm842_vm2, %v10438_v1, %v10437_v33  ;;  %v10443_v52 = vrot.slane %v4707_v17, 7  ;;  %v891_v1 = vrot.slane %v10351_v56, 1  ;;  %v900_v33 = vrot.slane %v4620_v9, 1  ;;  %v10456_v56 = vld [vmem:[#allocation36_spill] sm:$0xff] }
  0xfd   : > { %10436 = vst [vmem:[#allocation117_spill] sm:$0xff] %v4972_v25  ;;  %v4988_v15 = vsel %vm842_vm2, %v10441_v21, %v10440_v40  ;;  %v894_v40 = vrot.slane %v10354_v61, 1  ;;  %v895_v21 = vrot.slane %v10355_v5, 1  ;;  %v10446_v25 = vld [vmem:[#allocation42_spill] sm:$0xff]  ;;  %v10452_v5 = vld [vmem:[#allocation23_spill] sm:$0xff]  ;;  %v10453_v61 = vld [vmem:[#allocation29_spill] sm:$0xff] }
  0xfe   : > { %10439 = vst [vmem:[#allocation118_spill] sm:$0xff] %v4980_v46  ;;  %v4996_v62 = vsel %vm842_vm2, %v10444_v30, %v10443_v52  ;;  %v892_v46 = vrot.slane %v10352_v24, 1  ;;  %v898_v52 = vrot.slane %v10359_v59, 1  ;;  %v899_v30 = vrot.slane %v10360_v7, 1  ;;  %v10455_v24 = vld [vmem:[#allocation35_spill] sm:$0xff] }
  0xff   : > { %10442 = vst [vmem:[#allocation119_spill] sm:$0xff] %v4988_v15  ;;  %v896_v15 = vrot.slane %v10356_v36, 1  ;;  %v906_v36 = vrot.slane %v10451_v63, 1  ;;  %v907_v29 = vrot.slane %v10452_v5, 1  ;;  %v908_v59 = vrot.slane %v10453_v61, 1  ;;  %v10461_v63 = vld [vmem:[#allocation50_spill] sm:$0xff] }
 0x100   : > { %10445 = vst [vmem:[#allocation120_spill] sm:$0xff] %v4996_v62  ;;  %v901_v62 = vrot.slane %v10446_v25, 1  ;;  %v909_v7 = vrot.slane %v10454_v3, 1  ;;  %v910_v9 = vrot.slane %v10455_v24, 1  ;;  %v911_v25 = vrot.slane %v10456_v56, 1 }
 0x101   : > { %v912_v27 = vrot.slane %v10457_v19, 1  ;;  %v916_v5 = vrot.slane %v10461_v63, 1  ;;  %v917_v61 = vrot.slane %v10462_v35, 1  ;;  %v918_v3 = vrot.slane %v10463_v16, 1  ;;  %v10533_v35 = vld [vmem:[#allocation27_spill] sm:$0xff] }
 0x102   : > { %v919_v24 = vrot.slane %v10464_v31, 1  ;;  %v920_v56 = vrot.slane %v10465_v23, 1  ;;  %v921_v19 = vrot.slane %v10466_v14, 1  ;;  %v922_v13 = vrot.slane %v10467_v39, 1  ;;  %v10532_v14 = vld [vmem:[#allocation38_spill] sm:$0xff] }
 0x103   : > { %v5036_v53 = vsel %vm923_vm3, %v891_v1, %v907_v29  ;;  %v5040_v63 = vsel %vm923_vm3, %v892_v46, %v908_v59  ;;  %v5044_v16 = vsel %vm923_vm3, %v893_v51, %v909_v7  ;;  %v5048_v23 = vsel %vm923_vm3, %v894_v40, %v910_v9 }
 0x104   : > { %10468 = vst [vmem:[#allocation121_spill] sm:$0xff] %v5036_v53  ;;  %v5052_v39 = vsel %vm923_vm3, %v895_v21, %v911_v25  ;;  %v5056_v29 = vsel %vm923_vm3, %v896_v15, %v912_v27  ;;  %v5060_v59 = vsel %vm923_vm3, %v897_v26, %v913_v42  ;;  %v5064_v7 = vsel %vm923_vm3, %v898_v52, %v914_v38  ;;  %v10531_v53 = vld [vmem:[#allocation85_spill] sm:$0xff] }
 0x105   : > { %10469 = vst [vmem:[#allocation122_spill] sm:$0xff] %v5040_v63  ;;  %v5068_v9 = vsel %vm923_vm3, %v899_v30, %v915_v0  ;;  %v5072_v25 = vsel %vm923_vm3, %v900_v33, %v916_v5  ;;  %v5076_v27 = vsel %vm923_vm3, %v901_v62, %v917_v61  ;;  %v5080_v42 = vsel %vm923_vm3, %v902_v45, %v918_v3  ;;  %v10530_v63 = vld [vmem:[#allocation83_spill] sm:$0xff] }
 0x106   : > { %10470 = vst [vmem:[#allocation123_spill] sm:$0xff] %v5044_v16  ;;  %v5084_v38 = vsel %vm923_vm3, %v903_v32, %v919_v24  ;;  %v5088_v0 = vsel %vm923_vm3, %v904_v34, %v920_v56  ;;  %v5092_v5 = vsel %vm923_vm3, %v905_v22, %v921_v19  ;;  %v5096_v61 = vsel %vm923_vm3, %v906_v36, %v922_v13  ;;  %v10529_v16 = vld [vmem:[#allocation81_spill] sm:$0xff] }
 0x107   : > { %10471 = vst [vmem:[#allocation124_spill] sm:$0xff] %v5048_v23  ;;  %v10484_v11 = vrot.slane %v4459_v57, 1  ;;  %v10486_v24 = vrot.slane %v4475_v28, 1  ;;  %v10490_v13 = vrot.slane %v10345_v12, 1  ;;  %v10528_v23 = vld [vmem:[#allocation79_spill] sm:$0xff]  ;;  %v994_v31 = vrot.slane %v10532_v14, 6 }
 0x108   : > { %10472 = vst [vmem:[#allocation125_spill] sm:$0xff] %v5052_v39  ;;  %v10527_v39 = vld [vmem:[#allocation78_spill] sm:$0xff] }
 0x109   : > { %10473 = vst [vmem:[#allocation126_spill] sm:$0xff] %v5056_v29  ;;  %v5102_v3 = vsel %vm923_vm3, %v10484_v11, %v891_v1  ;;  %v5108_v56 = vsel %vm923_vm3, %v10486_v24, %v892_v46  ;;  %v10492_v11 = vrot.slane %v10346_v8, 1  ;;  %v10494_v46 = vrot.slane %v10347_v10, 1  ;;  %v10526_v29 = vld [vmem:[#allocation77_spill] sm:$0xff] }
 0x10a   : > { %10474 = vst [vmem:[#allocation127_spill] sm:$0xff] %v5060_v59  ;;  %v986_v59 = vrot.slane %v4696_v54, 6 }
 0x10b   : > { %10475 = vst [vmem:[#allocation128_spill] sm:$0xff] %v5064_v7  ;;  %v5126_v1 = vsel %vm923_vm3, %v10492_v11, %v895_v21  ;;  %v5132_v24 = vsel %vm923_vm3, %v10494_v46, %v896_v15  ;;  %v10500_v21 = vrot.slane %v10350_v18, 1  ;;  %v10502_v15 = vrot.slane %v4616_v43, 1 }
 0x10c   : > { %10476 = vst [vmem:[#allocation129_spill] sm:$0xff] %v5068_v9  ;;  %v982_v9 = vrot.slane %v4634_v48, 6  ;;  %v984_v7 = vrot.slane %v4666_v20, 6 }
 0x10d   : > { %10477 = vst [vmem:[#allocation130_spill] sm:$0xff] %v5072_v25  ;;  %v5150_v11 = vsel %vm923_vm3, %v10500_v21, %v899_v30  ;;  %v5156_v46 = vsel %vm923_vm3, %v10502_v15, %v900_v33  ;;  %v10508_v30 = vrot.slane %v4666_v20, 1  ;;  %v10510_v33 = vrot.slane %v4682_v50, 1  ;;  %v10524_v25 = vld [vmem:[#allocation73_spill] sm:$0xff]  ;;  %v10535_v20 = vld [vmem:[#allocation34_spill] sm:$0xff] }
 0x10e   : > { %10478 = vst [vmem:[#allocation131_spill] sm:$0xff] %v5076_v27  ;;  %v10522_v27 = vld [vmem:[#allocation54_spill] sm:$0xff] }
 0x10f   : > { %10479 = vst [vmem:[#allocation132_spill] sm:$0xff] %v5080_v42  ;;  %v5174_v21 = vsel %vm923_vm3, %v10508_v30, %v903_v32  ;;  %v5180_v15 = vsel %vm923_vm3, %v10510_v33, %v904_v34  ;;  %v10519_v42 = vld [vmem:[#allocation33_spill] sm:$0xff]  ;;  %v977_v32 = vrot.slane %v10347_v10, 6  ;;  %v978_v30 = vrot.slane %v10348_v49, 6 }
 0x110   : > { %10480 = vst [vmem:[#allocation133_spill] sm:$0xff] %v5084_v38  ;;  %v972_v38 = vrot.slane %v4459_v57, 6  ;;  %v980_v34 = vrot.slane %v10350_v18, 6  ;;  %v981_v33 = vrot.slane %v4616_v43, 6  ;;  %v10538_v43 = vld [vmem:[#allocation87_spill] sm:$0xff]  ;;  %v10539_v18 = vld [vmem:[#allocation89_spill] sm:$0xff] }
 0x111   : > { %10481 = vst [vmem:[#allocation134_spill] sm:$0xff] %v5088_v0  ;;  %v10488_v0 = vrot.slane %v4491_v4, 1 }
 0x112   : > { %10482 = vst [vmem:[#allocation135_spill] sm:$0xff] %v5092_v5  ;;  %v979_v5 = vrot.slane %v10349_v41, 6 }
 0x113   : > { %10483 = vst [vmem:[#allocation136_spill] sm:$0xff] %v5096_v61  ;;  %v5114_v19 = vsel %vm923_vm3, %v10488_v0, %v893_v51  ;;  %v5120_v61 = vsel %vm923_vm3, %v10490_v13, %v894_v40  ;;  %v10496_v51 = vrot.slane %v10348_v49, 1  ;;  %v10498_v40 = vrot.slane %v10349_v41, 1  ;;  %v10540_v41 = vld [vmem:[#allocation92_spill] sm:$0xff]  ;;  %v10541_v49 = vld [vmem:[#allocation94_spill] sm:$0xff] }
 0x114   : > { %10485 = vst [vmem:[#allocation137_spill] sm:$0xff] %v5102_v3  ;;  %v993_v3 = vrot.slane %v10531_v53, 6  ;;  %v1002_v53 = vrot.slane %v10540_v41, 6  ;;  %v1003_v14 = vrot.slane %v10541_v49, 6 }
 0x115   : > { %10487 = vst [vmem:[#allocation138_spill] sm:$0xff] %v5108_v56  ;;  %v5138_v0 = vsel %vm923_vm3, %v10496_v51, %v897_v26  ;;  %v5144_v13 = vsel %vm923_vm3, %v10498_v40, %v898_v52  ;;  %v10504_v26 = vrot.slane %v4634_v48, 1  ;;  %v10506_v52 = vrot.slane %v4650_v6, 1  ;;  %v10537_v48 = vld [vmem:[#allocation49_spill] sm:$0xff] }
 0x116   : > { %10489 = vst [vmem:[#allocation139_spill] sm:$0xff] %v5114_v19  ;;  %v991_v19 = vrot.slane %v10529_v16, 6  ;;  %v992_v56 = vrot.slane %v10530_v63, 6  ;;  %v1000_v16 = vrot.slane %v10538_v43, 6  ;;  %v1001_v63 = vrot.slane %v10539_v18, 6 }
 0x117   : > { %10491 = vst [vmem:[#allocation140_spill] sm:$0xff] %v5120_v61  ;;  %v5162_v51 = vsel %vm923_vm3, %v10504_v26, %v901_v62  ;;  %v5168_v40 = vsel %vm923_vm3, %v10506_v52, %v902_v45  ;;  %v10512_v62 = vrot.slane %v4696_v54, 1  ;;  %v10514_v45 = vrot.slane %v4707_v17, 1  ;;  %v10534_v54 = vld [vmem:[#allocation32_spill] sm:$0xff] }
 0x118   : > { %10493 = vst [vmem:[#allocation141_spill] sm:$0xff] %v5126_v1  ;;  %v989_v1 = vrot.slane %v10527_v39, 6  ;;  %v990_v61 = vrot.slane %v10528_v23, 6  ;;  %v999_v23 = vrot.slane %v10537_v48, 6 }
 0x119   : > { %10495 = vst [vmem:[#allocation142_spill] sm:$0xff] %v5132_v24  ;;  %v5186_v26 = vsel %vm923_vm3, %v10512_v62, %v905_v22  ;;  %v5192_v52 = vsel %vm923_vm3, %v10514_v45, %v906_v36  ;;  %v10517_v22 = vld [vmem:[#allocation9_spill] sm:$0xff]  ;;  %v973_v62 = vrot.slane %v4475_v28, 6  ;;  %v976_v45 = vrot.slane %v10346_v8, 6 }
 0x11a   : > { %10497 = vst [vmem:[#allocation143_spill] sm:$0xff] %v5138_v0  ;;  %v10520_v36 = vld [vmem:[#allocation41_spill] sm:$0xff]  ;;  %v987_v0 = vrot.slane %v4707_v17, 6  ;;  %v988_v24 = vrot.slane %v10526_v29, 6  ;;  %v996_v17 = vrot.slane %v10534_v54, 6  ;;  %v997_v29 = vrot.slane %v10535_v20, 6 }
 0x11b   : > { %10499 = vst [vmem:[#allocation144_spill] sm:$0xff] %v5144_v13  ;;  %v985_v13 = vrot.slane %v4682_v50, 6  ;;  %v995_v50 = vrot.slane %v10533_v35, 6  ;;  %v5248_v54 = vsel %vm1004_vm4, %v973_v62, %v989_v1  ;;  %v5260_v41 = vsel %vm1004_vm4, %v976_v45, %v992_v56 }
 0x11c   : > { %10501 = vst [vmem:[#allocation145_spill] sm:$0xff] %v5150_v11  ;;  %v983_v11 = vrot.slane %v4650_v6, 6  ;;  %v10536_v6 = vld [vmem:[#allocation42_spill] sm:$0xff]  ;;  %v5244_v35 = vsel %vm1004_vm4, %v972_v38, %v988_v24  ;;  %v5264_v24 = vsel %vm1004_vm4, %v977_v32, %v993_v3  ;;  %v5268_v1 = vsel %vm1004_vm4, %v978_v30, %v994_v31 }
 0x11d   : > { %10503 = vst [vmem:[#allocation146_spill] sm:$0xff] %v5156_v46  ;;  %v10525_v46 = vld [vmem:[#allocation93_spill] sm:$0xff]  ;;  %v998_v39 = vrot.slane %v10536_v6, 6  ;;  %v5280_v56 = vsel %vm1004_vm4, %v981_v33, %v997_v29  ;;  %v5300_v29 = vsel %vm1004_vm4, %v986_v59, %v1002_v53 }
 0x11e   : > { %10505 = vst [vmem:[#allocation147_spill] sm:$0xff] %v5162_v51  ;;  %v10523_v51 = vld [vmem:[#allocation59_spill] sm:$0xff]  ;;  %v5288_v31 = vsel %vm1004_vm4, %v983_v11, %v999_v23 }
 0x11f   : > { %10507 = vst [vmem:[#allocation148_spill] sm:$0xff] %v5168_v40  ;;  %v975_v40 = vrot.slane %v10345_v12, 6  ;;  %v5284_v3 = vsel %vm1004_vm4, %v982_v9, %v998_v39  ;;  %v5304_v39 = vsel %vm1004_vm4, %v987_v0, %v1003_v14  ;;  %v10564_v14 = vrot.slane %v10406_v37, 6 }
 0x120   : > { %10509 = vst [vmem:[#allocation149_spill] sm:$0xff] %v5174_v21  ;;  %v974_v21 = vrot.slane %v4491_v4, 6 }
 0x121   : > { %10511 = vst [vmem:[#allocation150_spill] sm:$0xff] %v5180_v15  ;;  %v10516_v15 = vld [vmem:[#allocation25_spill] sm:$0xff]  ;;  %v5256_v43 = vsel %vm1004_vm4, %v975_v40, %v991_v19  ;;  %v5276_v19 = vsel %vm1004_vm4, %v980_v34, %v996_v17  ;;  %v5296_v17 = vsel %vm1004_vm4, %v985_v13, %v1001_v63 }
 0x122   : > { %10513 = vst [vmem:[#allocation151_spill] sm:$0xff] %v5186_v26  ;;  %v10518_v26 = vld [vmem:[#allocation28_spill] sm:$0xff]  ;;  %v5252_v6 = vsel %vm1004_vm4, %v974_v21, %v990_v61  ;;  %v5272_v61 = vsel %vm1004_vm4, %v979_v5, %v995_v50  ;;  %v5292_v50 = vsel %vm1004_vm4, %v984_v7, %v1000_v16  ;;  %v10560_v16 = vrot.slane %v10398_v44, 6 }
 0x123   : > { %10515 = vst [vmem:[#allocation152_spill] sm:$0xff] %v5192_v52  ;;  %v10521_v52 = vld [vmem:[#allocation48_spill] sm:$0xff] }
 0x124   : > { %10542 = vst [vmem:[#allocation25_spill] sm:$0xff] %v5244_v35  ;;  %v5316_v63 = vsel %vm1004_vm4, %v10560_v16, %v973_v62  ;;  %v10568_v62 = vrot.slane %v4531_v58, 6 }
 0x125   : > { %10543 = vst [vmem:[#allocation9_spill] sm:$0xff] %v5248_v54 }
 0x126   : > { %10544 = vst [vmem:[#allocation28_spill] sm:$0xff] %v5252_v6 }
 0x127   : > { %10545 = vst [vmem:[#allocation33_spill] sm:$0xff] %v5256_v43 }
 0x128   : > { %10546 = vst [vmem:[#allocation41_spill] sm:$0xff] %v5260_v41 }
 0x129   : > { %10547 = vst [vmem:[#allocation48_spill] sm:$0xff] %v5264_v24 }
 0x12a   : > { %10548 = vst [vmem:[#allocation54_spill] sm:$0xff] %v5268_v1 }
 0x12b   : > { %10549 = vst [vmem:[#allocation59_spill] sm:$0xff] %v5272_v61  ;;  %v1068_v61 = vrot.slane %v10541_v49, 2 }
 0x12c   : > { %10550 = vst [vmem:[#allocation73_spill] sm:$0xff] %v5276_v19  ;;  %v10611_v19 = vld [vmem:[#allocation92_spill] sm:$0xff] }
 0x12d   : > { %10551 = vst [vmem:[#allocation93_spill] sm:$0xff] %v5280_v56 }
 0x12e   : > { %10552 = vst [vmem:[#allocation153_spill] sm:$0xff] %v5284_v3  ;;  %v10558_v3 = vrot.slane %v10394_v2, 6  ;;  %v5328_v2 = vsel %vm1004_vm4, %v10564_v14, %v975_v40  ;;  %v10572_v40 = vrot.slane %v10517_v22, 6  ;;  %v10591_v14 = vld [vmem:[#allocation39_spill] sm:$0xff] }
 0x12f   : > { %10553 = vst [vmem:[#allocation154_spill] sm:$0xff] %v5288_v31 }
 0x130   : > { %10554 = vst [vmem:[#allocation155_spill] sm:$0xff] %v5292_v50  ;;  %v5310_v23 = vsel %vm1004_vm4, %v10558_v3, %v972_v38  ;;  %v10566_v38 = vrot.slane %v10410_v60, 6  ;;  %v5352_v60 = vsel %vm1004_vm4, %v10572_v40, %v979_v5  ;;  %v10580_v5 = vrot.slane %v10521_v52, 6  ;;  %v10594_v40 = vld [vmem:[#allocation51_spill] sm:$0xff]  ;;  %v10600_v3 = vld [vmem:[#allocation77_spill] sm:$0xff]  ;;  %v10608_v50 = vld [vmem:[#allocation32_spill] sm:$0xff] }
 0x131   : > { %10555 = vst [vmem:[#allocation156_spill] sm:$0xff] %v5296_v17  ;;  %v10562_v17 = vrot.slane %v10402_v47, 6  ;;  %v5340_v47 = vsel %vm1004_vm4, %v10568_v62, %v977_v32  ;;  %v10576_v32 = vrot.slane %v10519_v42, 6  ;;  %v1053_v16 = vrot.slane %v10600_v3, 2 }
 0x132   : > { %10556 = vst [vmem:[#allocation157_spill] sm:$0xff] %v5300_v29  ;;  %v5334_v44 = vsel %vm1004_vm4, %v10566_v38, %v976_v45  ;;  %v10574_v45 = vrot.slane %v10518_v26, 6  ;;  %v5376_v26 = vsel %vm1004_vm4, %v10580_v5, %v983_v11  ;;  %v10588_v11 = vrot.slane %v10525_v46, 6  ;;  %v10592_v38 = vld [vmem:[#allocation44_spill] sm:$0xff]  ;;  %v10596_v5 = vld [vmem:[#allocation58_spill] sm:$0xff]  ;;  %v10605_v29 = vld [vmem:[#allocation85_spill] sm:$0xff] }
 0x133   : > { %10557 = vst [vmem:[#allocation158_spill] sm:$0xff] %v5304_v39  ;;  %v5322_v53 = vsel %vm1004_vm4, %v10562_v17, %v974_v21  ;;  %v10570_v21 = vrot.slane %v10516_v15, 6  ;;  %v5364_v15 = vsel %vm1004_vm4, %v10576_v32, %v981_v33  ;;  %v10584_v33 = vrot.slane %v10523_v51, 6  ;;  %v10595_v32 = vld [vmem:[#allocation55_spill] sm:$0xff]  ;;  %v10601_v51 = vld [vmem:[#allocation78_spill] sm:$0xff]  ;;  %v10603_v39 = vld [vmem:[#allocation81_spill] sm:$0xff] }
 0x134   : > { %10559 = vst [vmem:[#allocation159_spill] sm:$0xff] %v5310_v23  ;;  %v5358_v58 = vsel %vm1004_vm4, %v10574_v45, %v980_v34  ;;  %v10582_v34 = vrot.slane %v10522_v27, 6  ;;  %v5400_v27 = vsel %vm1004_vm4, %v10588_v11, %v987_v0  ;;  %v10593_v0 = vld [vmem:[#allocation46_spill] sm:$0xff]  ;;  %v10598_v11 = vld [vmem:[#allocation91_spill] sm:$0xff]  ;;  %v1054_v46 = vrot.slane %v10601_v51, 2  ;;  %v10758_v55 = vld [vmem:[#allocation93_spill] sm:$0xff] }
 0x135   : > { %10561 = vst [vmem:[#allocation160_spill] sm:$0xff] %v5316_v63  ;;  %v5346_v37 = vsel %vm1004_vm4, %v10570_v21, %v978_v30  ;;  %v10578_v30 = vrot.slane %v10520_v36, 6  ;;  %v5388_v36 = vsel %vm1004_vm4, %v10584_v33, %v985_v13  ;;  %v10597_v33 = vld [vmem:[#allocation88_spill] sm:$0xff]  ;;  %v10599_v13 = vld [vmem:[#allocation74_spill] sm:$0xff]  ;;  %v1056_v21 = vrot.slane %v10603_v39, 2  ;;  %v10619_v23 = vld [vmem:[#allocation43_spill] sm:$0xff] }
 0x136   : > { %10563 = vst [vmem:[#allocation161_spill] sm:$0xff] %v5322_v53  ;;  %v5382_v42 = vsel %vm1004_vm4, %v10582_v34, %v984_v7  ;;  %v10602_v7 = vld [vmem:[#allocation79_spill] sm:$0xff]  ;;  %v1062_v17 = vrot.slane %v10535_v20, 2  ;;  %v10617_v53 = vld [vmem:[#allocation86_spill] sm:$0xff]  ;;  %v10624_v20 = vld [vmem:[#allocation56_spill] sm:$0xff] }
 0x137   : > { %10565 = vst [vmem:[#allocation162_spill] sm:$0xff] %v5328_v2  ;;  %v5370_v22 = vsel %vm1004_vm4, %v10578_v30, %v982_v9  ;;  %v10586_v9 = vrot.slane %v10524_v25, 6  ;;  %v1055_v62 = vrot.slane %v10602_v7, 2  ;;  %v1058_v30 = vrot.slane %v10605_v29, 2  ;;  %v10616_v2 = vld [vmem:[#allocation36_spill] sm:$0xff]  ;;  %v10618_v63 = vld [vmem:[#allocation26_spill] sm:$0xff] }
 0x138   : > { %10567 = vst [vmem:[#allocation163_spill] sm:$0xff] %v5334_v44  ;;  %v1061_v25 = vrot.slane %v10608_v50, 2  ;;  %v10615_v44 = vld [vmem:[#allocation35_spill] sm:$0xff]  ;;  %v1073_v6 = vrot.slane %v10616_v2, 2  ;;  %v1074_v54 = vrot.slane %v10617_v53, 2  ;;  %v1075_v35 = vrot.slane %v10618_v63, 2 }
 0x139   : > { %10569 = vst [vmem:[#allocation164_spill] sm:$0xff] %v5340_v47  ;;  %v5394_v52 = vsel %vm1004_vm4, %v10586_v9, %v986_v59  ;;  %v10590_v59 = vld [vmem:[#allocation4_spill] sm:$0xff]  ;;  %v10614_v47 = vld [vmem:[#allocation30_spill] sm:$0xff]  ;;  %v1072_v43 = vrot.slane %v10615_v44, 2  ;;  %v1081_v44 = vrot.slane %v10624_v20, 2  ;;  %v10628_v29 = vld [vmem:[#allocation13_spill] sm:$0xff] }
 0x13a   : > { %10571 = vst [vmem:[#allocation165_spill] sm:$0xff] %v5346_v37  ;;  %v10613_v37 = vld [vmem:[#allocation29_spill] sm:$0xff]  ;;  %v1071_v41 = vrot.slane %v10614_v47, 2  ;;  %v10625_v50 = vld [vmem:[#allocation90_spill] sm:$0xff] }
 0x13b   : > { %10573 = vst [vmem:[#allocation166_spill] sm:$0xff] %v5352_v60  ;;  %v10612_v60 = vld [vmem:[#allocation23_spill] sm:$0xff]  ;;  %v1070_v24 = vrot.slane %v10613_v37, 2  ;;  %v10623_v37 = vld [vmem:[#allocation57_spill] sm:$0xff]  ;;  %v1082_v2 = vrot.slane %v10625_v50, 2 }
 0x13c   : > { %10575 = vst [vmem:[#allocation167_spill] sm:$0xff] %v5358_v58  ;;  %v1067_v58 = vrot.slane %v10611_v19, 2  ;;  %v1069_v1 = vrot.slane %v10612_v60, 2  ;;  %v1080_v47 = vrot.slane %v10623_v37, 2  ;;  %v5467_v50 = vsel %vm1085_vm5, %v1055_v62, %v1071_v41 }
 0x13d   : > { %10577 = vst [vmem:[#allocation168_spill] sm:$0xff] %v5364_v15  ;;  %v1066_v15 = vrot.slane %v10539_v18, 2  ;;  %v1076_v18 = vrot.slane %v10619_v23, 2  ;;  %v5463_v20 = vsel %vm1085_vm5, %v1054_v46, %v1070_v24 }
 0x13e   : > { %10579 = vst [vmem:[#allocation169_spill] sm:$0xff] %v5370_v22  ;;  %v10610_v22 = vld [vmem:[#allocation87_spill] sm:$0xff]  ;;  %v5459_v37 = vsel %vm1085_vm5, %v1053_v16, %v1069_v1  ;;  %v5479_v1 = vsel %vm1085_vm5, %v1058_v30, %v1074_v54 }
 0x13f   : > { %10581 = vst [vmem:[#allocation170_spill] sm:$0xff] %v5376_v26  ;;  %v1064_v26 = vrot.slane %v10537_v48, 2  ;;  %v1065_v56 = vrot.slane %v10610_v22, 2  ;;  %v10620_v22 = vld [vmem:[#allocation45_spill] sm:$0xff]  ;;  %v10621_v48 = vld [vmem:[#allocation50_spill] sm:$0xff] }
 0x140   : > { %10583 = vst [vmem:[#allocation171_spill] sm:$0xff] %v5382_v42  ;;  %v10609_v42 = vld [vmem:[#allocation42_spill] sm:$0xff]  ;;  %v1077_v19 = vrot.slane %v10620_v22, 2  ;;  %v1078_v49 = vrot.slane %v10621_v48, 2  ;;  %v10651_v48 = vrot.slane %v4491_v4, 2 }
 0x141   : > { %10585 = vst [vmem:[#allocation172_spill] sm:$0xff] %v5388_v36  ;;  %v10607_v36 = vld [vmem:[#allocation27_spill] sm:$0xff]  ;;  %v1063_v31 = vrot.slane %v10609_v42, 2  ;;  %v10622_v42 = vld [vmem:[#allocation52_spill] sm:$0xff]  ;;  %v10629_v22 = vld [vmem:[#allocation82_spill] sm:$0xff] }
 0x142   : > { %10587 = vst [vmem:[#allocation173_spill] sm:$0xff] %v5394_v52  ;;  %v10606_v52 = vld [vmem:[#allocation38_spill] sm:$0xff]  ;;  %v1060_v9 = vrot.slane %v10607_v36, 2  ;;  %v1079_v60 = vrot.slane %v10622_v42, 2  ;;  %v10626_v36 = vld [vmem:[#allocation61_spill] sm:$0xff]  ;;  %v10647_v42 = vrot.slane %v4459_v57, 2 }
 0x143   : > { %10589 = vst [vmem:[#allocation174_spill] sm:$0xff] %v5400_v27  ;;  %v10604_v27 = vld [vmem:[#allocation83_spill] sm:$0xff]  ;;  %v1059_v34 = vrot.slane %v10606_v52, 2  ;;  %v1083_v53 = vrot.slane %v10626_v36, 2  ;;  %v10627_v52 = vld [vmem:[#allocation76_spill] sm:$0xff]  ;;  %v5471_v36 = vsel %vm1085_vm5, %v1056_v21, %v1072_v43  ;;  %v5491_v43 = vsel %vm1085_vm5, %v1061_v25, %v1077_v19 }
 0x144   : > { %v1057_v45 = vrot.slane %v10604_v27, 2  ;;  %v1084_v63 = vrot.slane %v10627_v52, 2  ;;  %v10630_v27 = vld [vmem:[#allocation14_spill] sm:$0xff]  ;;  %10631 = vst [vmem:[#allocation77_spill] sm:$0xff] %v5459_v37  ;;  %v5487_v41 = vsel %vm1085_vm5, %v1060_v9, %v1076_v18  ;;  %v5499_v54 = vsel %vm1085_vm5, %v1063_v31, %v1079_v60  ;;  %v10752_v37 = vld [vmem:[#allocation167_spill] sm:$0xff] }
 0x145   : > { %10632 = vst [vmem:[#allocation78_spill] sm:$0xff] %v5463_v20  ;;  %v5483_v24 = vsel %vm1085_vm5, %v1059_v34, %v1075_v35  ;;  %v5503_v35 = vsel %vm1085_vm5, %v1064_v26, %v1080_v47  ;;  %v5507_v18 = vsel %vm1085_vm5, %v1065_v56, %v1081_v44  ;;  %v5511_v19 = vsel %vm1085_vm5, %v1066_v15, %v1082_v2 }
 0x146   : > { %10633 = vst [vmem:[#allocation79_spill] sm:$0xff] %v5467_v50  ;;  %v5475_v52 = vsel %vm1085_vm5, %v1057_v45, %v1073_v6  ;;  %v5495_v6 = vsel %vm1085_vm5, %v1062_v17, %v1078_v49  ;;  %v5515_v49 = vsel %vm1085_vm5, %v1067_v58, %v1083_v53  ;;  %v5519_v60 = vsel %vm1085_vm5, %v1068_v61, %v1084_v63  ;;  %v10731_v50 = vld [vmem:[#allocation123_spill] sm:$0xff] }
 0x147   : > { %10634 = vst [vmem:[#allocation81_spill] sm:$0xff] %v5471_v36  ;;  %v5525_v47 = vsel %vm1085_vm5, %v10647_v42, %v1053_v16  ;;  %v10649_v44 = vrot.slane %v4475_v28, 2  ;;  %v5537_v53 = vsel %vm1085_vm5, %v10651_v48, %v1055_v62  ;;  %v10653_v63 = vrot.slane %v10345_v12, 2  ;;  %v10729_v36 = vld [vmem:[#allocation139_spill] sm:$0xff] }
 0x148   : > { %10635 = vst [vmem:[#allocation23_spill] sm:$0xff] %v5475_v52  ;;  %v10655_v16 = vrot.slane %v10346_v8, 2  ;;  %v10659_v62 = vrot.slane %v10590_v59, 2  ;;  %v10770_v59 = vld [vmem:[#allocation155_spill] sm:$0xff] }
 0x149   : > { %10636 = vst [vmem:[#allocation29_spill] sm:$0xff] %v5479_v1  ;;  %v5531_v2 = vsel %vm1085_vm5, %v10649_v44, %v1054_v46  ;;  %v5543_v23 = vsel %vm1085_vm5, %v10653_v63, %v1056_v21  ;;  %v10657_v46 = vrot.slane %v10347_v10, 2  ;;  %v10661_v21 = vrot.slane %v10591_v14, 2  ;;  %v10723_v1 = vld [vmem:[#allocation121_spill] sm:$0xff] }
 0x14a   : > { %10637 = vst [vmem:[#allocation30_spill] sm:$0xff] %v5483_v24  ;;  %v5549_v42 = vsel %vm1085_vm5, %v10655_v16, %v1057_v45  ;;  %v5561_v48 = vsel %vm1085_vm5, %v10659_v62, %v1059_v34  ;;  %v10663_v45 = vrot.slane %v10592_v38, 2  ;;  %v10667_v34 = vrot.slane %v10594_v40, 2  ;;  %v10721_v24 = vld [vmem:[#allocation137_spill] sm:$0xff]  ;;  %v10748_v38 = vld [vmem:[#allocation166_spill] sm:$0xff] }
 0x14b   : > { %10638 = vst [vmem:[#allocation35_spill] sm:$0xff] %v5487_v41  ;;  %v5555_v44 = vsel %vm1085_vm5, %v10657_v46, %v1058_v30  ;;  %v5567_v63 = vsel %vm1085_vm5, %v10661_v21, %v1060_v9  ;;  %v10665_v30 = vrot.slane %v10593_v0, 2  ;;  %v10669_v9 = vrot.slane %v10595_v32, 2  ;;  %v10742_v41 = vld [vmem:[#allocation48_spill] sm:$0xff]  ;;  %v10762_v14 = vld [vmem:[#allocation153_spill] sm:$0xff] }
 0x14c   : > { %10639 = vst [vmem:[#allocation36_spill] sm:$0xff] %v5491_v43  ;;  %v5573_v16 = vsel %vm1085_vm5, %v10663_v45, %v1061_v25  ;;  %v5585_v62 = vsel %vm1085_vm5, %v10667_v34, %v1063_v31  ;;  %v10671_v25 = vrot.slane %v10596_v5, 2  ;;  %v10675_v31 = vrot.slane %v10598_v11, 2  ;;  %v10720_v5 = vld [vmem:[#allocation159_spill] sm:$0xff]  ;;  %v10728_v11 = vld [vmem:[#allocation161_spill] sm:$0xff]  ;;  %v10730_v43 = vld [vmem:[#allocation28_spill] sm:$0xff] }
 0x14d   : > { %10640 = vst [vmem:[#allocation86_spill] sm:$0xff] %v5495_v6  ;;  %v5579_v46 = vsel %vm1085_vm5, %v10665_v30, %v1062_v17  ;;  %v5591_v21 = vsel %vm1085_vm5, %v10669_v9, %v1064_v26  ;;  %v10673_v17 = vrot.slane %v10597_v33, 2  ;;  %v10677_v26 = vrot.slane %v10599_v13, 2  ;;  %v10724_v33 = vld [vmem:[#allocation160_spill] sm:$0xff]  ;;  %v10732_v13 = vld [vmem:[#allocation162_spill] sm:$0xff]  ;;  %v10760_v6 = vld [vmem:[#allocation169_spill] sm:$0xff] }
 0x14e   : > { %10641 = vst [vmem:[#allocation26_spill] sm:$0xff] %v5499_v54  ;;  %v5597_v45 = vsel %vm1085_vm5, %v10671_v25, %v1065_v56  ;;  %v5609_v34 = vsel %vm1085_vm5, %v10675_v31, %v1067_v58  ;;  %v10679_v56 = vld [vmem:[#allocation95_spill] sm:$0xff]  ;;  %v10683_v58 = vld [vmem:[#allocation97_spill] sm:$0xff]  ;;  %v1150_v20 = vmax.f32 %v10721_v24, %v10720_v5  ;;  %v1154_v52 = vmax.f32 %v10729_v36, %v10728_v11  ;;  %v10735_v5 = vld [vmem:[#allocation124_spill] sm:$0xff] }
 0x14f   : > { %10642 = vst [vmem:[#allocation43_spill] sm:$0xff] %v5503_v35  ;;  %v5603_v30 = vsel %vm1085_vm5, %v10673_v17, %v1066_v15  ;;  %v5615_v9 = vsel %vm1085_vm5, %v10677_v26, %v1068_v61  ;;  %v10681_v15 = vld [vmem:[#allocation96_spill] sm:$0xff]  ;;  %v10722_v35 = vld [vmem:[#allocation25_spill] sm:$0xff]  ;;  %v1155_v32 = vmax.f32 %v10731_v50, %v10730_v43  ;;  %v10743_v11 = vld [vmem:[#allocation126_spill] sm:$0xff] }
 0x150   : > { %10643 = vst [vmem:[#allocation45_spill] sm:$0xff] %v5507_v18  ;;  %v1151_v0 = vmax.f32 %v10723_v1, %v10722_v35  ;;  %v10737_v1 = vld [vmem:[#allocation141_spill] sm:$0xff]  ;;  %v10740_v17 = vld [vmem:[#allocation164_spill] sm:$0xff]  ;;  %v1161_v36 = vmax.f32 %v10743_v11, %v10742_v41  ;;  %v10745_v50 = vld [vmem:[#allocation143_spill] sm:$0xff] }
 0x151   : > { %10644 = vst [vmem:[#allocation50_spill] sm:$0xff] %v5511_v19  ;;  %v10682_v19 = vld [vmem:[#allocation18_spill] sm:$0xff]  ;;  %v10738_v31 = vld [vmem:[#allocation41_spill] sm:$0xff] }
 0x152   : > { %10645 = vst [vmem:[#allocation52_spill] sm:$0xff] %v5515_v49  ;;  %v10744_v25 = vld [vmem:[#allocation165_spill] sm:$0xff]  ;;  %v10757_v41 = vld [vmem:[#allocation146_spill] sm:$0xff]  ;;  %v10774_v49 = vld [vmem:[#allocation156_spill] sm:$0xff] }
 0x153   : > { %10646 = vst [vmem:[#allocation57_spill] sm:$0xff] %v5519_v60  ;;  %v10680_v60 = vld [vmem:[#allocation15_spill] sm:$0xff]  ;;  %v1162_v43 = vmax.f32 %v10745_v50, %v10744_v25  ;;  %v10759_v25 = vld [vmem:[#allocation130_spill] sm:$0xff]  ;;  %v10776_v18 = vld [vmem:[#allocation173_spill] sm:$0xff] }
 0x154   : > { %10648 = vst [vmem:[#allocation56_spill] sm:$0xff] %v5525_v47  ;;  %v10754_v47 = vld [vmem:[#allocation73_spill] sm:$0xff]  ;;  %v1169_v50 = vmax.f32 %v10759_v25, %v10758_v55  ;;  %v10764_v54 = vld [vmem:[#allocation170_spill] sm:$0xff] }
 0x155   : > { %10650 = vst [vmem:[#allocation90_spill] sm:$0xff] %v5531_v2  ;;  %v10750_v2 = vld [vmem:[#allocation59_spill] sm:$0xff]  ;;  %v10773_v55 = vld [vmem:[#allocation150_spill] sm:$0xff]  ;;  %v10778_v10 = vld [vmem:[#allocation157_spill] sm:$0xff] }
 0x156   : > { %10652 = vst [vmem:[#allocation61_spill] sm:$0xff] %v5537_v53  ;;  %v10733_v53 = vld [vmem:[#allocation140_spill] sm:$0xff]  ;;  %v10780_v61 = vld [vmem:[#allocation174_spill] sm:$0xff] }
 0x157   : > { %10654 = vst [vmem:[#allocation76_spill] sm:$0xff] %v5543_v23  ;;  %v1156_v23 = vmax.f32 %v10733_v53, %v10732_v13  ;;  %v10747_v13 = vld [vmem:[#allocation127_spill] sm:$0xff]  ;;  %v10782_v26 = vld [vmem:[#allocation158_spill] sm:$0xff] }
 0x158   : > { %10656 = vst [vmem:[#allocation13_spill] sm:$0xff] %v5549_v42  ;;  %v10727_v42 = vld [vmem:[#allocation122_spill] sm:$0xff] }
 0x159   : > { %10658 = vst [vmem:[#allocation82_spill] sm:$0xff] %v5555_v44  ;;  %v10725_v44 = vld [vmem:[#allocation138_spill] sm:$0xff] }
 0x15a   : > { %10660 = vst [vmem:[#allocation14_spill] sm:$0xff] %v5561_v48  ;;  %v1152_v48 = vmax.f32 %v10725_v44, %v10724_v33  ;;  %v10739_v33 = vld [vmem:[#allocation125_spill] sm:$0xff] }
 0x15b   : > { %10662 = vst [vmem:[#allocation175_spill] sm:$0xff] %v5567_v63  ;;  %v10734_v63 = vld [vmem:[#allocation33_spill] sm:$0xff]  ;;  %v1159_v44 = vmax.f32 %v10739_v33, %v10738_v31 }
 0x15c   : > { %10664 = vst [vmem:[#allocation176_spill] sm:$0xff] %v5573_v16  ;;  %v1157_v24 = vmax.f32 %v10735_v5, %v10734_v63  ;;  %v10746_v16 = vld [vmem:[#allocation54_spill] sm:$0xff]  ;;  %v10749_v63 = vld [vmem:[#allocation144_spill] sm:$0xff]  ;;  %v10753_v31 = vld [vmem:[#allocation145_spill] sm:$0xff] }
 0x15d   : > { %10666 = vst [vmem:[#allocation177_spill] sm:$0xff] %v5579_v46  ;;  %v1163_v53 = vmax.f32 %v10747_v13, %v10746_v16  ;;  %v1164_v5 = vmax.f32 %v10749_v63, %v10748_v38  ;;  %v1166_v33 = vmax.f32 %v10753_v31, %v10752_v37  ;;  %v10756_v46 = vld [vmem:[#allocation168_spill] sm:$0xff]  ;;  %v10761_v16 = vld [vmem:[#allocation147_spill] sm:$0xff] }
 0x15e   : > { %10668 = vst [vmem:[#allocation178_spill] sm:$0xff] %v5585_v62  ;;  %v10726_v62 = vld [vmem:[#allocation9_spill] sm:$0xff]  ;;  %v1168_v11 = vmax.f32 %v10757_v41, %v10756_v46  ;;  %v1170_v13 = vmax.f32 %v10761_v16, %v10760_v6  ;;  %v10763_v38 = vld [vmem:[#allocation131_spill] sm:$0xff]  ;;  %v10767_v37 = vld [vmem:[#allocation132_spill] sm:$0xff] }
 0x15f   : > { %10670 = vst [vmem:[#allocation179_spill] sm:$0xff] %v5591_v21  ;;  %v1153_v40 = vmax.f32 %v10727_v42, %v10726_v62  ;;  %v10741_v42 = vld [vmem:[#allocation142_spill] sm:$0xff]  ;;  %v1171_v63 = vmax.f32 %v10763_v38, %v10762_v14  ;;  %v10768_v21 = vld [vmem:[#allocation171_spill] sm:$0xff]  ;;  %v10771_v46 = vld [vmem:[#allocation133_spill] sm:$0xff] }
 0x160   : > { %10672 = vst [vmem:[#allocation180_spill] sm:$0xff] %v5597_v45  ;;  %v1160_v62 = vmax.f32 %v10741_v42, %v10740_v17  ;;  %v10755_v17 = vld [vmem:[#allocation129_spill] sm:$0xff]  ;;  %v1175_v41 = vmax.f32 %v10771_v46, %v10770_v59  ;;  %v10772_v45 = vld [vmem:[#allocation172_spill] sm:$0xff]  ;;  %v10775_v6 = vld [vmem:[#allocation134_spill] sm:$0xff]  ;;  %v10784_v59 = vmax.f32 %v4459_v57, %v10628_v29  ;;  %v10789_v57 = vmax.f32 %v10602_v7, %v10681_v15 }
 0x161   : > { %10674 = vst [vmem:[#allocation181_spill] sm:$0xff] %v5603_v30  ;;  %v1167_v42 = vmax.f32 %v10755_v17, %v10754_v47  ;;  %v10766_v30 = vld [vmem:[#allocation154_spill] sm:$0xff]  ;;  %v10769_v47 = vld [vmem:[#allocation149_spill] sm:$0xff]  ;;  %v1176_v25 = vmax.f32 %v10773_v55, %v10772_v45  ;;  %v1177_v16 = vmax.f32 %v10775_v6, %v10774_v49  ;;  %v10777_v14 = vld [vmem:[#allocation151_spill] sm:$0xff]  ;;  %v10785_v45 = vmax.f32 %v10600_v3, %v10629_v22 }
 0x162   : > { %10676 = vst [vmem:[#allocation182_spill] sm:$0xff] %v5609_v34  ;;  %v10684_v34 = vld [vmem:[#allocation19_spill] sm:$0xff]  ;;  %v1173_v31 = vmax.f32 %v10767_v37, %v10766_v30  ;;  %v1174_v17 = vmax.f32 %v10769_v47, %v10768_v21  ;;  %v1178_v38 = vmax.f32 %v10777_v14, %v10776_v18  ;;  %v10781_v30 = vld [vmem:[#allocation152_spill] sm:$0xff]  ;;  %v1182_v46 = vmax.f32 %v10784_v59, %v1150_v20  ;;  %v10794_v20 = vld [vmem:[#allocation98_spill] sm:$0xff] }
 0x163   : > { %10678 = vst [vmem:[#allocation183_spill] sm:$0xff] %v5615_v9  ;;  %v10736_v9 = vld [vmem:[#allocation163_spill] sm:$0xff]  ;;  %v1180_v37 = vmax.f32 %v10781_v30, %v10780_v61  ;;  %v10783_v21 = vld [vmem:[#allocation136_spill] sm:$0xff]  ;;  %v1183_v49 = vmax.f32 %v10785_v45, %v1151_v0  ;;  %v10786_v18 = vmax.f32 %v4475_v28, %v10630_v27  ;;  %v10788_v61 = vmax.f32 %v4491_v4, %v10680_v60  ;;  %v10812_v45 = vld [vmem:[#allocation101_spill] sm:$0xff] }
 0x164   : > { %v1158_v35 = vmax.f32 %v10737_v1, %v10736_v9  ;;  %v10751_v9 = vld [vmem:[#allocation128_spill] sm:$0xff]  ;;  %v1181_v47 = vmax.f32 %v10783_v21, %v10782_v26  ;;  %v1187_v29 = vmax.f32 %v10789_v57, %v1155_v32  ;;  %v10790_v3 = vmax.f32 %v10345_v12, %v10682_v19  ;;  %v10793_v22 = vld [vmem:[#allocation83_spill] sm:$0xff] }
 0x165   : > { %v1165_v1 = vmax.f32 %v10751_v9, %v10750_v2  ;;  %v10765_v2 = vld [vmem:[#allocation148_spill] sm:$0xff]  ;;  %v1184_v55 = vmax.f32 %v10786_v18, %v1152_v48  ;;  %v1186_v26 = vmax.f32 %v10788_v61, %v1154_v52  ;;  %v10791_v28 = vmax.f32 %v10603_v39, %v10683_v58  ;;  %v10797_v48 = vld [vmem:[#allocation110_spill] sm:$0xff]  ;;  %v10800_v15 = vld [vmem:[#allocation99_spill] sm:$0xff] }
 0x166   : > { %v1172_v9 = vmax.f32 %v10765_v2, %v10764_v54  ;;  %v10779_v54 = vld [vmem:[#allocation135_spill] sm:$0xff]  ;;  %v1188_v0 = vmax.f32 %v10790_v3, %v1156_v23  ;;  %v10795_v4 = vmax.f32 %v10793_v22, %v10794_v20  ;;  %v10796_v60 = vld [vmem:[#allocation84_spill] sm:$0xff]  ;;  %v10818_v3 = vld [vmem:[#allocation90_spill] sm:$0xff] }
 0x167   : > { %v1179_v2 = vmax.f32 %v10779_v54, %v10778_v10  ;;  %v10787_v10 = vmax.f32 %v10601_v51, %v10679_v56  ;;  %v1189_v27 = vmax.f32 %v10791_v28, %v1157_v24  ;;  %v10792_v51 = vmax.f32 %v10346_v8, %v10684_v34  ;;  %v10799_v56 = vld [vmem:[#allocation85_spill] sm:$0xff]  ;;  %v10802_v19 = vld [vmem:[#allocation4_spill] sm:$0xff]  ;;  %v10803_v14 = vld [vmem:[#allocation111_spill] sm:$0xff] }
 0x168   : > { %v1191_v52 = vmax.f32 %v10795_v4, %v1159_v44  ;;  %v10798_v7 = vmax.f32 %v10796_v60, %v10797_v48  ;;  %v10801_v12 = vmax.f32 %v10799_v56, %v10800_v15  ;;  %v10804_v39 = vmax.f32 %v10802_v19, %v10803_v14  ;;  %v10805_v24 = vld [vmem:[#allocation38_spill] sm:$0xff]  ;;  %v10806_v54 = vld [vmem:[#allocation100_spill] sm:$0xff]  ;;  %v10811_v59 = vld [vmem:[#allocation27_spill] sm:$0xff] }
 0x169   : > { %v1185_v6 = vmax.f32 %v10787_v10, %v1153_v40  ;;  %v1190_v40 = vmax.f32 %v10792_v51, %v1158_v35  ;;  %v10807_v8 = vmax.f32 %v10805_v24, %v10806_v54  ;;  %v10808_v35 = vld [vmem:[#allocation39_spill] sm:$0xff]  ;;  %v10809_v30 = vld [vmem:[#allocation112_spill] sm:$0xff]  ;;  %v10813_v18 = vmax.f32 %v10811_v59, %v10812_v45  ;;  %v10821_v51 = vld [vmem:[#allocation113_spill] sm:$0xff] }
 0x16a   : > { %v1192_v32 = vmax.f32 %v10798_v7, %v1160_v62  ;;  %v1193_v23 = vmax.f32 %v10801_v12, %v1161_v36  ;;  %v1194_v58 = vmax.f32 %v10804_v39, %v1162_v43  ;;  %v10810_v21 = vmax.f32 %v10808_v35, %v10809_v30  ;;  %v10814_v10 = vld [vmem:[#allocation56_spill] sm:$0xff]  ;;  %v10816_v36 = vld [vmem:[#allocation77_spill] sm:$0xff]  ;;  %v10824_v4 = vld [vmem:[#allocation102_spill] sm:$0xff] }
 0x16b   : > { %v1195_v34 = vmax.f32 %v10807_v8, %v1163_v53  ;;  %v1197_v62 = vmax.f32 %v10813_v18, %v1165_v1  ;;  %v5788_v61 = vmax.f32 %v1182_v46, %v10814_v10  ;;  %v5791_v57 = vmax.f32 %v1183_v49, %v10816_v36  ;;  %v10820_v28 = vld [vmem:[#allocation44_spill] sm:$0xff]  ;;  %v10826_v48 = vld [vmem:[#allocation46_spill] sm:$0xff]  ;;  %v10832_v12 = vld [vmem:[#allocation103_spill] sm:$0xff] }
 0x16c   : > { %v1196_v44 = vmax.f32 %v10810_v21, %v1164_v5  ;;  %v5794_v43 = vmax.f32 %v1184_v55, %v10818_v3  ;;  %v10822_v53 = vmax.f32 %v10820_v28, %v10821_v51  ;;  %v10823_v20 = vld [vmem:[#allocation32_spill] sm:$0xff]  ;;  %v10827_v7 = vld [vmem:[#allocation114_spill] sm:$0xff]  ;;  %v10834_v14 = vld [vmem:[#allocation51_spill] sm:$0xff] }
 0x16d   : > { %10815 = vst [vmem:[#allocation95_spill] sm:$0xff] %v5788_v61  ;;  %v10825_v5 = vmax.f32 %v10823_v20, %v10824_v4  ;;  %v10828_v1 = vmax.f32 %v10826_v48, %v10827_v7  ;;  %v10829_v46 = vld [vmem:[#allocation78_spill] sm:$0xff]  ;;  %v10835_v39 = vld [vmem:[#allocation115_spill] sm:$0xff]  ;;  %v10838_v8 = vld [vmem:[#allocation104_spill] sm:$0xff] }
 0x16e   : > { %10817 = vst [vmem:[#allocation15_spill] sm:$0xff] %v5791_v57  ;;  %v1198_v22 = vmax.f32 %v10822_v53, %v1166_v33  ;;  %v5806_v15 = vmax.f32 %v1185_v6, %v10829_v46  ;;  %v10831_v49 = vld [vmem:[#allocation34_spill] sm:$0xff]  ;;  %v10836_v24 = vmax.f32 %v10834_v14, %v10835_v39  ;;  %v10843_v6 = vld [vmem:[#allocation116_spill] sm:$0xff]  ;;  %v10845_v18 = vld [vmem:[#allocation49_spill] sm:$0xff] }
 0x16f   : > { %10819 = vst [vmem:[#allocation96_spill] sm:$0xff] %v5794_v43  ;;  %v1199_v60 = vmax.f32 %v10825_v5, %v1167_v42  ;;  %v1200_v56 = vmax.f32 %v10828_v1, %v1168_v11  ;;  %v10833_v19 = vmax.f32 %v10831_v49, %v10832_v12  ;;  %v10837_v33 = vld [vmem:[#allocation42_spill] sm:$0xff]  ;;  %v10840_v42 = vld [vmem:[#allocation61_spill] sm:$0xff]  ;;  %v10842_v11 = vld [vmem:[#allocation55_spill] sm:$0xff] }
 0x170   : > { %10830 = vst [vmem:[#allocation18_spill] sm:$0xff] %v5806_v15  ;;  %v1202_v54 = vmax.f32 %v10836_v24, %v1170_v13  ;;  %v10839_v35 = vmax.f32 %v10837_v33, %v10838_v8  ;;  %v5818_v21 = vmax.f32 %v1186_v26, %v10840_v42  ;;  %v10844_v59 = vmax.f32 %v10842_v11, %v10843_v6  ;;  %v10848_v3 = vld [vmem:[#allocation58_spill] sm:$0xff]  ;;  %v10849_v13 = vld [vmem:[#allocation117_spill] sm:$0xff]  ;;  %v10851_v53 = vld [vmem:[#allocation79_spill] sm:$0xff] }
 0x171   : > { %v1201_v55 = vmax.f32 %v10833_v19, %v1169_v50  ;;  %1492 = vst.msk [vmem:[#allocation2 + $0x48] sm:$0xff] %vm171_vm1, %v5788_v61  ;;  %v10846_v50 = vld [vmem:[#allocation105_spill] sm:$0xff]  ;;  %v10850_v28 = vmax.f32 %v10848_v3, %v10849_v13  ;;  %v10853_v26 = vld [vmem:[#allocation87_spill] sm:$0xff]  ;;  %v10854_v20 = vld [vmem:[#allocation106_spill] sm:$0xff] }
 0x172   : > { %v1203_v30 = vmax.f32 %v10839_v35, %v1171_v63  ;;  %10841 = vst [vmem:[#allocation97_spill] sm:$0xff] %v5818_v21  ;;  %v1204_v45 = vmax.f32 %v10844_v59, %v1172_v9  ;;  %v10847_v10 = vmax.f32 %v10845_v18, %v10846_v50  ;;  %v5832_v63 = vmax.f32 %v1187_v29, %v10851_v53  ;;  %v10856_v48 = vld [vmem:[#allocation88_spill] sm:$0xff]  ;;  %v10857_v9 = vld [vmem:[#allocation118_spill] sm:$0xff]  ;;  %v10859_v46 = vld [vmem:[#allocation89_spill] sm:$0xff] }
 0x173   : > { %v1206_v51 = vmax.f32 %v10850_v28, %v1174_v17  ;;  %1493 = vst.msk [vmem:[#allocation2 + $0x50] sm:$0xff] %vm171_vm1, %v5791_v57  ;;  %v10855_v4 = vmax.f32 %v10853_v26, %v10854_v20  ;;  %v10858_v7 = vmax.f32 %v10856_v48, %v10857_v9  ;;  %v10862_v19 = vld [vmem:[#allocation76_spill] sm:$0xff]  ;;  %v10864_v29 = vld [vmem:[#allocation91_spill] sm:$0xff]  ;;  %v10870_v42 = vld [vmem:[#allocation74_spill] sm:$0xff] }
 0x174   : > { %v1205_v36 = vmax.f32 %v10847_v10, %v1173_v31  ;;  %10852 = vst [vmem:[#allocation19_spill] sm:$0xff] %v5832_v63  ;;  %v10860_v31 = vld [vmem:[#allocation107_spill] sm:$0xff]  ;;  %v5846_v17 = vmax.f32 %v1188_v0, %v10862_v19  ;;  %v10867_v33 = vld [vmem:[#allocation92_spill] sm:$0xff]  ;;  %v10873_v59 = vld [vmem:[#allocation81_spill] sm:$0xff] }
 0x175   : > { %v1207_v5 = vmax.f32 %v10855_v4, %v1175_v41  ;;  %v1208_v1 = vmax.f32 %v10858_v7, %v1176_v25  ;;  %v10861_v49 = vmax.f32 %v10859_v46, %v10860_v31  ;;  %1494 = vst.msk [vmem:[#allocation2 + $0x68] sm:$0xff] %vm171_vm1, %v5794_v43  ;;  %v10865_v14 = vld [vmem:[#allocation119_spill] sm:$0xff]  ;;  %v10868_v41 = vld [vmem:[#allocation108_spill] sm:$0xff]  ;;  %v10875_v0 = vld [vmem:[#allocation94_spill] sm:$0xff] }
 0x176   : > { %10863 = vst [vmem:[#allocation159_spill] sm:$0xff] %v5846_v17  ;;  %v10866_v39 = vmax.f32 %v10864_v29, %v10865_v14  ;;  %v10869_v8 = vmax.f32 %v10867_v33, %v10868_v41  ;;  %v10871_v25 = vld [vmem:[#allocation120_spill] sm:$0xff]  ;;  %v10876_v18 = vld [vmem:[#allocation109_spill] sm:$0xff]  ;;  %v10880_v13 = vld [vmem:[#allocation23_spill] sm:$0xff] }
 0x177   : > { %v1209_v12 = vmax.f32 %v10861_v49, %v1177_v16  ;;  %v10872_v11 = vmax.f32 %v10870_v42, %v10871_v25  ;;  %v5860_v16 = vmax.f32 %v1189_v27, %v10873_v59  ;;  %1495 = vst.msk [vmem:[#allocation2 + $0x70] sm:$0xff] %vm171_vm1, %v5806_v15  ;;  %v10877_v50 = vmax.f32 %v10875_v0, %v10876_v18  ;;  %v10878_v3 = vld [vmem:[#allocation13_spill] sm:$0xff]  ;;  %v10886_v26 = vld [vmem:[#allocation14_spill] sm:$0xff]  ;;  %v5914_v29 = vld [vmem:[#allocation2 + $0x20] sm:$0xff] }
 0x178   : > { %v1210_v24 = vmax.f32 %v10866_v39, %v1178_v38  ;;  %v1211_v35 = vmax.f32 %v10869_v8, %v1179_v2  ;;  %v5868_v38 = vmax.f32 %v1190_v40, %v10878_v3  ;;  %v5871_v28 = vmax.f32 %v1191_v52, %v10880_v13  ;;  %v10882_v2 = vld [vmem:[#allocation82_spill] sm:$0xff]  ;;  %1496 = vst.msk [vmem:[#allocation2 + $0x88] sm:$0xff] %vm171_vm1, %v5818_v21  ;;  %v10890_v40 = vld [vmem:[#allocation175_spill] sm:$0xff]  ;;  %v5896_v9 = vld [vmem:[#allocation2 + $0x10] sm:$0xff] }
 0x179   : > { %v1212_v6 = vmax.f32 %v10872_v11, %v1180_v37  ;;  %10874 = vst [vmem:[#allocation137_spill] sm:$0xff] %v5860_v16  ;;  %v1213_v10 = vmax.f32 %v10877_v50, %v1181_v47  ;;  %v5874_v53 = vmax.f32 %v1192_v32, %v10882_v2  ;;  %v10884_v37 = vld [vmem:[#allocation29_spill] sm:$0xff]  ;;  %v5882_v20 = vmax.f32 %v1194_v58, %v10886_v26  ;;  %v10888_v4 = vld [vmem:[#allocation30_spill] sm:$0xff]  ;;  %v5892_v52 = vld [vmem:[#allocation2] sm:$0xff] }
 0x17a   : > { %10879 = vst [vmem:[#allocation25_spill] sm:$0xff] %v5868_v38  ;;  %v5879_v27 = vmax.f32 %v1193_v23, %v10884_v37  ;;  %v5885_v47 = vmax.f32 %v1195_v34, %v10888_v4  ;;  %v5888_v48 = vmax.f32 %v1196_v44, %v10890_v40  ;;  %v5894_v32 = vld [vmem:[#allocation2 + $0x8] sm:$0xff]  ;;  %v10892_v23 = vld [vmem:[#allocation35_spill] sm:$0xff]  ;;  %v10898_v44 = vld [vmem:[#allocation177_spill] sm:$0xff] }
 0x17b   : > { %10881 = vst [vmem:[#allocation121_spill] sm:$0xff] %v5871_v28  ;;  %v5899_v7 = vmax.f32 %v1197_v62, %v10892_v23  ;;  %v10894_v58 = vld [vmem:[#allocation176_spill] sm:$0xff]  ;;  %v5908_v49 = vmax.f32 %v1200_v56, %v10898_v44  ;;  %v5912_v19 = vld [vmem:[#allocation2 + $0x18] sm:$0xff]  ;;  %v5918_v62 = vld [vmem:[#allocation2 + $0x30] sm:$0xff] }
 0x17c   : > { %10883 = vst [vmem:[#allocation160_spill] sm:$0xff] %v5874_v53  ;;  %v5902_v46 = vmax.f32 %v1198_v22, %v10894_v58  ;;  %v10896_v34 = vld [vmem:[#allocation36_spill] sm:$0xff]  ;;  %v10900_v39 = vld [vmem:[#allocation86_spill] sm:$0xff]  ;;  %v10906_v8 = vld [vmem:[#allocation179_spill] sm:$0xff] }
 0x17d   : > { %10885 = vst [vmem:[#allocation138_spill] sm:$0xff] %v5879_v27  ;;  %v5905_v31 = vmax.f32 %v1199_v60, %v10896_v34  ;;  %v5916_v14 = vld [vmem:[#allocation2 + $0x28] sm:$0xff]  ;;  %v5921_v22 = vmax.f32 %v1201_v55, %v10900_v39  ;;  %v10902_v33 = vld [vmem:[#allocation178_spill] sm:$0xff]  ;;  %v5930_v42 = vmax.f32 %v1204_v45, %v10906_v8  ;;  %v5936_v11 = vld [vmem:[#allocation2 + $0x40] sm:$0xff] }
 0x17e   : > { %10887 = vst [vmem:[#allocation9_spill] sm:$0xff] %v5882_v20  ;;  %v5924_v60 = vmax.f32 %v1202_v54, %v10902_v33  ;;  %v10904_v41 = vld [vmem:[#allocation26_spill] sm:$0xff]  ;;  %v10908_v55 = vld [vmem:[#allocation43_spill] sm:$0xff]  ;;  %v10910_v54 = vld [vmem:[#allocation180_spill] sm:$0xff] }
 0x17f   : > { %10889 = vst [vmem:[#allocation122_spill] sm:$0xff] %v5885_v47  ;;  %v5927_v56 = vmax.f32 %v1203_v30, %v10904_v41  ;;  %v5934_v25 = vld [vmem:[#allocation2 + $0x38] sm:$0xff]  ;;  %v5941_v0 = vmax.f32 %v1205_v36, %v10908_v55  ;;  %v5944_v18 = vmax.f32 %v1206_v51, %v10910_v54  ;;  %v10912_v30 = vld [vmem:[#allocation45_spill] sm:$0xff]  ;;  %v1536_v13 = vld [vmem:[#allocation2 + $0x60] sm:$0xff] }
 0x180   : > { %10891 = vst [vmem:[#allocation161_spill] sm:$0xff] %v5888_v48  ;;  %v5938_v59 = vld [vmem:[#allocation2 + $0x58] sm:$0xff]  ;;  %v5947_v50 = vmax.f32 %v1207_v5, %v10912_v30  ;;  %v10914_v45 = vld [vmem:[#allocation181_spill] sm:$0xff]  ;;  %v5954_v37 = vld [vmem:[#allocation2 + $0x80] sm:$0xff] }
 0x181   : > { %1497 = vst.msk [vmem:[#allocation2 + $0x90] sm:$0xff] %vm171_vm1, %v5832_v63  ;;  %v5950_v3 = vmax.f32 %v1208_v1, %v10914_v45  ;;  %v1539_v2 = vld [vmem:[#allocation2 + $0x78] sm:$0xff]  ;;  %v10921_v51 = vld [vmem:[#allocation52_spill] sm:$0xff]  ;;  %v10923_v5 = vld [vmem:[#allocation183_spill] sm:$0xff] }
 0x182   : > { %10893 = vst [vmem:[#allocation139_spill] sm:$0xff] %v5899_v7  ;;  %v10917_v26 = vld [vmem:[#allocation50_spill] sm:$0xff]  ;;  %v5963_v23 = vmax.f32 %v1211_v35, %v10921_v51  ;;  %v5966_v58 = vmax.f32 %v1212_v6, %v10923_v5  ;;  %v5970_v1 = vld [vmem:[#allocation2 + $0x48] sm:$0xff]  ;;  %v5974_v44 = vld [vmem:[#allocation2 + $0xa0] sm:$0xff]  ;;  %v6008_v51 = vmax.f32 %v5936_v11, %v1536_v13 }
 0x183   : > { %10895 = vst [vmem:[#allocation28_spill] sm:$0xff] %v5902_v46  ;;  %v5957_v4 = vmax.f32 %v1209_v12, %v10917_v26  ;;  %v10919_v36 = vld [vmem:[#allocation182_spill] sm:$0xff]  ;;  %v10927_v12 = vld [vmem:[#allocation57_spill] sm:$0xff]  ;;  %v5985_v6 = vld [vmem:[#allocation2 + $0xc0] sm:$0xff]  ;;  %v6021_v26 = vmax.f32 %v5938_v59, %v1539_v2 }
 0x184   : > { %10897 = vst [vmem:[#allocation123_spill] sm:$0xff] %v5905_v31  ;;  %v5960_v40 = vmax.f32 %v1210_v24, %v10919_v36  ;;  %v5972_v34 = vld [vmem:[#allocation2 + $0x98] sm:$0xff]  ;;  %v5977_v39 = vmax.f32 %v1213_v10, %v10927_v12  ;;  %v5981_v24 = vld [vmem:[#allocation2 + $0x50] sm:$0xff]  ;;  %v1537_v10 = vld [vmem:[#allocation2 + $0x68] sm:$0xff]  ;;  %v6024_v36 = vmax.f32 %v1536_v13, %v5954_v37 }
 0x185   : > { %10899 = vst [vmem:[#allocation162_spill] sm:$0xff] %v5908_v49  ;;  %v5983_v35 = vld [vmem:[#allocation2 + $0xb8] sm:$0xff]  ;;  %v5997_v54 = vld [vmem:[#allocation2 + $0xe0] sm:$0xff]  ;;  %v1538_v5 = vld [vmem:[#allocation2 + $0x70] sm:$0xff]  ;;  %v6027_v33 = vmax.f32 %v1539_v2, %v5972_v34  ;;  %v6049_v2 = vmax.f32 %v5974_v44, %v5985_v6 }
 0x186   : > { %1498 = vst.msk [vmem:[#allocation2 + $0xa8] sm:$0xff] %vm171_vm1, %v5846_v17  ;;  %v5995_v55 = vld [vmem:[#allocation2 + $0xd8] sm:$0xff]  ;;  %v6012_v12 = vld [vmem:[#allocation2 + $0x100] sm:$0xff]  ;;  %v6045_v13 = vmax.f32 %v5972_v34, %v5983_v35  ;;  %v6068_v63 = vmax.f32 %v5985_v6, %v5997_v54  ;;  %v6083_v57 = vmax.f32 %v5981_v24, %v1538_v5 }
 0x187   : > { %10901 = vst [vmem:[#allocation140_spill] sm:$0xff] %v5921_v22  ;;  %v5999_v30 = vld [vmem:[#allocation2 + $0xf8] sm:$0xff]  ;;  %v6016_v41 = vld [vmem:[#allocation2 + $0x120] sm:$0xff]  ;;  %v6064_v17 = vmax.f32 %v5983_v35, %v5995_v55  ;;  %v6087_v61 = vmax.f32 %v5997_v54, %v6012_v12 }
 0x188   : > { %10903 = vst [vmem:[#allocation33_spill] sm:$0xff] %v5924_v60  ;;  %v6014_v8 = vld [vmem:[#allocation2 + $0x118] sm:$0xff]  ;;  %v6057_v45 = vld [vmem:[#allocation2 + $0x160] sm:$0xff] }
 0x189   : > { %10905 = vst [vmem:[#allocation124_spill] sm:$0xff] %v5927_v56  ;;  %v6078_v15 = vld [vmem:[#allocation2 + $0x178] sm:$0xff]  ;;  %v6080_v43 = vld [vmem:[#allocation2 + $0x180] sm:$0xff] }
 0x18a   : > { %10907 = vst [vmem:[#allocation163_spill] sm:$0xff] %v5930_v42 }
 0x18b   : > { %1499 = vst.msk [vmem:[#allocation2 + $0xb0] sm:$0xff] %vm171_vm1, %v5860_v16  ;;  %v6060_v16 = vmax.f32 %v5970_v1, %v1537_v10 }
 0x18c   : > { %10909 = vst [vmem:[#allocation141_spill] sm:$0xff] %v5941_v0 }
 0x18d   : > { %10911 = vst [vmem:[#allocation41_spill] sm:$0xff] %v5944_v18  ;;  %v6076_v21 = vld [vmem:[#allocation2 + $0xa8] sm:$0xff] }
 0x18e   : > { %10913 = vst [vmem:[#allocation125_spill] sm:$0xff] %v5947_v50 }
 0x18f   : > { %10915 = vst [vmem:[#allocation164_spill] sm:$0xff] %v5950_v3 }
 0x190   : > { %1500 = vst.msk [vmem:[#allocation2 + $0xc8] sm:$0xff] %vm171_vm1, %v5868_v38  ;;  %v6055_v38 = vld [vmem:[#allocation2 + $0x158] sm:$0xff] }
 0x191   : > { %10916 = vst [vmem:[#allocation142_spill] sm:$0xff] %v5954_v37 }
 0x192   : > { %10918 = vst [vmem:[#allocation48_spill] sm:$0xff] %v5957_v4 }
 0x193   : > { %10920 = vst [vmem:[#allocation126_spill] sm:$0xff] %v5960_v40 }
 0x194   : > { %10922 = vst [vmem:[#allocation165_spill] sm:$0xff] %v5963_v23 }
 0x195   : > { %10924 = vst [vmem:[#allocation143_spill] sm:$0xff] %v5966_v58 }
 0x196   : > { %1501 = vst.msk [vmem:[#allocation2 + $0xd0] sm:$0xff] %vm171_vm1, %v5871_v28  ;;  %v6041_v28 = vmax.f32 %v5954_v37, %v5974_v44  ;;  %v6124_v37 = vld [vmem:[#allocation2 + $0x1c0] sm:$0xff] }
 0x197   : > { %10925 = vst [vmem:[#allocation54_spill] sm:$0xff] %v5972_v34  ;;  %v6122_v34 = vld [vmem:[#allocation2 + $0x1b8] sm:$0xff] }
 0x198   : > { %10926 = vst [vmem:[#allocation127_spill] sm:$0xff] %v5974_v44  ;;  %v6103_v44 = vld [vmem:[#allocation2 + $0x1a0] sm:$0xff] }
 0x199   : > { %10928 = vst [vmem:[#allocation166_spill] sm:$0xff] %v5977_v39 }
 0x19a   : > { %1502 = vst.msk [vmem:[#allocation2 + $0xe8] sm:$0xff] %vm171_vm1, %v5874_v53  ;;  %v6035_v53 = vld [vmem:[#allocation2 + $0x140] sm:$0xff] }
 0x19b   : > { %10929 = vst [vmem:[#allocation144_spill] sm:$0xff] %v5983_v35  ;;  %v6101_v35 = vld [vmem:[#allocation2 + $0x198] sm:$0xff] }
 0x19c   : > { %10930 = vst [vmem:[#allocation59_spill] sm:$0xff] %v5985_v6  ;;  %v6099_v6 = vld [vmem:[#allocation2 + $0xb0] sm:$0xff] }
 0x19d   : > { %1503 = vst.msk [vmem:[#allocation2 + $0xf0] sm:$0xff] %vm171_vm1, %v5879_v27  ;;  %v6033_v27 = vld [vmem:[#allocation2 + $0x138] sm:$0xff] }
 0x19e   : > { %10931 = vst [vmem:[#allocation128_spill] sm:$0xff] %v5995_v55 }
 0x19f   : > { %10932 = vst [vmem:[#allocation167_spill] sm:$0xff] %v5997_v54 }
 0x1a0   : > { %10933 = vst [vmem:[#allocation145_spill] sm:$0xff] %v5999_v30 }
 0x1a1   : > { %1504 = vst.msk [vmem:[#allocation2 + $0x108] sm:$0xff] %vm171_vm1, %v5882_v20  ;;  %v6031_v20 = vld [vmem:[#allocation2 + $0x88] sm:$0xff] }
 0x1a2   : > { %10934 = vst [vmem:[#allocation73_spill] sm:$0xff] %v6012_v12  ;;  %v6106_v54 = vmax.f32 %v1537_v10, %v6031_v20  ;;  %v6126_v10 = vld [vmem:[#allocation2 + $0x1d8] sm:$0xff] }
 0x1a3   : > { %10935 = vst [vmem:[#allocation129_spill] sm:$0xff] %v6014_v8 }
 0x1a4   : > { %10936 = vst [vmem:[#allocation168_spill] sm:$0xff] %v6016_v41 }
 0x1a5   : > { %1505 = vst.msk [vmem:[#allocation2 + $0x110] sm:$0xff] %vm171_vm1, %v5885_v47  ;;  %v6053_v47 = vld [vmem:[#allocation2 + $0x90] sm:$0xff] }
 0x1a6   : > { %10937 = vst [vmem:[#allocation146_spill] sm:$0xff] %v6031_v20 }
 0x1a7   : > { %10938 = vst [vmem:[#allocation93_spill] sm:$0xff] %v6033_v27 }
 0x1a8   : > { %10939 = vst [vmem:[#allocation130_spill] sm:$0xff] %v6035_v53 }
 0x1a9   : > { %1506 = vst.msk [vmem:[#allocation2 + $0x128] sm:$0xff] %vm171_vm1, %v5888_v48  ;;  %v6072_v48 = vmax.f32 %v5995_v55, %v5999_v30  ;;  %v6091_v55 = vmax.f32 %v5999_v30, %v6014_v8  ;;  %v6110_v30 = vmax.f32 %v6014_v8, %v6033_v27  ;;  %v6129_v8 = vmax.f32 %v1538_v5, %v6053_v47  ;;  %v6149_v5 = vld [vmem:[#allocation2 + $0x200] sm:$0xff] }
 0x1aa   : > { %10940 = vst [vmem:[#allocation169_spill] sm:$0xff] %v6053_v47 }
 0x1ab   : > { %10941 = vst [vmem:[#allocation147_spill] sm:$0xff] %v6055_v38 }
 0x1ac   : > { %10942 = vst [vmem:[#allocation153_spill] sm:$0xff] %v6057_v45 }
 0x1ad   : > { %10943 = vst [vmem:[#allocation131_spill] sm:$0xff] %v6064_v17 }
 0x1ae   : > { %10944 = vst [vmem:[#allocation170_spill] sm:$0xff] %v6068_v63 }
 0x1af   : > { %10945 = vst [vmem:[#allocation148_spill] sm:$0xff] %v6072_v48 }
 0x1b0   : > { %1507 = vst.msk [vmem:[#allocation2 + $0x130] sm:$0xff] %vm171_vm1, %v5899_v7  ;;  %v6095_v7 = vmax.f32 %v6012_v12, %v6016_v41  ;;  %v6114_v12 = vmax.f32 %v6016_v41, %v6035_v53  ;;  %v6133_v41 = vmax.f32 %v6035_v53, %v6057_v45  ;;  %v6153_v53 = vmax.f32 %v6031_v20, %v6076_v21  ;;  %v6173_v20 = vld [vmem:[#allocation2 + $0x220] sm:$0xff] }
 0x1b1   : > { %10946 = vst [vmem:[#allocation154_spill] sm:$0xff] %v6076_v21 }
 0x1b2   : > { %10947 = vst [vmem:[#allocation132_spill] sm:$0xff] %v6078_v15 }
 0x1b3   : > { %10948 = vst [vmem:[#allocation171_spill] sm:$0xff] %v6080_v43 }
 0x1b4   : > { %10949 = vst [vmem:[#allocation149_spill] sm:$0xff] %v6091_v55 }
 0x1b5   : > { %10950 = vst [vmem:[#allocation155_spill] sm:$0xff] %v6095_v7 }
 0x1b6   : > { %1508 = vst.msk [vmem:[#allocation2 + $0x148] sm:$0xff] %vm171_vm1, %v5902_v46  ;;  %v6118_v46 = vmax.f32 %v6033_v27, %v6055_v38  ;;  %v6137_v27 = vmax.f32 %v6055_v38, %v6078_v15  ;;  %v6157_v38 = vmax.f32 %v6078_v15, %v6101_v35  ;;  %v6177_v15 = vmax.f32 %v6053_v47, %v6099_v6  ;;  %v6197_v47 = vld [vmem:[#allocation2 + $0x240] sm:$0xff] }
 0x1b7   : > { %10951 = vst [vmem:[#allocation133_spill] sm:$0xff] %v6099_v6 }
 0x1b8   : > { %10952 = vst [vmem:[#allocation172_spill] sm:$0xff] %v6101_v35 }
 0x1b9   : > { %10953 = vst [vmem:[#allocation150_spill] sm:$0xff] %v6103_v44 }
 0x1ba   : > { %10954 = vst [vmem:[#allocation156_spill] sm:$0xff] %v6110_v30 }
 0x1bb   : > { %10955 = vst [vmem:[#allocation134_spill] sm:$0xff] %v6114_v12  ;;  %v6147_v12 = vld [vmem:[#allocation2 + $0x1f8] sm:$0xff] }
 0x1bc   : > { %10956 = vst [vmem:[#allocation173_spill] sm:$0xff] %v6118_v46  ;;  %v6145_v46 = vld [vmem:[#allocation2 + $0x1e0] sm:$0xff] }
 0x1bd   : > { %1509 = vst.msk [vmem:[#allocation2 + $0x150] sm:$0xff] %vm171_vm1, %v5905_v31  ;;  %v6141_v31 = vmax.f32 %v6057_v45, %v6080_v43  ;;  %v6161_v45 = vmax.f32 %v6080_v43, %v6103_v44  ;;  %v6181_v43 = vmax.f32 %v6103_v44, %v6124_v37 }
 0x1be   : > { %10957 = vst [vmem:[#allocation151_spill] sm:$0xff] %v6122_v34 }
 0x1bf   : > { %10958 = vst [vmem:[#allocation157_spill] sm:$0xff] %v6124_v37 }
 0x1c0   : > { %10959 = vst [vmem:[#allocation135_spill] sm:$0xff] %v6126_v10 }
 0x1c1   : > { %10960 = vst [vmem:[#allocation174_spill] sm:$0xff] %v6133_v41 }
 0x1c2   : > { %10961 = vst [vmem:[#allocation152_spill] sm:$0xff] %v6137_v27  ;;  %v6171_v27 = vld [vmem:[#allocation2 + $0x218] sm:$0xff] }
 0x1c3   : > { %10962 = vst [vmem:[#allocation158_spill] sm:$0xff] %v6141_v31  ;;  %v6169_v31 = vld [vmem:[#allocation2 + $0xc8] sm:$0xff] }
 0x1c4   : > { %1510 = vst.msk [vmem:[#allocation2 + $0x168] sm:$0xff] %vm171_vm1, %v5908_v49  ;;  %v6165_v49 = vmax.f32 %v6101_v35, %v6122_v34  ;;  %v6185_v35 = vmax.f32 %v6122_v34, %v6126_v10  ;;  %v6201_v44 = vmax.f32 %v6076_v21, %v6169_v31  ;;  %v6205_v34 = vmax.f32 %v6126_v10, %v6147_v12 }
 0x1c5   : > { %10963 = vst [vmem:[#allocation136_spill] sm:$0xff] %v6145_v46  ;;  %v10978_v10 = vmax.f32 %v5892_v52, %v5914_v29  ;;  %v10983_v52 = vmax.f32 %v5896_v9, %v5918_v62 }
 0x1c6   : > { %10964 = vst [vmem:[#allocation83_spill] sm:$0xff] %v6147_v12 }
 0x1c7   : > { %10965 = vst [vmem:[#allocation98_spill] sm:$0xff] %v6157_v38 }
 0x1c8   : > { %10966 = vst [vmem:[#allocation84_spill] sm:$0xff] %v6161_v45  ;;  %v6195_v45 = vld [vmem:[#allocation2 + $0x238] sm:$0xff] }
 0x1c9   : > { %10967 = vst [vmem:[#allocation110_spill] sm:$0xff] %v6165_v49  ;;  %v6193_v49 = vld [vmem:[#allocation2 + $0xd0] sm:$0xff] }
 0x1ca   : > { %1511 = vst.msk [vmem:[#allocation2 + $0x170] sm:$0xff] %vm171_vm1, %v5921_v22  ;;  %v6189_v22 = vmax.f32 %v6124_v37, %v6145_v46  ;;  %v6209_v37 = vmax.f32 %v6145_v46, %v6149_v5  ;;  %v6223_v21 = vmax.f32 %v6099_v6, %v6193_v49  ;;  %v6245_v46 = vmax.f32 %v10978_v10, %v6008_v51 }
 0x1cb   : > { %10968 = vst [vmem:[#allocation85_spill] sm:$0xff] %v6169_v31  ;;  %v6265_v10 = vmax.f32 %v10983_v52, %v6083_v57 }
 0x1cc   : > { %10969 = vst [vmem:[#allocation99_spill] sm:$0xff] %v6171_v27 }
 0x1cd   : > { %10970 = vst [vmem:[#allocation4_spill] sm:$0xff] %v6173_v20 }
 0x1ce   : > { %10971 = vst [vmem:[#allocation111_spill] sm:$0xff] %v6181_v43 }
 0x1cf   : > { %10972 = vst [vmem:[#allocation38_spill] sm:$0xff] %v6185_v35  ;;  %v6219_v35 = vld [vmem:[#allocation2 + $0x258] sm:$0xff] }
 0x1d0   : > { %10973 = vst [vmem:[#allocation100_spill] sm:$0xff] %v6189_v22  ;;  %v6217_v22 = vld [vmem:[#allocation2 + $0xe8] sm:$0xff] }
 0x1d1   : > { %1512 = vst.msk [vmem:[#allocation2 + $0x188] sm:$0xff] %vm171_vm1, %v5924_v60  ;;  %v6213_v60 = vmax.f32 %v6147_v12, %v6171_v27  ;;  %v10979_v12 = vmax.f32 %v5894_v32, %v5916_v14  ;;  %v10984_v32 = vmax.f32 %v5912_v19, %v5934_v25  ;;  %v10988_v19 = vmax.f32 %v5916_v14, %v5970_v1 }
 0x1d2   : > { %10974 = vst [vmem:[#allocation39_spill] sm:$0xff] %v6193_v49 }
 0x1d3   : > { %10975 = vst [vmem:[#allocation112_spill] sm:$0xff] %v6197_v47  ;;  %v6291_v52 = vmax.f32 %v10988_v19, %v6106_v54 }
 0x1d4   : > { %10976 = vst [vmem:[#allocation27_spill] sm:$0xff] %v6213_v60  ;;  %v6237_v60 = vmax.f32 %v6169_v31, %v6217_v22  ;;  %v6255_v31 = vld [vmem:[#allocation2 + $0x108] sm:$0xff] }
 0x1d5   : > { %1513 = vst.msk [vmem:[#allocation2 + $0x190] sm:$0xff] %vm171_vm1, %v5927_v56  ;;  %v6233_v56 = vld [vmem:[#allocation2 + $0xf0] sm:$0xff]  ;;  %v6285_v9 = vmax.f32 %v6217_v22, %v6255_v31 }
 0x1d6   : > { %10977 = vst [vmem:[#allocation101_spill] sm:$0xff] %v6219_v35  ;;  %v6259_v6 = vmax.f32 %v6193_v49, %v6233_v56  ;;  %v6281_v49 = vld [vmem:[#allocation2 + $0x110] sm:$0xff] }
 0x1d7   : > { %1514 = vst.msk [vmem:[#allocation2 + $0x1a8] sm:$0xff] %vm171_vm1, %v5930_v42  ;;  %v6251_v42 = vmax.f32 %v10979_v12, %v6060_v16  ;;  %v6271_v12 = vmax.f32 %v10984_v32, %v6021_v26  ;;  %v6311_v14 = vmax.f32 %v6233_v56, %v6281_v49 }
 0x1d8   : > { %1515 = vst.msk [vmem:[#allocation2 + $0x1b0] sm:$0xff] %vm171_vm1, %v5941_v0  ;;  %v10985_v0 = vmax.f32 %v5914_v29, %v5936_v11  ;;  %v10989_v29 = vmax.f32 %v5918_v62, %v5981_v24 }
 0x1d9   : > { %10980 = vst [vmem:[#allocation56_spill] sm:$0xff] %v6251_v42 }
 0x1da   : > { %10981 = vst [vmem:[#allocation77_spill] sm:$0xff] %v6255_v31  ;;  %v6277_v42 = vmax.f32 %v10985_v0, %v6024_v36  ;;  %v6297_v11 = vmax.f32 %v10989_v29, %v6129_v8  ;;  %v10990_v0 = vmax.f32 %v5934_v25, %v5938_v59  ;;  %v6321_v59 = vld [vmem:[#allocation2 + $0x130] sm:$0xff]  ;;  %v6335_v25 = vld [vmem:[#allocation2 + $0x148] sm:$0xff] }
 0x1db   : > { %10982 = vst [vmem:[#allocation90_spill] sm:$0xff] %v6259_v6  ;;  %v6339_v1 = vmax.f32 %v6281_v49, %v6321_v59  ;;  %v6363_v29 = vld [vmem:[#allocation2 + $0x168] sm:$0xff] }
 0x1dc   : > { %1516 = vst.msk [vmem:[#allocation2 + $0x1c8] sm:$0xff] %vm171_vm1, %v5944_v18  ;;  %v6303_v32 = vmax.f32 %v10990_v0, %v6027_v33  ;;  %v6307_v18 = vld [vmem:[#allocation2 + $0x128] sm:$0xff]  ;;  %v6349_v0 = vld [vmem:[#allocation2 + $0x150] sm:$0xff] }
 0x1dd   : > { %10986 = vst [vmem:[#allocation44_spill] sm:$0xff] %v6281_v49  ;;  %v6325_v24 = vmax.f32 %v6255_v31, %v6307_v18 }
 0x1de   : > { %10987 = vst [vmem:[#allocation113_spill] sm:$0xff] %v6285_v9  ;;  %v11016_v9 = vld [vmem:[#allocation100_spill] sm:$0xff] }
 0x1df   : > { %1517 = vst.msk [vmem:[#allocation2 + $0x1d0] sm:$0xff] %vm171_vm1, %v5947_v50  ;;  %v6369_v50 = vmax.f32 %v6321_v59, %v6349_v0  ;;  %v6411_v19 = vld [vmem:[#allocation2 + $0x1b0] sm:$0xff] }
 0x1e0   : > { %10991 = vst [vmem:[#allocation32_spill] sm:$0xff] %v6307_v18 }
 0x1e1   : > { %1518 = vst.msk [vmem:[#allocation2 + $0x1e8] sm:$0xff] %vm171_vm1, %v5950_v3 }
 0x1e2   : > { %10992 = vst [vmem:[#allocation102_spill] sm:$0xff] %v6321_v59  ;;  %v6385_v59 = vmax.f32 %v6335_v25, %v6363_v29 }
 0x1e3   : > { %1519 = vst.msk [vmem:[#allocation2 + $0x1f0] sm:$0xff] %vm171_vm1, %v5957_v4  ;;  %v6353_v4 = vmax.f32 %v6307_v18, %v6335_v25  ;;  %v6381_v18 = vld [vmem:[#allocation2 + $0x190] sm:$0xff]  ;;  %v6423_v17 = vld [vmem:[#allocation2 + $0x1c8] sm:$0xff] }
 0x1e4   : > { %10993 = vst [vmem:[#allocation46_spill] sm:$0xff] %v6335_v25  ;;  %v6427_v62 = vmax.f32 %v6381_v18, %v6411_v19 }
 0x1e5   : > { %10994 = vst [vmem:[#allocation114_spill] sm:$0xff] %v6339_v1 }
 0x1e6   : > { %1520 = vst.msk [vmem:[#allocation2 + $0x208] sm:$0xff] %vm171_vm1, %v5960_v40  ;;  %v6365_v40 = vld [vmem:[#allocation2 + $0x170] sm:$0xff] }
 0x1e7   : > { %10995 = vst [vmem:[#allocation78_spill] sm:$0xff] %v6349_v0  ;;  %v6389_v3 = vmax.f32 %v6349_v0, %v6365_v40  ;;  %v6405_v25 = vmax.f32 %v6365_v40, %v6381_v18  ;;  %v6435_v48 = vld [vmem:[#allocation2 + $0x1d0] sm:$0xff]  ;;  %v6495_v0 = vld [vmem:[#allocation2 + $0x248] sm:$0xff] }
 0x1e8   : > { %1521 = vst.msk [vmem:[#allocation2 + $0x210] sm:$0xff] %vm171_vm1, %v5963_v23  ;;  %v6379_v23 = vld [vmem:[#allocation2 + $0x188] sm:$0xff]  ;;  %v6449_v6 = vmax.f32 %v6411_v19, %v6435_v48 }
 0x1e9   : > { %10996 = vst [vmem:[#allocation34_spill] sm:$0xff] %v6363_v29  ;;  %v6401_v49 = vmax.f32 %v6363_v29, %v6379_v23  ;;  %v6457_v63 = vld [vmem:[#allocation2 + $0x1e8] sm:$0xff] }
 0x1ea   : > { %10997 = vst [vmem:[#allocation103_spill] sm:$0xff] %v6365_v40  ;;  %v6467_v31 = vld [vmem:[#allocation2 + $0x1f0] sm:$0xff] }
 0x1eb   : > { %1522 = vst.msk [vmem:[#allocation2 + $0x228] sm:$0xff] %vm171_vm1, %v5966_v58  ;;  %v6397_v58 = vld [vmem:[#allocation2 + $0x1a8] sm:$0xff]  ;;  %v6485_v7 = vmax.f32 %v6435_v48, %v6467_v31 }
 0x1ec   : > { %10998 = vst [vmem:[#allocation51_spill] sm:$0xff] %v6379_v23  ;;  %v6439_v40 = vmax.f32 %v6397_v58, %v6423_v17 }
 0x1ed   : > { %10999 = vst [vmem:[#allocation115_spill] sm:$0xff] %v6381_v18  ;;  %v6479_v41 = vld [vmem:[#allocation2 + $0x208] sm:$0xff]  ;;  %v6511_v18 = vld [vmem:[#allocation2 + $0x250] sm:$0xff] }
 0x1ee   : > { %11000 = vst [vmem:[#allocation42_spill] sm:$0xff] %v6389_v3  ;;  %v6499_v38 = vmax.f32 %v6457_v63, %v6479_v41  ;;  %v11022_v3 = vmax.f32 %v6149_v5, %v6173_v20 }
 0x1ef   : > { %1523 = vst.msk [vmem:[#allocation2 + $0x230] sm:$0xff] %vm171_vm1, %v5977_v39  ;;  %v6415_v39 = vmax.f32 %v6379_v23, %v6397_v58  ;;  %v11014_v23 = vld [vmem:[#allocation38_spill] sm:$0xff] }
 0x1f0   : > { %11001 = vst [vmem:[#allocation104_spill] sm:$0xff] %v6397_v58  ;;  %v6471_v58 = vmax.f32 %v6423_v17, %v6457_v63 }
 0x1f1   : > { %11002 = vst [vmem:[#allocation61_spill] sm:$0xff] %v6401_v49  ;;  %v11021_v49 = vld [vmem:[#allocation27_spill] sm:$0xff] }
 0x1f2   : > { %11003 = vst [vmem:[#allocation55_spill] sm:$0xff] %v6411_v19  ;;  %v6481_v19 = vld [vmem:[#allocation2 + $0x210] sm:$0xff]  ;;  %v6493_v29 = vld [vmem:[#allocation2 + $0x228] sm:$0xff] }
 0x1f3   : > { %11005 = vst [vmem:[#allocation116_spill] sm:$0xff] %v6423_v17  ;;  %v1669_v30 = vmax.f32 %v6479_v41, %v6493_v29  ;;  %v6523_v17 = vmax.f32 %v11016_v9, %v11022_v3  ;;  %v11026_v3 = vmax.f32 %v6173_v20, %v6197_v47  ;;  %v11032_v47 = vld [vmem:[#allocation146_spill] sm:$0xff]  ;;  %v11033_v20 = vld [vmem:[#allocation56_spill] sm:$0xff] }
 0x1f4   : > { %11007 = vst [vmem:[#allocation49_spill] sm:$0xff] %v6435_v48  ;;  %v6503_v48 = vmax.f32 %v6467_v31, %v6481_v19 }
 0x1f5   : > { %11010 = vst [vmem:[#allocation105_spill] sm:$0xff] %v6457_v63  ;;  %v1673_v63 = vmax.f32 %v6493_v29, %v6495_v0 }
 0x1f6   : > { %11013 = vst [vmem:[#allocation58_spill] sm:$0xff] %v6467_v31  ;;  %v6509_v1 = vld [vmem:[#allocation2 + $0x230] sm:$0xff] }
 0x1f7   : > { %11015 = vst [vmem:[#allocation117_spill] sm:$0xff] %v6479_v41  ;;  %v1670_v55 = vmax.f32 %v6481_v19, %v6509_v1  ;;  %v1674_v43 = vmax.f32 %v6509_v1, %v6511_v18 }
 0x1f8   : > { %11017 = vst [vmem:[#allocation79_spill] sm:$0xff] %v6493_v29  ;;  %v1726_v29 = vmax.f32 %v6427_v62, %v6485_v7 }
 0x1f9   : > { %11018 = vst [vmem:[#allocation87_spill] sm:$0xff] %v6495_v0  ;;  %v11024_v0 = vmax.f32 %v6171_v27, %v6195_v45 }
 0x1fa   : > { %11019 = vst [vmem:[#allocation106_spill] sm:$0xff] %v6509_v1  ;;  %v11030_v1 = vld [vmem:[#allocation142_spill] sm:$0xff] }
 0x1fb   : > { %11020 = vst [vmem:[#allocation88_spill] sm:$0xff] %v6511_v18  ;;  %v6535_v31 = vmax.f32 %v6205_v34, %v11024_v0  ;;  %v11028_v18 = vmax.f32 %v6195_v45, %v6219_v35  ;;  %v6553_v27 = vmax.f32 %v6245_v46, %v11030_v1  ;;  %v1729_v0 = vmax.f32 %v6439_v40, %v6499_v38  ;;  %v11037_v46 = vld [vmem:[#allocation54_spill] sm:$0xff] }
 0x1fc   : > { %11023 = vst [vmem:[#allocation118_spill] sm:$0xff] %v6523_v17  ;;  %v6543_v17 = vmax.f32 %v6209_v37, %v11026_v3  ;;  %v6561_v3 = vmax.f32 %v11033_v20, %v11032_v47  ;;  %v6573_v1 = vmax.f32 %v6271_v12, %v11037_v46  ;;  %v1734_v20 = vmax.f32 %v6485_v7, %v1670_v55  ;;  %v11045_v12 = vld [vmem:[#allocation59_spill] sm:$0xff]  ;;  %v11047_v7 = vld [vmem:[#allocation85_spill] sm:$0xff] }
 0x1fd   : > { %11025 = vst [vmem:[#allocation89_spill] sm:$0xff] %v6535_v31  ;;  %v6549_v41 = vmax.f32 %v11021_v49, %v11028_v18  ;;  %v1730_v31 = vmax.f32 %v6449_v6, %v6503_v48  ;;  %v1733_v18 = vmax.f32 %v6471_v58, %v1669_v30  ;;  %v1738_v47 = vmax.f32 %v6503_v48, %v1674_v43  ;;  %v11041_v30 = vld [vmem:[#allocation133_spill] sm:$0xff]  ;;  %v11049_v55 = vld [vmem:[#allocation39_spill] sm:$0xff] }
 0x1fe   : > { %11027 = vst [vmem:[#allocation107_spill] sm:$0xff] %v6543_v17  ;;  %v11035_v17 = vld [vmem:[#allocation169_spill] sm:$0xff]  ;;  %v11048_v43 = vmax.f32 %v6060_v16, %v6153_v53  ;;  %v11057_v16 = vmax.f32 %v6106_v54, %v6201_v44  ;;  %v11068_v54 = vmax.f32 %v6153_v53, %v6237_v60  ;;  %v11080_v53 = vld [vmem:[#allocation32_spill] sm:$0xff] }
 0x1ff   : > { %11029 = vst [vmem:[#allocation76_spill] sm:$0xff] %v6549_v41  ;;  %v6565_v35 = vmax.f32 %v6265_v10, %v11035_v17  ;;  %v6569_v41 = vmax.f32 %v6499_v38, %v1673_v63  ;;  %v6587_v63 = vmax.f32 %v6297_v11, %v11041_v30  ;;  %v11043_v38 = vld [vmem:[#allocation144_spill] sm:$0xff]  ;;  %v11056_v30 = vmax.f32 %v6024_v36, %v6049_v2  ;;  %v11064_v36 = vld [vmem:[#allocation73_spill] sm:$0xff] }
 0x200   : > { %11031 = vst [vmem:[#allocation91_spill] sm:$0xff] %v6553_v27  ;;  %v11039_v27 = vld [vmem:[#allocation127_spill] sm:$0xff]  ;;  %v6591_v10 = vmax.f32 %v6303_v32, %v11043_v38  ;;  %v6603_v48 = vmax.f32 %v11048_v43, %v11047_v7  ;;  %v11052_v32 = vld [vmem:[#allocation128_spill] sm:$0xff] }
 0x201   : > { %11034 = vst [vmem:[#allocation119_spill] sm:$0xff] %v6561_v3  ;;  %v6577_v49 = vmax.f32 %v6277_v42, %v11039_v27  ;;  %v11040_v3 = vld [vmem:[#allocation154_spill] sm:$0xff]  ;;  %v11046_v27 = vmax.f32 %v6008_v51, %v6041_v28  ;;  %v11055_v51 = vld [vmem:[#allocation167_spill] sm:$0xff] }
 0x202   : > { %11036 = vst [vmem:[#allocation92_spill] sm:$0xff] %v6565_v35  ;;  %v6583_v17 = vmax.f32 %v6291_v52, %v11040_v3  ;;  %v11050_v52 = vmax.f32 %v6083_v57, %v6177_v15  ;;  %v11053_v3 = vmax.f32 %v6021_v26, %v6045_v13  ;;  %v6621_v38 = vmax.f32 %v11056_v30, %v11055_v51  ;;  %v11060_v26 = vld [vmem:[#allocation145_spill] sm:$0xff]  ;;  %v11061_v7 = vld [vmem:[#allocation131_spill] sm:$0xff] }
 0x203   : > { %11038 = vst [vmem:[#allocation108_spill] sm:$0xff] %v6573_v1  ;;  %v6597_v42 = vmax.f32 %v11046_v27, %v11045_v12  ;;  %v6627_v12 = vmax.f32 %v11057_v16, %v6217_v22  ;;  %v11058_v57 = vmax.f32 %v6129_v8, %v6223_v21  ;;  %v11062_v43 = vmax.f32 %v6027_v33, %v11061_v7  ;;  %v11067_v22 = vld [vmem:[#allocation77_spill] sm:$0xff]  ;;  %v11070_v8 = vld [vmem:[#allocation90_spill] sm:$0xff] }
 0x204   : > { %11042 = vst [vmem:[#allocation74_spill] sm:$0xff] %v6587_v63  ;;  %v6609_v11 = vmax.f32 %v11050_v52, %v11049_v55  ;;  %v6615_v46 = vmax.f32 %v11053_v3, %v11052_v32  ;;  %v11065_v52 = vld [vmem:[#allocation170_spill] sm:$0xff]  ;;  %v6651_v51 = vmax.f32 %v11068_v54, %v11067_v22  ;;  %v11071_v30 = vmax.f32 %v6177_v15, %v11070_v8  ;;  %v11073_v33 = vld [vmem:[#allocation129_spill] sm:$0xff] }
 0x205   : > { %11044 = vst [vmem:[#allocation120_spill] sm:$0xff] %v6591_v10  ;;  %v6633_v27 = vmax.f32 %v11058_v57, %v6233_v56  ;;  %v6639_v55 = vmax.f32 %v11062_v43, %v11060_v26  ;;  %v11066_v32 = vmax.f32 %v6041_v28, %v11065_v52  ;;  %v11069_v56 = vld [vmem:[#allocation44_spill] sm:$0xff]  ;;  %v11081_v22 = vld [vmem:[#allocation113_spill] sm:$0xff]  ;;  %v11084_v15 = vld [vmem:[#allocation102_spill] sm:$0xff] }
 0x206   : > { %11051 = vst [vmem:[#allocation81_spill] sm:$0xff] %v6609_v11  ;;  %v6657_v16 = vmax.f32 %v11071_v30, %v11069_v56  ;;  %v11074_v57 = vld [vmem:[#allocation148_spill] sm:$0xff]  ;;  %v11082_v54 = vmax.f32 %v6201_v44, %v11081_v22  ;;  %v11085_v56 = vmax.f32 %v6223_v21, %v6311_v14  ;;  %v11095_v44 = vld [vmem:[#allocation46_spill] sm:$0xff] }
 0x207   : > { %11054 = vst [vmem:[#allocation94_spill] sm:$0xff] %v6615_v46  ;;  %v6645_v3 = vmax.f32 %v11066_v32, %v11064_v36  ;;  %v11075_v26 = vmax.f32 %v6045_v13, %v11074_v57  ;;  %v11077_v28 = vld [vmem:[#allocation168_spill] sm:$0xff]  ;;  %v11078_v36 = vmax.f32 %v6049_v2, %v6087_v61  ;;  %v11087_v13 = vld [vmem:[#allocation93_spill] sm:$0xff]  ;;  %v11091_v2 = vld [vmem:[#allocation130_spill] sm:$0xff] }
 0x208   : > { %11059 = vst [vmem:[#allocation109_spill] sm:$0xff] %v6633_v27  ;;  %v6681_v30 = vmax.f32 %v11085_v56, %v11084_v15  ;;  %v11098_v21 = vld [vmem:[#allocation78_spill] sm:$0xff] }
 0x209   : > { %11063 = vst [vmem:[#allocation13_spill] sm:$0xff] %v6639_v55  ;;  %v6663_v43 = vmax.f32 %v11075_v26, %v11073_v33  ;;  %v6669_v32 = vmax.f32 %v11078_v36, %v11077_v28  ;;  %v6675_v55 = vmax.f32 %v11082_v54, %v11080_v53  ;;  %v11088_v33 = vld [vmem:[#allocation149_spill] sm:$0xff]  ;;  %v11092_v28 = vld [vmem:[#allocation155_spill] sm:$0xff]  ;;  %v11096_v53 = vmax.f32 %v6237_v60, %v6325_v24  ;;  %v11099_v15 = vld [vmem:[#allocation114_spill] sm:$0xff] }
 0x20a   : > { %11072 = vst [vmem:[#allocation23_spill] sm:$0xff] %v6657_v16  ;;  %v11089_v26 = vmax.f32 %v11061_v7, %v11088_v33  ;;  %v11093_v36 = vmax.f32 %v11065_v52, %v11092_v28  ;;  %v11100_v56 = vmax.f32 %v11070_v8, %v11099_v15  ;;  %v11102_v7 = vld [vmem:[#allocation147_spill] sm:$0xff]  ;;  %v11106_v52 = vld [vmem:[#allocation153_spill] sm:$0xff]  ;;  %v11110_v60 = vld [vmem:[#allocation34_spill] sm:$0xff] }
 0x20b   : > { %11076 = vst [vmem:[#allocation82_spill] sm:$0xff] %v6663_v43  ;;  %v6699_v54 = vmax.f32 %v11096_v53, %v11095_v44  ;;  %v11111_v44 = vmax.f32 %v11081_v22, %v6353_v4  ;;  %v11113_v8 = vld [vmem:[#allocation103_spill] sm:$0xff] }
 0x20c   : > { %11079 = vst [vmem:[#allocation29_spill] sm:$0xff] %v6669_v32  ;;  %v6687_v43 = vmax.f32 %v11089_v26, %v11087_v13  ;;  %v6693_v46 = vmax.f32 %v11093_v36, %v11091_v2  ;;  %v6705_v10 = vmax.f32 %v11100_v56, %v11098_v21  ;;  %v11103_v13 = vld [vmem:[#allocation156_spill] sm:$0xff]  ;;  %v11107_v2 = vld [vmem:[#allocation134_spill] sm:$0xff]  ;;  %v11114_v21 = vmax.f32 %v6311_v14, %v6369_v50  ;;  %v11124_v22 = vld [vmem:[#allocation51_spill] sm:$0xff] }
 0x20d   : > { %11083 = vst [vmem:[#allocation14_spill] sm:$0xff] %v6675_v55  ;;  %v11104_v26 = vmax.f32 %v11074_v57, %v11103_v13  ;;  %v11108_v36 = vmax.f32 %v6087_v61, %v11107_v2  ;;  %v6723_v53 = vmax.f32 %v11111_v44, %v11110_v60  ;;  %v11116_v57 = vld [vmem:[#allocation132_spill] sm:$0xff]  ;;  %v11120_v61 = vld [vmem:[#allocation171_spill] sm:$0xff]  ;;  %v11125_v60 = vmax.f32 %v6325_v24, %v6385_v59 }
 0x20e   : > { %11086 = vst [vmem:[#allocation30_spill] sm:$0xff] %v6681_v30  ;;  %v6729_v56 = vmax.f32 %v11114_v21, %v11113_v8  ;;  %v11127_v14 = vld [vmem:[#allocation115_spill] sm:$0xff]  ;;  %v11128_v8 = vld [vmem:[#allocation42_spill] sm:$0xff]  ;;  %v11139_v24 = vld [vmem:[#allocation104_spill] sm:$0xff] }
 0x20f   : > { %11090 = vst [vmem:[#allocation175_spill] sm:$0xff] %v6687_v43  ;;  %v6711_v43 = vmax.f32 %v11104_v26, %v11102_v7  ;;  %v6717_v1 = vmax.f32 %v11108_v36, %v11106_v52  ;;  %v11117_v7 = vld [vmem:[#allocation173_spill] sm:$0xff]  ;;  %v11121_v52 = vld [vmem:[#allocation174_spill] sm:$0xff]  ;;  %v6747_v44 = vmax.f32 %v11125_v60, %v11124_v22  ;;  %v11129_v21 = vmax.f32 %v11099_v15, %v11128_v8  ;;  %v11143_v15 = vld [vmem:[#allocation55_spill] sm:$0xff] }
 0x210   : > { %11094 = vst [vmem:[#allocation35_spill] sm:$0xff] %v6693_v46  ;;  %v11118_v26 = vmax.f32 %v11088_v33, %v11117_v7  ;;  %v11122_v36 = vmax.f32 %v11092_v28, %v11121_v52  ;;  %v11131_v33 = vld [vmem:[#allocation172_spill] sm:$0xff]  ;;  %v11135_v28 = vld [vmem:[#allocation150_spill] sm:$0xff]  ;;  %v11140_v22 = vld [vmem:[#allocation61_spill] sm:$0xff] }
 0x211   : > { %11097 = vst [vmem:[#allocation176_spill] sm:$0xff] %v6699_v54  ;;  %v11141_v60 = vmax.f32 %v6353_v4, %v11140_v22  ;;  %v11154_v4 = vld [vmem:[#allocation116_spill] sm:$0xff] }
 0x212   : > { %11101 = vst [vmem:[#allocation36_spill] sm:$0xff] %v6705_v10  ;;  %v6741_v10 = vmax.f32 %v11122_v36, %v11120_v61  ;;  %v11136_v61 = vld [vmem:[#allocation158_spill] sm:$0xff] }
 0x213   : > { %11105 = vst [vmem:[#allocation177_spill] sm:$0xff] %v6711_v43  ;;  %v6735_v43 = vmax.f32 %v11118_v26, %v11116_v57  ;;  %v11132_v57 = vld [vmem:[#allocation152_spill] sm:$0xff]  ;;  %v11137_v36 = vmax.f32 %v11107_v2, %v11136_v61  ;;  %v6771_v16 = vmax.f32 %v11141_v60, %v11139_v24  ;;  %v11150_v2 = vld [vmem:[#allocation157_spill] sm:$0xff]  ;;  %v11155_v24 = vmax.f32 %v6385_v59, %v6415_v39 }
 0x214   : > { %11109 = vst [vmem:[#allocation86_spill] sm:$0xff] %v6717_v1  ;;  %v11133_v26 = vmax.f32 %v11103_v13, %v11132_v57  ;;  %v11146_v13 = vld [vmem:[#allocation151_spill] sm:$0xff]  ;;  %v11168_v59 = vld [vmem:[#allocation105_spill] sm:$0xff] }
 0x215   : > { %11112 = vst [vmem:[#allocation178_spill] sm:$0xff] %v6723_v53  ;;  %v6765_v30 = vmax.f32 %v11137_v36, %v11135_v28  ;;  %v11151_v28 = vld [vmem:[#allocation84_spill] sm:$0xff]  ;;  %v6795_v60 = vmax.f32 %v11155_v24, %v11154_v4  ;;  %v11169_v4 = vmax.f32 %v11140_v22, %v6439_v40 }
 0x216   : > { %11115 = vst [vmem:[#allocation26_spill] sm:$0xff] %v6729_v56  ;;  %v6753_v56 = vmax.f32 %v11129_v21, %v11127_v14  ;;  %v11144_v14 = vmax.f32 %v6369_v50, %v6405_v25  ;;  %v11152_v36 = vmax.f32 %v11121_v52, %v11151_v28  ;;  %v11157_v50 = vld [vmem:[#allocation49_spill] sm:$0xff]  ;;  %v11164_v52 = vld [vmem:[#allocation136_spill] sm:$0xff]  ;;  %v11177_v40 = vmax.f32 %v11151_v28, %v11016_v9  ;;  %v11189_v28 = vld [vmem:[#allocation79_spill] sm:$0xff] }
 0x217   : > { %11119 = vst [vmem:[#allocation179_spill] sm:$0xff] %v6735_v43  ;;  %v6759_v43 = vmax.f32 %v11133_v26, %v11131_v33  ;;  %v11147_v33 = vld [vmem:[#allocation98_spill] sm:$0xff]  ;;  %v6819_v24 = vmax.f32 %v11169_v4, %v11168_v59  ;;  %v6846_v59 = vmax.f32 %v1726_v29, %v6481_v19  ;;  %v11193_v19 = vld [vmem:[#allocation27_spill] sm:$0xff] }
 0x218   : > { %11123 = vst [vmem:[#allocation43_spill] sm:$0xff] %v6741_v10  ;;  %v6777_v21 = vmax.f32 %v11144_v14, %v11143_v15  ;;  %v11148_v26 = vmax.f32 %v11117_v7, %v11147_v33  ;;  %v11158_v15 = vmax.f32 %v11128_v8, %v6427_v62  ;;  %v11160_v7 = vld [vmem:[#allocation135_spill] sm:$0xff]  ;;  %v11171_v62 = vld [vmem:[#allocation58_spill] sm:$0xff]  ;;  %v11172_v8 = vmax.f32 %v6405_v25, %v6449_v6 }
 0x219   : > { %11126 = vst [vmem:[#allocation180_spill] sm:$0xff] %v6747_v44  ;;  %v6837_v22 = vmax.f32 %v11177_v40, %v6149_v5  ;;  %v11180_v6 = vmax.f32 %v6415_v39, %v6471_v58  ;;  %v1603_v4 = vld [vmem:[#allocation2 + $0x278] sm:$0xff]  ;;  %v6861_v58 = vmax.f32 %v1729_v0, %v11189_v28  ;;  %v11194_v29 = vmax.f32 %v11014_v23, %v11193_v19  ;;  %v11203_v0 = vld [vmem:[#allocation101_spill] sm:$0xff]  ;;  %v11210_v28 = vld [vmem:[#allocation76_spill] sm:$0xff] }
 0x21a   : > { %11130 = vst [vmem:[#allocation45_spill] sm:$0xff] %v6753_v56  ;;  %v6789_v56 = vmax.f32 %v11152_v36, %v11150_v2  ;;  %v6801_v14 = vmax.f32 %v11158_v15, %v11157_v50  ;;  %v11165_v2 = vld [vmem:[#allocation111_spill] sm:$0xff]  ;;  %v6825_v50 = vmax.f32 %v11172_v8, %v11171_v62  ;;  %v1601_v15 = vld [vmem:[#allocation2 + $0x268] sm:$0xff]  ;;  %v11191_v39 = vld [vmem:[#allocation106_spill] sm:$0xff] }
 0x21b   : > { %11134 = vst [vmem:[#allocation181_spill] sm:$0xff] %v6759_v43  ;;  %v6783_v43 = vmax.f32 %v11148_v26, %v11146_v13  ;;  %v11161_v13 = vld [vmem:[#allocation110_spill] sm:$0xff]  ;;  %v11166_v36 = vmax.f32 %v11136_v61, %v11165_v2  ;;  %v11175_v61 = vmax.f32 %v11147_v33, %v11014_v23  ;;  %v11183_v62 = vld [vmem:[#allocation99_spill] sm:$0xff]  ;;  %v11187_v5 = vmax.f32 %v11165_v2, %v6209_v37  ;;  %v11201_v2 = vld [vmem:[#allocation88_spill] sm:$0xff] }
 0x21c   : > { %11138 = vst [vmem:[#allocation50_spill] sm:$0xff] %v6765_v30  ;;  %v11162_v26 = vmax.f32 %v11132_v57, %v11161_v13  ;;  %v1600_v57 = vld [vmem:[#allocation2 + $0x260] sm:$0xff]  ;;  %v11184_v33 = vmax.f32 %v11161_v13, %v6205_v34  ;;  %v6870_v40 = vmax.f32 %v11194_v29, %v6195_v45  ;;  %v11196_v34 = vld [vmem:[#allocation112_spill] sm:$0xff]  ;;  %v11197_v13 = vld [vmem:[#allocation118_spill] sm:$0xff]  ;;  %v6890_v23 = vmax.f32 %v6569_v41, %v1601_v15 }
 0x21d   : > { %11142 = vst [vmem:[#allocation182_spill] sm:$0xff] %v6771_v16  ;;  %v1822_v15 = vrot.slane %v6603_v48, 7  ;;  %v1833_v29 = vrot.slane %v6861_v58, 7 }
 0x21e   : > { %11145 = vst [vmem:[#allocation52_spill] sm:$0xff] %v6777_v21  ;;  %v6813_v21 = vmax.f32 %v11166_v36, %v11164_v52  ;;  %v11179_v36 = vld [vmem:[#allocation117_spill] sm:$0xff]  ;;  %v6852_v8 = vmax.f32 %v11184_v33, %v11183_v62  ;;  %v6880_v62 = vmax.f32 %v1734_v20, %v11201_v2  ;;  %v1826_v2 = vrot.slane %v6699_v54, 7 }
 0x21f   : > { %11149 = vst [vmem:[#allocation183_spill] sm:$0xff] %v6783_v43  ;;  %v6807_v43 = vmax.f32 %v11162_v26, %v11160_v7  ;;  %v1602_v7 = vld [vmem:[#allocation2 + $0x270] sm:$0xff]  ;;  %v11174_v26 = vld [vmem:[#allocation83_spill] sm:$0xff]  ;;  %v6843_v25 = vmax.f32 %v11180_v6, %v11179_v36  ;;  %v6874_v36 = vmax.f32 %v11197_v13, %v11196_v34  ;;  %v1831_v13 = vrot.slane %v6819_v24, 7 }
 0x220   : > { %11153 = vst [vmem:[#allocation57_spill] sm:$0xff] %v6789_v56  ;;  %v6831_v52 = vmax.f32 %v11175_v61, %v11174_v26  ;;  %v11186_v26 = vld [vmem:[#allocation4_spill] sm:$0xff]  ;;  %v6864_v61 = vmax.f32 %v1730_v31, %v11191_v39  ;;  %v11199_v6 = vld [vmem:[#allocation87_spill] sm:$0xff]  ;;  %v11204_v33 = vld [vmem:[#allocation89_spill] sm:$0xff]  ;;  %v6892_v45 = vmax.f32 %v1738_v47, %v1602_v7  ;;  %v6895_v39 = vmax.f32 %v11210_v28, %v1603_v4 }
 0x221   : > { %11156 = vst [vmem:[#allocation38_spill] sm:$0xff] %v6795_v60  ;;  %v6858_v9 = vmax.f32 %v11187_v5, %v11186_v26  ;;  %v6877_v37 = vmax.f32 %v1733_v18, %v11199_v6  ;;  %v6884_v31 = vmax.f32 %v11204_v33, %v11203_v0  ;;  %v11206_v26 = vld [vmem:[#allocation107_spill] sm:$0xff]  ;;  %v1821_v47 = vrot.slane %v6583_v17, 7 }
 0x222   : > { %11159 = vst [vmem:[#allocation100_spill] sm:$0xff] %v6801_v14  ;;  %v6887_v5 = vmax.f32 %v11206_v26, %v1600_v57  ;;  %v11212_v18 = vld [vmem:[#allocation91_spill] sm:$0xff]  ;;  %v1823_v7 = vrot.slane %v6627_v12, 7  ;;  %v1824_v4 = vrot.slane %v6651_v51, 7  ;;  %v1825_v6 = vrot.slane %v6675_v55, 7 }
 0x223   : > { %11163 = vst [vmem:[#allocation142_spill] sm:$0xff] %v6807_v43  ;;  %v11213_v28 = vld [vmem:[#allocation119_spill] sm:$0xff]  ;;  %v1827_v0 = vrot.slane %v6723_v53, 7  ;;  %v1828_v33 = vrot.slane %v6747_v44, 7  ;;  %v1829_v26 = vrot.slane %v6771_v16, 7  ;;  %v1830_v57 = vrot.slane %v6795_v60, 7 }
 0x224   : > { %11167 = vst [vmem:[#allocation146_spill] sm:$0xff] %v6813_v21  ;;  %v1820_v41 = vrot.slane %v11213_v28, 7  ;;  %v1832_v34 = vrot.slane %v6843_v25, 7  ;;  %v1834_v20 = vrot.slane %v6877_v37, 7  ;;  %v1835_v19 = vrot.slane %v6890_v23, 7  ;;  %v11215_v60 = vld [vmem:[#allocation30_spill] sm:$0xff] }
 0x225   : > { %11170 = vst [vmem:[#allocation56_spill] sm:$0xff] %v6819_v24  ;;  %v1841_v24 = vrot.slane %v11215_v60, 7  ;;  %v11216_v16 = vld [vmem:[#allocation36_spill] sm:$0xff]  ;;  %v11217_v44 = vld [vmem:[#allocation26_spill] sm:$0xff]  ;;  %v11218_v53 = vld [vmem:[#allocation45_spill] sm:$0xff]  ;;  %v1851_v60 = vrot.slane %v6892_v45, 7 }
 0x226   : > { %11173 = vst [vmem:[#allocation169_spill] sm:$0xff] %v6825_v50  ;;  %v11219_v54 = vld [vmem:[#allocation52_spill] sm:$0xff] }
 0x227   : > { %11176 = vst [vmem:[#allocation54_spill] sm:$0xff] %v6831_v52  ;;  %v11214_v52 = vld [vmem:[#allocation23_spill] sm:$0xff] }
 0x228   : > { %11178 = vst [vmem:[#allocation127_spill] sm:$0xff] %v6837_v22  ;;  %v1840_v43 = vrot.slane %v11214_v52, 7  ;;  %v1850_v52 = vrot.slane %v6880_v62, 7 }
 0x229   : > { %11181 = vst [vmem:[#allocation154_spill] sm:$0xff] %v6843_v25  ;;  %v1842_v25 = vrot.slane %v11216_v16, 7 }
 0x22a   : > { %11182 = vst [vmem:[#allocation133_spill] sm:$0xff] %v6846_v59 }
 0x22b   : > { %11185 = vst [vmem:[#allocation144_spill] sm:$0xff] %v6852_v8  ;;  %v1839_v8 = vrot.slane %v6633_v27, 7  ;;  %v1849_v27 = vrot.slane %v6864_v61, 7 }
 0x22c   : > { %11188 = vst [vmem:[#allocation59_spill] sm:$0xff] %v6858_v9 }
 0x22d   : > { %11190 = vst [vmem:[#allocation85_spill] sm:$0xff] %v6861_v58  ;;  %v1843_v58 = vrot.slane %v11217_v44, 7 }
 0x22e   : > { %11192 = vst [vmem:[#allocation39_spill] sm:$0xff] %v6864_v61 }
 0x22f   : > { %11195 = vst [vmem:[#allocation128_spill] sm:$0xff] %v6870_v40  ;;  %v1838_v40 = vrot.slane %v6609_v11, 7  ;;  %v1848_v11 = vrot.slane %v6846_v59, 7  ;;  %v6959_v59 = vsel %vm842_vm2, %v1823_v7, %v1839_v8 }
 0x230   : > { %11198 = vst [vmem:[#allocation167_spill] sm:$0xff] %v6874_v36 }
 0x231   : > { %11200 = vst [vmem:[#allocation145_spill] sm:$0xff] %v6877_v37  ;;  %v1844_v37 = vrot.slane %v11218_v53, 7 }
 0x232   : > { %11202 = vst [vmem:[#allocation131_spill] sm:$0xff] %v6880_v62  ;;  %v6963_v62 = vsel %vm842_vm2, %v1824_v4, %v1840_v43 }
 0x233   : > { %11205 = vst [vmem:[#allocation73_spill] sm:$0xff] %v6884_v31  ;;  %v1837_v31 = vrot.slane %v6587_v63, 7  ;;  %v1847_v63 = vrot.slane %v6825_v50, 7  ;;  %v6979_v8 = vsel %vm842_vm2, %v1828_v33, %v1844_v37  ;;  %v6999_v37 = vsel %vm842_vm2, %v1833_v29, %v1849_v27 }
 0x234   : > { %11207 = vst [vmem:[#allocation170_spill] sm:$0xff] %v6887_v5 }
 0x235   : > { %11208 = vst [vmem:[#allocation77_spill] sm:$0xff] %v6890_v23  ;;  %v1845_v23 = vrot.slane %v11219_v54, 7  ;;  %v6951_v53 = vsel %vm842_vm2, %v1821_v47, %v1837_v31  ;;  %v6971_v31 = vsel %vm842_vm2, %v1826_v2, %v1842_v25  ;;  %v6991_v25 = vsel %vm842_vm2, %v1831_v13, %v1847_v63 }
 0x236   : > { %11209 = vst [vmem:[#allocation44_spill] sm:$0xff] %v6892_v45 }
 0x237   : > { %11211 = vst [vmem:[#allocation90_spill] sm:$0xff] %v6895_v39  ;;  %v1836_v39 = vrot.slane %v6565_v35, 7  ;;  %v1846_v35 = vrot.slane %v6801_v14, 7  ;;  %v6955_v14 = vsel %vm842_vm2, %v1822_v15, %v1838_v40  ;;  %v6975_v40 = vsel %vm842_vm2, %v1827_v0, %v1843_v58 }
 0x238   : > { %11222 = vst [vmem:[#allocation148_spill] sm:$0xff] %v6951_v53  ;;  %v6983_v43 = vsel %vm842_vm2, %v1829_v26, %v1845_v23  ;;  %v6995_v58 = vsel %vm842_vm2, %v1832_v34, %v1848_v11  ;;  %v7003_v23 = vsel %vm842_vm2, %v1834_v20, %v1850_v52  ;;  %v11239_v11 = vrot.slane %v6577_v49, 7 }
 0x239   : > { %v6947_v16 = vsel %vm842_vm2, %v1820_v41, %v1836_v39  ;;  %11223 = vst [vmem:[#allocation168_spill] sm:$0xff] %v6955_v14  ;;  %v6967_v39 = vsel %vm842_vm2, %v1825_v6, %v1841_v24  ;;  %v6987_v24 = vsel %vm842_vm2, %v1830_v57, %v1846_v35  ;;  %v7007_v35 = vsel %vm842_vm2, %v1835_v19, %v1851_v60 }
 0x23a   : > { %11221 = vst [vmem:[#allocation129_spill] sm:$0xff] %v6947_v16  ;;  %v7019_v27 = vsel %vm842_vm2, %v11239_v11, %v1821_v47  ;;  %v11243_v60 = vrot.slane %v6621_v38, 7  ;;  %v11247_v47 = vrot.slane %v6669_v32, 7  ;;  %v1911_v14 = vrot.slane %v6825_v50, 1  ;;  %v11290_v16 = vld [vmem:[#allocation131_spill] sm:$0xff] }
 0x23b   : > { %11224 = vst [vmem:[#allocation32_spill] sm:$0xff] %v6959_v59  ;;  %v11288_v59 = vld [vmem:[#allocation100_spill] sm:$0xff] }
 0x23c   : > { %11225 = vst [vmem:[#allocation113_spill] sm:$0xff] %v6963_v62  ;;  %v7043_v11 = vsel %vm842_vm2, %v11247_v47, %v1825_v6  ;;  %v11255_v6 = vrot.slane %v6765_v30, 7  ;;  %v11286_v62 = vld [vmem:[#allocation36_spill] sm:$0xff]  ;;  %v11302_v30 = vld [vmem:[#allocation54_spill] sm:$0xff] }
 0x23d   : > { %11226 = vst [vmem:[#allocation102_spill] sm:$0xff] %v6967_v39  ;;  %v11284_v39 = vld [vmem:[#allocation23_spill] sm:$0xff] }
 0x23e   : > { %11227 = vst [vmem:[#allocation93_spill] sm:$0xff] %v6971_v31  ;;  %v7067_v47 = vsel %vm842_vm2, %v11255_v6, %v1829_v26  ;;  %v11263_v26 = vrot.slane %v6858_v9, 7  ;;  %v11282_v31 = vld [vmem:[#allocation81_spill] sm:$0xff]  ;;  %v11298_v9 = vld [vmem:[#allocation179_spill] sm:$0xff]  ;;  %v11306_v32 = vld [vmem:[#allocation90_spill] sm:$0xff] }
 0x23f   : > { %11228 = vst [vmem:[#allocation149_spill] sm:$0xff] %v6975_v40  ;;  %v11280_v40 = vld [vmem:[#allocation92_spill] sm:$0xff] }
 0x240   : > { %11229 = vst [vmem:[#allocation130_spill] sm:$0xff] %v6979_v8  ;;  %v7091_v6 = vsel %vm842_vm2, %v11263_v26, %v1833_v29  ;;  %v11278_v8 = vld [vmem:[#allocation145_spill] sm:$0xff]  ;;  %v1907_v29 = vrot.slane %v11217_v44, 1 }
 0x241   : > { %11230 = vst [vmem:[#allocation155_spill] sm:$0xff] %v6983_v43  ;;  %v11276_v43 = vld [vmem:[#allocation154_spill] sm:$0xff] }
 0x242   : > { %11231 = vst [vmem:[#allocation46_spill] sm:$0xff] %v6987_v24  ;;  %v11237_v24 = vrot.slane %v11212_v18, 7 }
 0x243   : > { %11232 = vst [vmem:[#allocation78_spill] sm:$0xff] %v6991_v25  ;;  %v11272_v25 = vld [vmem:[#allocation180_spill] sm:$0xff] }
 0x244   : > { %11233 = vst [vmem:[#allocation114_spill] sm:$0xff] %v6995_v58  ;;  %v7013_v63 = vsel %vm842_vm2, %v11237_v24, %v1820_v41  ;;  %v11245_v41 = vrot.slane %v6645_v3, 7  ;;  %v1909_v58 = vrot.slane %v11219_v54, 1 }
 0x245   : > { %11234 = vst [vmem:[#allocation147_spill] sm:$0xff] %v6999_v37  ;;  %v11241_v37 = vrot.slane %v6597_v42, 7 }
 0x246   : > { %11235 = vst [vmem:[#allocation156_spill] sm:$0xff] %v7003_v23  ;;  %v7037_v24 = vsel %vm842_vm2, %v11245_v41, %v1824_v4  ;;  %v11253_v4 = vrot.slane %v6741_v10, 7  ;;  %v1906_v23 = vrot.slane %v11286_v62, 1  ;;  %v11303_v10 = vld [vmem:[#allocation144_spill] sm:$0xff] }
 0x247   : > { %11236 = vst [vmem:[#allocation153_spill] sm:$0xff] %v7007_v35  ;;  %v7025_v52 = vsel %vm842_vm2, %v11241_v37, %v1822_v15  ;;  %v7031_v35 = vsel %vm842_vm2, %v11243_v60, %v1823_v7  ;;  %v11249_v15 = vrot.slane %v6693_v46, 7  ;;  %v11251_v7 = vrot.slane %v6717_v1, 7  ;;  %v11304_v1 = vld [vmem:[#allocation128_spill] sm:$0xff]  ;;  %v11305_v46 = vld [vmem:[#allocation73_spill] sm:$0xff] }
 0x248   : > { %11238 = vst [vmem:[#allocation134_spill] sm:$0xff] %v7013_v63  ;;  %v7061_v41 = vsel %vm842_vm2, %v11253_v4, %v1828_v33  ;;  %v11261_v33 = vrot.slane %v6837_v22, 7  ;;  %v1914_v63 = vrot.slane %v11290_v16, 1  ;;  %v11299_v22 = vld [vmem:[#allocation181_spill] sm:$0xff] }
 0x249   : > { %11240 = vst [vmem:[#allocation34_spill] sm:$0xff] %v7019_v27  ;;  %v7049_v37 = vsel %vm842_vm2, %v11249_v15, %v1826_v2  ;;  %v7055_v60 = vsel %vm842_vm2, %v11251_v7, %v1827_v0  ;;  %v11257_v2 = vrot.slane %v6789_v56, 7  ;;  %v11259_v0 = vrot.slane %v6813_v21, 7  ;;  %v11300_v21 = vld [vmem:[#allocation183_spill] sm:$0xff]  ;;  %v11301_v56 = vld [vmem:[#allocation142_spill] sm:$0xff] }
 0x24a   : > { %11242 = vst [vmem:[#allocation103_spill] sm:$0xff] %v7025_v52  ;;  %v7085_v4 = vsel %vm842_vm2, %v11261_v33, %v1832_v34  ;;  %v1904_v34 = vrot.slane %v11284_v39, 1  ;;  %v11289_v52 = vld [vmem:[#allocation133_spill] sm:$0xff]  ;;  %v1913_v27 = vrot.slane %v6864_v61, 1  ;;  %v11291_v39 = vld [vmem:[#allocation108_spill] sm:$0xff]  ;;  %v1923_v61 = vrot.slane %v11298_v9, 1 }
 0x24b   : > { %11244 = vst [vmem:[#allocation132_spill] sm:$0xff] %v7031_v35  ;;  %v7073_v15 = vsel %vm842_vm2, %v11257_v2, %v1830_v57  ;;  %v7079_v7 = vsel %vm842_vm2, %v11259_v0, %v1831_v13  ;;  %v11265_v57 = vrot.slane %v6874_v36, 7  ;;  %v11267_v13 = vrot.slane %v6887_v5, 7  ;;  %v11296_v5 = vld [vmem:[#allocation175_spill] sm:$0xff]  ;;  %v11297_v36 = vld [vmem:[#allocation177_spill] sm:$0xff]  ;;  %v11373_v9 = vld [vmem:[#allocation26_spill] sm:$0xff] }
 0x24c   : > { %11246 = vst [vmem:[#allocation173_spill] sm:$0xff] %v7037_v24  ;;  %v11287_v24 = vld [vmem:[#allocation45_spill] sm:$0xff]  ;;  %v1910_v35 = vrot.slane %v11288_v59, 1  ;;  %v1912_v53 = vrot.slane %v11289_v52, 1  ;;  %v1916_v62 = vrot.slane %v11291_v39, 1  ;;  %v1921_v50 = vrot.slane %v11296_v5, 1 }
 0x24d   : > { %11248 = vst [vmem:[#allocation171_spill] sm:$0xff] %v7043_v11  ;;  %v7097_v2 = vsel %vm842_vm2, %v11265_v57, %v1834_v20  ;;  %v7103_v0 = vsel %vm842_vm2, %v11267_v13, %v1835_v19  ;;  %v11270_v20 = vld [vmem:[#allocation176_spill] sm:$0xff]  ;;  %v11273_v19 = vld [vmem:[#allocation182_spill] sm:$0xff]  ;;  %v1900_v57 = vrot.slane %v11280_v40, 1  ;;  %v1908_v26 = vrot.slane %v11287_v24, 1 }
 0x24e   : > { %11250 = vst [vmem:[#allocation174_spill] sm:$0xff] %v7049_v37  ;;  %v11283_v37 = vld [vmem:[#allocation109_spill] sm:$0xff]  ;;  %v11285_v11 = vld [vmem:[#allocation30_spill] sm:$0xff]  ;;  %v1922_v52 = vrot.slane %v11297_v36, 1  ;;  %v1924_v16 = vrot.slane %v11299_v22, 1  ;;  %v1926_v39 = vrot.slane %v11301_v56, 1 }
 0x24f   : > { %11252 = vst [vmem:[#allocation51_spill] sm:$0xff] %v7055_v60  ;;  %v11281_v60 = vld [vmem:[#allocation74_spill] sm:$0xff]  ;;  %v1903_v13 = vrot.slane %v11283_v37, 1  ;;  %v1905_v33 = vrot.slane %v11285_v11, 1  ;;  %v1915_v11 = vrot.slane %v6892_v45, 1  ;;  %v11292_v37 = vld [vmem:[#allocation120_spill] sm:$0xff]  ;;  %v7155_v36 = vsel %vm923_vm3, %v1900_v57, %v1916_v62 }
 0x250   : > { %11254 = vst [vmem:[#allocation115_spill] sm:$0xff] %v7061_v41  ;;  %v11279_v41 = vld [vmem:[#allocation77_spill] sm:$0xff]  ;;  %v1917_v44 = vrot.slane %v11292_v37, 1  ;;  %v11295_v40 = vld [vmem:[#allocation82_spill] sm:$0xff]  ;;  %v1925_v45 = vrot.slane %v11300_v21, 1  ;;  %v1927_v37 = vrot.slane %v11302_v30, 1 }
 0x251   : > { %11256 = vst [vmem:[#allocation42_spill] sm:$0xff] %v7067_v47  ;;  %v11277_v47 = vld [vmem:[#allocation85_spill] sm:$0xff]  ;;  %v1920_v59 = vrot.slane %v11295_v40, 1  ;;  %v1930_v40 = vrot.slane %v11305_v46, 1  ;;  %v1931_v5 = vrot.slane %v11306_v32, 1  ;;  %v7175_v62 = vsel %vm923_vm3, %v1905_v33, %v1921_v50  ;;  %v11372_v30 = vld [vmem:[#allocation36_spill] sm:$0xff] }
 0x252   : > { %11258 = vst [vmem:[#allocation172_spill] sm:$0xff] %v7073_v15  ;;  %v11275_v15 = vld [vmem:[#allocation56_spill] sm:$0xff]  ;;  %v7195_v50 = vsel %vm923_vm3, %v1910_v35, %v1926_v39  ;;  %v11323_v32 = vrot.slane %v11213_v28, 1  ;;  %v2002_v21 = vrot.slane %v11372_v30, 6 }
 0x253   : > { %11260 = vst [vmem:[#allocation152_spill] sm:$0xff] %v7079_v7  ;;  %v1902_v7 = vrot.slane %v11282_v31, 1  ;;  %v11293_v31 = vld [vmem:[#allocation94_spill] sm:$0xff]  ;;  %v7171_v46 = vsel %vm923_vm3, %v1904_v34, %v1920_v59  ;;  %v7191_v59 = vsel %vm923_vm3, %v1909_v58, %v1925_v45  ;;  %v7211_v45 = vsel %vm923_vm3, %v1914_v63, %v1930_v40 }
 0x254   : > { %11262 = vst [vmem:[#allocation150_spill] sm:$0xff] %v7085_v4  ;;  %v1901_v4 = vrot.slane %v11281_v60, 1  ;;  %v1918_v24 = vrot.slane %v11293_v31, 1  ;;  %v11294_v60 = vld [vmem:[#allocation13_spill] sm:$0xff]  ;;  %v1928_v31 = vrot.slane %v11303_v10, 1  ;;  %v7215_v39 = vsel %vm923_vm3, %v1915_v11, %v1931_v5 }
 0x255   : > { %11264 = vst [vmem:[#allocation158_spill] sm:$0xff] %v7091_v6  ;;  %v11269_v6 = vld [vmem:[#allocation14_spill] sm:$0xff]  ;;  %v1919_v54 = vrot.slane %v11294_v60, 1  ;;  %v1929_v60 = vrot.slane %v11304_v1, 1  ;;  %v11329_v5 = vrot.slane %v6627_v12, 1 }
 0x256   : > { %11266 = vst [vmem:[#allocation104_spill] sm:$0xff] %v7097_v2  ;;  %v11271_v2 = vld [vmem:[#allocation178_spill] sm:$0xff]  ;;  %v7159_v22 = vsel %vm923_vm3, %v1901_v4, %v1917_v44  ;;  %v7163_v56 = vsel %vm923_vm3, %v1902_v7, %v1918_v24  ;;  %v7179_v44 = vsel %vm923_vm3, %v1906_v23, %v1922_v52  ;;  %v7183_v24 = vsel %vm923_vm3, %v1907_v29, %v1923_v61 }
 0x257   : > { %11268 = vst [vmem:[#allocation61_spill] sm:$0xff] %v7103_v0  ;;  %v11274_v0 = vld [vmem:[#allocation38_spill] sm:$0xff]  ;;  %v7167_v10 = vsel %vm923_vm3, %v1903_v13, %v1919_v54  ;;  %v7187_v54 = vsel %vm923_vm3, %v1908_v26, %v1924_v16  ;;  %v7199_v52 = vsel %vm923_vm3, %v1911_v14, %v1927_v37  ;;  %v7203_v61 = vsel %vm923_vm3, %v1912_v53, %v1928_v31 }
 0x258   : > { %11307 = vst [vmem:[#allocation55_spill] sm:$0xff] %v7155_v36  ;;  %v7207_v16 = vsel %vm923_vm3, %v1913_v27, %v1929_v60  ;;  %v7221_v37 = vsel %vm923_vm3, %v11323_v32, %v1900_v57  ;;  %v11325_v31 = vrot.slane %v6583_v17, 1  ;;  %v11331_v32 = vrot.slane %v6651_v51, 1 }
 0x259   : > { %11308 = vst [vmem:[#allocation151_spill] sm:$0xff] %v7159_v22 }
 0x25a   : > { %11309 = vst [vmem:[#allocation98_spill] sm:$0xff] %v7163_v56  ;;  %v7227_v60 = vsel %vm923_vm3, %v11325_v31, %v1901_v4  ;;  %v7245_v57 = vsel %vm923_vm3, %v11331_v32, %v1904_v34  ;;  %v11333_v4 = vrot.slane %v11269_v6, 1  ;;  %v11339_v34 = vrot.slane %v11272_v25, 1 }
 0x25b   : > { %11310 = vst [vmem:[#allocation157_spill] sm:$0xff] %v7167_v10 }
 0x25c   : > { %11311 = vst [vmem:[#allocation84_spill] sm:$0xff] %v7171_v46  ;;  %v7251_v31 = vsel %vm923_vm3, %v11333_v4, %v1905_v33  ;;  %v7269_v32 = vsel %vm923_vm3, %v11339_v34, %v1908_v26  ;;  %v11341_v33 = vrot.slane %v11273_v19, 1  ;;  %v11347_v26 = vrot.slane %v11276_v43, 1 }
 0x25d   : > { %11312 = vst [vmem:[#allocation116_spill] sm:$0xff] %v7175_v62  ;;  %v1995_v62 = vrot.slane %v11279_v41, 6 }
 0x25e   : > { %11313 = vst [vmem:[#allocation49_spill] sm:$0xff] %v7179_v44  ;;  %v7275_v4 = vsel %vm923_vm3, %v11341_v33, %v1909_v58  ;;  %v7293_v34 = vsel %vm923_vm3, %v11347_v26, %v1912_v53  ;;  %v11349_v58 = vrot.slane %v11277_v47, 1  ;;  %v1984_v53 = vrot.slane %v6651_v51, 6 }
 0x25f   : > { %11314 = vst [vmem:[#allocation135_spill] sm:$0xff] %v7183_v24  ;;  %v1985_v26 = vrot.slane %v11269_v6, 6  ;;  %v1991_v24 = vrot.slane %v11275_v15, 6  ;;  %v1993_v44 = vrot.slane %v11277_v47, 6  ;;  %v2003_v47 = vrot.slane %v11373_v9, 6  ;;  %v11381_v6 = vld [vmem:[#allocation44_spill] sm:$0xff] }
 0x260   : > { %11315 = vst [vmem:[#allocation110_spill] sm:$0xff] %v7187_v54  ;;  %v7299_v33 = vsel %vm923_vm3, %v11349_v58, %v1913_v27  ;;  %v11365_v54 = vld [vmem:[#allocation170_spill] sm:$0xff]  ;;  %v1987_v27 = vrot.slane %v11271_v2, 6  ;;  %v1988_v58 = vrot.slane %v11272_v25, 6  ;;  %v11378_v25 = vld [vmem:[#allocation133_spill] sm:$0xff] }
 0x261   : > { %11316 = vst [vmem:[#allocation136_spill] sm:$0xff] %v7191_v59  ;;  %v11363_v59 = vld [vmem:[#allocation59_spill] sm:$0xff] }
 0x262   : > { %11317 = vst [vmem:[#allocation111_spill] sm:$0xff] %v7195_v50  ;;  %v11361_v50 = vld [vmem:[#allocation146_spill] sm:$0xff] }
 0x263   : > { %11318 = vst [vmem:[#allocation105_spill] sm:$0xff] %v7199_v52  ;;  %v11358_v52 = vld [vmem:[#allocation43_spill] sm:$0xff] }
 0x264   : > { %11319 = vst [vmem:[#allocation58_spill] sm:$0xff] %v7203_v61  ;;  %v1989_v61 = vrot.slane %v11273_v19, 6  ;;  %v11377_v19 = vld [vmem:[#allocation169_spill] sm:$0xff] }
 0x265   : > { %11320 = vst [vmem:[#allocation83_spill] sm:$0xff] %v7207_v16  ;;  %v11327_v16 = vrot.slane %v6603_v48, 1 }
 0x266   : > { %11321 = vst [vmem:[#allocation117_spill] sm:$0xff] %v7211_v45  ;;  %v1986_v45 = vrot.slane %v11270_v20, 6 }
 0x267   : > { %11322 = vst [vmem:[#allocation99_spill] sm:$0xff] %v7215_v39  ;;  %v7233_v40 = vsel %vm923_vm3, %v11327_v16, %v1902_v7  ;;  %v7239_v39 = vsel %vm923_vm3, %v11329_v5, %v1903_v13  ;;  %v11335_v7 = vrot.slane %v11270_v20, 1  ;;  %v11337_v13 = vrot.slane %v11271_v2, 1  ;;  %v11379_v2 = vld [vmem:[#allocation39_spill] sm:$0xff] }
 0x268   : > { %11324 = vst [vmem:[#allocation4_spill] sm:$0xff] %v7221_v37  ;;  %v11371_v37 = vld [vmem:[#allocation30_spill] sm:$0xff]  ;;  %v11380_v20 = vld [vmem:[#allocation131_spill] sm:$0xff] }
 0x269   : > { %11326 = vst [vmem:[#allocation79_spill] sm:$0xff] %v7227_v60  ;;  %v7257_v16 = vsel %vm923_vm3, %v11335_v7, %v1906_v23  ;;  %v7263_v5 = vsel %vm923_vm3, %v11337_v13, %v1907_v29  ;;  %v11343_v23 = vrot.slane %v11274_v0, 1  ;;  %v11345_v29 = vrot.slane %v11275_v15, 1  ;;  %v11370_v60 = vld [vmem:[#allocation23_spill] sm:$0xff]  ;;  %v11375_v15 = vld [vmem:[#allocation52_spill] sm:$0xff] }
 0x26a   : > { %11328 = vst [vmem:[#allocation106_spill] sm:$0xff] %v7233_v40  ;;  %v11369_v40 = vld [vmem:[#allocation109_spill] sm:$0xff]  ;;  %v2000_v36 = vrot.slane %v11370_v60, 6  ;;  %v2001_v1 = vrot.slane %v11371_v37, 6  ;;  %v2010_v60 = vrot.slane %v11380_v20, 6  ;;  %v2011_v37 = vrot.slane %v11381_v6, 6 }
 0x26b   : > { %11330 = vst [vmem:[#allocation27_spill] sm:$0xff] %v7239_v39  ;;  %v7281_v7 = vsel %vm923_vm3, %v11343_v23, %v1910_v35  ;;  %v7287_v13 = vsel %vm923_vm3, %v11345_v29, %v1911_v14  ;;  %v11351_v35 = vrot.slane %v11278_v8, 1  ;;  %v11353_v14 = vrot.slane %v11279_v41, 1  ;;  %v11368_v39 = vld [vmem:[#allocation81_spill] sm:$0xff] }
 0x26c   : > { %11332 = vst [vmem:[#allocation112_spill] sm:$0xff] %v7245_v57  ;;  %v11367_v57 = vld [vmem:[#allocation74_spill] sm:$0xff]  ;;  %v1998_v56 = vrot.slane %v11368_v39, 6  ;;  %v1999_v22 = vrot.slane %v11369_v40, 6  ;;  %v2005_v41 = vrot.slane %v11375_v15, 6  ;;  %v2008_v39 = vrot.slane %v11378_v25, 6 }
 0x26d   : > { %11334 = vst [vmem:[#allocation118_spill] sm:$0xff] %v7251_v31  ;;  %v7305_v23 = vsel %vm923_vm3, %v11351_v35, %v1914_v63  ;;  %v7311_v29 = vsel %vm923_vm3, %v11353_v14, %v1915_v11  ;;  %v11356_v63 = vld [vmem:[#allocation35_spill] sm:$0xff]  ;;  %v11359_v11 = vld [vmem:[#allocation50_spill] sm:$0xff]  ;;  %v1980_v35 = vrot.slane %v11213_v28, 6  ;;  %v1983_v14 = vrot.slane %v6627_v12, 6  ;;  %v11366_v31 = vld [vmem:[#allocation92_spill] sm:$0xff] }
 0x26e   : > { %11336 = vst [vmem:[#allocation87_spill] sm:$0xff] %v7257_v16  ;;  %v1994_v16 = vrot.slane %v11278_v8, 6  ;;  %v1996_v46 = vrot.slane %v11366_v31, 6  ;;  %v1997_v10 = vrot.slane %v11367_v57, 6  ;;  %v2007_v57 = vrot.slane %v11377_v19, 6 }
 0x26f   : > { %11338 = vst [vmem:[#allocation88_spill] sm:$0xff] %v7263_v5  ;;  %v1992_v5 = vrot.slane %v11276_v43, 6  ;;  %v11374_v43 = vld [vmem:[#allocation45_spill] sm:$0xff]  ;;  %v2009_v40 = vrot.slane %v11379_v2, 6  ;;  %v7375_v25 = vsel %vm1004_vm4, %v1983_v14, %v1999_v22  ;;  %v7379_v20 = vsel %vm1004_vm4, %v1984_v53, %v2000_v36 }
 0x270   : > { %11340 = vst [vmem:[#allocation101_spill] sm:$0xff] %v7269_v32  ;;  %v1990_v32 = vrot.slane %v11274_v0, 6  ;;  %v2004_v8 = vrot.slane %v11374_v43, 6  ;;  %v11376_v0 = vld [vmem:[#allocation100_spill] sm:$0xff]  ;;  %v7363_v30 = vsel %vm1004_vm4, %v1980_v35, %v1996_v46  ;;  %v7383_v46 = vsel %vm1004_vm4, %v1985_v26, %v2001_v1 }
 0x271   : > { %11342 = vst [vmem:[#allocation89_spill] sm:$0xff] %v7275_v4  ;;  %v11364_v4 = vld [vmem:[#allocation167_spill] sm:$0xff]  ;;  %v2006_v31 = vrot.slane %v11376_v0, 6  ;;  %v7399_v36 = vsel %vm1004_vm4, %v1989_v61, %v2005_v41  ;;  %v7419_v41 = vsel %vm1004_vm4, %v1994_v16, %v2010_v60 }
 0x272   : > { %11344 = vst [vmem:[#allocation107_spill] sm:$0xff] %v7281_v7  ;;  %v11362_v7 = vld [vmem:[#allocation127_spill] sm:$0xff]  ;;  %v7395_v22 = vsel %vm1004_vm4, %v1988_v58, %v2004_v8  ;;  %v7415_v8 = vsel %vm1004_vm4, %v1993_v44, %v2009_v40 }
 0x273   : > { %11346 = vst [vmem:[#allocation76_spill] sm:$0xff] %v7287_v13  ;;  %v1982_v13 = vrot.slane %v6603_v48, 6  ;;  %v7403_v1 = vsel %vm1004_vm4, %v1990_v32, %v2006_v31  ;;  %v7423_v31 = vsel %vm1004_vm4, %v1995_v62, %v2011_v37  ;;  %v11404_v37 = vrot.slane %v6621_v38, 6 }
 0x274   : > { %11348 = vst [vmem:[#allocation91_spill] sm:$0xff] %v7293_v34  ;;  %v1981_v34 = vrot.slane %v6583_v17, 6 }
 0x275   : > { %11350 = vst [vmem:[#allocation119_spill] sm:$0xff] %v7299_v33  ;;  %v11355_v33 = vld [vmem:[#allocation29_spill] sm:$0xff]  ;;  %v7371_v0 = vsel %vm1004_vm4, %v1982_v13, %v1998_v56  ;;  %v7391_v56 = vsel %vm1004_vm4, %v1987_v27, %v2003_v47  ;;  %v7411_v47 = vsel %vm1004_vm4, %v1992_v5, %v2008_v39  ;;  %v11400_v39 = vrot.slane %v6577_v49, 6 }
 0x276   : > { %11352 = vst [vmem:[#allocation184_spill] sm:$0xff] %v7305_v23  ;;  %v11357_v23 = vld [vmem:[#allocation86_spill] sm:$0xff]  ;;  %v7367_v43 = vsel %vm1004_vm4, %v1981_v34, %v1997_v10  ;;  %v7387_v10 = vsel %vm1004_vm4, %v1986_v45, %v2002_v21  ;;  %v7407_v21 = vsel %vm1004_vm4, %v1991_v24, %v2007_v57 }
 0x277   : > { %11354 = vst [vmem:[#allocation185_spill] sm:$0xff] %v7311_v29  ;;  %v11360_v29 = vld [vmem:[#allocation57_spill] sm:$0xff]  ;;  %v7435_v40 = vsel %vm1004_vm4, %v11400_v39, %v1981_v34  ;;  %v11408_v34 = vrot.slane %v11355_v33, 6  ;;  %v2069_v39 = vrot.slane %v11375_v15, 2  ;;  %v11463_v15 = vld [vmem:[#allocation54_spill] sm:$0xff] }
 0x278   : > { %11382 = vst [vmem:[#allocation29_spill] sm:$0xff] %v7363_v30  ;;  %v11459_v30 = vld [vmem:[#allocation179_spill] sm:$0xff] }
 0x279   : > { %11383 = vst [vmem:[#allocation35_spill] sm:$0xff] %v7367_v43  ;;  %v11458_v43 = vld [vmem:[#allocation177_spill] sm:$0xff] }
 0x27a   : > { %11384 = vst [vmem:[#allocation86_spill] sm:$0xff] %v7371_v0  ;;  %v11457_v0 = vld [vmem:[#allocation175_spill] sm:$0xff] }
 0x27b   : > { %11385 = vst [vmem:[#allocation43_spill] sm:$0xff] %v7375_v25  ;;  %v11456_v25 = vld [vmem:[#allocation82_spill] sm:$0xff] }
 0x27c   : > { %11386 = vst [vmem:[#allocation50_spill] sm:$0xff] %v7379_v20  ;;  %v11455_v20 = vld [vmem:[#allocation13_spill] sm:$0xff] }
 0x27d   : > { %11387 = vst [vmem:[#allocation57_spill] sm:$0xff] %v7383_v46  ;;  %v11454_v46 = vld [vmem:[#allocation94_spill] sm:$0xff] }
 0x27e   : > { %11388 = vst [vmem:[#allocation146_spill] sm:$0xff] %v7387_v10  ;;  %v11453_v10 = vld [vmem:[#allocation120_spill] sm:$0xff] }
 0x27f   : > { %11389 = vst [vmem:[#allocation127_spill] sm:$0xff] %v7391_v56  ;;  %v11452_v56 = vld [vmem:[#allocation108_spill] sm:$0xff] }
 0x280   : > { %11390 = vst [vmem:[#allocation59_spill] sm:$0xff] %v7395_v22  ;;  %v11451_v22 = vld [vmem:[#allocation131_spill] sm:$0xff] }
 0x281   : > { %11391 = vst [vmem:[#allocation167_spill] sm:$0xff] %v7399_v36 }
 0x282   : > { %11392 = vst [vmem:[#allocation170_spill] sm:$0xff] %v7403_v1  ;;  %v11398_v1 = vrot.slane %v11212_v18, 6  ;;  %v7447_v18 = vsel %vm1004_vm4, %v11404_v37, %v1983_v14  ;;  %v11412_v14 = vrot.slane %v11357_v23, 6 }
 0x283   : > { %11393 = vst [vmem:[#allocation186_spill] sm:$0xff] %v7407_v21 }
 0x284   : > { %11394 = vst [vmem:[#allocation187_spill] sm:$0xff] %v7411_v47  ;;  %v7429_v57 = vsel %vm1004_vm4, %v11398_v1, %v1980_v35  ;;  %v11406_v35 = vrot.slane %v6645_v3, 6  ;;  %v7471_v3 = vsel %vm1004_vm4, %v11412_v14, %v1987_v27  ;;  %v11420_v27 = vrot.slane %v11361_v50, 6  ;;  %v11440_v1 = vld [vmem:[#allocation77_spill] sm:$0xff] }
 0x285   : > { %11395 = vst [vmem:[#allocation188_spill] sm:$0xff] %v7415_v8  ;;  %v11402_v8 = vrot.slane %v6597_v42, 6  ;;  %v7459_v42 = vsel %vm1004_vm4, %v11408_v34, %v1985_v26  ;;  %v11416_v26 = vrot.slane %v11359_v11, 6  ;;  %v11433_v34 = vld [vmem:[#allocation180_spill] sm:$0xff]  ;;  %v11448_v47 = vld [vmem:[#allocation45_spill] sm:$0xff] }
 0x286   : > { %11396 = vst [vmem:[#allocation189_spill] sm:$0xff] %v7419_v41  ;;  %v7453_v49 = vsel %vm1004_vm4, %v11406_v35, %v1984_v53  ;;  %v11414_v53 = vrot.slane %v11358_v52, 6  ;;  %v7495_v52 = vsel %vm1004_vm4, %v11420_v27, %v1991_v24  ;;  %v11428_v24 = vrot.slane %v11365_v54, 6  ;;  %v11432_v35 = vld [vmem:[#allocation178_spill] sm:$0xff]  ;;  %v11445_v41 = vld [vmem:[#allocation23_spill] sm:$0xff]  ;;  %v11577_v55 = vld [vmem:[#allocation57_spill] sm:$0xff] }
 0x287   : > { %11397 = vst [vmem:[#allocation190_spill] sm:$0xff] %v7423_v31  ;;  %v7441_v60 = vsel %vm1004_vm4, %v11402_v8, %v1982_v13  ;;  %v11410_v13 = vrot.slane %v11356_v63, 6  ;;  %v7483_v63 = vsel %vm1004_vm4, %v11416_v26, %v1989_v61  ;;  %v11424_v61 = vrot.slane %v11363_v59, 6  ;;  %v11430_v8 = vld [vmem:[#allocation14_spill] sm:$0xff]  ;;  %v11441_v59 = vld [vmem:[#allocation92_spill] sm:$0xff]  ;;  %v11443_v31 = vld [vmem:[#allocation81_spill] sm:$0xff] }
 0x288   : > { %11399 = vst [vmem:[#allocation191_spill] sm:$0xff] %v7429_v57  ;;  %v7477_v33 = vsel %vm1004_vm4, %v11414_v53, %v1988_v58  ;;  %v11422_v58 = vrot.slane %v11362_v7, 6  ;;  %v7519_v7 = vsel %vm1004_vm4, %v11428_v24, %v1995_v62  ;;  %v11434_v62 = vld [vmem:[#allocation182_spill] sm:$0xff]  ;;  %v2060_v37 = vrot.slane %v11441_v59, 2 }
 0x289   : > { %11401 = vst [vmem:[#allocation192_spill] sm:$0xff] %v7435_v40  ;;  %v7465_v38 = vsel %vm1004_vm4, %v11410_v13, %v1986_v45  ;;  %v11418_v45 = vrot.slane %v11360_v29, 6  ;;  %v7507_v29 = vsel %vm1004_vm4, %v11424_v61, %v1993_v44  ;;  %v11435_v53 = vld [vmem:[#allocation38_spill] sm:$0xff]  ;;  %v11439_v44 = vld [vmem:[#allocation145_spill] sm:$0xff]  ;;  %v2062_v13 = vrot.slane %v11443_v31, 2 }
 0x28a   : > { %11403 = vst [vmem:[#allocation193_spill] sm:$0xff] %v7441_v60  ;;  %v7501_v11 = vsel %vm1004_vm4, %v11422_v58, %v1992_v5  ;;  %v11437_v58 = vld [vmem:[#allocation154_spill] sm:$0xff]  ;;  %v2064_v26 = vrot.slane %v11445_v41, 2  ;;  %v2067_v24 = vrot.slane %v11373_v9, 2  ;;  %v2081_v60 = vrot.slane %v11457_v0, 2  ;;  %v11465_v9 = vld [vmem:[#allocation128_spill] sm:$0xff] }
 0x28b   : > { %11405 = vst [vmem:[#allocation194_spill] sm:$0xff] %v7447_v18  ;;  %v7489_v23 = vsel %vm1004_vm4, %v11418_v45, %v1990_v32  ;;  %v11426_v32 = vrot.slane %v11364_v4, 6  ;;  %v11436_v45 = vld [vmem:[#allocation56_spill] sm:$0xff]  ;;  %v11442_v5 = vld [vmem:[#allocation74_spill] sm:$0xff]  ;;  %v2068_v4 = vrot.slane %v11448_v47, 2  ;;  %v2080_v18 = vrot.slane %v11456_v25, 2 }
 0x28c   : > { %11407 = vst [vmem:[#allocation195_spill] sm:$0xff] %v7453_v49  ;;  %v2061_v54 = vrot.slane %v11442_v5, 2  ;;  %v2079_v49 = vrot.slane %v11455_v20, 2  ;;  %v2082_v40 = vrot.slane %v11458_v43, 2  ;;  %v2083_v57 = vrot.slane %v11459_v30, 2  ;;  %v11464_v47 = vld [vmem:[#allocation144_spill] sm:$0xff] }
 0x28d   : > { %11409 = vst [vmem:[#allocation196_spill] sm:$0xff] %v7459_v42  ;;  %v7513_v50 = vsel %vm1004_vm4, %v11426_v32, %v1994_v16  ;;  %v11431_v16 = vld [vmem:[#allocation176_spill] sm:$0xff]  ;;  %v11438_v32 = vld [vmem:[#allocation85_spill] sm:$0xff]  ;;  %v2078_v42 = vrot.slane %v11454_v46, 2  ;;  %v10135_v46 = vrot.slane %v11381_v6, 2  ;;  %v2088_v20 = vrot.slane %v11464_v47, 2 }
 0x28e   : > { %11411 = vst [vmem:[#allocation197_spill] sm:$0xff] %v7465_v38  ;;  %v2077_v38 = vrot.slane %v11453_v10, 2  ;;  %v2087_v10 = vrot.slane %v11463_v15, 2  ;;  %v2089_v25 = vrot.slane %v11465_v9, 2  ;;  %v7586_v9 = vsel %vm1085_vm5, %v2064_v26, %v2080_v18  ;;  %v11569_v6 = vld [vmem:[#allocation43_spill] sm:$0xff]  ;;  %v11617_v41 = vld [vmem:[#allocation190_spill] sm:$0xff] }
 0x28f   : > { %11413 = vst [vmem:[#allocation198_spill] sm:$0xff] %v7471_v3  ;;  %v2076_v3 = vrot.slane %v11452_v56, 2 }
 0x290   : > { %11415 = vst [vmem:[#allocation199_spill] sm:$0xff] %v7477_v33  ;;  %v2074_v33 = vrot.slane %v11451_v22, 2  ;;  %v7574_v30 = vsel %vm1085_vm5, %v2061_v54, %v2077_v38 }
 0x291   : > { %11417 = vst [vmem:[#allocation200_spill] sm:$0xff] %v7483_v63  ;;  %v2073_v63 = vrot.slane %v11379_v2, 2  ;;  %v7570_v43 = vsel %vm1085_vm5, %v2060_v37, %v2076_v3  ;;  %v11482_v3 = vrot.slane %v11213_v28, 2 }
 0x292   : > { %11419 = vst [vmem:[#allocation201_spill] sm:$0xff] %v7489_v23  ;;  %v11450_v23 = vld [vmem:[#allocation133_spill] sm:$0xff] }
 0x293   : > { %11421 = vst [vmem:[#allocation202_spill] sm:$0xff] %v7495_v52  ;;  %v2071_v52 = vrot.slane %v11377_v19, 2  ;;  %v2072_v36 = vrot.slane %v11450_v23, 2  ;;  %v11460_v23 = vld [vmem:[#allocation181_spill] sm:$0xff]  ;;  %v11461_v19 = vld [vmem:[#allocation183_spill] sm:$0xff] }
 0x294   : > { %11423 = vst [vmem:[#allocation203_spill] sm:$0xff] %v7501_v11  ;;  %v11449_v11 = vld [vmem:[#allocation100_spill] sm:$0xff]  ;;  %v2084_v2 = vrot.slane %v11460_v23, 2  ;;  %v2085_v22 = vrot.slane %v11461_v19, 2  ;;  %v7578_v19 = vsel %vm1085_vm5, %v2062_v13, %v2078_v42  ;;  %v7598_v42 = vsel %vm1085_vm5, %v2067_v24, %v2083_v57 }
 0x295   : > { %11425 = vst [vmem:[#allocation204_spill] sm:$0xff] %v7507_v29  ;;  %v11447_v29 = vld [vmem:[#allocation36_spill] sm:$0xff]  ;;  %v2070_v21 = vrot.slane %v11449_v11, 2  ;;  %v11462_v11 = vld [vmem:[#allocation142_spill] sm:$0xff]  ;;  %v7618_v57 = vsel %vm1085_vm5, %v2072_v36, %v2088_v20  ;;  %v7632_v23 = vsel %vm1085_vm5, %v11482_v3, %v2060_v37  ;;  %v11488_v20 = vrot.slane %v6627_v12, 2 }
 0x296   : > { %11427 = vst [vmem:[#allocation205_spill] sm:$0xff] %v7513_v50  ;;  %v11446_v50 = vld [vmem:[#allocation30_spill] sm:$0xff]  ;;  %v2066_v61 = vrot.slane %v11447_v29, 2  ;;  %v2086_v56 = vrot.slane %v11462_v11, 2  ;;  %v11466_v29 = vld [vmem:[#allocation73_spill] sm:$0xff]  ;;  %v7606_v18 = vsel %vm1085_vm5, %v2069_v39, %v2085_v22  ;;  %v11484_v11 = vrot.slane %v6583_v17, 2 }
 0x297   : > { %11429 = vst [vmem:[#allocation206_spill] sm:$0xff] %v7519_v7  ;;  %v11444_v7 = vld [vmem:[#allocation109_spill] sm:$0xff]  ;;  %v2065_v27 = vrot.slane %v11446_v50, 2  ;;  %v2090_v0 = vrot.slane %v11466_v29, 2  ;;  %v11490_v37 = vrot.slane %v6651_v51, 2  ;;  %v11609_v50 = vld [vmem:[#allocation188_spill] sm:$0xff] }
 0x298   : > { %v2063_v14 = vrot.slane %v11444_v7, 2  ;;  %11467 = vst [vmem:[#allocation92_spill] sm:$0xff] %v7570_v43  ;;  %v7594_v38 = vsel %vm1085_vm5, %v2066_v61, %v2082_v40  ;;  %v7614_v40 = vsel %vm1085_vm5, %v2071_v52, %v2087_v10  ;;  %v7638_v29 = vsel %vm1085_vm5, %v11484_v11, %v2061_v54  ;;  %v11556_v43 = vld [vmem:[#allocation4_spill] sm:$0xff] }
 0x299   : > { %11468 = vst [vmem:[#allocation74_spill] sm:$0xff] %v7574_v30  ;;  %v7590_v47 = vsel %vm1085_vm5, %v2065_v27, %v2081_v60  ;;  %v7610_v60 = vsel %vm1085_vm5, %v2070_v21, %v2086_v56  ;;  %v7626_v22 = vsel %vm1085_vm5, %v2074_v33, %v2090_v0  ;;  %v11486_v56 = vrot.slane %v6603_v48, 2  ;;  %v11555_v30 = vld [vmem:[#allocation191_spill] sm:$0xff] }
 0x29a   : > { %11469 = vst [vmem:[#allocation81_spill] sm:$0xff] %v7578_v19  ;;  %v7582_v15 = vsel %vm1085_vm5, %v2063_v14, %v2079_v49  ;;  %v7602_v49 = vsel %vm1085_vm5, %v2068_v4, %v2084_v2  ;;  %v7622_v2 = vsel %vm1085_vm5, %v2073_v63, %v2089_v25  ;;  %v7650_v25 = vsel %vm1085_vm5, %v11488_v20, %v2063_v14 }
 0x29b   : > { %11470 = vst [vmem:[#allocation109_spill] sm:$0xff] %v7582_v15  ;;  %v7644_v10 = vsel %vm1085_vm5, %v11486_v56, %v2062_v13  ;;  %v7656_v0 = vsel %vm1085_vm5, %v11490_v37, %v2064_v26  ;;  %v11492_v54 = vrot.slane %v11430_v8, 2  ;;  %v11494_v13 = vrot.slane %v11431_v16, 2  ;;  %v11562_v15 = vld [vmem:[#allocation151_spill] sm:$0xff]  ;;  %v11613_v8 = vld [vmem:[#allocation189_spill] sm:$0xff] }
 0x29c   : > { %11471 = vst [vmem:[#allocation108_spill] sm:$0xff] %v7586_v9  ;;  %v11496_v14 = vrot.slane %v11432_v35, 2  ;;  %v11498_v26 = vrot.slane %v11433_v34, 2  ;;  %v11560_v9 = vld [vmem:[#allocation79_spill] sm:$0xff]  ;;  %v11597_v35 = vld [vmem:[#allocation170_spill] sm:$0xff] }
 0x29d   : > { %11472 = vst [vmem:[#allocation120_spill] sm:$0xff] %v7590_v47  ;;  %v7662_v3 = vsel %vm1085_vm5, %v11492_v54, %v2065_v27  ;;  %v7668_v11 = vsel %vm1085_vm5, %v11494_v13, %v2066_v61  ;;  %v11500_v27 = vrot.slane %v11434_v62, 2  ;;  %v11502_v61 = vrot.slane %v11435_v53, 2  ;;  %v11581_v62 = vld [vmem:[#allocation146_spill] sm:$0xff]  ;;  %v11589_v34 = vld [vmem:[#allocation59_spill] sm:$0xff] }
 0x29e   : > { %11473 = vst [vmem:[#allocation94_spill] sm:$0xff] %v7594_v38  ;;  %v7674_v56 = vsel %vm1085_vm5, %v11496_v14, %v2067_v24  ;;  %v7680_v20 = vsel %vm1085_vm5, %v11498_v26, %v2068_v4  ;;  %v11504_v24 = vrot.slane %v11436_v45, 2  ;;  %v11506_v4 = vrot.slane %v11437_v58, 2  ;;  %v11568_v38 = vld [vmem:[#allocation27_spill] sm:$0xff] }
 0x29f   : > { %11474 = vst [vmem:[#allocation13_spill] sm:$0xff] %v7598_v42  ;;  %v7686_v37 = vsel %vm1085_vm5, %v11500_v27, %v2069_v39  ;;  %v7692_v54 = vsel %vm1085_vm5, %v11502_v61, %v2070_v21  ;;  %v11508_v39 = vrot.slane %v11438_v32, 2  ;;  %v11510_v21 = vrot.slane %v11439_v44, 2  ;;  %v11514_v61 = vld [vmem:[#allocation134_spill] sm:$0xff]  ;;  %v11559_v32 = vld [vmem:[#allocation192_spill] sm:$0xff]  ;;  %v11563_v44 = vld [vmem:[#allocation193_spill] sm:$0xff] }
 0x2a0   : > { %11475 = vst [vmem:[#allocation82_spill] sm:$0xff] %v7602_v49  ;;  %v7698_v13 = vsel %vm1085_vm5, %v11504_v24, %v2071_v52  ;;  %v7704_v14 = vsel %vm1085_vm5, %v11506_v4, %v2072_v36  ;;  %v11512_v52 = vrot.slane %v11440_v1, 2  ;;  %v11515_v4 = vld [vmem:[#allocation129_spill] sm:$0xff]  ;;  %v2158_v47 = vmax.f32 %v11560_v9, %v11559_v32  ;;  %v11567_v1 = vld [vmem:[#allocation194_spill] sm:$0xff]  ;;  %v11571_v58 = vld [vmem:[#allocation195_spill] sm:$0xff] }
 0x2a1   : > { %11476 = vst [vmem:[#allocation175_spill] sm:$0xff] %v7606_v18  ;;  %v7710_v26 = vsel %vm1085_vm5, %v11508_v39, %v2073_v63  ;;  %v7716_v27 = vsel %vm1085_vm5, %v11510_v21, %v2074_v33  ;;  %v11516_v39 = vld [vmem:[#allocation34_spill] sm:$0xff]  ;;  %v11518_v21 = vld [vmem:[#allocation103_spill] sm:$0xff]  ;;  %v2162_v19 = vmax.f32 %v11568_v38, %v11567_v1  ;;  %v11574_v32 = vld [vmem:[#allocation84_spill] sm:$0xff] }
 0x2a2   : > { %11477 = vst [vmem:[#allocation177_spill] sm:$0xff] %v7610_v60  ;;  %v7724_v36 = vsel %vm1085_vm5, %v11512_v52, %v10135_v46  ;;  %v11520_v52 = vld [vmem:[#allocation132_spill] sm:$0xff]  ;;  %v11561_v18 = vld [vmem:[#allocation35_spill] sm:$0xff]  ;;  %v11582_v1 = vld [vmem:[#allocation49_spill] sm:$0xff] }
 0x2a3   : > { %11478 = vst [vmem:[#allocation179_spill] sm:$0xff] %v7614_v40  ;;  %v2159_v53 = vmax.f32 %v11562_v15, %v11561_v18  ;;  %v11575_v24 = vld [vmem:[#allocation196_spill] sm:$0xff]  ;;  %v11576_v15 = vld [vmem:[#allocation118_spill] sm:$0xff]  ;;  %v2169_v38 = vmax.f32 %v11582_v1, %v11581_v62  ;;  %v11585_v33 = vld [vmem:[#allocation127_spill] sm:$0xff] }
 0x2a4   : > { %11479 = vst [vmem:[#allocation181_spill] sm:$0xff] %v7618_v57  ;;  %v11522_v57 = vld [vmem:[#allocation173_spill] sm:$0xff]  ;;  %v2166_v18 = vmax.f32 %v11576_v15, %v11575_v24  ;;  %v11587_v42 = vld [vmem:[#allocation199_spill] sm:$0xff]  ;;  %v11590_v24 = vld [vmem:[#allocation110_spill] sm:$0xff] }
 0x2a5   : > { %11480 = vst [vmem:[#allocation183_spill] sm:$0xff] %v7622_v2  ;;  %v11517_v2 = vld [vmem:[#allocation148_spill] sm:$0xff]  ;;  %v2173_v15 = vmax.f32 %v11590_v24, %v11589_v34  ;;  %v11593_v63 = vld [vmem:[#allocation167_spill] sm:$0xff]  ;;  %v11601_v46 = vld [vmem:[#allocation186_spill] sm:$0xff] }
 0x2a6   : > { %11481 = vst [vmem:[#allocation142_spill] sm:$0xff] %v7626_v22  ;;  %v11573_v22 = vld [vmem:[#allocation50_spill] sm:$0xff]  ;;  %v11591_v49 = vld [vmem:[#allocation200_spill] sm:$0xff]  ;;  %v11596_v62 = vld [vmem:[#allocation107_spill] sm:$0xff] }
 0x2a7   : > { %11483 = vst [vmem:[#allocation54_spill] sm:$0xff] %v7632_v23  ;;  %v2165_v9 = vmax.f32 %v11574_v32, %v11573_v22  ;;  %v11588_v22 = vld [vmem:[#allocation101_spill] sm:$0xff]  ;;  %v11603_v60 = vld [vmem:[#allocation203_spill] sm:$0xff] }
 0x2a8   : > { %11485 = vst [vmem:[#allocation144_spill] sm:$0xff] %v7638_v29  ;;  %v2156_v29 = vmax.f32 %v11556_v43, %v11555_v30  ;;  %v11570_v43 = vld [vmem:[#allocation157_spill] sm:$0xff]  ;;  %v2172_v32 = vmax.f32 %v11588_v22, %v11587_v42  ;;  %v11604_v34 = vld [vmem:[#allocation91_spill] sm:$0xff] }
 0x2a9   : > { %11487 = vst [vmem:[#allocation128_spill] sm:$0xff] %v7644_v10  ;;  %v11566_v10 = vld [vmem:[#allocation98_spill] sm:$0xff]  ;;  %v2163_v30 = vmax.f32 %v11570_v43, %v11569_v6  ;;  %v11584_v6 = vld [vmem:[#allocation88_spill] sm:$0xff]  ;;  %v11602_v42 = vld [vmem:[#allocation105_spill] sm:$0xff]  ;;  %v2180_v24 = vmax.f32 %v11604_v34, %v11603_v60 }
 0x2aa   : > { %11489 = vst [vmem:[#allocation73_spill] sm:$0xff] %v7650_v25  ;;  %v11564_v25 = vld [vmem:[#allocation106_spill] sm:$0xff]  ;;  %v2179_v22 = vmax.f32 %v11602_v42, %v11601_v46  ;;  %v11605_v16 = vld [vmem:[#allocation187_spill] sm:$0xff]  ;;  %v11611_v40 = vld [vmem:[#allocation205_spill] sm:$0xff] }
 0x2ab   : > { %11491 = vst [vmem:[#allocation207_spill] sm:$0xff] %v7656_v0  ;;  %v2160_v0 = vmax.f32 %v11564_v25, %v11563_v44  ;;  %v11578_v44 = vld [vmem:[#allocation116_spill] sm:$0xff]  ;;  %v11616_v46 = vld [vmem:[#allocation185_spill] sm:$0xff]  ;;  %v11618_v60 = vld [vmem:[#allocation99_spill] sm:$0xff] }
 0x2ac   : > { %11493 = vst [vmem:[#allocation208_spill] sm:$0xff] %v7662_v3  ;;  %v11558_v3 = vld [vmem:[#allocation55_spill] sm:$0xff]  ;;  %v2167_v25 = vmax.f32 %v11578_v44, %v11577_v55  ;;  %v11592_v55 = vld [vmem:[#allocation89_spill] sm:$0xff] }
 0x2ad   : > { %11495 = vst [vmem:[#allocation209_spill] sm:$0xff] %v7668_v11  ;;  %v11579_v11 = vld [vmem:[#allocation197_spill] sm:$0xff]  ;;  %v2174_v44 = vmax.f32 %v11592_v55, %v11591_v49  ;;  %v11606_v49 = vld [vmem:[#allocation58_spill] sm:$0xff] }
 0x2ae   : > { %11497 = vst [vmem:[#allocation210_spill] sm:$0xff] %v7674_v56  ;;  %v11583_v56 = vld [vmem:[#allocation198_spill] sm:$0xff]  ;;  %v2181_v55 = vmax.f32 %v11606_v49, %v11605_v16  ;;  %v11619_v16 = vmax.f32 %v11213_v28, %v11514_v61  ;;  %v11622_v28 = vmax.f32 %v11442_v5, %v11517_v2  ;;  %v11623_v61 = vmax.f32 %v6603_v48, %v11518_v21  ;;  %v3633_v48 = vld [vmem:[%s9638_s1 + $0x4] sm:$0xf] }
 0x2af   : > { %11499 = vst [vmem:[#allocation211_spill] sm:$0xff] %v7680_v20  ;;  %v11565_v20 = vld [vmem:[#allocation86_spill] sm:$0xff]  ;;  %v2170_v43 = vmax.f32 %v11584_v6, %v11583_v56  ;;  %v11598_v56 = vld [vmem:[#allocation111_spill] sm:$0xff]  ;;  %v11627_v5 = vmax.f32 %v6651_v51, %v11522_v57  ;;  %v11637_v51 = vld [vmem:[#allocation176_spill] sm:$0xff]  ;;  %3634 = vmatpush.msk.msra.mxu1 %vm362_vm0, %v3633_v48 }
 0x2b0   : > { %11501 = vst [vmem:[#allocation212_spill] sm:$0xff] %v7686_v37  ;;  %v2161_v45 = vmax.f32 %v11566_v10, %v11565_v20  ;;  %v11580_v10 = vld [vmem:[#allocation87_spill] sm:$0xff]  ;;  %v11595_v37 = vld [vmem:[#allocation201_spill] sm:$0xff]  ;;  %v2177_v6 = vmax.f32 %v11598_v56, %v11597_v35  ;;  %v11612_v35 = vld [vmem:[#allocation184_spill] sm:$0xff]  ;;  %v2188_v49 = vmax.f32 %v11619_v16, %v2156_v29  ;;  %v2191_v29 = vmax.f32 %v11622_v28, %v2159_v53 }
 0x2b1   : > { %11503 = vst [vmem:[#allocation213_spill] sm:$0xff] %v7692_v54  ;;  %v2168_v20 = vmax.f32 %v11580_v10, %v11579_v11  ;;  %v11594_v11 = vld [vmem:[#allocation136_spill] sm:$0xff]  ;;  %v2176_v1 = vmax.f32 %v11596_v62, %v11595_v37  ;;  %v11599_v54 = vld [vmem:[#allocation202_spill] sm:$0xff]  ;;  %v11610_v37 = vld [vmem:[#allocation83_spill] sm:$0xff]  ;;  %v2184_v56 = vmax.f32 %v11612_v35, %v11611_v40 }
 0x2b2   : > { %11505 = vst [vmem:[#allocation214_spill] sm:$0xff] %v7698_v13  ;;  %v2175_v10 = vmax.f32 %v11594_v11, %v11593_v63  ;;  %v11607_v13 = vld [vmem:[#allocation204_spill] sm:$0xff]  ;;  %v11608_v63 = vld [vmem:[#allocation119_spill] sm:$0xff]  ;;  %v2183_v62 = vmax.f32 %v11610_v37, %v11609_v50  ;;  %v2192_v37 = vmax.f32 %v11623_v61, %v2160_v0  ;;  %v11638_v57 = vld [vmem:[#allocation174_spill] sm:$0xff] }
 0x2b3   : > { %11507 = vst [vmem:[#allocation215_spill] sm:$0xff] %v7704_v14  ;;  %v2182_v11 = vmax.f32 %v11608_v63, %v11607_v13  ;;  %v11615_v14 = vld [vmem:[#allocation206_spill] sm:$0xff]  ;;  %v261_v50 = vld [vmem:[%s9638_s1] sm:$0xf]  ;;  %v3701_v40 = vld [vmem:[%s9638_s1 + $0xc] sm:$0xf] }
 0x2b4   : > { %11509 = vst [vmem:[#allocation216_spill] sm:$0xff] %v7710_v26  ;;  %v11519_v26 = vld [vmem:[#allocation168_spill] sm:$0xff]  ;;  %v2186_v42 = vmax.f32 %v11616_v46, %v11615_v14  ;;  %v11621_v14 = vmax.f32 %v6583_v17, %v11516_v39  ;;  %3600 = vmatpush.msk.msra.mxu0 %vm362_vm0, %v261_v50  ;;  %3702 = vmatpush.msk.msra.mxu3 %vm362_vm0, %v3701_v40  ;;  %v11642_v16 = vld [vmem:[#allocation93_spill] sm:$0xff] }
 0x2b5   : > { %11511 = vst [vmem:[#allocation217_spill] sm:$0xff] %v7716_v27  ;;  %v11557_v27 = vld [vmem:[#allocation29_spill] sm:$0xff]  ;;  %v11624_v35 = vmax.f32 %v11443_v31, %v11519_v26  ;;  %v11628_v31 = vld [vmem:[#allocation23_spill] sm:$0xff]  ;;  %v11641_v46 = vld [vmem:[#allocation36_spill] sm:$0xff] }
 0x2b6   : > { %11513 = vst [vmem:[#allocation218_spill] sm:$0xff] %v7724_v36  ;;  %v11521_v36 = vld [vmem:[#allocation32_spill] sm:$0xff]  ;;  %v2157_v23 = vmax.f32 %v11558_v3, %v11557_v27  ;;  %v2190_v63 = vmax.f32 %v11621_v14, %v2158_v47  ;;  %v11643_v50 = vmax.f32 %v11641_v46, %v11642_v16  ;;  %v11648_v61 = vld [vmem:[#allocation149_spill] sm:$0xff] }
 0x2b7   : > { %v11572_v3 = vld [vmem:[#allocation112_spill] sm:$0xff]  ;;  %v11626_v17 = vmax.f32 %v11444_v7, %v11521_v36  ;;  %v11634_v7 = vld [vmem:[#allocation30_spill] sm:$0xff] }
 0x2b8   : > { %v2164_v27 = vmax.f32 %v11572_v3, %v11571_v58  ;;  %v11586_v58 = vld [vmem:[#allocation135_spill] sm:$0xff]  ;;  %v11635_v36 = vld [vmem:[#allocation102_spill] sm:$0xff]  ;;  %v2201_v40 = vmax.f32 %v11643_v50, %v2169_v38  ;;  %v11666_v46 = vld [vmem:[#allocation172_spill] sm:$0xff] }
 0x2b9   : > { %v2171_v3 = vmax.f32 %v11586_v58, %v11585_v33  ;;  %v11600_v33 = vld [vmem:[#allocation76_spill] sm:$0xff]  ;;  %v2195_v47 = vmax.f32 %v11626_v17, %v2163_v30  ;;  %v11636_v39 = vmax.f32 %v11634_v7, %v11635_v36  ;;  %v11651_v17 = vld [vmem:[#allocation115_spill] sm:$0xff]  ;;  %v11657_v38 = vld [vmem:[#allocation42_spill] sm:$0xff] }
 0x2ba   : > { %v2178_v58 = vmax.f32 %v11600_v33, %v11599_v54  ;;  %v11614_v54 = vld [vmem:[#allocation117_spill] sm:$0xff]  ;;  %v2196_v53 = vmax.f32 %v11627_v5, %v2164_v27  ;;  %v11640_v27 = vld [vmem:[#allocation3_spill] sm:$0xff]  ;;  %v11659_v36 = vld [vmem:[#allocation54_spill] sm:$0xff] }
 0x2bb   : > { %v2185_v33 = vmax.f32 %v11614_v54, %v11613_v8  ;;  %v11620_v8 = vmax.f32 %v11441_v59, %v11515_v4  ;;  %v2193_v54 = vmax.f32 %v11624_v35, %v2161_v45  ;;  %v11625_v59 = vmax.f32 %v6627_v12, %v11520_v52  ;;  %v11629_v45 = vld [vmem:[#allocation113_spill] sm:$0xff]  ;;  %v11631_v12 = vld [vmem:[#allocation14_spill] sm:$0xff]  ;;  %3601 = vmatmul.msk.f32.vlgmr.msra.gmra.mxu0 %vm171_vm1, %v11640_v27  ;;  %v11668_v50 = vld [vmem:[#allocation100_spill] sm:$0xff] }
 0x2bc   : > { %v11630_v2 = vmax.f32 %v11628_v31, %v11629_v45  ;;  %v2199_v21 = vmax.f32 %v11636_v39, %v2167_v25  ;;  %v11639_v52 = vmax.f32 %v11637_v51, %v11638_v57  ;;  %v11650_v25 = vld [vmem:[#allocation180_spill] sm:$0xff]  ;;  %v11654_v45 = vld [vmem:[#allocation130_spill] sm:$0xff] }
 0x2bd   : > { %v2189_v13 = vmax.f32 %v11620_v8, %v2157_v23  ;;  %v2194_v23 = vmax.f32 %v11625_v59, %v2162_v19  ;;  %v11632_v19 = vld [vmem:[#allocation171_spill] sm:$0xff]  ;;  %v11652_v5 = vmax.f32 %v11650_v25, %v11651_v17  ;;  %v11660_v39 = vld [vmem:[#allocation92_spill] sm:$0xff]  ;;  %v11665_v27 = vld [vmem:[#allocation38_spill] sm:$0xff] }
 0x2be   : > { %v2197_v0 = vmax.f32 %v11630_v2, %v2165_v9  ;;  %v11633_v26 = vmax.f32 %v11631_v12, %v11632_v19  ;;  %v2200_v30 = vmax.f32 %v11639_v52, %v2168_v20  ;;  %v11644_v9 = vld [vmem:[#allocation178_spill] sm:$0xff]  ;;  %v11645_v8 = vld [vmem:[#allocation51_spill] sm:$0xff]  ;;  %v11653_v20 = vld [vmem:[#allocation45_spill] sm:$0xff]  ;;  %v11667_v16 = vmax.f32 %v11665_v27, %v11666_v46 }
 0x2bf   : > { %v11646_v14 = vmax.f32 %v11644_v9, %v11645_v8  ;;  %v2204_v31 = vmax.f32 %v11652_v5, %v2172_v32  ;;  %v11655_v2 = vmax.f32 %v11653_v20, %v11654_v45  ;;  %v11656_v19 = vld [vmem:[#allocation182_spill] sm:$0xff]  ;;  %v7927_v51 = vmax.f32 %v2189_v13, %v11660_v39  ;;  %v11662_v57 = vld [vmem:[#allocation52_spill] sm:$0xff]  ;;  %v11663_v32 = vld [vmem:[#allocation155_spill] sm:$0xff] }
 0x2c0   : > { %v2198_v4 = vmax.f32 %v11633_v26, %v2166_v18  ;;  %v11647_v18 = vld [vmem:[#allocation26_spill] sm:$0xff]  ;;  %v11658_v26 = vmax.f32 %v11656_v19, %v11657_v38  ;;  %v11664_v52 = vmax.f32 %v11662_v57, %v11663_v32  ;;  %v11672_v13 = vld [vmem:[#allocation56_spill] sm:$0xff]  ;;  %v11675_v25 = vld [vmem:[#allocation169_spill] sm:$0xff] }
 0x2c1   : > { %v2202_v28 = vmax.f32 %v11646_v14, %v2170_v43  ;;  %v11649_v35 = vmax.f32 %v11647_v18, %v11648_v61  ;;  %v2205_v12 = vmax.f32 %v11655_v2, %v2173_v15  ;;  %v2220_v43 = vmax.f32 %v2188_v49, %v11659_v36  ;;  %v11669_v9 = vld [vmem:[#allocation46_spill] sm:$0xff]  ;;  %v11671_v49 = vld [vmem:[#allocation144_spill] sm:$0xff]  ;;  %v11685_v36 = vld [vmem:[#allocation85_spill] sm:$0xff]  ;;  %2499 = vst.msk [vmem:[#allocation2 + $0x50] sm:$0xff] %vm171_vm1, %v7927_v51 }
 0x2c2   : > { %v2206_v7 = vmax.f32 %v11658_v26, %v2174_v44  ;;  %v2207_v48 = vmax.f32 %v11664_v52, %v2175_v10  ;;  %v2208_v15 = vmax.f32 %v11667_v16, %v2176_v1  ;;  %v11670_v8 = vmax.f32 %v11668_v50, %v11669_v9  ;;  %v11673_v18 = vld [vmem:[#allocation152_spill] sm:$0xff]  ;;  %v11676_v17 = vld [vmem:[#allocation78_spill] sm:$0xff]  ;;  %v11688_v57 = vld [vmem:[#allocation39_spill] sm:$0xff] }
 0x2c3   : > { %v2203_v59 = vmax.f32 %v11649_v35, %v2171_v3  ;;  %v11661_v3 = vld [vmem:[#allocation95_spill] sm:$0xff]  ;;  %v7943_v14 = vmax.f32 %v2190_v63, %v11671_v49  ;;  %v11674_v61 = vmax.f32 %v11672_v13, %v11673_v18  ;;  %v11677_v10 = vmax.f32 %v11675_v25, %v11676_v17  ;;  %v11678_v20 = vld [vmem:[#allocation154_spill] sm:$0xff]  ;;  %3669 = vmatmul.msk.f32.vlgmr.msra.gmra.mxu2 %vm171_vm1, %v2220_v43  ;;  %v11682_v63 = vld [vmem:[#allocation133_spill] sm:$0xff] }
 0x2c4   : > { %3635 = vmatmul.msk.f32.vlgmr.msra.gmra.mxu1 %vm171_vm1, %v11661_v3  ;;  %v7940_v44 = vmax.f32 %v11670_v8, %v2177_v6  ;;  %v11679_v1 = vld [vmem:[#allocation150_spill] sm:$0xff]  ;;  %v11689_v32 = vld [vmem:[#allocation147_spill] sm:$0xff]  ;;  %v11691_v27 = vld [vmem:[#allocation128_spill] sm:$0xff]  ;;  %2498 = vst.msk [vmem:[#allocation2 + $0x48] sm:$0xff] %vm171_vm1, %v2220_v43 }
 0x2c5   : > { %v7948_v35 = vmax.f32 %v11674_v61, %v2178_v58  ;;  %v7953_v5 = vmax.f32 %v11677_v10, %v2179_v22  ;;  %v11680_v45 = vmax.f32 %v11678_v20, %v11679_v1  ;;  %v11681_v6 = vld [vmem:[#allocation74_spill] sm:$0xff]  ;;  %v11690_v52 = vmax.f32 %v11688_v57, %v11689_v32  ;;  %v11692_v46 = vld [vmem:[#allocation145_spill] sm:$0xff]  ;;  %v11693_v16 = vld [vmem:[#allocation104_spill] sm:$0xff]  ;;  %2500 = vst.msk [vmem:[#allocation2 + $0x68] sm:$0xff] %vm171_vm1, %v7943_v14 }
 0x2c6   : > { %v7961_v19 = vmax.f32 %v2191_v29, %v11681_v6  ;;  %v11683_v38 = vld [vmem:[#allocation114_spill] sm:$0xff]  ;;  %v7980_v29 = vmax.f32 %v2192_v37, %v11691_v27  ;;  %v11694_v50 = vmax.f32 %v11692_v46, %v11693_v16  ;;  %v11695_v9 = vld [vmem:[#allocation131_spill] sm:$0xff]  ;;  %v11696_v8 = vld [vmem:[#allocation156_spill] sm:$0xff] }
 0x2c7   : > { %v7958_v2 = vmax.f32 %v11680_v45, %v2180_v24  ;;  %v11684_v26 = vmax.f32 %v11682_v63, %v11683_v38  ;;  %v11686_v39 = vld [vmem:[#allocation158_spill] sm:$0xff]  ;;  %v7977_v24 = vmax.f32 %v11690_v52, %v2183_v62  ;;  %v11697_v49 = vmax.f32 %v11695_v9, %v11696_v8  ;;  %v11698_v13 = vld [vmem:[#allocation77_spill] sm:$0xff]  ;;  %v2530_v43 = vld [vmem:[#allocation2] sm:$0xff] }
 0x2c8   : > { %v11687_v3 = vmax.f32 %v11685_v36, %v11686_v39  ;;  %v11699_v18 = vld [vmem:[#allocation61_spill] sm:$0xff]  ;;  %v2534_v17 = vld [vmem:[#allocation2 + $0x20] sm:$0xff]  ;;  %v11705_v6 = vld [vmem:[#allocation108_spill] sm:$0xff]  ;;  %2501 = vst.msk [vmem:[#allocation2 + $0x70] sm:$0xff] %vm171_vm1, %v7961_v19 }
 0x2c9   : > { %v7967_v58 = vmax.f32 %v11684_v26, %v2181_v55  ;;  %v7986_v55 = vmax.f32 %v11694_v50, %v2184_v56  ;;  %v11700_v61 = vmax.f32 %v11698_v13, %v11699_v18  ;;  %v11701_v25 = vld [vmem:[#allocation81_spill] sm:$0xff]  ;;  %v2542_v63 = vld [vmem:[#allocation2 + $0x60] sm:$0xff]  ;;  %v2533_v38 = vld [vmem:[#allocation2 + $0x18] sm:$0xff]  ;;  %2502 = vst.msk [vmem:[#allocation2 + $0x88] sm:$0xff] %vm171_vm1, %v7980_v29 }
 0x2ca   : > { %v7972_v22 = vmax.f32 %v11687_v3, %v2182_v11  ;;  %v7991_v11 = vmax.f32 %v11697_v49, %v2185_v33  ;;  %v7999_v37 = vmax.f32 %v2193_v54, %v11701_v25  ;;  %v11702_v56 = vld [vmem:[#allocation73_spill] sm:$0xff]  ;;  %v11704_v33 = vld [vmem:[#allocation207_spill] sm:$0xff]  ;;  %v11706_v26 = vld [vmem:[#allocation208_spill] sm:$0xff] }
 0x2cb   : > { %v7996_v62 = vmax.f32 %v11700_v61, %v2186_v42  ;;  %v8004_v10 = vmax.f32 %v2194_v23, %v11702_v56  ;;  %v11703_v20 = vld [vmem:[#allocation109_spill] sm:$0xff]  ;;  %v8010_v45 = vmax.f32 %v2196_v53, %v11704_v33  ;;  %v8013_v42 = vmax.f32 %v2197_v0, %v11705_v6  ;;  %v2538_v54 = vld [vmem:[#allocation2 + $0x40] sm:$0xff]  ;;  %v11707_v23 = vld [vmem:[#allocation120_spill] sm:$0xff]  ;;  %3670 = vmatmul.msk.f32.gmra.mxu2 %vm171_vm1, %v7927_v51 }
 0x2cc   : > { %v8007_v1 = vmax.f32 %v2195_v47, %v11703_v20  ;;  %v8018_v36 = vmax.f32 %v2198_v4, %v11706_v26  ;;  %v8021_v39 = vmax.f32 %v2199_v21, %v11707_v23  ;;  %v11709_v47 = vld [vmem:[#allocation209_spill] sm:$0xff]  ;;  %v11711_v53 = vld [vmem:[#allocation94_spill] sm:$0xff]  ;;  %v11717_v21 = vld [vmem:[#allocation211_spill] sm:$0xff]  ;;  %2503 = vst.msk [vmem:[#allocation2 + $0x90] sm:$0xff] %vm171_vm1, %v7999_v37 }
 0x2cd   : > { %v8024_v3 = vmax.f32 %v2200_v30, %v11709_v47  ;;  %v8027_v57 = vmax.f32 %v2201_v40, %v11711_v53  ;;  %v8031_v0 = vld [vmem:[#allocation2 + $0x38] sm:$0xff]  ;;  %v11715_v4 = vld [vmem:[#allocation13_spill] sm:$0xff]  ;;  %v8040_v50 = vmax.f32 %v2204_v31, %v11717_v21  ;;  %v2531_v40 = vld [vmem:[#allocation2 + $0x8] sm:$0xff]  ;;  %v2610_v31 = vmax.f32 %v2530_v43, %v2534_v17  ;;  %2504 = vst.msk [vmem:[#allocation2 + $0xa8] sm:$0xff] %vm171_vm1, %v8004_v10 }
 0x2ce   : > { %11708 = vst [vmem:[#allocation134_spill] sm:$0xff] %v8021_v39  ;;  %v2541_v32 = vld [vmem:[#allocation2 + $0x58] sm:$0xff]  ;;  %v8037_v16 = vmax.f32 %v2203_v59, %v11715_v4  ;;  %v8047_v8 = vld [vmem:[#allocation2 + $0x28] sm:$0xff]  ;;  %v11725_v59 = vld [vmem:[#allocation213_spill] sm:$0xff]  ;;  %v2614_v53 = vmax.f32 %v2534_v17, %v2538_v54 }
 0x2cf   : > { %11710 = vst [vmem:[#allocation129_spill] sm:$0xff] %v8024_v3  ;;  %v2545_v52 = vld [vmem:[#allocation2 + $0x78] sm:$0xff]  ;;  %v11721_v49 = vld [vmem:[#allocation212_spill] sm:$0xff]  ;;  %v8056_v61 = vmax.f32 %v2208_v15, %v11725_v59  ;;  %v8062_v25 = vld [vmem:[#allocation2 + $0x30] sm:$0xff]  ;;  %v2611_v23 = vmax.f32 %v2531_v40, %v8047_v8 }
 0x2d0   : > { %11712 = vst [vmem:[#allocation34_spill] sm:$0xff] %v8027_v57  ;;  %v11713_v27 = vld [vmem:[#allocation210_spill] sm:$0xff]  ;;  %v8050_v13 = vmax.f32 %v2206_v7, %v11721_v49  ;;  %v8064_v56 = vld [vmem:[#allocation2 + $0x80] sm:$0xff]  ;;  %v8066_v7 = vmax.f32 %v2538_v54, %v2542_v63  ;;  %v11726_v20 = vld [vmem:[#allocation5_spill] sm:$0xff]  ;;  %v8071_v15 = vmax.f32 %v2541_v32, %v2545_v52 }
 0x2d1   : > { %v8034_v46 = vmax.f32 %v2202_v28, %v11713_v27  ;;  %11716 = vst [vmem:[#allocation103_spill] sm:$0xff] %v8037_v16  ;;  %v11719_v30 = vld [vmem:[#allocation82_spill] sm:$0xff]  ;;  %v11723_v28 = vld [vmem:[#allocation175_spill] sm:$0xff]  ;;  %3602 = vmatmul.msk.f32.gmra.mxu0 %vm171_vm1, %v11726_v20  ;;  %v2539_v26 = vld [vmem:[#allocation2 + $0x48] sm:$0xff] }
 0x2d2   : > { %11718 = vst [vmem:[#allocation168_spill] sm:$0xff] %v8040_v50  ;;  %v8043_v9 = vmax.f32 %v2205_v12, %v11719_v30  ;;  %v8053_v18 = vmax.f32 %v2207_v48, %v11723_v28  ;;  %v2532_v12 = vld [vmem:[#allocation2 + $0x10] sm:$0xff]  ;;  %v2613_v48 = vmax.f32 %v2533_v38, %v8031_v0  ;;  %v11727_v33 = vld [vmem:[#allocation15_spill] sm:$0xff]  ;;  %v11728_v43 = vld [vmem:[#allocation90_spill] sm:$0xff]  ;;  %v8084_v38 = vmax.f32 %v2542_v63, %v8064_v56 }
 0x2d3   : > { %11714 = vst [vmem:[#allocation148_spill] sm:$0xff] %v8034_v46  ;;  %3636 = vmatmul.msk.f32.gmra.mxu1 %vm171_vm1, %v11727_v33  ;;  %v8081_v47 = vld [vmem:[#allocation2 + $0x98] sm:$0xff]  ;;  %v2540_v27 = vld [vmem:[#allocation2 + $0x50] sm:$0xff]  ;;  %v2682_v4 = vmax.f32 %v2610_v31, %v8066_v7  ;;  %v2617_v30 = vmax.f32 %v8031_v0, %v2541_v32  ;;  %v2543_v63 = vld [vmem:[#allocation2 + $0x68] sm:$0xff]  ;;  %v2612_v28 = vmax.f32 %v2532_v12, %v8062_v25 }
 0x2d4   : > { %11720 = vst [vmem:[#allocation132_spill] sm:$0xff] %v8043_v9  ;;  %v2685_v21 = vmax.f32 %v2613_v48, %v8071_v15  ;;  %v8092_v40 = vmax.f32 %v2545_v52, %v8081_v47  ;;  %v11729_v51 = vld [vmem:[#allocation177_spill] sm:$0xff]  ;;  %v11730_v17 = vld [vmem:[#allocation214_spill] sm:$0xff]  ;;  %v2686_v59 = vmax.f32 %v2614_v53, %v8084_v38  ;;  %v11732_v0 = vld [vmem:[#allocation179_spill] sm:$0xff]  ;;  %v8112_v52 = vmax.f32 %v2539_v26, %v2543_v63 }
 0x2d5   : > { %11722 = vst [vmem:[#allocation32_spill] sm:$0xff] %v8050_v13  ;;  %v8096_v49 = vmax.f32 %v7940_v44, %v11729_v51  ;;  %v8100_v54 = vmax.f32 %v7948_v35, %v11730_v17  ;;  %v8108_v32 = vmax.f32 %v7953_v5, %v11732_v0  ;;  %v2544_v44 = vld [vmem:[#allocation2 + $0x70] sm:$0xff]  ;;  %v2746_v35 = vmax.f32 %v2682_v4, %v8064_v56  ;;  %v8118_v20 = vld [vmem:[#allocation2 + $0xa0] sm:$0xff]  ;;  %v8126_v5 = vld [vmem:[#allocation2 + $0x88] sm:$0xff] }
 0x2d6   : > { %11724 = vst [vmem:[#allocation173_spill] sm:$0xff] %v8053_v18  ;;  %v8116_v31 = vmax.f32 %v2685_v21, %v8081_v47  ;;  %v11733_v12 = vld [vmem:[#allocation215_spill] sm:$0xff]  ;;  %v8128_v33 = vmax.f32 %v2540_v27, %v2544_v44  ;;  %v2615_v53 = vmax.f32 %v8047_v8, %v2539_v26  ;;  %v2616_v4 = vmax.f32 %v8062_v25, %v2540_v27  ;;  %v11734_v51 = vld [vmem:[#allocation181_spill] sm:$0xff]  ;;  %v11735_v17 = vld [vmem:[#allocation216_spill] sm:$0xff] }
 0x2d7   : > { %2505 = vst.msk [vmem:[#allocation2 + $0xb0] sm:$0xff] %vm171_vm1, %v8007_v1  ;;  %v8122_v48 = vmax.f32 %v7958_v2, %v11733_v12  ;;  %v8134_v21 = vmax.f32 %v7967_v58, %v11734_v51  ;;  %v8138_v0 = vmax.f32 %v7972_v22, %v11735_v17  ;;  %v8142_v2 = vld [vmem:[#allocation2 + $0x90] sm:$0xff]  ;;  %v2683_v12 = vmax.f32 %v2611_v23, %v8112_v52  ;;  %v11736_v51 = vld [vmem:[#allocation6_spill] sm:$0xff] }
 0x2d8   : > { %2506 = vst.msk [vmem:[#allocation2 + $0xc8] sm:$0xff] %vm171_vm1, %v8010_v45  ;;  %v8146_v34 = vmax.f32 %v2617_v30, %v8092_v40  ;;  %v2684_v58 = vmax.f32 %v2612_v28, %v8128_v33  ;;  %v8152_v8 = vmax.f32 %v2543_v63, %v8126_v5  ;;  %v8155_v22 = vmax.f32 %v2544_v44, %v8142_v2  ;;  %v11737_v63 = vld [vmem:[#allocation96_spill] sm:$0xff] }
 0x2d9   : > { %11731 = vst [vmem:[#allocation191_spill] sm:$0xff] %v8100_v54  ;;  %v8158_v25 = vmax.f32 %v2686_v59, %v8118_v20  ;;  %v2747_v26 = vmax.f32 %v2683_v12, %v8126_v5  ;;  %v2810_v23 = vrot.slane %v2746_v35, 7  ;;  %v2970_v27 = vrot.slane %v2746_v35, 6  ;;  %3603 = vmatmul.msk.f32.gmra.mxu0 %vm171_vm1, %v11736_v51  ;;  %3671 = vmatmul.msk.f32.gmra.mxu2 %vm171_vm1, %v7943_v14  ;;  %v8174_v44 = vld [vmem:[#allocation2 + $0xa8] sm:$0xff] }
 0x2da   : > { %2507 = vst.msk [vmem:[#allocation2 + $0xd0] sm:$0xff] %vm171_vm1, %v8013_v42  ;;  %v2922_v30 = vrot.slane %v8116_v31, 1  ;;  %v2748_v28 = vmax.f32 %v2684_v58, %v8142_v2  ;;  %v3082_v59 = vrot.slane %v8116_v31, 2  ;;  %v2687_v17 = vmax.f32 %v2615_v53, %v8152_v8 }
 0x2db   : > { %2508 = vst.msk [vmem:[#allocation2 + $0xe8] sm:$0xff] %vm171_vm1, %v8018_v36  ;;  %3637 = vmatmul.msk.f32.gmra.mxu1 %vm171_vm1, %v11737_v63  ;;  %v2688_v12 = vmax.f32 %v2616_v4, %v8155_v22  ;;  %v2826_v51 = vrot.slane %v2747_v26, 7  ;;  %v2890_v63 = vrot.slane %v2747_v26, 1  ;;  %v2986_v6 = vrot.slane %v2747_v26, 6 }
 0x2dc   : > { %2509 = vst.msk [vmem:[#allocation2 + $0xf0] sm:$0xff] %vm171_vm1, %v8021_v39  ;;  %v3050_v58 = vrot.slane %v2747_v26, 2  ;;  %v2906_v31 = vrot.slane %v2748_v28, 1  ;;  %v3066_v14 = vrot.slane %v2748_v28, 2 }
 0x2dd   : > { %2510 = vst.msk [vmem:[#allocation2 + $0x108] sm:$0xff] %vm171_vm1, %v8024_v3  ;;  %v2874_v4 = vsel %vm842_vm2, %v2810_v23, %v2826_v51  ;;  %v2811_v23 = vrot.slane %v8158_v25, 7 }
 0x2de   : > { %2511 = vst.msk [vmem:[#allocation2 + $0x110] sm:$0xff] %vm171_vm1, %v8027_v57  ;;  %v8176_v35 = vld [vmem:[#allocation2 + $0xb0] sm:$0xff]  ;;  %v8191_v57 = vmax.f32 %v2687_v17, %v8174_v44  ;;  %v3130_v39 = vmax.f32 %v2747_v26, %v2874_v4  ;;  %v2938_v17 = vsel %vm923_vm3, %v2906_v31, %v2922_v30  ;;  %v8222_v30 = vld [vmem:[#allocation2 + $0xb8] sm:$0xff]  ;;  %v11744_v4 = vmax.f32 %v11618_v60, %v11617_v41 }
 0x2df   : > { %2512 = vst.msk [vmem:[#allocation2 + $0x128] sm:$0xff] %vm171_vm1, %v8034_v46  ;;  %v3002_v46 = vrot.slane %v2748_v28, 6  ;;  %v8194_v3 = vmax.f32 %v2688_v12, %v8176_v35  ;;  %v11750_v60 = vld [vmem:[#allocation218_spill] sm:$0xff] }
 0x2e0   : > { %2513 = vst.msk [vmem:[#allocation2 + $0x130] sm:$0xff] %vm171_vm1, %v8037_v16  ;;  %v2842_v16 = vrot.slane %v2748_v28, 7 }
 0x2e1   : > { %2514 = vst.msk [vmem:[#allocation2 + $0x148] sm:$0xff] %vm171_vm1, %v8040_v50  ;;  %v3034_v50 = vsel %vm1004_vm4, %v2970_v27, %v2986_v6  ;;  %v3018_v12 = vsel %vm1004_vm4, %v2986_v6, %v3002_v46  ;;  %v2907_v46 = vrot.slane %v8194_v3, 1  ;;  %v2987_v6 = vrot.slane %v8191_v57, 6  ;;  %3672 = vmatmul.msk.f32.gmra.mxu2 %vm171_vm1, %v7961_v19 }
 0x2e2   : > { %2515 = vst.msk [vmem:[#allocation2 + $0x150] sm:$0xff] %vm171_vm1, %v8043_v9  ;;  %v2954_v9 = vsel %vm923_vm3, %v2890_v63, %v2906_v31  ;;  %v2827_v63 = vrot.slane %v8191_v57, 7  ;;  %v3098_v19 = vsel %vm1085_vm5, %v3066_v14, %v3082_v59 }
 0x2e3   : > { %2516 = vst.msk [vmem:[#allocation2 + $0x168] sm:$0xff] %vm171_vm1, %v8050_v13  ;;  %v2858_v13 = vsel %vm842_vm2, %v2826_v51, %v2842_v16  ;;  %v3162_v27 = vmax.f32 %v2954_v9, %v3034_v50  ;;  %v3114_v16 = vsel %vm1085_vm5, %v3050_v58, %v3066_v14  ;;  %v3163_v51 = vmax.f32 %v2938_v17, %v3018_v12  ;;  %v11740_v58 = vld [vmem:[#allocation18_spill] sm:$0xff] }
 0x2e4   : > { %2517 = vst.msk [vmem:[#allocation2 + $0x170] sm:$0xff] %vm171_vm1, %v8053_v18  ;;  %v2971_v18 = vrot.slane %v8158_v25, 6  ;;  %v3131_v26 = vmax.f32 %v2748_v28, %v2858_v13  ;;  %v2891_v9 = vrot.slane %v8191_v57, 1  ;;  %v11739_v25 = vld [vmem:[#allocation7_spill] sm:$0xff]  ;;  %3638 = vmatmul.msk.f32.gmra.mxu1 %vm171_vm1, %v11740_v58  ;;  %v11741_v13 = vrot.slane %v11728_v43, 2  ;;  %v11742_v28 = vld [vmem:[#allocation44_spill] sm:$0xff] }
 0x2e5   : > { %2518 = vst.msk [vmem:[#allocation2 + $0x188] sm:$0xff] %vm171_vm1, %v8056_v61  ;;  %v3194_v50 = vmax.f32 %v3130_v39, %v3162_v27  ;;  %3604 = vmatmul.msk.f32.gmra.mxu0 %vm171_vm1, %v11739_v25  ;;  %v11743_v31 = vrot.slane %v11742_v28, 2  ;;  %v11745_v27 = vld [vmem:[#allocation153_spill] sm:$0xff]  ;;  %v11748_v43 = vld [vmem:[#allocation183_spill] sm:$0xff] }
 0x2e6   : > { %2519 = vst.msk [vmem:[#allocation2 + $0x190] sm:$0xff] %vm171_vm1, %v8096_v49  ;;  %v11746_v17 = vmax.f32 %v11742_v28, %v11745_v27  ;;  %v11747_v25 = vld [vmem:[#allocation217_spill] sm:$0xff]  ;;  %v8248_v58 = vmax.f32 %v7977_v24, %v11748_v43  ;;  %v8256_v28 = vmax.f32 %v7996_v62, %v11750_v60  ;;  %v3195_v24 = vmax.f32 %v3131_v26, %v3163_v51  ;;  %v8309_v27 = vld [vmem:[#allocation2 + $0xc0] sm:$0xff] }
 0x2e7   : > { %2520 = vst.msk [vmem:[#allocation2 + $0x1a8] sm:$0xff] %vm171_vm1, %v8100_v54  ;;  %v2107_v39 = vsel %vm1085_vm5, %v11743_v31, %v11741_v13  ;;  %v8240_v54 = vmax.f32 %v7986_v55, %v11747_v25  ;;  %v11749_v13 = vld [vmem:[#allocation142_spill] sm:$0xff]  ;;  %v3226_v55 = vmax.f32 %v3194_v50, %v3114_v16  ;;  %v8266_v31 = vmax.f32 %v8146_v34, %v8222_v30  ;;  %v8323_v25 = vld [vmem:[#allocation2 + $0xd0] sm:$0xff] }
 0x2e8   : > { %v2219_v12 = vmax.f32 %v11746_v17, %v11744_v4  ;;  %2521 = vst.msk [vmem:[#allocation2 + $0x1b0] sm:$0xff] %vm171_vm1, %v8108_v32  ;;  %v8252_v41 = vmax.f32 %v7991_v11, %v11749_v13  ;;  %v8270_v11 = vmax.f32 %v8064_v56, %v8118_v20  ;;  %v2875_v62 = vsel %vm842_vm2, %v2811_v23, %v2827_v63  ;;  %v11753_v4 = vld [vmem:[#allocation8_spill] sm:$0xff] }
 0x2e9   : > { %11751 = vst [vmem:[#allocation4_spill] sm:$0xff] %v8256_v28  ;;  %3703 = vmatmul.msk.f32.vlgmr.msra.gmra.mxu3 %vm171_vm1, %v3226_v55  ;;  %v2955_v59 = vsel %vm923_vm3, %v2891_v9, %v2907_v46  ;;  %v3035_v14 = vsel %vm1004_vm4, %v2971_v18, %v2987_v6  ;;  %v8287_v56 = vmax.f32 %v8126_v5, %v8174_v44  ;;  %v3051_v23 = vrot.slane %v8191_v57, 2 }
 0x2ea   : > { %2522 = vst.msk [vmem:[#allocation2 + $0x1c8] sm:$0xff] %vm171_vm1, %v8122_v48  ;;  %v8281_v34 = vmax.f32 %v2219_v12, %v2107_v39  ;;  %v8291_v16 = vmax.f32 %v8142_v2, %v8176_v35  ;;  %v3067_v18 = vrot.slane %v8194_v3, 2  ;;  %v2843_v26 = vrot.slane %v8194_v3, 7  ;;  %v11754_v12 = vld [vmem:[#allocation97_spill] sm:$0xff]  ;;  %3673 = vmatmul.msk.f32.gmra.mxu2 %vm171_vm1, %v7980_v29 }
 0x2eb   : > { %2523 = vst.msk [vmem:[#allocation2 + $0x1d0] sm:$0xff] %vm171_vm1, %v8134_v21  ;;  %v3227_v51 = vmax.f32 %v3195_v24, %v3098_v19  ;;  %v3132_v5 = vmax.f32 %v8191_v57, %v2875_v62  ;;  %v3164_v50 = vmax.f32 %v2955_v59, %v3035_v14  ;;  %v2690_v2 = vmax.f32 %v8066_v7, %v8270_v11  ;;  %v8321_v7 = vld [vmem:[#allocation2 + $0xc8] sm:$0xff] }
 0x2ec   : > { %2524 = vst.msk [vmem:[#allocation2 + $0x1e8] sm:$0xff] %vm171_vm1, %v8138_v0  ;;  %v2923_v9 = vrot.slane %v8266_v31, 1  ;;  %v3003_v39 = vrot.slane %v8194_v3, 6  ;;  %v2691_v17 = vmax.f32 %v8112_v52, %v8287_v56  ;;  %v2692_v57 = vmax.f32 %v8128_v33, %v8291_v16  ;;  %3639 = vmatmul.msk.f32.gmra.mxu1 %vm171_vm1, %v11754_v12 }
 0x2ed   : > { %11752 = vst [vmem:[#allocation29_spill] sm:$0xff] %v8281_v34  ;;  %3605 = vmatmul.msk.f32.gmra.mxu0 %vm171_vm1, %v11753_v4  ;;  %v8327_v43 = vmax.f32 %v8081_v47, %v8222_v30  ;;  %v3115_v52 = vsel %vm1085_vm5, %v3051_v23, %v3067_v18  ;;  %v3196_v33 = vmax.f32 %v3132_v5, %v3164_v50  ;;  %v11755_v50 = vld [vmem:[#allocation10_spill] sm:$0xff] }
 0x2ee   : > { %2526 = vst.msk [vmem:[#allocation2 + $0x208] sm:$0xff] %vm171_vm1, %v8240_v54  ;;  %v2859_v13 = vsel %vm842_vm2, %v2827_v63, %v2843_v26  ;;  %v2754_v60 = vmax.f32 %v2690_v2, %v8309_v27  ;;  %v2939_v29 = vsel %vm923_vm3, %v2907_v46, %v2923_v9  ;;  %v3019_v55 = vsel %vm1004_vm4, %v2987_v6, %v3003_v39  ;;  %v8346_v26 = vld [vmem:[#allocation2 + $0xd8] sm:$0xff]  ;;  %v11756_v2 = vld [vmem:[#allocation19_spill] sm:$0xff] }
 0x2ef   : > { %2527 = vst.msk [vmem:[#allocation2 + $0x210] sm:$0xff] %vm171_vm1, %v8252_v41  ;;  %v2755_v47 = vmax.f32 %v2691_v17, %v8321_v7  ;;  %v8341_v19 = vmax.f32 %v2692_v57, %v8323_v25  ;;  %v3133_v24 = vmax.f32 %v8194_v3, %v2859_v13  ;;  %v2693_v63 = vmax.f32 %v8071_v15, %v8327_v43 }
 0x2f0   : > { %2528 = vst.msk [vmem:[#allocation2 + $0x228] sm:$0xff] %vm171_vm1, %v8256_v28  ;;  %v3228_v62 = vmax.f32 %v3196_v33, %v3115_v52  ;;  %v3165_v59 = vmax.f32 %v2939_v29, %v3019_v55  ;;  %v2812_v14 = vrot.slane %v2754_v60, 7  ;;  %v2972_v23 = vrot.slane %v2754_v60, 6  ;;  %v11792_v28 = vld [vmem:[#allocation173_spill] sm:$0xff] }
 0x2f1   : > { %2525 = vst.msk [vmem:[#allocation2 + $0x1f0] sm:$0xff] %vm171_vm1, %v8248_v58  ;;  %3704 = vmatmul.msk.f32.gmra.mxu3 %vm171_vm1, %v3227_v51  ;;  %v2828_v46 = vrot.slane %v2755_v47, 7  ;;  %v2892_v51 = vrot.slane %v2755_v47, 1  ;;  %v2908_v6 = vrot.slane %v8341_v19, 1  ;;  %v2988_v5 = vrot.slane %v2755_v47, 6 }
 0x2f2   : > { %2529 = vst.msk [vmem:[#allocation2 + $0x230] sm:$0xff] %vm171_vm1, %v8281_v34  ;;  %v3083_v3 = vrot.slane %v8266_v31, 2  ;;  %3674 = vmatmul.msk.f32.gmra.mxu2 %vm171_vm1, %v7999_v37  ;;  %v2757_v15 = vmax.f32 %v2693_v63, %v8346_v26  ;;  %v3197_v9 = vmax.f32 %v3133_v24, %v3165_v59  ;;  %v8359_v39 = vmax.f32 %v8118_v20, %v8309_v27  ;;  %v11757_v63 = vld [vmem:[#allocation11_spill] sm:$0xff] }
 0x2f3   : > { %v8363_v4 = vmax.f32 %v8174_v44, %v8321_v7  ;;  %v2876_v17 = vsel %vm842_vm2, %v2812_v14, %v2828_v46  ;;  %v2956_v31 = vsel %vm923_vm3, %v2892_v51, %v2908_v6  ;;  %v3036_v37 = vsel %vm1004_vm4, %v2972_v23, %v2988_v5 }
 0x2f4   : > { %3640 = vmatmul.msk.f32.gmra.mxu1 %vm171_vm1, %v11756_v2  ;;  %v8374_v57 = vmax.f32 %v8176_v35, %v8323_v25  ;;  %v3099_v20 = vsel %vm1085_vm5, %v3067_v18, %v3083_v3  ;;  %v2844_v44 = vrot.slane %v8341_v19, 7  ;;  %v2924_v12 = vrot.slane %v2757_v15, 1  ;;  %v8387_v18 = vld [vmem:[#allocation2 + $0xe0] sm:$0xff] }
 0x2f5   : > { %3606 = vmatmul.msk.f32.gmra.mxu0 %vm171_vm1, %v11755_v50  ;;  %v3004_v52 = vrot.slane %v8341_v19, 6  ;;  %v3134_v33 = vmax.f32 %v2755_v47, %v2876_v17  ;;  %v3166_v13 = vmax.f32 %v2956_v31, %v3036_v37  ;;  %v2694_v60 = vmax.f32 %v8084_v38, %v8359_v39  ;;  %v8395_v38 = vld [vmem:[#allocation2 + $0xf0] sm:$0xff] }
 0x2f6   : > { %v2695_v29 = vmax.f32 %v8152_v8, %v8363_v4  ;;  %v3229_v55 = vmax.f32 %v3197_v9, %v3099_v20  ;;  %v3052_v24 = vrot.slane %v2755_v47, 2  ;;  %v3068_v35 = vrot.slane %v8341_v19, 2  ;;  %v11758_v8 = vld [vmem:[#allocation159_spill] sm:$0xff] }
 0x2f7   : > { %v2696_v59 = vmax.f32 %v8155_v22, %v8374_v57  ;;  %v2860_v47 = vsel %vm842_vm2, %v2828_v46, %v2844_v44  ;;  %v2940_v14 = vsel %vm923_vm3, %v2908_v6, %v2924_v12  ;;  %v3020_v23 = vsel %vm1004_vm4, %v2988_v5, %v3004_v52  ;;  %v11759_v12 = vld [vmem:[#allocation12_spill] sm:$0xff]  ;;  %v8423_v52 = vld [vmem:[#allocation2 + $0xf8] sm:$0xff] }
 0x2f8   : > { %v3198_v51 = vmax.f32 %v3134_v33, %v3166_v13  ;;  %v2758_v22 = vmax.f32 %v2694_v60, %v8387_v18  ;;  %v3116_v46 = vsel %vm1085_vm5, %v3052_v24, %v3068_v35  ;;  %v3135_v6 = vmax.f32 %v8341_v19, %v2860_v47  ;;  %v11760_v19 = vld [vmem:[#allocation137_spill] sm:$0xff] }
 0x2f9   : > { %3705 = vmatmul.msk.f32.gmra.mxu3 %vm171_vm1, %v3228_v62  ;;  %v8389_v62 = vld [vmem:[#allocation2 + $0xe8] sm:$0xff]  ;;  %v8415_v2 = vmax.f32 %v2696_v59, %v8395_v38  ;;  %v3167_v5 = vmax.f32 %v2940_v14, %v3020_v23  ;;  %v3084_v33 = vrot.slane %v2757_v15, 2 }
 0x2fa   : > { %3675 = vmatmul.msk.f32.gmra.mxu2 %vm171_vm1, %v8004_v10  ;;  %v2759_v50 = vmax.f32 %v2695_v29, %v8389_v62  ;;  %v8409_v10 = vmax.f32 %v8222_v30, %v8346_v26  ;;  %v3230_v3 = vmax.f32 %v3198_v51, %v3116_v46  ;;  %v2813_v9 = vrot.slane %v2758_v22, 7  ;;  %v11761_v51 = vld [vmem:[#allocation16_spill] sm:$0xff]  ;;  %v8462_v46 = vld [vmem:[#allocation2 + $0x100] sm:$0xff] }
 0x2fb   : > { %v2909_v30 = vrot.slane %v8415_v2, 1  ;;  %v2973_v20 = vrot.slane %v2758_v22, 6  ;;  %v3199_v13 = vmax.f32 %v3135_v6, %v3167_v5  ;;  %v3100_v24 = vsel %vm1085_vm5, %v3068_v35, %v3084_v33  ;;  %v8464_v6 = vld [vmem:[#allocation2 + $0x108] sm:$0xff] }
 0x2fc   : > { %3641 = vmatmul.msk.f32.gmra.mxu1 %vm171_vm1, %v11758_v8  ;;  %v2829_v17 = vrot.slane %v2759_v50, 7  ;;  %v2697_v31 = vmax.f32 %v8092_v40, %v8409_v10  ;;  %v2893_v37 = vrot.slane %v2759_v50, 1  ;;  %v2989_v44 = vrot.slane %v2759_v50, 6 }
 0x2fd   : > { %3607 = vmatmul.msk.f32.gmra.mxu0 %vm171_vm1, %v11757_v63  ;;  %v8449_v63 = vmax.f32 %v8323_v25, %v8395_v38  ;;  %v2845_v47 = vrot.slane %v8415_v2, 7  ;;  %v3005_v14 = vrot.slane %v8415_v2, 6  ;;  %v3231_v23 = vmax.f32 %v3199_v13, %v3100_v24 }
 0x2fe   : > { %v2877_v40 = vsel %vm842_vm2, %v2813_v9, %v2829_v17  ;;  %v2761_v60 = vmax.f32 %v2697_v31, %v8423_v52  ;;  %v2957_v29 = vsel %vm923_vm3, %v2893_v37, %v2909_v30  ;;  %v3037_v15 = vsel %vm1004_vm4, %v2973_v20, %v2989_v44 }
 0x2ff   : > { %v3136_v59 = vmax.f32 %v2759_v50, %v2877_v40  ;;  %v3168_v8 = vmax.f32 %v2957_v29, %v3037_v15  ;;  %v3053_v22 = vrot.slane %v2759_v50, 2  ;;  %v3069_v25 = vrot.slane %v8415_v2, 2  ;;  %v11763_v40 = vld [vmem:[#allocation17_spill] sm:$0xff] }
 0x300   : > { %v2700_v5 = vmax.f32 %v8291_v16, %v8449_v63  ;;  %v3021_v50 = vsel %vm1004_vm4, %v2989_v44, %v3005_v14  ;;  %v8483_v37 = vmax.f32 %v8346_v26, %v8423_v52  ;;  %v3085_v44 = vrot.slane %v2761_v60, 2 }
 0x301   : > { %3706 = vmatmul.msk.f32.gmra.mxu3 %vm171_vm1, %v3229_v55  ;;  %v8443_v55 = vmax.f32 %v8321_v7, %v8389_v62  ;;  %v3200_v9 = vmax.f32 %v3136_v59, %v3168_v8  ;;  %v3117_v20 = vsel %vm1085_vm5, %v3053_v22, %v3069_v25 }
 0x302   : > { %3676 = vmatmul.msk.f32.gmra.mxu2 %vm171_vm1, %v8007_v1  ;;  %v8439_v1 = vmax.f32 %v8309_v27, %v8387_v18  ;;  %v2925_v27 = vrot.slane %v2761_v60, 1  ;;  %v2701_v26 = vmax.f32 %v8327_v43, %v8483_v37  ;;  %v8498_v60 = vld [vmem:[#allocation2 + $0x118] sm:$0xff] }
 0x303   : > { %v2699_v35 = vmax.f32 %v8287_v56, %v8443_v55  ;;  %v2861_v56 = vsel %vm842_vm2, %v2829_v17, %v2845_v47  ;;  %v3101_v47 = vsel %vm1085_vm5, %v3069_v25, %v3085_v44  ;;  %v8547_v44 = vmax.f32 %v8423_v52, %v8498_v60 }
 0x304   : > { %3642 = vmatmul.msk.f32.gmra.mxu1 %vm171_vm1, %v11760_v19  ;;  %v2698_v7 = vmax.f32 %v8270_v11, %v8439_v1  ;;  %v8470_v11 = vld [vmem:[#allocation2 + $0x110] sm:$0xff]  ;;  %v3232_v19 = vmax.f32 %v3200_v9, %v3117_v20  ;;  %v2765_v14 = vmax.f32 %v2701_v26, %v8498_v60  ;;  %v11765_v9 = vld [vmem:[#allocation20_spill] sm:$0xff] }
 0x305   : > { %3608 = vmatmul.msk.f32.gmra.mxu0 %vm171_vm1, %v11759_v12  ;;  %v2763_v16 = vmax.f32 %v2699_v35, %v8464_v6  ;;  %v8488_v17 = vmax.f32 %v2700_v5, %v8470_v11  ;;  %v3137_v12 = vmax.f32 %v8415_v2, %v2861_v56  ;;  %v11764_v2 = vld [vmem:[#allocation121_spill] sm:$0xff]  ;;  %v8541_v20 = vld [vmem:[#allocation2 + $0x128] sm:$0xff] }
 0x306   : > { %v2762_v31 = vmax.f32 %v2698_v7, %v8462_v46  ;;  %v8522_v7 = vmax.f32 %v8395_v38, %v8470_v11  ;;  %v8533_v38 = vld [vmem:[#allocation2 + $0x120] sm:$0xff] }
 0x307   : > { %v2830_v13 = vrot.slane %v2763_v16, 7  ;;  %v2894_v29 = vrot.slane %v2763_v16, 1  ;;  %v2910_v15 = vrot.slane %v8488_v17, 1  ;;  %v2990_v59 = vrot.slane %v2763_v16, 6 }
 0x308   : > { %v2974_v24 = vrot.slane %v2762_v31, 6  ;;  %v3054_v22 = vrot.slane %v2763_v16, 2  ;;  %v3070_v25 = vrot.slane %v8488_v17, 2 }
 0x309   : > { %3707 = vmatmul.msk.f32.gmra.mxu3 %vm171_vm1, %v3230_v3  ;;  %v11762_v3 = vld [vmem:[#allocation25_spill] sm:$0xff] }
 0x30a   : > { %3677 = vmatmul.msk.f32.gmra.mxu2 %vm171_vm1, %v8010_v45  ;;  %v2941_v45 = vsel %vm923_vm3, %v2909_v30, %v2925_v27  ;;  %v2814_v30 = vrot.slane %v2762_v31, 7  ;;  %v3038_v27 = vsel %vm1004_vm4, %v2974_v24, %v2990_v59  ;;  %v2704_v31 = vmax.f32 %v8374_v57, %v8522_v7 }
 0x30b   : > { %v3169_v33 = vmax.f32 %v2941_v45, %v3021_v50  ;;  %v3006_v50 = vrot.slane %v8488_v17, 6 }
 0x30c   : > { %3643 = vmatmul.msk.f32.gmra.mxu1 %vm171_vm1, %v11762_v3  ;;  %v2878_v43 = vsel %vm842_vm2, %v2814_v30, %v2830_v13  ;;  %v2846_v3 = vrot.slane %v8488_v17, 7 }
 0x30d   : > { %3609 = vmatmul.msk.f32.gmra.mxu0 %vm171_vm1, %v11761_v51  ;;  %v3201_v8 = vmax.f32 %v3137_v12, %v3169_v33  ;;  %v8518_v51 = vmax.f32 %v8389_v62, %v8464_v6  ;;  %v2926_v62 = vrot.slane %v2765_v14, 1 }
 0x30e   : > { %v2862_v57 = vsel %vm842_vm2, %v2830_v13, %v2846_v3 }
 0x30f   : > { %v3233_v35 = vmax.f32 %v3201_v8, %v3101_v47  ;;  %v2703_v45 = vmax.f32 %v8363_v4, %v8518_v51  ;;  %v2942_v33 = vsel %vm923_vm3, %v2910_v15, %v2926_v62  ;;  %v3139_v26 = vmax.f32 %v8488_v17, %v2862_v57  ;;  %v11767_v47 = vld [vmem:[#allocation21_spill] sm:$0xff]  ;;  %v11769_v17 = vld [vmem:[#allocation138_spill] sm:$0xff] }
 0x311   : > { %3708 = vmatmul.msk.f32.gmra.mxu3 %vm171_vm1, %v3231_v23  ;;  %v8510_v23 = vmax.f32 %v8387_v18, %v8462_v46  ;;  %v3138_v18 = vmax.f32 %v2763_v16, %v2878_v43  ;;  %v11766_v16 = vld [vmem:[#allocation160_spill] sm:$0xff]  ;;  %v2767_v52 = vmax.f32 %v2703_v45, %v8541_v20  ;;  %v8603_v45 = vld [vmem:[#allocation2 + $0x140] sm:$0xff] }
 0x312   : > { %3678 = vmatmul.msk.f32.gmra.mxu2 %vm171_vm1, %v8013_v42  ;;  %v2958_v42 = vsel %vm923_vm3, %v2894_v29, %v2910_v15  ;;  %v2705_v29 = vmax.f32 %v8409_v10, %v8547_v44  ;;  %v8568_v15 = vld [vmem:[#allocation2 + $0x138] sm:$0xff]  ;;  %v8577_v10 = vmax.f32 %v8462_v46, %v8533_v38 }
 0x313   : > { %v3170_v5 = vmax.f32 %v2958_v42, %v3038_v27  ;;  %v2702_v56 = vmax.f32 %v8359_v39, %v8510_v23  ;;  %v8543_v39 = vld [vmem:[#allocation2 + $0x130] sm:$0xff]  ;;  %v2895_v43 = vrot.slane %v2767_v52, 1  ;;  %v2991_v27 = vrot.slane %v2767_v52, 6 }
 0x314   : > { %3644 = vmatmul.msk.f32.gmra.mxu1 %vm171_vm1, %v11764_v2  ;;  %v8561_v30 = vmax.f32 %v2704_v31, %v8543_v39  ;;  %v8605_v31 = vld [vmem:[#allocation2 + $0x148] sm:$0xff] }
 0x315   : > { %3610 = vmatmul.msk.f32.gmra.mxu0 %vm171_vm1, %v11763_v40  ;;  %v3202_v4 = vmax.f32 %v3138_v18, %v3170_v5  ;;  %v2766_v12 = vmax.f32 %v2702_v56, %v8533_v38  ;;  %v3086_v40 = vrot.slane %v2765_v14, 2  ;;  %v11768_v14 = vld [vmem:[#allocation134_spill] sm:$0xff]  ;;  %v8586_v18 = vmax.f32 %v8470_v11, %v8543_v39 }
 0x316   : > { %v2911_v42 = vrot.slane %v8561_v30, 1  ;;  %v2706_v56 = vmax.f32 %v8439_v1, %v8577_v10  ;;  %v2847_v62 = vrot.slane %v8561_v30, 7  ;;  %v8611_v1 = vld [vmem:[#allocation2 + $0x150] sm:$0xff] }
 0x317   : > { %v2815_v2 = vrot.slane %v2766_v12, 7  ;;  %v2975_v8 = vrot.slane %v2766_v12, 6  ;;  %v3102_v3 = vsel %vm1085_vm5, %v3070_v25, %v3086_v40  ;;  %v11770_v12 = vld [vmem:[#allocation22_spill] sm:$0xff]  ;;  %v11772_v40 = vld [vmem:[#allocation9_spill] sm:$0xff] }
 0x319   : > { %3709 = vmatmul.msk.f32.gmra.mxu3 %vm171_vm1, %v3232_v19  ;;  %v3022_v19 = vsel %vm1004_vm4, %v2990_v59, %v3006_v50  ;;  %v2831_v59 = vrot.slane %v2767_v52, 7 }
 0x31a   : > { %3679 = vmatmul.msk.f32.gmra.mxu2 %vm171_vm1, %v8018_v36  ;;  %v3118_v36 = vsel %vm1085_vm5, %v3054_v22, %v3070_v25  ;;  %v3171_v24 = vmax.f32 %v2942_v33, %v3022_v19  ;;  %v2769_v22 = vmax.f32 %v2705_v29, %v8568_v15  ;;  %v3007_v25 = vrot.slane %v8561_v30, 6  ;;  %v11771_v19 = vld [vmem:[#allocation129_spill] sm:$0xff] }
 0x31b   : > { %v3234_v13 = vmax.f32 %v3202_v4, %v3118_v36  ;;  %v2879_v46 = vsel %vm842_vm2, %v2815_v2, %v2831_v59  ;;  %v3071_v33 = vrot.slane %v8561_v30, 2  ;;  %v2863_v29 = vsel %vm842_vm2, %v2831_v59, %v2847_v62 }
 0x31c   : > { %3645 = vmatmul.msk.f32.gmra.mxu1 %vm171_vm1, %v11766_v16  ;;  %v3203_v5 = vmax.f32 %v3139_v26, %v3171_v24  ;;  %v2927_v50 = vrot.slane %v2769_v22, 1  ;;  %v2708_v16 = vmax.f32 %v8449_v63, %v8586_v18  ;;  %v3140_v4 = vmax.f32 %v2767_v52, %v2879_v46 }
 0x31d   : > { %3611 = vmatmul.msk.f32.gmra.mxu0 %vm171_vm1, %v11765_v9  ;;  %v2959_v9 = vsel %vm923_vm3, %v2895_v43, %v2911_v42  ;;  %v2770_v26 = vmax.f32 %v2706_v56, %v8603_v45  ;;  %v3087_v59 = vrot.slane %v2769_v22, 2  ;;  %v3141_v43 = vmax.f32 %v8561_v30, %v2863_v29  ;;  %v11774_v56 = vld [vmem:[#allocation34_spill] sm:$0xff] }
 0x31e   : > { %v3235_v36 = vmax.f32 %v3203_v5, %v3102_v3  ;;  %v8627_v24 = vmax.f32 %v2708_v16, %v8611_v1  ;;  %v8644_v22 = vld [vmem:[#allocation2 + $0x158] sm:$0xff]  ;;  %v8658_v16 = vmax.f32 %v8533_v38, %v8603_v45 }
 0x31f   : > { %v2976_v3 = vrot.slane %v2770_v26, 6  ;;  %v11775_v30 = vld [vmem:[#allocation122_spill] sm:$0xff] }
 0x320   : > { %v2912_v5 = vrot.slane %v8627_v24, 1  ;;  %v2710_v38 = vmax.f32 %v8510_v23, %v8658_v16  ;;  %v8687_v23 = vld [vmem:[#allocation2 + $0x170] sm:$0xff] }
 0x321   : > { %3710 = vmatmul.msk.f32.gmra.mxu3 %vm171_vm1, %v3233_v35  ;;  %v8581_v35 = vmax.f32 %v8464_v6, %v8541_v20  ;;  %v3039_v6 = vsel %vm1004_vm4, %v2975_v8, %v2991_v27  ;;  %v8632_v8 = vmax.f32 %v8498_v60, %v8568_v15 }
 0x322   : > { %3680 = vmatmul.msk.f32.gmra.mxu2 %vm171_vm1, %v11768_v14  ;;  %v3172_v57 = vmax.f32 %v2959_v9, %v3039_v6  ;;  %v2816_v14 = vrot.slane %v2770_v26, 7  ;;  %v11773_v6 = vld [vmem:[#allocation24_spill] sm:$0xff]  ;;  %v2848_v26 = vrot.slane %v8627_v24, 7 }
 0x323   : > { %v2707_v11 = vmax.f32 %v8443_v55, %v8581_v35  ;;  %v3055_v55 = vrot.slane %v2767_v52, 2  ;;  %v3023_v52 = vsel %vm1004_vm4, %v2991_v27, %v3007_v25  ;;  %v2709_v60 = vmax.f32 %v8483_v37, %v8632_v8 }
 0x324   : > { %3646 = vmatmul.msk.f32.gmra.mxu1 %vm171_vm1, %v11769_v17  ;;  %v3204_v2 = vmax.f32 %v3140_v4, %v3172_v57  ;;  %v8668_v57 = vmax.f32 %v8543_v39, %v8611_v1  ;;  %v8679_v39 = vld [vmem:[#allocation2 + $0x160] sm:$0xff] }
 0x325   : > { %3612 = vmatmul.msk.f32.gmra.mxu0 %vm171_vm1, %v11767_v47  ;;  %v2771_v63 = vmax.f32 %v2707_v11, %v8605_v31  ;;  %v3119_v47 = vsel %vm1085_vm5, %v3055_v55, %v3071_v33  ;;  %v3103_v11 = vsel %vm1085_vm5, %v3071_v33, %v3087_v59  ;;  %v2773_v4 = vmax.f32 %v2709_v60, %v8644_v22 }
 0x326   : > { %v3236_v9 = vmax.f32 %v3204_v2, %v3119_v47  ;;  %v8681_v2 = vld [vmem:[#allocation2 + $0x168] sm:$0xff] }
 0x327   : > { %v2832_v17 = vrot.slane %v2771_v63, 7  ;;  %v2896_v27 = vrot.slane %v2771_v63, 1  ;;  %v2992_v46 = vrot.slane %v2771_v63, 6  ;;  %v2928_v29 = vrot.slane %v2773_v4, 1  ;;  %v11777_v47 = vld [vmem:[#allocation148_spill] sm:$0xff] }
 0x329   : > { %3711 = vmatmul.msk.f32.gmra.mxu3 %vm171_vm1, %v3234_v13  ;;  %v2943_v13 = vsel %vm923_vm3, %v2911_v42, %v2927_v50  ;;  %v2880_v50 = vsel %vm842_vm2, %v2816_v14, %v2832_v17  ;;  %v2960_v25 = vsel %vm923_vm3, %v2896_v27, %v2912_v5  ;;  %v3040_v37 = vsel %vm1004_vm4, %v2976_v3, %v2992_v46 }
 0x32a   : > { %3681 = vmatmul.msk.f32.gmra.mxu2 %vm171_vm1, %v11771_v19  ;;  %v3173_v42 = vmax.f32 %v2943_v13, %v3023_v52  ;;  %v3142_v55 = vmax.f32 %v2771_v63, %v2880_v50  ;;  %v3174_v33 = vmax.f32 %v2960_v25, %v3040_v37  ;;  %v3056_v19 = vrot.slane %v2771_v63, 2  ;;  %v11776_v52 = vld [vmem:[#allocation31_spill] sm:$0xff] }
 0x32b   : > { %v3008_v13 = vrot.slane %v8627_v24, 6  ;;  %v2712_v63 = vmax.f32 %v8522_v7, %v8668_v57  ;;  %v2864_v7 = vsel %vm842_vm2, %v2832_v17, %v2848_v26  ;;  %v2944_v27 = vsel %vm923_vm3, %v2912_v5, %v2928_v29 }
 0x32c   : > { %3647 = vmatmul.msk.f32.gmra.mxu1 %vm171_vm1, %v11772_v40  ;;  %v3205_v62 = vmax.f32 %v3141_v43, %v3173_v42  ;;  %v3072_v40 = vrot.slane %v8627_v24, 2  ;;  %v3206_v59 = vmax.f32 %v3142_v55, %v3174_v33  ;;  %v2774_v42 = vmax.f32 %v2710_v38, %v8679_v39 }
 0x32d   : > { %3613 = vmatmul.msk.f32.gmra.mxu0 %vm171_vm1, %v11770_v12  ;;  %v3024_v3 = vsel %vm1004_vm4, %v2992_v46, %v3008_v13  ;;  %v11779_v46 = vld [vmem:[#allocation37_spill] sm:$0xff]  ;;  %v8736_v29 = vmax.f32 %v8603_v45, %v8679_v39  ;;  %v11782_v45 = vld [vmem:[#allocation40_spill] sm:$0xff] }
 0x32e   : > { %v3237_v12 = vmax.f32 %v3205_v62, %v3103_v11  ;;  %v3120_v43 = vsel %vm1085_vm5, %v3056_v19, %v3072_v40  ;;  %v3175_v11 = vmax.f32 %v2944_v27, %v3024_v3  ;;  %v2817_v62 = vrot.slane %v2774_v42, 7  ;;  %v11783_v3 = vld [vmem:[#allocation168_spill] sm:$0xff] }
 0x32f   : > { %v3238_v60 = vmax.f32 %v3206_v59, %v3120_v43  ;;  %v2977_v25 = vrot.slane %v2774_v42, 6 }
 0x331   : > { %3712 = vmatmul.msk.f32.gmra.mxu3 %vm171_vm1, %v3235_v36  ;;  %v8662_v36 = vmax.f32 %v8541_v20, %v8605_v31 }
 0x332   : > { %3682 = vmatmul.msk.f32.gmra.mxu2 %vm171_vm1, %v11774_v56  ;;  %v3088_v56 = vrot.slane %v2773_v4, 2  ;;  %v11781_v4 = vld [vmem:[#allocation139_spill] sm:$0xff] }
 0x333   : > { %v2711_v20 = vmax.f32 %v8518_v51, %v8662_v36  ;;  %v11778_v51 = vld [vmem:[#allocation161_spill] sm:$0xff] }
 0x334   : > { %3648 = vmatmul.msk.f32.gmra.mxu1 %vm171_vm1, %v11775_v30  ;;  %v3143_v30 = vmax.f32 %v8627_v24, %v2864_v7  ;;  %v8719_v24 = vld [vmem:[#allocation2 + $0x178] sm:$0xff]  ;;  %v3104_v55 = vsel %vm1085_vm5, %v3072_v40, %v3088_v56  ;;  %v8740_v40 = vmax.f32 %v8605_v31, %v8681_v2  ;;  %v2714_v31 = vmax.f32 %v8577_v10, %v8736_v29  ;;  %v8766_v10 = vld [vmem:[#allocation2 + $0x190] sm:$0xff] }
 0x335   : > { %3614 = vmatmul.msk.f32.gmra.mxu0 %vm171_vm1, %v11773_v6  ;;  %v2775_v14 = vmax.f32 %v2711_v20, %v8681_v2  ;;  %v8707_v6 = vmax.f32 %v8568_v15, %v8644_v22 }
 0x336   : > { %v3207_v33 = vmax.f32 %v3143_v30, %v3175_v11  ;;  %v2715_v7 = vmax.f32 %v8581_v35, %v8740_v40  ;;  %v11784_v30 = vld [vmem:[#allocation28_spill] sm:$0xff] }
 0x337   : > { %v2833_v17 = vrot.slane %v2775_v14, 7  ;;  %v2897_v50 = vrot.slane %v2775_v14, 1  ;;  %v2993_v37 = vrot.slane %v2775_v14, 6  ;;  %v2713_v15 = vmax.f32 %v8547_v44, %v8707_v6 }
 0x338   : > { %v8725_v38 = vpop.f32.mrf.mxu0 }
 0x339   : > { %3713 = vmatmul.msk.f32.gmra.mxu3 %vm171_vm1, %v3236_v9  ;;  %v8703_v9 = vmax.f32 %v2712_v63, %v8687_v23  ;;  %v2881_v19 = vsel %vm842_vm2, %v2817_v62, %v2833_v17  ;;  %v3041_v44 = vsel %vm1004_vm4, %v2977_v25, %v2993_v37  ;;  %v2777_v13 = vmax.f32 %v2713_v15, %v8719_v24 }
 0x33a   : > { %3683 = vmatmul.msk.f32.gmra.mxu2 %vm171_vm1, %v11777_v47  ;;  %v3239_v63 = vmax.f32 %v3207_v33, %v3104_v55  ;;  %v3057_v47 = vrot.slane %v2775_v14, 2 }
 0x33b   : > { %v2913_v5 = vrot.slane %v8703_v9, 1  ;;  %v3073_v43 = vrot.slane %v8703_v9, 2  ;;  %v2849_v42 = vrot.slane %v8703_v9, 7  ;;  %v2929_v27 = vrot.slane %v2777_v13, 1 }
 0x33c   : > { %3649 = vmatmul.msk.f32.gmra.mxu1 %vm171_vm1, %v11778_v51  ;;  %v3144_v51 = vmax.f32 %v2775_v14, %v2881_v19  ;;  %v8758_v14 = vld [vmem:[#allocation2 + $0x180] sm:$0xff]  ;;  %v3089_v19 = vrot.slane %v2777_v13, 2 }
 0x33d   : > { %3615 = vmatmul.msk.f32.gmra.mxu0 %vm171_vm1, %v11776_v52  ;;  %v2961_v20 = vsel %vm923_vm3, %v2897_v50, %v2913_v5  ;;  %v8745_v52 = vmax.f32 %v8611_v1, %v8687_v23  ;;  %v3009_v1 = vrot.slane %v8703_v9, 6  ;;  %v3121_v35 = vsel %vm1085_vm5, %v3057_v47, %v3073_v43  ;;  %v11785_v47 = vld [vmem:[#allocation47_spill] sm:$0xff] }
 0x33e   : > { %v3176_v59 = vmax.f32 %v2961_v20, %v3041_v44  ;;  %v2865_v62 = vsel %vm842_vm2, %v2833_v17, %v2849_v42  ;;  %v2778_v50 = vmax.f32 %v2714_v31, %v8758_v14  ;;  %v8792_v17 = vmax.f32 %v8644_v22, %v8719_v24  ;;  %v11786_v22 = vld [vmem:[#allocation132_spill] sm:$0xff]  ;;  %v11787_v13 = vld [vmem:[#allocation123_spill] sm:$0xff] }
 0x33f   : > { %v2716_v56 = vmax.f32 %v8586_v18, %v8745_v52  ;;  %v3145_v20 = vmax.f32 %v8703_v9, %v2865_v62  ;;  %v8811_v31 = vmax.f32 %v8679_v39, %v8758_v14 }
 0x340   : > { %v3208_v11 = vmax.f32 %v3144_v51, %v3176_v59  ;;  %v2717_v9 = vmax.f32 %v8632_v8, %v8792_v17  ;;  %v3105_v8 = vsel %vm1085_vm5, %v3073_v43, %v3089_v19  ;;  %v8854_v19 = vld [vmem:[%s9639_s2] ss:$0 sm:$0xff] }
 0x341   : > { %3714 = vmatmul.msk.f32.gmra.mxu3 %vm171_vm1, %v3237_v12  ;;  %v11780_v12 = vld [vmem:[#allocation103_spill] sm:$0xff]  ;;  %v8732_v26 = vpop.f32.mrf.mxu1  ;;  %v8784_v15 = vmax.f32 %v2716_v56, %v8766_v10  ;;  %v2718_v43 = vmax.f32 %v8658_v16, %v8811_v31 }
 0x342   : > { %3684 = vmatmul.msk.f32.gmra.mxu2 %vm171_vm1, %v11780_v12  ;;  %v3025_v12 = vsel %vm1004_vm4, %v2993_v37, %v3009_v1  ;;  %v3240_v33 = vmax.f32 %v3208_v11, %v3121_v35  ;;  %v2978_v37 = vrot.slane %v2778_v50, 6 }
 0x343   : > { %v2914_v59 = vrot.slane %v8784_v15, 1 }
 0x344   : > { %3650 = vmatmul.msk.f32.gmra.mxu1 %vm171_vm1, %v11781_v4 }
 0x345   : > { %3616 = vmatmul.msk.f32.gmra.mxu0 %vm171_vm1, %v11779_v46  ;;  %v2945_v46 = vsel %vm923_vm3, %v2913_v5, %v2929_v27  ;;  %v2818_v5 = vrot.slane %v2778_v50, 7  ;;  %v8819_v27 = vmax.f32 %v8687_v23, %v8766_v10  ;;  %v8845_v50 = vld [vmem:[#allocation2 + $0x1a0] sm:$0xff] }
 0x346   : > { %v8777_v18 = vpop.f32.mrf.mxu2  ;;  %v3177_v44 = vmax.f32 %v2945_v46, %v3025_v12  ;;  %v8847_v46 = vld [vmem:[#allocation2 + $0x1a8] sm:$0xff]  ;;  %v8849_v12 = vld [vmem:[#allocation2 + $0x1b0] sm:$0xff] }
 0x347   : > { %v2720_v62 = vmax.f32 %v8668_v57, %v8819_v27  ;;  %v3074_v57 = vrot.slane %v8784_v15, 2 }
 0x348   : > { %v3209_v1 = vmax.f32 %v3145_v20, %v3177_v44  ;;  %v11788_v44 = vld [vmem:[#allocation53_spill] sm:$0xff] }
 0x349   : > { %3715 = vmatmul.msk.f32.gmra.mxu3 %vm171_vm1, %v3238_v60  ;;  %v8760_v60 = vld [vmem:[#allocation2 + $0x188] sm:$0xff] }
 0x34a   : > { %3685 = vmatmul.msk.f32.gmra.mxu2 %vm171_vm1, %v11783_v3  ;;  %v8775_v25 = vmax.f32 %v2715_v7, %v8760_v60  ;;  %v8815_v7 = vmax.f32 %v8681_v2, %v8760_v60 }
 0x34c   : > { %3651 = vmatmul.msk.f32.gmra.mxu1 %vm171_vm1, %v11784_v30  ;;  %v2898_v51 = vrot.slane %v8775_v25, 1  ;;  %v2994_v42 = vrot.slane %v8775_v25, 6  ;;  %v2719_v35 = vmax.f32 %v8662_v36, %v8815_v7  ;;  %v3058_v16 = vrot.slane %v8775_v25, 2 }
 0x34d   : > { %3617 = vmatmul.msk.f32.gmra.mxu0 %vm171_vm1, %v11782_v45  ;;  %v8807_v45 = vld [vmem:[#allocation2 + $0x198] sm:$0xff] }
 0x34e   : > { %v8786_v4 = vpop.f32.mrf.mxu0  ;;  %v8824_v3 = vpop.f32.mrf.mxu2  ;;  %v2962_v56 = vsel %vm923_vm3, %v2898_v51, %v2914_v59  ;;  %v3042_v2 = vsel %vm1004_vm4, %v2978_v37, %v2994_v42  ;;  %v8833_v23 = vmax.f32 %v2717_v9, %v8807_v45  ;;  %v11789_v51 = vld [vmem:[#allocation32_spill] sm:$0xff]  ;;  %v8870_v9 = vmax.f32 %v2719_v35, %v8847_v46 }
 0x34f   : > { %v3178_v36 = vmax.f32 %v2962_v56, %v3042_v2  ;;  %v3122_v2 = vsel %vm1085_vm5, %v3058_v16, %v3074_v57 }
 0x350   : > { %v8788_v55 = vpop.f32.mrf.mxu1  ;;  %v2930_v37 = vrot.slane %v8833_v23, 1  ;;  %v3090_v34 = vrot.slane %v8833_v23, 2  ;;  %v8924_v23 = vmax.f32 %v8758_v14, %v8845_v50 }
 0x351   : > { %3716 = vmatmul.msk.f32.gmra.mxu3 %vm171_vm1, %v3239_v63  ;;  %v2834_v63 = vrot.slane %v8775_v25, 7 }
 0x352   : > { %3686 = vmatmul.msk.f32.gmra.mxu2 %vm171_vm1, %v11786_v22  ;;  %v11790_v22 = vld [vmem:[#allocation162_spill] sm:$0xff]  ;;  %v2946_v35 = vsel %vm923_vm3, %v2914_v59, %v2930_v37  ;;  %v3106_v14 = vsel %vm1085_vm5, %v3074_v57, %v3090_v34  ;;  %v2722_v57 = vmax.f32 %v8736_v29, %v8924_v23  ;;  %v8974_v29 = vld [vmem:[#allocation2 + $0x1d0] sm:$0xff] }
 0x353   : > { %v2882_v39 = vsel %vm842_vm2, %v2818_v5, %v2834_v63  ;;  %v2850_v5 = vrot.slane %v8784_v15, 7 }
 0x354   : > { %3652 = vmatmul.msk.f32.gmra.mxu1 %vm171_vm1, %v11787_v13  ;;  %v3146_v20 = vmax.f32 %v8775_v25, %v2882_v39  ;;  %v2782_v25 = vmax.f32 %v2718_v43, %v8845_v50  ;;  %v8873_v13 = vmax.f32 %v2720_v62, %v8849_v12 }
 0x355   : > { %3618 = vmatmul.msk.f32.gmra.mxu0 %vm171_vm1, %v11785_v47  ;;  %v3010_v47 = vrot.slane %v8784_v15, 6  ;;  %v2866_v43 = vsel %vm842_vm2, %v2834_v63, %v2850_v5  ;;  %v2995_v63 = vrot.slane %v8870_v9, 6 }
 0x356   : > { %v8835_v30 = vpop.f32.mrf.mxu0  ;;  %v3210_v39 = vmax.f32 %v3146_v20, %v3178_v36  ;;  %v2835_v20 = vrot.slane %v8870_v9, 7  ;;  %v2899_v36 = vrot.slane %v8870_v9, 1  ;;  %v2915_v16 = vrot.slane %v8873_v13, 1 }
 0x357   : > { %v3147_v37 = vmax.f32 %v8784_v15, %v2866_v43 }
 0x358   : > { %v8837_v11 = vpop.f32.mrf.mxu1 }
 0x359   : > { %3717 = vmatmul.msk.f32.gmra.mxu3 %vm171_vm1, %v3240_v33  ;;  %v3241_v33 = vmax.f32 %v3209_v1, %v3105_v8  ;;  %v8877_v8 = vmax.f32 %v8719_v24, %v8807_v45  ;;  %v384_v1 = vadd.f32 %v8854_v19, %v8725_v38  ;;  %v3026_v24 = vsel %vm1004_vm4, %v2994_v42, %v3010_v47 }
 0x35a   : > { %3687 = vmatmul.msk.f32.gmra.mxu2 %vm171_vm1, %v11789_v51  ;;  %v2819_v38 = vrot.slane %v2782_v25, 7  ;;  %v3242_v42 = vmax.f32 %v3210_v39, %v3122_v2  ;;  %v3179_v47 = vmax.f32 %v2946_v35, %v3026_v24  ;;  %v11791_v51 = vld [vmem:[#allocation60_spill] sm:$0xff]  ;;  %v387_v2 = vadd.f32 %v8854_v19, %v8786_v4 }
 0x35b   : > { %v2721_v59 = vmax.f32 %v8707_v6, %v8877_v8  ;;  %v1460_v5 = vadd.f32 %v8732_v26, %v384_v1  ;;  %v2963_v26 = vsel %vm923_vm3, %v2899_v36, %v2915_v16  ;;  %v8938_v24 = vmax.f32 %v8766_v10, %v8849_v12 }
 0x35c   : > { %3653 = vmatmul.msk.f32.gmra.mxu1 %vm171_vm1, %v11790_v22  ;;  %v8882_v56 = vpop.f32.mrf.mxu2  ;;  %v8906_v22 = vld [vmem:[#allocation2 + $0x1b8] sm:$0xff]  ;;  %v2883_v6 = vsel %vm842_vm2, %v2819_v38, %v2835_v20  ;;  %v3211_v43 = vmax.f32 %v3147_v37, %v3179_v47  ;;  %v3075_v38 = vrot.slane %v8873_v13, 2  ;;  %v1461_v37 = vadd.f32 %v8788_v55, %v387_v2 }
 0x35d   : > { %3619 = vmatmul.msk.f32.gmra.mxu0 %vm171_vm1, %v11788_v44  ;;  %v2979_v44 = vrot.slane %v2782_v25, 6  ;;  %v11793_v25 = vld [vmem:[#allocation140_spill] sm:$0xff]  ;;  %v8920_v1 = vmax.f32 %v2721_v59, %v8906_v22  ;;  %v2466_v39 = vadd.f32 %v8777_v18, %v1460_v5  ;;  %v3148_v4 = vmax.f32 %v8870_v9, %v2883_v6 }
 0x35e   : > { %v2851_v59 = vrot.slane %v8873_v13, 7  ;;  %v3011_v5 = vrot.slane %v8873_v13, 6  ;;  %v3243_v47 = vmax.f32 %v3211_v43, %v3106_v14  ;;  %v8968_v6 = vld [vmem:[#allocation2 + $0x1c8] sm:$0xff] }
 0x35f   : > { %v3043_v15 = vsel %vm1004_vm4, %v2979_v44, %v2995_v63  ;;  %v2931_v10 = vrot.slane %v8920_v1, 1 }
 0x360   : > { %v3180_v44 = vmax.f32 %v2963_v26, %v3043_v15  ;;  %v2724_v26 = vmax.f32 %v8745_v52, %v8938_v24  ;;  %v3027_v52 = vsel %vm1004_vm4, %v2995_v63, %v3011_v5 }
 0x361   : > { %3718 = vmatmul.msk.f32.gmra.mxu3 %vm171_vm1, %v3241_v33  ;;  %v8894_v33 = vpop.f32.mrf.mxu1  ;;  %v2947_v2 = vsel %vm923_vm3, %v2915_v16, %v2931_v10  ;;  %v9007_v16 = vmax.f32 %v8807_v45, %v8906_v22 }
 0x362   : > { %v8892_v62 = vpop.f32.mrf.mxu0  ;;  %3688 = vmatmul.msk.f32.gmra.mxu2 %vm171_vm1, %v11792_v28  ;;  %v8928_v28 = vmax.f32 %v8760_v60, %v8847_v46  ;;  %v3059_v60 = vrot.slane %v8870_v9, 2  ;;  %v3212_v15 = vmax.f32 %v3148_v4, %v3180_v44 }
 0x364   : > { %3654 = vmatmul.msk.f32.gmra.mxu1 %vm171_vm1, %v11793_v25  ;;  %v8934_v35 = vpop.f32.mrf.mxu2  ;;  %v2723_v9 = vmax.f32 %v8740_v40, %v8928_v28  ;;  %v8966_v25 = vld [vmem:[#allocation2 + $0x1c0] sm:$0xff]  ;;  %v11795_v40 = vld [vmem:[#allocation33_spill] sm:$0xff]  ;;  %v3123_v55 = vsel %vm1085_vm5, %v3059_v60, %v3075_v38  ;;  %v2467_v60 = vadd.f32 %v8824_v3, %v1461_v37 }
 0x365   : > { %3620 = vmatmul.msk.f32.gmra.mxu0 %vm171_vm1, %v11791_v51  ;;  %v11794_v51 = vld [vmem:[#allocation62_spill] sm:$0xff]  ;;  %v2786_v43 = vmax.f32 %v2722_v57, %v8966_v25  ;;  %v3244_v44 = vmax.f32 %v3212_v15, %v3123_v55 }
 0x366   : > { %v8992_v14 = vmax.f32 %v2723_v9, %v8968_v6  ;;  %v9034_v55 = vld [vmem:[#allocation2 + $0x1d8] sm:$0xff] }
 0x367   : > { %v2820_v57 = vrot.slane %v2786_v43, 7  ;;  %v2980_v45 = vrot.slane %v2786_v43, 6 }
 0x368   : > { %v2836_v9 = vrot.slane %v8992_v14, 7 }
 0x369   : > { %3719 = vmatmul.msk.f32.gmra.mxu3 %vm171_vm1, %v3242_v42  ;;  %v8946_v18 = vpop.f32.mrf.mxu1 }
 0x36a   : > { %v8944_v36 = vpop.f32.mrf.mxu0  ;;  %3689 = vmatmul.msk.f32.gmra.mxu2 %vm171_vm1, %v8056_v61  ;;  %v390_v61 = vadd.f32 %v8854_v19, %v8835_v30 }
 0x36c   : > { %v3376_v34 = vpop.f32.mrf.mxu3  ;;  %3655 = vmatmul.msk.f32.gmra.mxu1 %vm171_vm1, %v11795_v40  ;;  %v1462_v10 = vadd.f32 %v8837_v11, %v390_v61  ;;  %v2725_v11 = vmax.f32 %v8792_v17, %v9007_v16  ;;  %v9030_v40 = vmax.f32 %v8847_v46, %v8968_v6  ;;  %v2884_v46 = vsel %vm842_vm2, %v2820_v57, %v2836_v9  ;;  %v9073_v57 = vld [vmem:[#allocation2 + $0x1f0] sm:$0xff] }
 0x36d   : > { %v3472_v42 = vadd.f32 %v3376_v34, %v2466_v39  ;;  %3621 = vmatmul.msk.f32.gmra.mxu0 %vm171_vm1, %v11794_v51  ;;  %v2867_v39 = vsel %vm842_vm2, %v2835_v20, %v2851_v59  ;;  %v8997_v20 = vmax.f32 %v2724_v26, %v8974_v29  ;;  %v8999_v4 = vpop.f32.mrf.mxu2  ;;  %v3091_v59 = vrot.slane %v8920_v1, 2  ;;  %v11796_v26 = vld [vmem:[#allocation63_spill] sm:$0xff] }
 0x36e   : > { %v3149_v5 = vmax.f32 %v8873_v13, %v2867_v39  ;;  %v3181_v34 = vmax.f32 %v2947_v2, %v3027_v52  ;;  %v2996_v51 = vrot.slane %v8992_v14, 6  ;;  %v11797_v13 = vld [vmem:[#allocation124_spill] sm:$0xff]  ;;  %v9026_v1 = vmax.f32 %v8845_v50, %v8966_v25 }
 0x36f   : > { %3504 = vst.msk [vmem:[%s8956_s30] sm:$0xff] %vm171_vm1, %v3472_v42  ;;  %v2900_v42 = vrot.slane %v8992_v14, 1  ;;  %v2468_v17 = vadd.f32 %v8882_v56, %v1462_v10  ;;  %v3107_v15 = vsel %vm1085_vm5, %v3075_v38, %v3091_v59  ;;  %v393_v50 = vadd.f32 %v8854_v19, %v8892_v62 }
 0x370   : > { %v3213_v39 = vmax.f32 %v3149_v5, %v3181_v34  ;;  %v9055_v56 = vmax.f32 %v2725_v11, %v9034_v55  ;;  %v2726_v2 = vmax.f32 %v8811_v31, %v9026_v1  ;;  %v2727_v62 = vmax.f32 %v8815_v7, %v9030_v40 }
 0x371   : > { %3720 = vmatmul.msk.f32.gmra.mxu3 %vm171_vm1, %v3243_v47  ;;  %v9003_v30 = vpop.f32.mrf.mxu1  ;;  %v2916_v47 = vrot.slane %v8997_v20, 1  ;;  %v3150_v10 = vmax.f32 %v8992_v14, %v2884_v46  ;;  %v3012_v11 = vrot.slane %v8997_v20, 6 }
 0x372   : > { %v9001_v63 = vpop.f32.mrf.mxu0  ;;  %3690 = vmatmul.msk.f32.gmra.mxu2 %vm171_vm1, %v8096_v49  ;;  %v9038_v49 = vmax.f32 %v8849_v12, %v8974_v29  ;;  %v3044_v12 = vsel %vm1004_vm4, %v2980_v45, %v2996_v51  ;;  %v3245_v34 = vmax.f32 %v3213_v39, %v3107_v15  ;;  %v2852_v45 = vrot.slane %v8997_v20, 7 }
 0x373   : > { %v2964_v52 = vsel %vm923_vm3, %v2900_v42, %v2916_v47  ;;  %v1463_v42 = vadd.f32 %v8894_v33, %v393_v50  ;;  %v11800_v33 = vld [vmem:[#allocation163_spill] sm:$0xff]  ;;  %v9097_v50 = vmax.f32 %v8906_v22, %v9034_v55  ;;  %v3028_v22 = vsel %vm1004_vm4, %v2996_v51, %v3012_v11  ;;  %v11801_v11 = vld [vmem:[#allocation65_spill] sm:$0xff] }
 0x374   : > { %v3379_v3 = vpop.f32.mrf.mxu3  ;;  %3656 = vmatmul.msk.f32.gmra.mxu1 %vm171_vm1, %v11797_v13  ;;  %v2728_v59 = vmax.f32 %v8819_v27, %v9038_v49  ;;  %v3182_v31 = vmax.f32 %v2964_v52, %v3044_v12  ;;  %v2932_v27 = vrot.slane %v9055_v56, 1  ;;  %v11799_v13 = vld [vmem:[#allocation191_spill] sm:$0xff]  ;;  %v396_v52 = vadd.f32 %v8854_v19, %v8944_v36 }
 0x375   : > { %v3473_v37 = vadd.f32 %v3379_v3, %v2467_v60  ;;  %3622 = vmatmul.msk.f32.gmra.mxu0 %vm171_vm1, %v11796_v26  ;;  %v9052_v61 = vpop.f32.mrf.mxu2  ;;  %v9065_v60 = vld [vmem:[#allocation2 + $0x1e0] sm:$0xff]  ;;  %v3060_v3 = vrot.slane %v8992_v14, 2  ;;  %v11798_v26 = vld [vmem:[#allocation64_spill] sm:$0xff]  ;;  %v2469_v46 = vadd.f32 %v8934_v35, %v1463_v42  ;;  %v2729_v51 = vmax.f32 %v8877_v8, %v9097_v50 }
 0x376   : > { %v2790_v14 = vmax.f32 %v2726_v2, %v9065_v60  ;;  %v9093_v15 = vmax.f32 %v2728_v59, %v9073_v57  ;;  %v3214_v39 = vmax.f32 %v3150_v10, %v3182_v31  ;;  %v2868_v2 = vsel %vm842_vm2, %v2836_v9, %v2852_v45 }
 0x377   : > { %3505 = vst.msk [vmem:[%s8956_s30 + $0x8] sm:$0xff] %vm171_vm1, %v3473_v37  ;;  %v3076_v37 = vrot.slane %v8997_v20, 2  ;;  %v2948_v59 = vsel %vm923_vm3, %v2916_v47, %v2932_v27  ;;  %v1464_v45 = vadd.f32 %v8946_v18, %v396_v52  ;;  %v399_v52 = vadd.f32 %v8854_v19, %v9001_v63 }
 0x378   : > { %v2981_v10 = vrot.slane %v2790_v14, 6  ;;  %v3183_v27 = vmax.f32 %v2948_v59, %v3028_v22  ;;  %v2853_v63 = vrot.slane %v9093_v15, 7 }
 0x379   : > { %3721 = vmatmul.msk.f32.gmra.mxu3 %vm171_vm1, %v3244_v44  ;;  %v9063_v43 = vpop.f32.mrf.mxu1  ;;  %v9067_v44 = vld [vmem:[#allocation2 + $0x1e8] sm:$0xff]  ;;  %v3124_v12 = vsel %vm1085_vm5, %v3060_v3, %v3076_v37  ;;  %v2917_v3 = vrot.slane %v9093_v15, 1 }
 0x37a   : > { %v9057_v38 = vpop.f32.mrf.mxu0  ;;  %3691 = vmatmul.msk.f32.gmra.mxu2 %vm171_vm1, %v11799_v13  ;;  %v3246_v47 = vmax.f32 %v3214_v39, %v3124_v12  ;;  %v9127_v13 = vld [vmem:[#allocation2 + $0x1f8] sm:$0xff] }
 0x37b   : > { %v9151_v39 = vmax.f32 %v2729_v51, %v9127_v13 }
 0x37c   : > { %v3382_v5 = vpop.f32.mrf.mxu3  ;;  %3657 = vmatmul.msk.f32.gmra.mxu1 %vm171_vm1, %v11800_v33  ;;  %v11802_v33 = vld [vmem:[#allocation141_spill] sm:$0xff] }
 0x37d   : > { %v3474_v7 = vadd.f32 %v3382_v5, %v2468_v17  ;;  %3623 = vmatmul.msk.f32.gmra.mxu0 %vm171_vm1, %v11798_v26  ;;  %v9086_v17 = vmax.f32 %v2727_v62, %v9067_v44  ;;  %v9107_v62 = vpop.f32.mrf.mxu2  ;;  %v2821_v5 = vrot.slane %v2790_v14, 7  ;;  %v3151_v26 = vmax.f32 %v8997_v20, %v2868_v2 }
 0x37e   : > { %v3092_v14 = vrot.slane %v9055_v56, 2  ;;  %v9144_v56 = vmax.f32 %v8966_v25, %v9065_v60  ;;  %v9159_v2 = vmax.f32 %v8974_v29, %v9073_v57 }
 0x37f   : > { %3506 = vst.msk [vmem:[%s8956_s30 + $0x10] sm:$0xff] %vm171_vm1, %v3474_v7  ;;  %v2837_v35 = vrot.slane %v9086_v17, 7  ;;  %v2901_v36 = vrot.slane %v9086_v17, 1  ;;  %v2997_v9 = vrot.slane %v9086_v17, 6  ;;  %v3215_v12 = vmax.f32 %v3151_v26, %v3183_v27  ;;  %v9180_v26 = vld [vmem:[#allocation2 + $0x200] sm:$0xff]  ;;  %v9182_v27 = vld [vmem:[#allocation2 + $0x208] sm:$0xff] }
 0x381   : > { %3722 = vmatmul.msk.f32.gmra.mxu3 %vm171_vm1, %v3245_v34  ;;  %v9119_v31 = vpop.f32.mrf.mxu1  ;;  %v2885_v8 = vsel %vm842_vm2, %v2821_v5, %v2837_v35  ;;  %v2965_v18 = vsel %vm923_vm3, %v2901_v36, %v2917_v3  ;;  %v3045_v20 = vsel %vm1004_vm4, %v2981_v10, %v2997_v9  ;;  %v3077_v36 = vrot.slane %v9093_v15, 2 }
 0x382   : > { %v9114_v34 = vpop.f32.mrf.mxu0  ;;  %3692 = vmatmul.msk.f32.gmra.mxu2 %vm171_vm1, %v8108_v32  ;;  %v9148_v32 = vmax.f32 %v8968_v6, %v9067_v44  ;;  %v3108_v6 = vsel %vm1085_vm5, %v3076_v37, %v3092_v14  ;;  %v3152_v59 = vmax.f32 %v9086_v17, %v2885_v8  ;;  %v3184_v22 = vmax.f32 %v2965_v18, %v3045_v20 }
 0x383   : > { %v2730_v37 = vmax.f32 %v8924_v23, %v9144_v56  ;;  %v2732_v14 = vmax.f32 %v8938_v24, %v9159_v2  ;;  %v2869_v24 = vsel %vm842_vm2, %v2837_v35, %v2853_v63 }
 0x384   : > { %v3385_v7 = vpop.f32.mrf.mxu3  ;;  %3658 = vmatmul.msk.f32.gmra.mxu1 %vm171_vm1, %v11802_v33  ;;  %v2731_v51 = vmax.f32 %v8928_v28, %v9148_v32  ;;  %v9188_v33 = vld [vmem:[#allocation2 + $0x210] sm:$0xff]  ;;  %v3216_v23 = vmax.f32 %v3152_v59, %v3184_v22  ;;  %v3093_v59 = vrot.slane %v9151_v39, 2  ;;  %v3153_v22 = vmax.f32 %v9093_v15, %v2869_v24 }
 0x385   : > { %v3475_v42 = vadd.f32 %v3385_v7, %v2469_v46  ;;  %3624 = vmatmul.msk.f32.gmra.mxu0 %vm171_vm1, %v11801_v11  ;;  %v2470_v46 = vadd.f32 %v8999_v4, %v1464_v45  ;;  %v9161_v25 = vpop.f32.mrf.mxu2  ;;  %v3061_v4 = vrot.slane %v9086_v17, 2  ;;  %v2933_v7 = vrot.slane %v9151_v39, 1  ;;  %v11803_v11 = vld [vmem:[#allocation66_spill] sm:$0xff]  ;;  %v11804_v28 = vld [vmem:[#allocation41_spill] sm:$0xff] }
 0x386   : > { %v1465_v17 = vadd.f32 %v9003_v30, %v399_v52  ;;  %v3247_v45 = vmax.f32 %v3215_v12, %v3108_v6  ;;  %v402_v30 = vadd.f32 %v8854_v19, %v9057_v38  ;;  %v2794_v20 = vmax.f32 %v2730_v37, %v9180_v26  ;;  %v9236_v39 = vld [vmem:[#allocation2 + $0x218] sm:$0xff] }
 0x387   : > { %3507 = vst.msk [vmem:[%s8956_s30 + $0x18] sm:$0xff] %vm171_vm1, %v3475_v42  ;;  %v3125_v8 = vsel %vm1085_vm5, %v3061_v4, %v3077_v36  ;;  %v2949_v18 = vsel %vm923_vm3, %v2917_v3, %v2933_v7  ;;  %v9214_v52 = vmax.f32 %v9034_v55, %v9127_v13  ;;  %v9217_v35 = vmax.f32 %v2732_v14, %v9188_v33 }
 0x388   : > { %v2471_v38 = vadd.f32 %v9052_v61, %v1465_v17  ;;  %v3248_v12 = vmax.f32 %v3216_v23, %v3125_v8  ;;  %v1466_v6 = vadd.f32 %v9063_v43, %v402_v30  ;;  %v2822_v63 = vrot.slane %v2794_v20, 7  ;;  %v11806_v17 = vld [vmem:[#allocation125_spill] sm:$0xff] }
 0x389   : > { %3723 = vmatmul.msk.f32.gmra.mxu3 %vm171_vm1, %v3246_v47  ;;  %v9171_v10 = vpop.f32.mrf.mxu1  ;;  %v3013_v47 = vrot.slane %v9093_v15, 6  ;;  %v2733_v15 = vmax.f32 %v9007_v16, %v9214_v52  ;;  %v405_v16 = vadd.f32 %v8854_v19, %v9114_v34  ;;  %v3109_v23 = vsel %vm1085_vm5, %v3077_v36, %v3093_v59 }
 0x38a   : > { %v9166_v5 = vpop.f32.mrf.mxu0  ;;  %3693 = vmatmul.msk.f32.gmra.mxu2 %vm171_vm1, %v8122_v48  ;;  %v2472_v14 = vadd.f32 %v9107_v62, %v1466_v6  ;;  %v9267_v34 = vmax.f32 %v9067_v44, %v9182_v27  ;;  %v9271_v36 = vmax.f32 %v9073_v57, %v9188_v33  ;;  %v2854_v59 = vrot.slane %v9217_v35, 7 }
 0x38b   : > { %v3029_v48 = vsel %vm1004_vm4, %v2997_v9, %v3013_v47  ;;  %v2982_v47 = vrot.slane %v2794_v20, 6  ;;  %v9261_v30 = vmax.f32 %v2733_v15, %v9236_v39 }
 0x38c   : > { %v3388_v29 = vpop.f32.mrf.mxu3  ;;  %3659 = vmatmul.msk.f32.gmra.mxu1 %vm171_vm1, %v11804_v28  ;;  %v3185_v61 = vmax.f32 %v2949_v18, %v3029_v48  ;;  %v3078_v48 = vrot.slane %v9217_v35, 2 }
 0x38d   : > { %v3476_v42 = vadd.f32 %v3388_v29, %v2470_v46  ;;  %3625 = vmatmul.msk.f32.gmra.mxu0 %vm171_vm1, %v11803_v11  ;;  %v9208_v46 = vmax.f32 %v2731_v51, %v9182_v27  ;;  %v9219_v3 = vpop.f32.mrf.mxu2  ;;  %v2918_v51 = vrot.slane %v9217_v35, 1  ;;  %v9246_v11 = vmax.f32 %v9065_v60, %v9180_v26 }
 0x38f   : > { %3508 = vst.msk [vmem:[%s8956_s30 + $0x20] sm:$0xff] %vm171_vm1, %v3476_v42  ;;  %v2838_v29 = vrot.slane %v9208_v46, 7  ;;  %v2902_v7 = vrot.slane %v9208_v46, 1  ;;  %v2998_v43 = vrot.slane %v9208_v46, 6  ;;  %v11805_v42 = vld [vmem:[#allocation67_spill] sm:$0xff]  ;;  %v3062_v18 = vrot.slane %v9208_v46, 2 }
 0x391   : > { %3724 = vmatmul.msk.f32.gmra.mxu3 %vm171_vm1, %v3247_v45  ;;  %v9226_v4 = vpop.f32.mrf.mxu1  ;;  %v3217_v45 = vmax.f32 %v3153_v22, %v3185_v61  ;;  %v2966_v28 = vsel %vm923_vm3, %v2902_v7, %v2918_v51  ;;  %v3046_v60 = vsel %vm1004_vm4, %v2982_v47, %v2998_v43  ;;  %v2934_v22 = vrot.slane %v9261_v30, 1  ;;  %v11808_v47 = vld [vmem:[#allocation164_spill] sm:$0xff] }
 0x392   : > { %v9221_v9 = vpop.f32.mrf.mxu0  ;;  %3694 = vmatmul.msk.f32.gmra.mxu2 %vm171_vm1, %v8134_v21  ;;  %v2886_v21 = vsel %vm842_vm2, %v2822_v63, %v2838_v29  ;;  %v3186_v6 = vmax.f32 %v2966_v28, %v3046_v60  ;;  %v3014_v61 = vrot.slane %v9217_v35, 6  ;;  %v2734_v63 = vmax.f32 %v9026_v1, %v9246_v11  ;;  %v9304_v1 = vld [vmem:[#allocation2 + $0x228] sm:$0xff] }
 0x393   : > { %v3249_v24 = vmax.f32 %v3217_v45, %v3109_v23  ;;  %v3154_v44 = vmax.f32 %v9208_v46, %v2886_v21  ;;  %v2735_v46 = vmax.f32 %v9030_v40, %v9267_v34  ;;  %v2736_v7 = vmax.f32 %v9038_v49, %v9271_v36 }
 0x394   : > { %v3391_v55 = vpop.f32.mrf.mxu3  ;;  %3660 = vmatmul.msk.f32.gmra.mxu1 %vm171_vm1, %v11806_v17  ;;  %v3126_v40 = vsel %vm1085_vm5, %v3062_v18, %v3078_v48  ;;  %v2870_v15 = vsel %vm842_vm2, %v2838_v29, %v2854_v59  ;;  %v2950_v17 = vsel %vm923_vm3, %v2918_v51, %v2934_v22  ;;  %v9339_v18 = vld [vmem:[#allocation2 + $0x238] sm:$0xff]  ;;  %v11809_v59 = vld [vmem:[#allocation69_spill] sm:$0xff] }
 0x395   : > { %v3477_v37 = vadd.f32 %v3391_v55, %v2471_v38  ;;  %3626 = vmatmul.msk.f32.gmra.mxu0 %vm171_vm1, %v11805_v42  ;;  %v9263_v62 = vpop.f32.mrf.mxu2  ;;  %v11807_v55 = vld [vmem:[#allocation68_spill] sm:$0xff]  ;;  %v3218_v49 = vmax.f32 %v3154_v44, %v3186_v6  ;;  %v3155_v60 = vmax.f32 %v9217_v35, %v2870_v15 }
 0x397   : > { %3509 = vst.msk [vmem:[%s8956_s30 + $0x28] sm:$0xff] %vm171_vm1, %v3477_v37  ;;  %v9302_v37 = vmax.f32 %v9127_v13, %v9236_v39  ;;  %v408_v13 = vadd.f32 %v8854_v19, %v9166_v5  ;;  %v3250_v28 = vmax.f32 %v3218_v49, %v3126_v40 }
 0x399   : > { %3725 = vmatmul.msk.f32.gmra.mxu3 %vm171_vm1, %v3248_v12  ;;  %v9277_v20 = vpop.f32.mrf.mxu1  ;;  %v1467_v12 = vadd.f32 %v9119_v31, %v405_v16  ;;  %v9290_v31 = vld [vmem:[#allocation2 + $0x220] sm:$0xff]  ;;  %v9326_v16 = vmax.f32 %v2735_v46, %v9304_v1  ;;  %v2737_v5 = vmax.f32 %v9097_v50, %v9302_v37 }
 0x39a   : > { %v9273_v8 = vpop.f32.mrf.mxu0  ;;  %3695 = vmatmul.msk.f32.gmra.mxu2 %vm171_vm1, %v8138_v0  ;;  %v9306_v0 = vld [vmem:[#allocation2 + $0x230] sm:$0xff]  ;;  %v2798_v45 = vmax.f32 %v2734_v63, %v9290_v31  ;;  %v2675_v63 = vmax.f32 %v9182_v27, %v9304_v1 }
 0x39b   : > { %v2473_v42 = vadd.f32 %v9161_v25, %v1467_v12  ;;  %v3030_v25 = vsel %vm1004_vm4, %v2998_v43, %v3014_v61  ;;  %v9329_v29 = vmax.f32 %v2736_v7, %v9306_v0  ;;  %v3094_v43 = vrot.slane %v9261_v30, 2  ;;  %v11810_v61 = vld [vmem:[#allocation48_spill] sm:$0xff] }
 0x39c   : > { %v3394_v38 = vpop.f32.mrf.mxu3  ;;  %3661 = vmatmul.msk.f32.gmra.mxu1 %vm171_vm1, %v11808_v47  ;;  %v1468_v12 = vadd.f32 %v9171_v10, %v408_v13  ;;  %v2823_v44 = vrot.slane %v2798_v45, 7  ;;  %v2983_v6 = vrot.slane %v2798_v45, 6  ;;  %v2839_v50 = vrot.slane %v9326_v16, 7  ;;  %v9388_v45 = vld [vmem:[#allocation2 + $0x240] sm:$0xff] }
 0x39d   : > { %v3478_v57 = vadd.f32 %v3394_v38, %v2472_v14  ;;  %3627 = vmatmul.msk.f32.gmra.mxu0 %vm171_vm1, %v11807_v55  ;;  %v9323_v14 = vpop.f32.mrf.mxu2  ;;  %v2919_v22 = vrot.slane %v9329_v29, 1  ;;  %v2999_v30 = vrot.slane %v9326_v16, 6  ;;  %v9355_v10 = vmax.f32 %v2737_v5, %v9339_v18  ;;  %v9390_v5 = vld [vmem:[#allocation2 + $0x248] sm:$0xff] }
 0x39e   : > { %v2674_v55 = vmax.f32 %v9180_v26, %v9290_v31  ;;  %v2676_v7 = vmax.f32 %v9188_v33, %v9306_v0  ;;  %v411_v47 = vadd.f32 %v8854_v19, %v9221_v9  ;;  %v2887_v27 = vsel %vm842_vm2, %v2823_v44, %v2839_v50 }
 0x39f   : > { %3510 = vst.msk [vmem:[%s8956_s30 + $0x30] sm:$0xff] %vm171_vm1, %v3478_v57  ;;  %v2903_v57 = vrot.slane %v9326_v16, 1  ;;  %v3047_v40 = vsel %vm1004_vm4, %v2983_v6, %v2999_v30  ;;  %v2935_v35 = vrot.slane %v9355_v10, 1  ;;  %v3015_v9 = vrot.slane %v9329_v29, 6 }
 0x3a0   : > { %v2738_v15 = vmax.f32 %v9144_v56, %v2674_v55  ;;  %v2739_v13 = vmax.f32 %v9148_v32, %v2675_v63  ;;  %v9397_v56 = vld [vmem:[#allocation2 + $0x250] sm:$0xff]  ;;  %v3063_v32 = vrot.slane %v9326_v16, 2 }
 0x3a1   : > { %3726 = vmatmul.msk.f32.gmra.mxu3 %vm171_vm1, %v3249_v24  ;;  %v9333_v21 = vpop.f32.mrf.mxu1  ;;  %v3187_v24 = vmax.f32 %v2950_v17, %v3030_v25  ;;  %v2967_v33 = vsel %vm923_vm3, %v2903_v57, %v2919_v22  ;;  %v3031_v6 = vsel %vm1004_vm4, %v2999_v30, %v3015_v9  ;;  %v414_v57 = vadd.f32 %v8854_v19, %v9273_v8  ;;  %v11813_v9 = vld [vmem:[#allocation71_spill] sm:$0xff] }
 0x3a2   : > { %v9331_v23 = vpop.f32.mrf.mxu0  ;;  %3696 = vmatmul.msk.f32.gmra.mxu2 %vm171_vm1, %v8248_v58  ;;  %v2474_v58 = vadd.f32 %v9219_v3, %v1468_v12  ;;  %v2855_v3 = vrot.slane %v9329_v29, 7  ;;  %v3079_v12 = vrot.slane %v9329_v29, 2  ;;  %v2677_v30 = vmax.f32 %v9236_v39, %v9339_v18 }
 0x3a3   : > { %v3219_v46 = vmax.f32 %v3155_v60, %v3187_v24  ;;  %v3156_v60 = vmax.f32 %v9326_v16, %v2887_v27  ;;  %v3188_v24 = vmax.f32 %v2967_v33, %v3047_v40  ;;  %v2802_v16 = vmax.f32 %v2738_v15, %v9388_v45 }
 0x3a4   : > { %v3397_v51 = vpop.f32.mrf.mxu3  ;;  %3662 = vmatmul.msk.f32.gmra.mxu1 %vm171_vm1, %v11810_v61  ;;  %v2871_v44 = vsel %vm842_vm2, %v2839_v50, %v2855_v3  ;;  %v3127_v55 = vsel %vm1085_vm5, %v3063_v32, %v3079_v12  ;;  %v1470_v3 = vadd.f32 %v9277_v20, %v414_v57  ;;  %v417_v20 = vadd.f32 %v8854_v19, %v9331_v23  ;;  %v11815_v57 = vld [vmem:[#allocation72_spill] sm:$0xff] }
 0x3a5   : > { %v3479_v38 = vadd.f32 %v3397_v51, %v2473_v42  ;;  %3628 = vmatmul.msk.f32.gmra.mxu0 %vm171_vm1, %v11809_v59  ;;  %v3110_v42 = vsel %vm1085_vm5, %v3078_v48, %v3094_v43  ;;  %v9371_v26 = vpop.f32.mrf.mxu2  ;;  %v2740_v51 = vmax.f32 %v9159_v2, %v2676_v7  ;;  %v1469_v43 = vadd.f32 %v9226_v4, %v411_v47  ;;  %v11812_v2 = vld [vmem:[#allocation126_spill] sm:$0xff] }
 0x3a6   : > { %v3251_v25 = vmax.f32 %v3219_v46, %v3110_v42  ;;  %v2951_v4 = vsel %vm923_vm3, %v2919_v22, %v2935_v35  ;;  %v9415_v59 = vmax.f32 %v2739_v13, %v9390_v5  ;;  %v3220_v61 = vmax.f32 %v3156_v60, %v3188_v24  ;;  %v9446_v13 = vld [vmem:[#allocation2 + $0x258] sm:$0xff] }
 0x3a7   : > { %3511 = vst.msk [vmem:[%s8956_s30 + $0x38] sm:$0xff] %vm171_vm1, %v3479_v38  ;;  %v11811_v38 = vld [vmem:[#allocation70_spill] sm:$0xff]  ;;  %v9418_v50 = vmax.f32 %v2740_v51, %v9397_v56  ;;  %v3157_v63 = vmax.f32 %v9329_v29, %v2871_v44  ;;  %v3189_v46 = vmax.f32 %v2951_v4, %v3031_v6  ;;  %v2984_v33 = vrot.slane %v2802_v16, 6 }
 0x3a8   : > { %v2840_v47 = vrot.slane %v9415_v59, 7  ;;  %v2904_v27 = vrot.slane %v9415_v59, 1  ;;  %v3000_v40 = vrot.slane %v9415_v59, 6  ;;  %v3252_v35 = vmax.f32 %v3220_v61, %v3127_v55  ;;  %v2607_v61 = vld [vmem:[#allocation2 + $0x268] sm:$0xff] }
 0x3a9   : > { %3727 = vmatmul.msk.f32.gmra.mxu3 %vm171_vm1, %v3250_v28  ;;  %v9384_v48 = vpop.f32.mrf.mxu1  ;;  %v2920_v39 = vrot.slane %v9418_v50, 1  ;;  %v3221_v15 = vmax.f32 %v3157_v63, %v3189_v46  ;;  %v2678_v51 = vmax.f32 %v9290_v31, %v9388_v45  ;;  %v2476_v23 = vadd.f32 %v9323_v14, %v1470_v3  ;;  %v11816_v55 = vld [vmem:[#allocation4_spill] sm:$0xff]  ;;  %v11817_v63 = vld [vmem:[#allocation143_spill] sm:$0xff] }
 0x3aa   : > { %v9380_v49 = vpop.f32.mrf.mxu0  ;;  %3697 = vmatmul.msk.f32.gmra.mxu2 %vm171_vm1, %v8240_v54  ;;  %v2475_v54 = vadd.f32 %v9263_v62, %v1469_v43  ;;  %v2824_v62 = vrot.slane %v2802_v16, 7  ;;  %v3048_v43 = vsel %vm1004_vm4, %v2984_v33, %v3000_v40  ;;  %v2680_v60 = vmax.f32 %v9306_v0, %v9397_v56 }
 0x3ab   : > { %v1471_v0 = vadd.f32 %v9333_v21, %v417_v20  ;;  %v2856_v56 = vrot.slane %v9418_v50, 7  ;;  %v2608_v21 = vld [vmem:[#allocation2 + $0x270] sm:$0xff] }
 0x3ac   : > { %v3400_v17 = vpop.f32.mrf.mxu3  ;;  %3663 = vmatmul.msk.f32.gmra.mxu1 %vm171_vm1, %v11812_v2  ;;  %v2742_v2 = vmax.f32 %v9246_v11, %v2678_v51  ;;  %v420_v11 = vadd.f32 %v8854_v19, %v9380_v49  ;;  %v11818_v51 = vld [vmem:[#allocation75_spill] sm:$0xff] }
 0x3ad   : > { %v3480_v28 = vadd.f32 %v3400_v17, %v2474_v58  ;;  %3629 = vmatmul.msk.f32.gmra.mxu0 %vm171_vm1, %v11811_v38  ;;  %v9424_v22 = vpop.f32.mrf.mxu2  ;;  %v3095_v58 = vrot.slane %v9355_v10, 2  ;;  %v2741_v10 = vmax.f32 %v9214_v52, %v2677_v30  ;;  %v11814_v17 = vld [vmem:[#allocation165_spill] sm:$0xff]  ;;  %v2888_v52 = vsel %vm842_vm2, %v2824_v62, %v2840_v47 }
 0x3ae   : > { %v3158_v32 = vmax.f32 %v9415_v59, %v2888_v52  ;;  %v2744_v30 = vmax.f32 %v9271_v36, %v2680_v60 }
 0x3af   : > { %3512 = vst.msk [vmem:[%s8956_s30 + $0x40] sm:$0xff] %vm171_vm1, %v3480_v28  ;;  %v2968_v28 = vsel %vm923_vm3, %v2904_v27, %v2920_v39  ;;  %v2805_v24 = vmax.f32 %v2741_v10, %v9446_v13 }
 0x3b0   : > { %v9508_v33 = vmax.f32 %v2744_v30, %v2608_v21 }
 0x3b1   : > { %3728 = vmatmul.msk.f32.gmra.mxu3 %vm171_vm1, %v3251_v25  ;;  %v9435_v8 = vpop.f32.mrf.mxu1  ;;  %v3111_v25 = vsel %vm1085_vm5, %v3079_v12, %v3095_v58  ;;  %v3190_v12 = vmax.f32 %v2968_v28, %v3048_v43  ;;  %v2936_v16 = vrot.slane %v2805_v24, 1  ;;  %v2872_v58 = vsel %vm842_vm2, %v2840_v47, %v2856_v56  ;;  %v11820_v28 = vld [vmem:[#allocation166_spill] sm:$0xff] }
 0x3b2   : > { %v9431_v7 = vpop.f32.mrf.mxu0  ;;  %3698 = vmatmul.msk.f32.gmra.mxu2 %vm171_vm1, %v8252_v41  ;;  %v2679_v41 = vmax.f32 %v9304_v1, %v9390_v5  ;;  %v3253_v31 = vmax.f32 %v3221_v15, %v3111_v25  ;;  %v3064_v1 = vrot.slane %v9415_v59, 2  ;;  %v3080_v5 = vrot.slane %v9418_v50, 2  ;;  %v2606_v59 = vld [vmem:[#allocation2 + $0x260] sm:$0xff]  ;;  %v2609_v43 = vld [vmem:[#allocation2 + $0x278] sm:$0xff] }
 0x3b3   : > { %v2806_v36 = vmax.f32 %v2742_v2, %v2606_v59  ;;  %v2952_v27 = vsel %vm923_vm3, %v2920_v39, %v2936_v16  ;;  %v2681_v47 = vmax.f32 %v9339_v18, %v9446_v13  ;;  %v3096_v10 = vrot.slane %v2805_v24, 2 }
 0x3b4   : > { %v3403_v42 = vpop.f32.mrf.mxu3  ;;  %3664 = vmatmul.msk.f32.gmra.mxu1 %vm171_vm1, %v11814_v17  ;;  %v2743_v4 = vmax.f32 %v9267_v34, %v2679_v41  ;;  %v3222_v34 = vmax.f32 %v3158_v32, %v3190_v12  ;;  %v3128_v46 = vsel %vm1085_vm5, %v3064_v1, %v3080_v5  ;;  %v2921_v18 = vrot.slane %v9508_v33, 1  ;;  %v11819_v41 = vld [vmem:[#allocation29_spill] sm:$0xff] }
 0x3b5   : > { %v3481_v29 = vadd.f32 %v3403_v42, %v2475_v54  ;;  %3630 = vmatmul.msk.f32.gmra.mxu0 %vm171_vm1, %v11813_v9  ;;  %v9471_v38 = vpop.f32.mrf.mxu2  ;;  %v3016_v54 = vrot.slane %v9418_v50, 6  ;;  %v2477_v42 = vadd.f32 %v9371_v26, %v1471_v0  ;;  %v3159_v26 = vmax.f32 %v9418_v50, %v2872_v58 }
 0x3b6   : > { %v9500_v62 = vmax.f32 %v2743_v4, %v2607_v61  ;;  %v3254_v9 = vmax.f32 %v3222_v34, %v3128_v46  ;;  %v2825_v17 = vrot.slane %v2806_v36, 7  ;;  %v2985_v13 = vrot.slane %v2806_v36, 6 }
 0x3b7   : > { %3513 = vst.msk [vmem:[%s8956_s30 + $0x48] sm:$0xff] %vm171_vm1, %v3481_v29  ;;  %v3032_v49 = vsel %vm1004_vm4, %v3000_v40, %v3016_v54  ;;  %v2745_v50 = vmax.f32 %v9302_v37, %v2681_v47  ;;  %v3112_v60 = vsel %vm1085_vm5, %v3080_v5, %v3096_v10  ;;  %v3081_v54 = vrot.slane %v9508_v33, 2 }
 0x3b8   : > { %v3191_v40 = vmax.f32 %v2952_v27, %v3032_v49  ;;  %v2841_v20 = vrot.slane %v9500_v62, 7  ;;  %v2905_v25 = vrot.slane %v9500_v62, 1  ;;  %v3065_v16 = vrot.slane %v9500_v62, 2 }
 0x3b9   : > { %3729 = vmatmul.msk.f32.gmra.mxu3 %vm171_vm1, %v3252_v35  ;;  %v9478_v44 = vpop.f32.mrf.mxu1  ;;  %v1472_v35 = vadd.f32 %v9384_v48, %v420_v11  ;;  %v3001_v48 = vrot.slane %v9500_v62, 6  ;;  %v2809_v12 = vmax.f32 %v2745_v50, %v2609_v43  ;;  %v3017_v61 = vrot.slane %v9508_v33, 6 }
 0x3ba   : > { %v9473_v45 = vpop.f32.mrf.mxu0  ;;  %3699 = vmatmul.msk.f32.gmra.mxu2 %vm171_vm1, %v11816_v55  ;;  %v3223_v24 = vmax.f32 %v3159_v26, %v3191_v40  ;;  %v2889_v37 = vsel %vm842_vm2, %v2825_v17, %v2841_v20  ;;  %v2969_v1 = vsel %vm923_vm3, %v2905_v25, %v2921_v18  ;;  %v3129_v21 = vsel %vm1085_vm5, %v3065_v16, %v3081_v54 }
 0x3bb   : > { %v3049_v32 = vsel %vm1004_vm4, %v2985_v13, %v3001_v48  ;;  %v3160_v2 = vmax.f32 %v9500_v62, %v2889_v37  ;;  %v2937_v59 = vrot.slane %v2809_v12, 1  ;;  %v3033_v46 = vsel %vm1004_vm4, %v3001_v48, %v3017_v61 }
 0x3bc   : > { %v3406_v14 = vpop.f32.mrf.mxu3  ;;  %3665 = vmatmul.msk.f32.gmra.mxu1 %vm171_vm1, %v11817_v63  ;;  %v3255_v56 = vmax.f32 %v3223_v24, %v3112_v60  ;;  %v3192_v4 = vmax.f32 %v2969_v1, %v3049_v32  ;;  %v3097_v47 = vrot.slane %v2809_v12, 2 }
 0x3bd   : > { %v3482_v6 = vadd.f32 %v3406_v14, %v2476_v23  ;;  %3631 = vmatmul.msk.f32.gmra.mxu0 %vm171_vm1, %v11815_v57  ;;  %v9510_v29 = vpop.f32.mrf.mxu2  ;;  %v2478_v23 = vadd.f32 %v9424_v22, %v1472_v35  ;;  %v2857_v57 = vrot.slane %v9508_v33, 7  ;;  %v2953_v34 = vsel %vm923_vm3, %v2921_v18, %v2937_v59 }
 0x3be   : > { %v3224_v30 = vmax.f32 %v3160_v2, %v3192_v4  ;;  %v3193_v49 = vmax.f32 %v2953_v34, %v3033_v46 }
 0x3bf   : > { %3514 = vst.msk [vmem:[%s8956_s30 + $0x50] sm:$0xff] %vm171_vm1, %v3482_v6  ;;  %v2873_v11 = vsel %vm842_vm2, %v2841_v20, %v2857_v57 }
 0x3c0   : > { %v3256_v62 = vmax.f32 %v3224_v30, %v3129_v21  ;;  %v3161_v27 = vmax.f32 %v9508_v33, %v2873_v11 }
 0x3c1   : > { %3730 = vmatmul.msk.f32.gmra.mxu3 %vm171_vm1, %v3253_v31  ;;  %v9518_v39 = vpop.f32.mrf.mxu1  ;;  %v423_v31 = vadd.f32 %v8854_v19, %v9431_v7 }
 0x3c2   : > { %v9514_v3 = vpop.f32.mrf.mxu0  ;;  %3700 = vmatmul.msk.f32.gmra.mxu2 %vm171_vm1, %v11819_v41  ;;  %v3225_v10 = vmax.f32 %v3161_v27, %v3193_v49 }
 0x3c3   : > { %v1473_v6 = vadd.f32 %v9435_v8, %v423_v31  ;;  %v426_v8 = vadd.f32 %v8854_v19, %v9473_v45 }
 0x3c4   : > { %v3409_v15 = vpop.f32.mrf.mxu3  ;;  %3666 = vmatmul.msk.f32.gmra.mxu1 %vm171_vm1, %v11820_v28 }
 0x3c5   : > { %v3483_v52 = vadd.f32 %v3409_v15, %v2477_v42  ;;  %3632 = vmatmul.msk.f32.gmra.mxu0 %vm171_vm1, %v11818_v51  ;;  %v2415_v22 = vpop.f32.mrf.mxu2  ;;  %v2479_v55 = vadd.f32 %v9471_v38, %v1473_v6  ;;  %v1474_v45 = vadd.f32 %v9478_v44, %v426_v8  ;;  %v3113_v15 = vsel %vm1085_vm5, %v3081_v54, %v3097_v47 }
 0x3c6   : > { %v3257_v25 = vmax.f32 %v3225_v10, %v3113_v15 }
 0x3c7   : > { %3515 = vst.msk [vmem:[%s8956_s30 + $0x58] sm:$0xff] %vm171_vm1, %v3483_v52  ;;  %v2480_v35 = vadd.f32 %v9510_v29, %v1474_v45 }
 0x3c9   : > { %3731 = vmatmul.msk.f32.gmra.mxu3 %vm171_vm1, %v3254_v9  ;;  %v1412_v5 = vpop.f32.mrf.mxu1  ;;  %v429_v9 = vadd.f32 %v8854_v19, %v9514_v3  ;;  %v9582_v19 = vld [vmem:[%s9639_s2] ss:$0 sm:$0xff] }
 0x3ca   : > { %v431_v14 = vpop.f32.mrf.mxu0 }
 0x3cb   : > { %v1475_v20 = vadd.f32 %v9518_v39, %v429_v9  ;;  %v432_v53 = vadd.f32 %v9582_v19, %v431_v14 }
 0x3cc   : > { %v3412_v0 = vpop.f32.mrf.mxu3 }
 0x3cd   : > { %v3484_v7 = vadd.f32 %v3412_v0, %v2478_v23  ;;  %v2418_v63 = vpop.f32.mrf.mxu2  ;;  %v2481_v29 = vadd.f32 %v2415_v22, %v1475_v20  ;;  %v1476_v39 = vadd.f32 %v1412_v5, %v432_v53 }
 0x3cf   : > { %3516 = vst.msk [vmem:[%s8956_s30 + $0x60] sm:$0xff] %vm171_vm1, %v3484_v7  ;;  %v2482_v51 = vadd.f32 %v2418_v63, %v1476_v39 }
 0x3d1   : > { %3732 = vmatmul.msk.f32.gmra.mxu3 %vm171_vm1, %v3255_v56  ;;  %v1415_v36 = vpop.f32.mrf.mxu1 }
 0x3d2   : > { %v434_v58 = vpop.f32.mrf.mxu0 }
 0x3d3   : > { %v435_v41 = vadd.f32 %v9582_v19, %v434_v58 }
 0x3d4   : > { %v3415_v38 = vpop.f32.mrf.mxu3 }
 0x3d5   : > { %v3485_v42 = vadd.f32 %v3415_v38, %v2479_v55  ;;  %v2421_v26 = vpop.f32.mrf.mxu2  ;;  %v1477_v24 = vadd.f32 %v1415_v36, %v435_v41 }
 0x3d7   : > { %3517 = vst.msk [vmem:[%s8956_s30 + $0x68] sm:$0xff] %vm171_vm1, %v3485_v42  ;;  %v2483_v31 = vadd.f32 %v2421_v26, %v1477_v24 }
 0x3d9   : > { %3733 = vmatmul.msk.f32.gmra.mxu3 %vm171_vm1, %v3256_v62  ;;  %v1418_v40 = vpop.f32.mrf.mxu1 }
 0x3da   : > { %v437_v44 = vpop.f32.mrf.mxu0 }
 0x3db   : > { %v438_v37 = vadd.f32 %v9582_v19, %v437_v44 }
 0x3dc   : > { %v3418_v33 = vpop.f32.mrf.mxu3 }
 0x3dd   : > { %v3486_v17 = vadd.f32 %v3418_v33, %v2480_v35  ;;  %v2424_v3 = vpop.f32.mrf.mxu2  ;;  %v1478_v14 = vadd.f32 %v1418_v40, %v438_v37 }
 0x3df   : > { %3518 = vst.msk [vmem:[%s8956_s30 + $0x70] sm:$0xff] %vm171_vm1, %v3486_v17  ;;  %v2484_v0 = vadd.f32 %v2424_v3, %v1478_v14 }
 0x3e1   : > { %3734 = vmatmul.msk.f32.gmra.mxu3 %vm171_vm1, %v3257_v25  ;;  %v1421_v18 = vpop.f32.mrf.mxu1 }
 0x3e2   : > { %v440_v52 = vpop.f32.mrf.mxu0 }
 0x3e3   : > { %v441_v56 = vadd.f32 %v9582_v19, %v440_v52 }
 0x3e4   : > { %v3421_v13 = vpop.f32.mrf.mxu3 }
 0x3e5   : > { %v3487_v48 = vadd.f32 %v3421_v13, %v2481_v29  ;;  %v2427_v50 = vpop.f32.mrf.mxu2  ;;  %v1479_v16 = vadd.f32 %v1421_v18, %v441_v56 }
 0x3e7   : > { %3519 = vst.msk [vmem:[%s8956_s30 + $0x78] sm:$0xff] %vm171_vm1, %v3487_v48  ;;  %v2485_v57 = vadd.f32 %v2427_v50, %v1479_v16 }
 0x3e9   : > { %v1424_v23 = vpop.f32.mrf.mxu1 }
 0x3ea   : > { %v443_v28 = vpop.f32.mrf.mxu0 }
 0x3eb   : > { %v444_v59 = vadd.f32 %v9582_v19, %v443_v28 }
 0x3ec   : > { %v3424_v43 = vpop.f32.mrf.mxu3 }
 0x3ed   : > { %v3488_v60 = vadd.f32 %v3424_v43, %v2482_v51  ;;  %v2430_v1 = vpop.f32.mrf.mxu2  ;;  %v1480_v8 = vadd.f32 %v1424_v23, %v444_v59 }
 0x3ef   : > { %3520 = vst.msk [vmem:[%s8956_s30 + $0x80] sm:$0xff] %vm171_vm1, %v3488_v60  ;;  %v2486_v63 = vadd.f32 %v2430_v1, %v1480_v8 }
 0x3f1   : > { %v1427_v5 = vpop.f32.mrf.mxu1 }
 0x3f2   : > { %v446_v32 = vpop.f32.mrf.mxu0 }
 0x3f3   : > { %v447_v11 = vadd.f32 %v9582_v19, %v446_v32 }
 0x3f4   : > { %v3427_v22 = vpop.f32.mrf.mxu3 }
 0x3f5   : > { %v3489_v12 = vadd.f32 %v3427_v22, %v2483_v31  ;;  %v2433_v2 = vpop.f32.mrf.mxu2  ;;  %v1481_v36 = vadd.f32 %v1427_v5, %v447_v11 }
 0x3f7   : > { %3521 = vst.msk [vmem:[%s8956_s30 + $0x88] sm:$0xff] %vm171_vm1, %v3489_v12  ;;  %v2487_v42 = vadd.f32 %v2433_v2, %v1481_v36 }
 0x3f9   : > { %v1430_v54 = vpop.f32.mrf.mxu1 }
 0x3fa   : > { %v449_v7 = vpop.f32.mrf.mxu0 }
 0x3fb   : > { %v450_v45 = vadd.f32 %v9582_v19, %v449_v7 }
 0x3fc   : > { %v3430_v4 = vpop.f32.mrf.mxu3 }
 0x3fd   : > { %v3490_v6 = vadd.f32 %v3430_v4, %v2484_v0  ;;  %v2436_v30 = vpop.f32.mrf.mxu2  ;;  %v1482_v35 = vadd.f32 %v1430_v54, %v450_v45 }
 0x3ff   : > { %3522 = vst.msk [vmem:[%s8956_s30 + $0x90] sm:$0xff] %vm171_vm1, %v3490_v6  ;;  %v2488_v10 = vadd.f32 %v2436_v30, %v1482_v35 }
 0x401   : > { %v1433_v34 = vpop.f32.mrf.mxu1 }
 0x402   : > { %v452_v21 = vpop.f32.mrf.mxu0 }
 0x403   : > { %v453_v26 = vadd.f32 %v9582_v19, %v452_v21 }
 0x404   : > { %v3433_v61 = vpop.f32.mrf.mxu3 }
 0x405   : > { %v3491_v55 = vadd.f32 %v3433_v61, %v2485_v57  ;;  %v2439_v38 = vpop.f32.mrf.mxu2  ;;  %v1483_v33 = vadd.f32 %v1433_v34, %v453_v26 }
 0x407   : > { %3523 = vst.msk [vmem:[%s8956_s30 + $0x98] sm:$0xff] %vm171_vm1, %v3491_v55  ;;  %v2489_v20 = vadd.f32 %v2439_v38, %v1483_v33 }
 0x409   : > { %v1436_v49 = vpop.f32.mrf.mxu1 }
 0x40a   : > { %v455_v62 = vpop.f32.mrf.mxu0 }
 0x40b   : > { %v456_v25 = vadd.f32 %v9582_v19, %v455_v62 }
 0x40c   : > { %v3436_v46 = vpop.f32.mrf.mxu3 }
 0x40d   : > { %v3492_v58 = vadd.f32 %v3436_v46, %v2486_v63  ;;  %v2442_v9 = vpop.f32.mrf.mxu2  ;;  %v1484_v18 = vadd.f32 %v1436_v49, %v456_v25 }
 0x40f   : > { %3524 = vst.msk [vmem:[%s8956_s30 + $0xa0] sm:$0xff] %vm171_vm1, %v3492_v58  ;;  %v2490_v48 = vadd.f32 %v2442_v9, %v1484_v18 }
 0x411   : > { %v1439_v17 = vpop.f32.mrf.mxu1 }
 0x412   : > { %v458_v15 = vpop.f32.mrf.mxu0 }
 0x413   : > { %v459_v39 = vadd.f32 %v9582_v19, %v458_v15 }
 0x414   : > { %v3439_v27 = vpop.f32.mrf.mxu3 }
 0x415   : > { %v3493_v47 = vadd.f32 %v3439_v27, %v2487_v42  ;;  %v2445_v29 = vpop.f32.mrf.mxu2  ;;  %v1485_v28 = vadd.f32 %v1439_v17, %v459_v39 }
 0x417   : > { %3525 = vst.msk [vmem:[%s8956_s30 + $0xa8] sm:$0xff] %vm171_vm1, %v3493_v47  ;;  %v2491_v23 = vadd.f32 %v2445_v29, %v1485_v28 }
 0x419   : > { %v1442_v13 = vpop.f32.mrf.mxu1 }
 0x41a   : > { %v461_v3 = vpop.f32.mrf.mxu0 }
 0x41b   : > { %v462_v60 = vadd.f32 %v9582_v19, %v461_v3 }
 0x41c   : > { %v3442_v44 = vpop.f32.mrf.mxu3 }
 0x41d   : > { %v3494_v40 = vadd.f32 %v3442_v44, %v2488_v10  ;;  %v2448_v41 = vpop.f32.mrf.mxu2  ;;  %v1486_v1 = vadd.f32 %v1442_v13, %v462_v60 }
 0x41f   : > { %3526 = vst.msk [vmem:[%s8956_s30 + $0xb0] sm:$0xff] %vm171_vm1, %v3494_v40  ;;  %v2492_v12 = vadd.f32 %v2448_v41, %v1486_v1 }
 0x421   : > { %v1445_v24 = vpop.f32.mrf.mxu1 }
 0x422   : > { %v464_v43 = vpop.f32.mrf.mxu0 }
 0x423   : > { %v465_v14 = vadd.f32 %v9582_v19, %v464_v43 }
 0x424   : > { %v3445_v53 = vpop.f32.mrf.mxu3 }
 0x425   : > { %v3495_v52 = vadd.f32 %v3445_v53, %v2489_v20  ;;  %v2451_v32 = vpop.f32.mrf.mxu2  ;;  %v1487_v2 = vadd.f32 %v1445_v24, %v465_v14 }
 0x427   : > { %3527 = vst.msk [vmem:[%s8956_s30 + $0xb8] sm:$0xff] %vm171_vm1, %v3495_v52  ;;  %v2493_v7 = vadd.f32 %v2451_v32, %v1487_v2 }
 0x429   : > { %v1448_v0 = vpop.f32.mrf.mxu1 }
 0x42a   : > { %v467_v22 = vpop.f32.mrf.mxu0 }
 0x42b   : > { %v468_v6 = vadd.f32 %v9582_v19, %v467_v22 }
 0x42c   : > { %v3448_v51 = vpop.f32.mrf.mxu3 }
 0x42d   : > { %v3496_v50 = vadd.f32 %v3448_v51, %v2490_v48  ;;  %v2454_v4 = vpop.f32.mrf.mxu2  ;;  %v1488_v59 = vadd.f32 %v1448_v0, %v468_v6 }
 0x42f   : > { %3528 = vst.msk [vmem:[%s8956_s30 + $0xc0] sm:$0xff] %vm171_vm1, %v3496_v50  ;;  %v2494_v30 = vadd.f32 %v2454_v4, %v1488_v59 }
 0x431   : > { %v1451_v61 = vpop.f32.mrf.mxu1 }
 0x432   : > { %v470_v16 = vpop.f32.mrf.mxu0 }
 0x433   : > { %v471_v55 = vadd.f32 %v9582_v19, %v470_v16 }
 0x434   : > { %v3451_v31 = vpop.f32.mrf.mxu3 }
 0x435   : > { %v3497_v37 = vadd.f32 %v3451_v31, %v2491_v23  ;;  %v2457_v8 = vpop.f32.mrf.mxu2  ;;  %v1489_v34 = vadd.f32 %v1451_v61, %v471_v55 }
 0x437   : > { %3529 = vst.msk [vmem:[%s8956_s30 + $0xc8] sm:$0xff] %vm171_vm1, %v3497_v37  ;;  %v2495_v58 = vadd.f32 %v2457_v8, %v1489_v34 }
 0x439   : > { %v1454_v46 = vpop.f32.mrf.mxu1 }
 0x43a   : > { %v473_v63 = vpop.f32.mrf.mxu0 }
 0x43b   : > { %v474_v36 = vadd.f32 %v9582_v19, %v473_v63 }
 0x43c   : > { %v3454_v5 = vpop.f32.mrf.mxu3 }
 0x43d   : > { %v3498_v56 = vadd.f32 %v3454_v5, %v2492_v12  ;;  %v2460_v62 = vpop.f32.mrf.mxu2  ;;  %v1490_v45 = vadd.f32 %v1454_v46, %v474_v36 }
 0x43f   : > { %3530 = vst.msk [vmem:[%s8956_s30 + $0xd0] sm:$0xff] %vm171_vm1, %v3498_v56  ;;  %v2496_v49 = vadd.f32 %v2460_v62, %v1490_v45 }
 0x441   : > { %v1457_v35 = vpop.f32.mrf.mxu1 }
 0x442   : > { %v476_v27 = vpop.f32.mrf.mxu0 }
 0x443   : > { %v477_v47 = vadd.f32 %v9582_v19, %v476_v27 }
 0x444   : > { %v3457_v54 = vpop.f32.mrf.mxu3 }
 0x445   : > { %v3499_v57 = vadd.f32 %v3457_v54, %v2493_v7  ;;  %v1491_v26 = vadd.f32 %v1457_v35, %v477_v47  ;;  %v2463_v15 = vpop.f32.mrf.mxu2 }
 0x447   : > { %3531 = vst.msk [vmem:[%s8956_s30 + $0xd8] sm:$0xff] %vm171_vm1, %v3499_v57  ;;  %v2497_v44 = vadd.f32 %v2463_v15, %v1491_v26 }
 0x44c   : > { %v3460_v21 = vpop.f32.mrf.mxu3 }
 0x44d   : > { %v3500_v11 = vadd.f32 %v3460_v21, %v2494_v30 }
 0x44f   : > { %3532 = vst.msk [vmem:[%s8956_s30 + $0xe0] sm:$0xff] %vm171_vm1, %v3500_v11 }
 0x454   : > { %v3463_v38 = vpop.f32.mrf.mxu3 }
 0x455   : > { %v3501_v42 = vadd.f32 %v3463_v38, %v2495_v58 }
 0x457   : > { %3533 = vst.msk [vmem:[%s8956_s30 + $0xe8] sm:$0xff] %vm171_vm1, %v3501_v42 }
 0x45c   : > { %v3466_v9 = vpop.f32.mrf.mxu3 }
 0x45d   : > { %v3502_v10 = vadd.f32 %v3466_v9, %v2496_v49 }
 0x45f   : > { %3534 = vst.msk [vmem:[%s8956_s30 + $0xf0] sm:$0xff] %vm171_vm1, %v3502_v10 }
 0x464   : > { %v3469_v40 = vpop.f32.mrf.mxu3 }
 0x465   : > { %v3503_v33 = vadd.f32 %v3469_v40, %v2497_v44 }
 0x467   : > { %3535 = vst.msk [vmem:[%s8956_s30 + $0xf8] sm:$0xff] %vm171_vm1, %v3503_v33 }
 0x468 PF: > { %s13_s12 = sadd.s32 1, %s3756_s12  }
 0x469   : > { %p10_p4 = scmp.ge.s32.totalorder %s13_s12, 4  }
 0x46b   :  { %12 = sbr.rel (!%p10_p4) target bundleno = 1 (0x1), region = 67 }

</bundles_post_ra>
